<compile_context>
chip_gen: v6e
topology: v6e:2x2x1
jax: 0.10.0
libtpu: 0.0.40
codegen_flags: <defaults>
</compile_context>

<pallas_src>
import functools

import jax
import jax.numpy as jnp
import numpy as np
from jax.experimental import pallas as pl
from jax.experimental.pallas import tpu as pltpu


# ----------------------------- shared math helpers -----------------------------

def _sigmoid(x):
    return 1.0 / (1.0 + jnp.exp(-x))


def _selu(x):
    alpha = 1.6732632423543772
    scale = 1.0507009873554805
    return scale * jnp.where(x > 0, x, alpha * (jnp.exp(x) - 1.0))


def _lstm_cell(gates, c, H):
    """PyTorch LSTM gate order: input, forget, cell (g), output."""
    i = _sigmoid(gates[:, 0 * H:1 * H])
    f = _sigmoid(gates[:, 1 * H:2 * H])
    g = jnp.tanh(gates[:, 2 * H:3 * H])
    o = _sigmoid(gates[:, 3 * H:4 * H])
    c_new = f * c + i * g
    h_new = o * jnp.tanh(c_new)
    return h_new, c_new


# ----------------------------- BiLSTM Pallas kernel -----------------------------

def _bilstm_kernel(*refs, num_steps, hidden, stride):
    """Fused bidirectional LSTM layer, optionally with folded stride-2 pairing.

    Inputs (full-array VMEM refs):
      x                              (T_in, B, C)
      wa_f [, wb_f], whh_f, b_f      forward-direction weights
      wa_b [, wb_b], whh_b, b_b      backward-direction weights
    Outputs:
      out  (num_steps, B, 2*hidden)  lane-dense (2*hidden is a multiple of 128)
      h_n  (B, 2*hidden)             concat(final fwd hidden, final bwd hidden)
    Scratch:
      out_f, out_b (num_steps, B, hidden)
    """
    if stride:
        (x_ref, wa_f_ref, wb_f_ref, whh_f_ref, b_f_ref,
         wa_b_ref, wb_b_ref, whh_b_ref, b_b_ref,
         out_ref, hn_ref, outf_s, outb_s) = refs
    else:
        (x_ref, wa_f_ref, whh_f_ref, b_f_ref,
         wa_b_ref, whh_b_ref, b_b_ref,
         out_ref, hn_ref, outf_s, outb_s) = refs
        wb_f_ref = wb_b_ref = None

    B = x_ref.shape[1]
    T = num_steps
    H = hidden

    def input_proj(t, wa_ref, wb_ref):
        if stride:
            # Stride-2 pyramid: the LSTM input at step t is concat(x[2t], x[2t+1]).
            # Split W_ih into two halves instead of materializing the
            # transposed/reshaped activation in the wrapper.
            return (jnp.dot(x_ref[2 * t], wa_ref[...],
                            preferred_element_type=jnp.float32)
                    + jnp.dot(x_ref[2 * t + 1], wb_ref[...],
                              preferred_element_type=jnp.float32))
        return jnp.dot(x_ref[t], wa_ref[...], preferred_element_type=jnp.float32)

    h0 = jnp.zeros((B, H), jnp.float32)
    c0 = jnp.zeros((B, H), jnp.float32)

    def step(t, carry):
        h_f, c_f, h_b, c_b = carry

        # ---- forward direction, time step t ----
        gates_f = (input_proj(t, wa_f_ref, wb_f_ref)
                   + jnp.dot(h_f, whh_f_ref[...],
                             preferred_element_type=jnp.float32)
                   + b_f_ref[...])
        h_f, c_f = _lstm_cell(gates_f, c_f, H)
        outf_s[t] = h_f

        # ---- backward direction, time step T-1-t ----
        tb = T - 1 - t
        gates_b = (input_proj(tb, wa_b_ref, wb_b_ref)
                   + jnp.dot(h_b, whh_b_ref[...],
                             preferred_element_type=jnp.float32)
                   + b_b_ref[...])
        h_b, c_b = _lstm_cell(gates_b, c_b, H)
        outb_s[tb] = h_b

        return h_f, c_f, h_b, c_b

    h_f, _, h_b, _ = jax.lax.fori_loop(0, T, step, (h0, c0, h0, c0))

    # Single lane-dense store of the concatenated (fwd, bwd) outputs.
    out_ref[...] = jnp.concatenate([outf_s[...], outb_s[...]], axis=-1)
    hn_ref[...] = jnp.concatenate([h_f, h_b], axis=-1)


def bilstm_layer(x, p, *, stride):
    """x: (T_in, B, C) time-major. Returns (out (T, B, 2H), h_n (B, 2H))."""
    T_in, B, _ = x.shape
    H = p['whh_f'].shape[0]
    num_steps = T_in // 2 if stride else T_in

    if stride:
        ins = (x, p['wa_f'], p['wb_f'], p['whh_f'], p['b_f'],
               p['wa_b'], p['wb_b'], p['whh_b'], p['b_b'])
    else:
        ins = (x, p['wa_f'], p['whh_f'], p['b_f'],
               p['wa_b'], p['whh_b'], p['b_b'])

    kernel = functools.partial(_bilstm_kernel, num_steps=num_steps,
                               hidden=H, stride=stride)
    vmem = pl.BlockSpec(memory_space=pltpu.MemorySpace.VMEM)
    out, h_n = pl.pallas_call(
        kernel,
        out_shape=(jax.ShapeDtypeStruct((num_steps, B, 2 * H), jnp.float32),
                   jax.ShapeDtypeStruct((B, 2 * H), jnp.float32)),
        in_specs=[vmem] * len(ins),
        out_specs=(vmem, vmem),
        scratch_shapes=[pltpu.VMEM((num_steps, B, H), jnp.float32),
                        pltpu.VMEM((num_steps, B, H), jnp.float32)],
    )(*ins)
    return out, h_n


# ----------------------------- fc1 + fc2 + SELU kernel -----------------------------

def _fc_selu_kernel(x_ref, w1_ref, b1_ref, w2_ref, b2_ref, key_ref, val_ref):
    x = x_ref[...]
    k = jnp.dot(x, w1_ref[...], preferred_element_type=jnp.float32) + b1_ref[...]
    v = jnp.dot(x, w2_ref[...], preferred_element_type=jnp.float32) + b2_ref[...]
    key_ref[...] = _selu(k)
    val_ref[...] = _selu(v)


def fc_selu(x, w1, b1, w2, b2):
    T8, B, D = x.shape
    xf = x.reshape(T8 * B, D)  # contiguous merge of leading dims (no transpose)
    vmem = pl.BlockSpec(memory_space=pltpu.MemorySpace.VMEM)
    k, v = pl.pallas_call(
        _fc_selu_kernel,
        out_shape=(jax.ShapeDtypeStruct((T8 * B, D), jnp.float32),
                   jax.ShapeDtypeStruct((T8 * B, D), jnp.float32)),
        in_specs=[vmem] * 5,
        out_specs=(vmem, vmem),
    )(xf, w1, b1, w2, b2)
    return k.reshape(T8, B, D), v.reshape(T8, B, D)


# ----------------------------- full encoder forward -----------------------------

@jax.jit
def encoder_forward(x, lengths, params):
    out1, _ = bilstm_layer(x, params['lstm1'], stride=False)
    out2, _ = bilstm_layer(out1, params['lstm2'], stride=True)
    out3, _ = bilstm_layer(out2, params['lstm3'], stride=True)
    out4, hid = bilstm_layer(out3, params['lstm4'], stride=True)
    key, value = fc_selu(out4, params['fc1_w'], params['fc1_b'],
                         params['fc2_w'], params['fc2_b'])
    return lengths // 8, key, value, hid


# ----------------------------- parameters -----------------------------

def init_params(rng, base=128, in_dim=40):
    H, G, D = base, 4 * base, 2 * base

    def norm(key, shape, scale=0.05):
        return (scale * jax.random.normal(key, shape)).astype(jnp.float32)

    keys = iter(jax.random.split(rng, 40))

    def lstm_params(in_f, split):
        p = {}
        for d in ('f', 'b'):
            if split:
                half = in_f // 2
                p[f'wa_{d}'] = norm(next(keys), (half, G))
                p[f'wb_{d}'] = norm(next(keys), (half, G))
            else:
                p[f'wa_{d}'] = norm(next(keys), (in_f, G))
            p[f'whh_{d}'] = norm(next(keys), (H, G))
            p[f'b_{d}'] = norm(next(keys), (1, G))
        return p

    return {
        'lstm1': lstm_params(in_dim, split=False),
        'lstm2': lstm_params(4 * base, split=True),
        'lstm3': lstm_params(4 * base, split=True),
        'lstm4': lstm_params(4 * base, split=True),
        'fc1_w': norm(next(keys), (D, D)),
        'fc1_b': norm(next(keys), (1, D)),
        'fc2_w': norm(next(keys), (D, D)),
        'fc2_b': norm(next(keys), (1, D)),
    }


# ----------------------------- pure-JAX reference -----------------------------

def _bilstm_ref(x, p, stride):
    HIGH = jax.lax.Precision.HIGHEST
    if stride:
        T_in, B, C = x.shape
        T = T_in // 2
        xs = x[:2 * T].reshape(T, 2, B, C).transpose(0, 2, 1, 3).reshape(T, B, 2 * C)
        w_f = jnp.concatenate([p['wa_f'], p['wb_f']], axis=0)
        w_b = jnp.concatenate([p['wa_b'], p['wb_b']], axis=0)
    else:
        xs = x
        w_f, w_b = p['wa_f'], p['wa_b']
    T, B, _ = xs.shape
    H = p['whh_f'].shape[0]

    def run(seq, w_ih, w_hh, b):
        def step(carry, xt):
            h, c = carry
            gates = (jnp.dot(xt, w_ih, precision=HIGH)
                     + jnp.dot(h, w_hh, precision=HIGH) + b)
            h, c = _lstm_cell(gates, c, H)
            return (h, c), h
        init = (jnp.zeros((B, H), jnp.float32), jnp.zeros((B, H), jnp.float32))
        (h, _), hs = jax.lax.scan(step, init, seq)
        return hs, h

    hs_f, h_f = run(xs, w_f, p['whh_f'], p['b_f'])
    hs_b_rev, h_b = run(xs[::-1], w_b, p['whh_b'], p['b_b'])
    hs_b = hs_b_rev[::-1]
    return (jnp.concatenate([hs_f, hs_b], axis=-1),
            jnp.concatenate([h_f, h_b], axis=-1))


def encoder_ref(x, lengths, params):
    HIGH = jax.lax.Precision.HIGHEST
    o1, _ = _bilstm_ref(x, params['lstm1'], False)
    o2, _ = _bilstm_ref(o1, params['lstm2'], True)
    o3, _ = _bilstm_ref(o2, params['lstm3'], True)
    o4, hid = _bilstm_ref(o3, params['lstm4'], True)
    T8, B, D = o4.shape
    xf = o4.reshape(T8 * B, D)
    k = _selu(jnp.dot(xf, params['fc1_w'], precision=HIGH) + params['fc1_b'])
    v = _selu(jnp.dot(xf, params['fc2_w'], precision=HIGH) + params['fc2_b'])
    return lengths // 8, k.reshape(T8, B, D), v.reshape(T8, B, D), hid


# ----------------------------- main -----------------------------

if __name__ == "__main__":
    B, T, IN_DIM, BASE = 2, 16, 40, 128   # seq 16 (multiple of 8), batch 2, feat 40
    root = jax.random.PRNGKey(0)
    kx, kp = jax.random.split(root)

    x = jax.random.normal(kx, (T, B, IN_DIM), dtype=jnp.float32)
    lengths = jnp.full((B,), T, dtype=jnp.int32)
    params = init_params(kp, base=BASE, in_dim=IN_DIM)

    seq8, key_out, val_out, hid = encoder_forward(x, lengths, params)
    jax.block_until_ready((seq8, key_out, val_out, hid))

    seq8_r, key_r, val_r, hid_r = encoder_ref(x, lengths, params)
    assert np.array_equal(np.asarray(seq8), np.asarray(seq8_r))
    assert np.allclose(np.asarray(key_out), np.asarray(key_r), atol=3e-3, rtol=3e-3)
    assert np.allclose(np.asarray(val_out), np.asarray(val_r), atol=3e-3, rtol=3e-3)
    assert np.allclose(np.asarray(hid), np.asarray(hid_r), atol=3e-3, rtol=3e-3)

    print("KERNEL_OK")
</pallas_src>

<mosaic_0001>
module attributes {stable_mosaic.version = 11 : i64} {
  func.func @_bilstm_kernel(%arg0: memref<16x2x256xf32, #tpu.memory_space<vmem>>, %arg1: memref<256x512xf32, #tpu.memory_space<vmem>>, %arg2: memref<256x512xf32, #tpu.memory_space<vmem>>, %arg3: memref<128x512xf32, #tpu.memory_space<vmem>>, %arg4: memref<1x512xf32, #tpu.memory_space<vmem>>, %arg5: memref<256x512xf32, #tpu.memory_space<vmem>>, %arg6: memref<256x512xf32, #tpu.memory_space<vmem>>, %arg7: memref<128x512xf32, #tpu.memory_space<vmem>>, %arg8: memref<1x512xf32, #tpu.memory_space<vmem>>, %arg9: memref<8x2x256xf32, #tpu.memory_space<vmem>>, %arg10: memref<2x256xf32, #tpu.memory_space<vmem>>, %arg11: memref<8x2x128xf32, #tpu.memory_space<vmem>>, %arg12: memref<8x2x128xf32, #tpu.memory_space<vmem>>) attributes {dimension_semantics = [], scalar_prefetch = 0 : i64, scratch_operands = 2 : i64, tpu.core_type = #tpu.core_type<tc>} {
    %cst = arith.constant 0.000000e+00 : f32
    %0 = vector.broadcast %cst : f32 to vector<2x128xf32>
    %cst_0 = arith.constant 0.000000e+00 : f32
    %1 = vector.broadcast %cst_0 : f32 to vector<2x128xf32>
    %c0_i32 = arith.constant 0 : i32
    %c8_i32 = arith.constant 8 : i32
    %2 = arith.addi %c0_i32, %c8_i32 : i32
    %c1_i32 = arith.constant 1 : i32
    %3:4 = scf.for %arg13 = %c0_i32 to %2 step %c1_i32 iter_args(%arg14 = %0, %arg15 = %1, %arg16 = %0, %arg17 = %1) -> (vector<2x128xf32>, vector<2x128xf32>, vector<2x128xf32>, vector<2x128xf32>)  : i32 {
      %c2_i32 = arith.constant 2 : i32
      %10 = arith.muli %c2_i32, %arg13 : i32
      %11 = arith.index_cast %10 : i32 to index
      %c0_12 = arith.constant 0 : index
      %c0_13 = arith.constant 0 : index
      %12 = vector.load %arg0[%11, %c0_12, %c0_13] : memref<16x2x256xf32, #tpu.memory_space<vmem>>, vector<1x2x256xf32>
      %13 = vector.shape_cast %12 : vector<1x2x256xf32> to vector<2x256xf32>
      %c0_14 = arith.constant 0 : index
      %c0_15 = arith.constant 0 : index
      %14 = vector.load %arg1[%c0_14, %c0_15] : memref<256x512xf32, #tpu.memory_space<vmem>>, vector<256x512xf32>
      %cst_16 = arith.constant dense<0.000000e+00> : vector<2x512xf32>
      %15 = tpu.matmul %13, %14, %cst_16 {dimension_numbers = #tpu.dot_dimension_numbers<[1], [0], [0], [1], [0, 0, 1, 1], [], []>} : vector<2x256xf32>, vector<256x512xf32>, vector<2x512xf32> -> vector<2x512xf32>
      %c2_i32_17 = arith.constant 2 : i32
      %16 = arith.muli %c2_i32_17, %arg13 : i32
      %c1_i32_18 = arith.constant 1 : i32
      %17 = arith.addi %16, %c1_i32_18 : i32
      %18 = arith.index_cast %17 : i32 to index
      %c0_19 = arith.constant 0 : index
      %c0_20 = arith.constant 0 : index
      %19 = vector.load %arg0[%18, %c0_19, %c0_20] : memref<16x2x256xf32, #tpu.memory_space<vmem>>, vector<1x2x256xf32>
      %20 = vector.shape_cast %19 : vector<1x2x256xf32> to vector<2x256xf32>
      %c0_21 = arith.constant 0 : index
      %c0_22 = arith.constant 0 : index
      %21 = vector.load %arg2[%c0_21, %c0_22] : memref<256x512xf32, #tpu.memory_space<vmem>>, vector<256x512xf32>
      %cst_23 = arith.constant dense<0.000000e+00> : vector<2x512xf32>
      %22 = tpu.matmul %20, %21, %cst_23 {dimension_numbers = #tpu.dot_dimension_numbers<[1], [0], [0], [1], [0, 0, 1, 1], [], []>} : vector<2x256xf32>, vector<256x512xf32>, vector<2x512xf32> -> vector<2x512xf32>
      %23 = arith.addf %15, %22 : vector<2x512xf32>
      %c0_24 = arith.constant 0 : index
      %c0_25 = arith.constant 0 : index
      %24 = vector.load %arg3[%c0_24, %c0_25] : memref<128x512xf32, #tpu.memory_space<vmem>>, vector<128x512xf32>
      %cst_26 = arith.constant dense<0.000000e+00> : vector<2x512xf32>
      %25 = tpu.matmul %arg14, %24, %cst_26 {dimension_numbers = #tpu.dot_dimension_numbers<[1], [0], [0], [1], [0, 0, 1, 1], [], []>} : vector<2x128xf32>, vector<128x512xf32>, vector<2x512xf32> -> vector<2x512xf32>
      %26 = arith.addf %23, %25 : vector<2x512xf32>
      %c0_27 = arith.constant 0 : index
      %c0_28 = arith.constant 0 : index
      %27 = vector.load %arg4[%c0_27, %c0_28] : memref<1x512xf32, #tpu.memory_space<vmem>>, vector<1x512xf32>
      %28 = vector.broadcast %27 : vector<1x512xf32> to vector<2x512xf32>
      %29 = arith.addf %26, %28 : vector<2x512xf32>
      %30 = vector.extract_strided_slice %29 {offsets = [0, 0], sizes = [2, 128], strides = [1, 1]} : vector<2x512xf32> to vector<2x128xf32>
      %cst_29 = arith.constant 0.000000e+00 : f32
      %31 = vector.broadcast %cst_29 : f32 to vector<2x128xf32>
      %32 = arith.subf %31, %30 : vector<2x128xf32>
      %33 = math.exp %32 : vector<2x128xf32>
      %cst_30 = arith.constant 1.000000e+00 : f32
      %34 = vector.broadcast %cst_30 : f32 to vector<2x128xf32>
      %35 = arith.addf %34, %33 : vector<2x128xf32>
      %cst_31 = arith.constant 1.000000e+00 : f32
      %36 = vector.broadcast %cst_31 : f32 to vector<2x128xf32>
      %37 = arith.divf %36, %35 : vector<2x128xf32>
      %38 = vector.extract_strided_slice %29 {offsets = [0, 128], sizes = [2, 128], strides = [1, 1]} : vector<2x512xf32> to vector<2x128xf32>
      %cst_32 = arith.constant 0.000000e+00 : f32
      %39 = vector.broadcast %cst_32 : f32 to vector<2x128xf32>
      %40 = arith.subf %39, %38 : vector<2x128xf32>
      %41 = math.exp %40 : vector<2x128xf32>
      %cst_33 = arith.constant 1.000000e+00 : f32
      %42 = vector.broadcast %cst_33 : f32 to vector<2x128xf32>
      %43 = arith.addf %42, %41 : vector<2x128xf32>
      %cst_34 = arith.constant 1.000000e+00 : f32
      %44 = vector.broadcast %cst_34 : f32 to vector<2x128xf32>
      %45 = arith.divf %44, %43 : vector<2x128xf32>
      %46 = vector.extract_strided_slice %29 {offsets = [0, 256], sizes = [2, 128], strides = [1, 1]} : vector<2x512xf32> to vector<2x128xf32>
      %47 = math.tanh %46 : vector<2x128xf32>
      %48 = vector.extract_strided_slice %29 {offsets = [0, 384], sizes = [2, 128], strides = [1, 1]} : vector<2x512xf32> to vector<2x128xf32>
      %cst_35 = arith.constant 0.000000e+00 : f32
      %49 = vector.broadcast %cst_35 : f32 to vector<2x128xf32>
      %50 = arith.subf %49, %48 : vector<2x128xf32>
      %51 = math.exp %50 : vector<2x128xf32>
      %cst_36 = arith.constant 1.000000e+00 : f32
      %52 = vector.broadcast %cst_36 : f32 to vector<2x128xf32>
      %53 = arith.addf %52, %51 : vector<2x128xf32>
      %cst_37 = arith.constant 1.000000e+00 : f32
      %54 = vector.broadcast %cst_37 : f32 to vector<2x128xf32>
      %55 = arith.divf %54, %53 : vector<2x128xf32>
      %56 = arith.mulf %45, %arg15 : vector<2x128xf32>
      %57 = arith.mulf %37, %47 : vector<2x128xf32>
      %58 = arith.addf %56, %57 : vector<2x128xf32>
      %59 = math.tanh %58 : vector<2x128xf32>
      %60 = arith.mulf %55, %59 : vector<2x128xf32>
      %61 = arith.index_cast %arg13 : i32 to index
      %c0_38 = arith.constant 0 : index
      %c0_39 = arith.constant 0 : index
      %62 = vector.load %arg11[%61, %c0_38, %c0_39] : memref<8x2x128xf32, #tpu.memory_space<vmem>>, vector<1x2x128xf32>
      %63 = vector.shape_cast %62 : vector<1x2x128xf32> to vector<2x128xf32>
      %64 = vector.shape_cast %60 : vector<2x128xf32> to vector<1x2x128xf32>
      tpu.vector_store %arg11[%61, %c0_38, %c0_39], %64 {strides = array<i32>} : memref<8x2x128xf32, #tpu.memory_space<vmem>>, vector<1x2x128xf32>,
      %c7_i32 = arith.constant 7 : i32
      %65 = arith.subi %c7_i32, %arg13 : i32
      %c2_i32_40 = arith.constant 2 : i32
      %66 = arith.muli %c2_i32_40, %65 : i32
      %67 = arith.index_cast %66 : i32 to index
      %c0_41 = arith.constant 0 : index
      %c0_42 = arith.constant 0 : index
      %68 = vector.load %arg0[%67, %c0_41, %c0_42] : memref<16x2x256xf32, #tpu.memory_space<vmem>>, vector<1x2x256xf32>
      %69 = vector.shape_cast %68 : vector<1x2x256xf32> to vector<2x256xf32>
      %c0_43 = arith.constant 0 : index
      %c0_44 = arith.constant 0 : index
      %70 = vector.load %arg5[%c0_43, %c0_44] : memref<256x512xf32, #tpu.memory_space<vmem>>, vector<256x512xf32>
      %cst_45 = arith.constant dense<0.000000e+00> : vector<2x512xf32>
      %71 = tpu.matmul %69, %70, %cst_45 {dimension_numbers = #tpu.dot_dimension_numbers<[1], [0], [0], [1], [0, 0, 1, 1], [], []>} : vector<2x256xf32>, vector<256x512xf32>, vector<2x512xf32> -> vector<2x512xf32>
      %c2_i32_46 = arith.constant 2 : i32
      %72 = arith.muli %c2_i32_46, %65 : i32
      %c1_i32_47 = arith.constant 1 : i32
      %73 = arith.addi %72, %c1_i32_47 : i32
      %74 = arith.index_cast %73 : i32 to index
      %c0_48 = arith.constant 0 : index
      %c0_49 = arith.constant 0 : index
      %75 = vector.load %arg0[%74, %c0_48, %c0_49] : memref<16x2x256xf32, #tpu.memory_space<vmem>>, vector<1x2x256xf32>
      %76 = vector.shape_cast %75 : vector<1x2x256xf32> to vector<2x256xf32>
      %c0_50 = arith.constant 0 : index
      %c0_51 = arith.constant 0 : index
      %77 = vector.load %arg6[%c0_50, %c0_51] : memref<256x512xf32, #tpu.memory_space<vmem>>, vector<256x512xf32>
      %cst_52 = arith.constant dense<0.000000e+00> : vector<2x512xf32>
      %78 = tpu.matmul %76, %77, %cst_52 {dimension_numbers = #tpu.dot_dimension_numbers<[1], [0], [0], [1], [0, 0, 1, 1], [], []>} : vector<2x256xf32>, vector<256x512xf32>, vector<2x512xf32> -> vector<2x512xf32>
      %79 = arith.addf %71, %78 : vector<2x512xf32>
      %c0_53 = arith.constant 0 : index
      %c0_54 = arith.constant 0 : index
      %80 = vector.load %arg7[%c0_53, %c0_54] : memref<128x512xf32, #tpu.memory_space<vmem>>, vector<128x512xf32>
      %cst_55 = arith.constant dense<0.000000e+00> : vector<2x512xf32>
      %81 = tpu.matmul %arg16, %80, %cst_55 {dimension_numbers = #tpu.dot_dimension_numbers<[1], [0], [0], [1], [0, 0, 1, 1], [], []>} : vector<2x128xf32>, vector<128x512xf32>, vector<2x512xf32> -> vector<2x512xf32>
      %82 = arith.addf %79, %81 : vector<2x512xf32>
      %c0_56 = arith.constant 0 : index
      %c0_57 = arith.constant 0 : index
      %83 = vector.load %arg8[%c0_56, %c0_57] : memref<1x512xf32, #tpu.memory_space<vmem>>, vector<1x512xf32>
      %84 = vector.broadcast %83 : vector<1x512xf32> to vector<2x512xf32>
      %85 = arith.addf %82, %84 : vector<2x512xf32>
      %86 = vector.extract_strided_slice %85 {offsets = [0, 0], sizes = [2, 128], strides = [1, 1]} : vector<2x512xf32> to vector<2x128xf32>
      %cst_58 = arith.constant 0.000000e+00 : f32
      %87 = vector.broadcast %cst_58 : f32 to vector<2x128xf32>
      %88 = arith.subf %87, %86 : vector<2x128xf32>
      %89 = math.exp %88 : vector<2x128xf32>
      %cst_59 = arith.constant 1.000000e+00 : f32
      %90 = vector.broadcast %cst_59 : f32 to vector<2x128xf32>
      %91 = arith.addf %90, %89 : vector<2x128xf32>
      %cst_60 = arith.constant 1.000000e+00 : f32
      %92 = vector.broadcast %cst_60 : f32 to vector<2x128xf32>
      %93 = arith.divf %92, %91 : vector<2x128xf32>
      %94 = vector.extract_strided_slice %85 {offsets = [0, 128], sizes = [2, 128], strides = [1, 1]} : vector<2x512xf32> to vector<2x128xf32>
      %cst_61 = arith.constant 0.000000e+00 : f32
      %95 = vector.broadcast %cst_61 : f32 to vector<2x128xf32>
      %96 = arith.subf %95, %94 : vector<2x128xf32>
      %97 = math.exp %96 : vector<2x128xf32>
      %cst_62 = arith.constant 1.000000e+00 : f32
      %98 = vector.broadcast %cst_62 : f32 to vector<2x128xf32>
      %99 = arith.addf %98, %97 : vector<2x128xf32>
      %cst_63 = arith.constant 1.000000e+00 : f32
      %100 = vector.broadcast %cst_63 : f32 to vector<2x128xf32>
      %101 = arith.divf %100, %99 : vector<2x128xf32>
      %102 = vector.extract_strided_slice %85 {offsets = [0, 256], sizes = [2, 128], strides = [1, 1]} : vector<2x512xf32> to vector<2x128xf32>
      %103 = math.tanh %102 : vector<2x128xf32>
      %104 = vector.extract_strided_slice %85 {offsets = [0, 384], sizes = [2, 128], strides = [1, 1]} : vector<2x512xf32> to vector<2x128xf32>
      %cst_64 = arith.constant 0.000000e+00 : f32
      %105 = vector.broadcast %cst_64 : f32 to vector<2x128xf32>
      %106 = arith.subf %105, %104 : vector<2x128xf32>
      %107 = math.exp %106 : vector<2x128xf32>
      %cst_65 = arith.constant 1.000000e+00 : f32
      %108 = vector.broadcast %cst_65 : f32 to vector<2x128xf32>
      %109 = arith.addf %108, %107 : vector<2x128xf32>
      %cst_66 = arith.constant 1.000000e+00 : f32
      %110 = vector.broadcast %cst_66 : f32 to vector<2x128xf32>
      %111 = arith.divf %110, %109 : vector<2x128xf32>
      %112 = arith.mulf %101, %arg17 : vector<2x128xf32>
      %113 = arith.mulf %93, %103 : vector<2x128xf32>
      %114 = arith.addf %112, %113 : vector<2x128xf32>
      %115 = math.tanh %114 : vector<2x128xf32>
      %116 = arith.mulf %111, %115 : vector<2x128xf32>
      %117 = arith.index_cast %65 : i32 to index
      %c0_67 = arith.constant 0 : index
      %c0_68 = arith.constant 0 : index
      %118 = vector.load %arg12[%117, %c0_67, %c0_68] : memref<8x2x128xf32, #tpu.memory_space<vmem>>, vector<1x2x128xf32>
      %119 = vector.shape_cast %118 : vector<1x2x128xf32> to vector<2x128xf32>
      %120 = vector.shape_cast %116 : vector<2x128xf32> to vector<1x2x128xf32>
      tpu.vector_store %arg12[%117, %c0_67, %c0_68], %120 {strides = array<i32>} : memref<8x2x128xf32, #tpu.memory_space<vmem>>, vector<1x2x128xf32>,
      scf.yield %60, %58, %116, %114 : vector<2x128xf32>, vector<2x128xf32>, vector<2x128xf32>, vector<2x128xf32>
    }
    %c8_i32_1 = arith.constant 8 : i32
    %c0 = arith.constant 0 : index
    %c0_2 = arith.constant 0 : index
    %c0_3 = arith.constant 0 : index
    %4 = vector.load %arg11[%c0, %c0_2, %c0_3] : memref<8x2x128xf32, #tpu.memory_space<vmem>>, vector<8x2x128xf32>
    %c0_4 = arith.constant 0 : index
    %c0_5 = arith.constant 0 : index
    %c0_6 = arith.constant 0 : index
    %5 = vector.load %arg12[%c0_4, %c0_5, %c0_6] : memref<8x2x128xf32, #tpu.memory_space<vmem>>, vector<8x2x128xf32>
    %6 = tpu.concatenate %4, %5 in 2 : vector<8x2x128xf32>, vector<8x2x128xf32> -> vector<8x2x256xf32>
    %c0_7 = arith.constant 0 : index
    %c0_8 = arith.constant 0 : index
    %c0_9 = arith.constant 0 : index
    %7 = vector.load %arg9[%c0_7, %c0_8, %c0_9] : memref<8x2x256xf32, #tpu.memory_space<vmem>>, vector<8x2x256xf32>
    tpu.vector_store %arg9[%c0_7, %c0_8, %c0_9], %6 {strides = array<i32>} : memref<8x2x256xf32, #tpu.memory_space<vmem>>, vector<8x2x256xf32>,
    %8 = tpu.concatenate %3#0, %3#2 in 1 : vector<2x128xf32>, vector<2x128xf32> -> vector<2x256xf32>
    %c0_10 = arith.constant 0 : index
    %c0_11 = arith.constant 0 : index
    %9 = vector.load %arg10[%c0_10, %c0_11] : memref<2x256xf32, #tpu.memory_space<vmem>>, vector<2x256xf32>
    tpu.vector_store %arg10[%c0_10, %c0_11], %8 {strides = array<i32>} : memref<2x256xf32, #tpu.memory_space<vmem>>, vector<2x256xf32>,
    return
  }
}

module attributes {stable_mosaic.version = 11 : i64} {
  func.func @_bilstm_kernel(%arg0: memref<16x2x40xf32, #tpu.memory_space<vmem>>, %arg1: memref<40x512xf32, #tpu.memory_space<vmem>>, %arg2: memref<128x512xf32, #tpu.memory_space<vmem>>, %arg3: memref<1x512xf32, #tpu.memory_space<vmem>>, %arg4: memref<40x512xf32, #tpu.memory_space<vmem>>, %arg5: memref<128x512xf32, #tpu.memory_space<vmem>>, %arg6: memref<1x512xf32, #tpu.memory_space<vmem>>, %arg7: memref<16x2x256xf32, #tpu.memory_space<vmem>>, %arg8: memref<2x256xf32, #tpu.memory_space<vmem>>, %arg9: memref<16x2x128xf32, #tpu.memory_space<vmem>>, %arg10: memref<16x2x128xf32, #tpu.memory_space<vmem>>) attributes {dimension_semantics = [], scalar_prefetch = 0 : i64, scratch_operands = 2 : i64, tpu.core_type = #tpu.core_type<tc>} {
    %cst = arith.constant 0.000000e+00 : f32
    %0 = vector.broadcast %cst : f32 to vector<2x128xf32>
    %cst_0 = arith.constant 0.000000e+00 : f32
    %1 = vector.broadcast %cst_0 : f32 to vector<2x128xf32>
    %c0_i32 = arith.constant 0 : i32
    %c16_i32 = arith.constant 16 : i32
    %2 = arith.addi %c0_i32, %c16_i32 : i32
    %c1_i32 = arith.constant 1 : i32
    %3:4 = scf.for %arg11 = %c0_i32 to %2 step %c1_i32 iter_args(%arg12 = %0, %arg13 = %1, %arg14 = %0, %arg15 = %1) -> (vector<2x128xf32>, vector<2x128xf32>, vector<2x128xf32>, vector<2x128xf32>)  : i32 {
      %10 = arith.index_cast %arg11 : i32 to index
      %c0_12 = arith.constant 0 : index
      %c0_13 = arith.constant 0 : index
      %11 = vector.load %arg0[%10, %c0_12, %c0_13] : memref<16x2x40xf32, #tpu.memory_space<vmem>>, vector<1x2x40xf32>
      %12 = vector.shape_cast %11 : vector<1x2x40xf32> to vector<2x40xf32>
      %c0_14 = arith.constant 0 : index
      %c0_15 = arith.constant 0 : index
      %13 = vector.load %arg1[%c0_14, %c0_15] : memref<40x512xf32, #tpu.memory_space<vmem>>, vector<40x512xf32>
      %cst_16 = arith.constant dense<0.000000e+00> : vector<2x512xf32>
      %14 = tpu.matmul %12, %13, %cst_16 {dimension_numbers = #tpu.dot_dimension_numbers<[1], [0], [0], [1], [0, 0, 1, 1], [], []>} : vector<2x40xf32>, vector<40x512xf32>, vector<2x512xf32> -> vector<2x512xf32>
      %c0_17 = arith.constant 0 : index
      %c0_18 = arith.constant 0 : index
      %15 = vector.load %arg2[%c0_17, %c0_18] : memref<128x512xf32, #tpu.memory_space<vmem>>, vector<128x512xf32>
      %cst_19 = arith.constant dense<0.000000e+00> : vector<2x512xf32>
      %16 = tpu.matmul %arg12, %15, %cst_19 {dimension_numbers = #tpu.dot_dimension_numbers<[1], [0], [0], [1], [0, 0, 1, 1], [], []>} : vector<2x128xf32>, vector<128x512xf32>, vector<2x512xf32> -> vector<2x512xf32>
      %17 = arith.addf %14, %16 : vector<2x512xf32>
      %c0_20 = arith.constant 0 : index
      %c0_21 = arith.constant 0 : index
      %18 = vector.load %arg3[%c0_20, %c0_21] : memref<1x512xf32, #tpu.memory_space<vmem>>, vector<1x512xf32>
      %19 = vector.broadcast %18 : vector<1x512xf32> to vector<2x512xf32>
      %20 = arith.addf %17, %19 : vector<2x512xf32>
      %21 = vector.extract_strided_slice %20 {offsets = [0, 0], sizes = [2, 128], strides = [1, 1]} : vector<2x512xf32> to vector<2x128xf32>
      %cst_22 = arith.constant 0.000000e+00 : f32
      %22 = vector.broadcast %cst_22 : f32 to vector<2x128xf32>
      %23 = arith.subf %22, %21 : vector<2x128xf32>
      %24 = math.exp %23 : vector<2x128xf32>
      %cst_23 = arith.constant 1.000000e+00 : f32
      %25 = vector.broadcast %cst_23 : f32 to vector<2x128xf32>
      %26 = arith.addf %25, %24 : vector<2x128xf32>
      %cst_24 = arith.constant 1.000000e+00 : f32
      %27 = vector.broadcast %cst_24 : f32 to vector<2x128xf32>
      %28 = arith.divf %27, %26 : vector<2x128xf32>
      %29 = vector.extract_strided_slice %20 {offsets = [0, 128], sizes = [2, 128], strides = [1, 1]} : vector<2x512xf32> to vector<2x128xf32>
      %cst_25 = arith.constant 0.000000e+00 : f32
      %30 = vector.broadcast %cst_25 : f32 to vector<2x128xf32>
      %31 = arith.subf %30, %29 : vector<2x128xf32>
      %32 = math.exp %31 : vector<2x128xf32>
      %cst_26 = arith.constant 1.000000e+00 : f32
      %33 = vector.broadcast %cst_26 : f32 to vector<2x128xf32>
      %34 = arith.addf %33, %32 : vector<2x128xf32>
      %cst_27 = arith.constant 1.000000e+00 : f32
      %35 = vector.broadcast %cst_27 : f32 to vector<2x128xf32>
      %36 = arith.divf %35, %34 : vector<2x128xf32>
      %37 = vector.extract_strided_slice %20 {offsets = [0, 256], sizes = [2, 128], strides = [1, 1]} : vector<2x512xf32> to vector<2x128xf32>
      %38 = math.tanh %37 : vector<2x128xf32>
      %39 = vector.extract_strided_slice %20 {offsets = [0, 384], sizes = [2, 128], strides = [1, 1]} : vector<2x512xf32> to vector<2x128xf32>
      %cst_28 = arith.constant 0.000000e+00 : f32
      %40 = vector.broadcast %cst_28 : f32 to vector<2x128xf32>
      %41 = arith.subf %40, %39 : vector<2x128xf32>
      %42 = math.exp %41 : vector<2x128xf32>
      %cst_29 = arith.constant 1.000000e+00 : f32
      %43 = vector.broadcast %cst_29 : f32 to vector<2x128xf32>
      %44 = arith.addf %43, %42 : vector<2x128xf32>
      %cst_30 = arith.constant 1.000000e+00 : f32
      %45 = vector.broadcast %cst_30 : f32 to vector<2x128xf32>
      %46 = arith.divf %45, %44 : vector<2x128xf32>
      %47 = arith.mulf %36, %arg13 : vector<2x128xf32>
      %48 = arith.mulf %28, %38 : vector<2x128xf32>
      %49 = arith.addf %47, %48 : vector<2x128xf32>
      %50 = math.tanh %49 : vector<2x128xf32>
      %51 = arith.mulf %46, %50 : vector<2x128xf32>
      %52 = arith.index_cast %arg11 : i32 to index
      %c0_31 = arith.constant 0 : index
      %c0_32 = arith.constant 0 : index
      %53 = vector.load %arg9[%52, %c0_31, %c0_32] : memref<16x2x128xf32, #tpu.memory_space<vmem>>, vector<1x2x128xf32>
      %54 = vector.shape_cast %53 : vector<1x2x128xf32> to vector<2x128xf32>
      %55 = vector.shape_cast %51 : vector<2x128xf32> to vector<1x2x128xf32>
      tpu.vector_store %arg9[%52, %c0_31, %c0_32], %55 {strides = array<i32>} : memref<16x2x128xf32, #tpu.memory_space<vmem>>, vector<1x2x128xf32>,
      %c15_i32 = arith.constant 15 : i32
      %56 = arith.subi %c15_i32, %arg11 : i32
      %57 = arith.index_cast %56 : i32 to index
      %c0_33 = arith.constant 0 : index
      %c0_34 = arith.constant 0 : index
      %58 = vector.load %arg0[%57, %c0_33, %c0_34] : memref<16x2x40xf32, #tpu.memory_space<vmem>>, vector<1x2x40xf32>
      %59 = vector.shape_cast %58 : vector<1x2x40xf32> to vector<2x40xf32>
      %c0_35 = arith.constant 0 : index
      %c0_36 = arith.constant 0 : index
      %60 = vector.load %arg4[%c0_35, %c0_36] : memref<40x512xf32, #tpu.memory_space<vmem>>, vector<40x512xf32>
      %cst_37 = arith.constant dense<0.000000e+00> : vector<2x512xf32>
      %61 = tpu.matmul %59, %60, %cst_37 {dimension_numbers = #tpu.dot_dimension_numbers<[1], [0], [0], [1], [0, 0, 1, 1], [], []>} : vector<2x40xf32>, vector<40x512xf32>, vector<2x512xf32> -> vector<2x512xf32>
      %c0_38 = arith.constant 0 : index
      %c0_39 = arith.constant 0 : index
      %62 = vector.load %arg5[%c0_38, %c0_39] : memref<128x512xf32, #tpu.memory_space<vmem>>, vector<128x512xf32>
      %cst_40 = arith.constant dense<0.000000e+00> : vector<2x512xf32>
      %63 = tpu.matmul %arg14, %62, %cst_40 {dimension_numbers = #tpu.dot_dimension_numbers<[1], [0], [0], [1], [0, 0, 1, 1], [], []>} : vector<2x128xf32>, vector<128x512xf32>, vector<2x512xf32> -> vector<2x512xf32>
      %64 = arith.addf %61, %63 : vector<2x512xf32>
      %c0_41 = arith.constant 0 : index
      %c0_42 = arith.constant 0 : index
      %65 = vector.load %arg6[%c0_41, %c0_42] : memref<1x512xf32, #tpu.memory_space<vmem>>, vector<1x512xf32>
      %66 = vector.broadcast %65 : vector<1x512xf32> to vector<2x512xf32>
      %67 = arith.addf %64, %66 : vector<2x512xf32>
      %68 = vector.extract_strided_slice %67 {offsets = [0, 0], sizes = [2, 128], strides = [1, 1]} : vector<2x512xf32> to vector<2x128xf32>
      %cst_43 = arith.constant 0.000000e+00 : f32
      %69 = vector.broadcast %cst_43 : f32 to vector<2x128xf32>
      %70 = arith.subf %69, %68 : vector<2x128xf32>
      %71 = math.exp %70 : vector<2x128xf32>
      %cst_44 = arith.constant 1.000000e+00 : f32
      %72 = vector.broadcast %cst_44 : f32 to vector<2x128xf32>
      %73 = arith.addf %72, %71 : vector<2x128xf32>
      %cst_45 = arith.constant 1.000000e+00 : f32
      %74 = vector.broadcast %cst_45 : f32 to vector<2x128xf32>
      %75 = arith.divf %74, %73 : vector<2x128xf32>
      %76 = vector.extract_strided_slice %67 {offsets = [0, 128], sizes = [2, 128], strides = [1, 1]} : vector<2x512xf32> to vector<2x128xf32>
      %cst_46 = arith.constant 0.000000e+00 : f32
      %77 = vector.broadcast %cst_46 : f32 to vector<2x128xf32>
      %78 = arith.subf %77, %76 : vector<2x128xf32>
      %79 = math.exp %78 : vector<2x128xf32>
      %cst_47 = arith.constant 1.000000e+00 : f32
      %80 = vector.broadcast %cst_47 : f32 to vector<2x128xf32>
      %81 = arith.addf %80, %79 : vector<2x128xf32>
      %cst_48 = arith.constant 1.000000e+00 : f32
      %82 = vector.broadcast %cst_48 : f32 to vector<2x128xf32>
      %83 = arith.divf %82, %81 : vector<2x128xf32>
      %84 = vector.extract_strided_slice %67 {offsets = [0, 256], sizes = [2, 128], strides = [1, 1]} : vector<2x512xf32> to vector<2x128xf32>
      %85 = math.tanh %84 : vector<2x128xf32>
      %86 = vector.extract_strided_slice %67 {offsets = [0, 384], sizes = [2, 128], strides = [1, 1]} : vector<2x512xf32> to vector<2x128xf32>
      %cst_49 = arith.constant 0.000000e+00 : f32
      %87 = vector.broadcast %cst_49 : f32 to vector<2x128xf32>
      %88 = arith.subf %87, %86 : vector<2x128xf32>
      %89 = math.exp %88 : vector<2x128xf32>
      %cst_50 = arith.constant 1.000000e+00 : f32
      %90 = vector.broadcast %cst_50 : f32 to vector<2x128xf32>
      %91 = arith.addf %90, %89 : vector<2x128xf32>
      %cst_51 = arith.constant 1.000000e+00 : f32
      %92 = vector.broadcast %cst_51 : f32 to vector<2x128xf32>
      %93 = arith.divf %92, %91 : vector<2x128xf32>
      %94 = arith.mulf %83, %arg15 : vector<2x128xf32>
      %95 = arith.mulf %75, %85 : vector<2x128xf32>
      %96 = arith.addf %94, %95 : vector<2x128xf32>
      %97 = math.tanh %96 : vector<2x128xf32>
      %98 = arith.mulf %93, %97 : vector<2x128xf32>
      %99 = arith.index_cast %56 : i32 to index
      %c0_52 = arith.constant 0 : index
      %c0_53 = arith.constant 0 : index
      %100 = vector.load %arg10[%99, %c0_52, %c0_53] : memref<16x2x128xf32, #tpu.memory_space<vmem>>, vector<1x2x128xf32>
      %101 = vector.shape_cast %100 : vector<1x2x128xf32> to vector<2x128xf32>
      %102 = vector.shape_cast %98 : vector<2x128xf32> to vector<1x2x128xf32>
      tpu.vector_store %arg10[%99, %c0_52, %c0_53], %102 {strides = array<i32>} : memref<16x2x128xf32, #tpu.memory_space<vmem>>, vector<1x2x128xf32>,
      scf.yield %51, %49, %98, %96 : vector<2x128xf32>, vector<2x128xf32>, vector<2x128xf32>, vector<2x128xf32>
    }
    %c16_i32_1 = arith.constant 16 : i32
    %c0 = arith.constant 0 : index
    %c0_2 = arith.constant 0 : index
    %c0_3 = arith.constant 0 : index
    %4 = vector.load %arg9[%c0, %c0_2, %c0_3] : memref<16x2x128xf32, #tpu.memory_space<vmem>>, vector<16x2x128xf32>
    %c0_4 = arith.constant 0 : index
    %c0_5 = arith.constant 0 : index
    %c0_6 = arith.constant 0 : index
    %5 = vector.load %arg10[%c0_4, %c0_5, %c0_6] : memref<16x2x128xf32, #tpu.memory_space<vmem>>, vector<16x2x128xf32>
    %6 = tpu.concatenate %4, %5 in 2 : vector<16x2x128xf32>, vector<16x2x128xf32> -> vector<16x2x256xf32>
    %c0_7 = arith.constant 0 : index
    %c0_8 = arith.constant 0 : index
    %c0_9 = arith.constant 0 : index
    %7 = vector.load %arg7[%c0_7, %c0_8, %c0_9] : memref<16x2x256xf32, #tpu.memory_space<vmem>>, vector<16x2x256xf32>
    tpu.vector_store %arg7[%c0_7, %c0_8, %c0_9], %6 {strides = array<i32>} : memref<16x2x256xf32, #tpu.memory_space<vmem>>, vector<16x2x256xf32>,
    %8 = tpu.concatenate %3#0, %3#2 in 1 : vector<2x128xf32>, vector<2x128xf32> -> vector<2x256xf32>
    %c0_10 = arith.constant 0 : index
    %c0_11 = arith.constant 0 : index
    %9 = vector.load %arg8[%c0_10, %c0_11] : memref<2x256xf32, #tpu.memory_space<vmem>>, vector<2x256xf32>
    tpu.vector_store %arg8[%c0_10, %c0_11], %8 {strides = array<i32>} : memref<2x256xf32, #tpu.memory_space<vmem>>, vector<2x256xf32>,
    return
  }
}

module attributes {stable_mosaic.version = 11 : i64} {
  func.func @_bilstm_kernel(%arg0: memref<8x2x256xf32, #tpu.memory_space<vmem>>, %arg1: memref<256x512xf32, #tpu.memory_space<vmem>>, %arg2: memref<256x512xf32, #tpu.memory_space<vmem>>, %arg3: memref<128x512xf32, #tpu.memory_space<vmem>>, %arg4: memref<1x512xf32, #tpu.memory_space<vmem>>, %arg5: memref<256x512xf32, #tpu.memory_space<vmem>>, %arg6: memref<256x512xf32, #tpu.memory_space<vmem>>, %arg7: memref<128x512xf32, #tpu.memory_space<vmem>>, %arg8: memref<1x512xf32, #tpu.memory_space<vmem>>, %arg9: memref<4x2x256xf32, #tpu.memory_space<vmem>>, %arg10: memref<2x256xf32, #tpu.memory_space<vmem>>, %arg11: memref<4x2x128xf32, #tpu.memory_space<vmem>>, %arg12: memref<4x2x128xf32, #tpu.memory_space<vmem>>) attributes {dimension_semantics = [], scalar_prefetch = 0 : i64, scratch_operands = 2 : i64, tpu.core_type = #tpu.core_type<tc>} {
    %cst = arith.constant 0.000000e+00 : f32
    %0 = vector.broadcast %cst : f32 to vector<2x128xf32>
    %cst_0 = arith.constant 0.000000e+00 : f32
    %1 = vector.broadcast %cst_0 : f32 to vector<2x128xf32>
    %c0_i32 = arith.constant 0 : i32
    %c4_i32 = arith.constant 4 : i32
    %2 = arith.addi %c0_i32, %c4_i32 : i32
    %c1_i32 = arith.constant 1 : i32
    %3:4 = scf.for %arg13 = %c0_i32 to %2 step %c1_i32 iter_args(%arg14 = %0, %arg15 = %1, %arg16 = %0, %arg17 = %1) -> (vector<2x128xf32>, vector<2x128xf32>, vector<2x128xf32>, vector<2x128xf32>)  : i32 {
      %c2_i32 = arith.constant 2 : i32
      %10 = arith.muli %c2_i32, %arg13 : i32
      %11 = arith.index_cast %10 : i32 to index
      %c0_12 = arith.constant 0 : index
      %c0_13 = arith.constant 0 : index
      %12 = vector.load %arg0[%11, %c0_12, %c0_13] : memref<8x2x256xf32, #tpu.memory_space<vmem>>, vector<1x2x256xf32>
      %13 = vector.shape_cast %12 : vector<1x2x256xf32> to vector<2x256xf32>
      %c0_14 = arith.constant 0 : index
      %c0_15 = arith.constant 0 : index
      %14 = vector.load %arg1[%c0_14, %c0_15] : memref<256x512xf32, #tpu.memory_space<vmem>>, vector<256x512xf32>
      %cst_16 = arith.constant dense<0.000000e+00> : vector<2x512xf32>
      %15 = tpu.matmul %13, %14, %cst_16 {dimension_numbers = #tpu.dot_dimension_numbers<[1], [0], [0], [1], [0, 0, 1, 1], [], []>} : vector<2x256xf32>, vector<256x512xf32>, vector<2x512xf32> -> vector<2x512xf32>
      %c2_i32_17 = arith.constant 2 : i32
      %16 = arith.muli %c2_i32_17, %arg13 : i32
      %c1_i32_18 = arith.constant 1 : i32
      %17 = arith.addi %16, %c1_i32_18 : i32
      %18 = arith.index_cast %17 : i32 to index
      %c0_19 = arith.constant 0 : index
      %c0_20 = arith.constant 0 : index
      %19 = vector.load %arg0[%18, %c0_19, %c0_20] : memref<8x2x256xf32, #tpu.memory_space<vmem>>, vector<1x2x256xf32>
      %20 = vector.shape_cast %19 : vector<1x2x256xf32> to vector<2x256xf32>
      %c0_21 = arith.constant 0 : index
      %c0_22 = arith.constant 0 : index
      %21 = vector.load %arg2[%c0_21, %c0_22] : memref<256x512xf32, #tpu.memory_space<vmem>>, vector<256x512xf32>
      %cst_23 = arith.constant dense<0.000000e+00> : vector<2x512xf32>
      %22 = tpu.matmul %20, %21, %cst_23 {dimension_numbers = #tpu.dot_dimension_numbers<[1], [0], [0], [1], [0, 0, 1, 1], [], []>} : vector<2x256xf32>, vector<256x512xf32>, vector<2x512xf32> -> vector<2x512xf32>
      %23 = arith.addf %15, %22 : vector<2x512xf32>
      %c0_24 = arith.constant 0 : index
      %c0_25 = arith.constant 0 : index
      %24 = vector.load %arg3[%c0_24, %c0_25] : memref<128x512xf32, #tpu.memory_space<vmem>>, vector<128x512xf32>
      %cst_26 = arith.constant dense<0.000000e+00> : vector<2x512xf32>
      %25 = tpu.matmul %arg14, %24, %cst_26 {dimension_numbers = #tpu.dot_dimension_numbers<[1], [0], [0], [1], [0, 0, 1, 1], [], []>} : vector<2x128xf32>, vector<128x512xf32>, vector<2x512xf32> -> vector<2x512xf32>
      %26 = arith.addf %23, %25 : vector<2x512xf32>
      %c0_27 = arith.constant 0 : index
      %c0_28 = arith.constant 0 : index
      %27 = vector.load %arg4[%c0_27, %c0_28] : memref<1x512xf32, #tpu.memory_space<vmem>>, vector<1x512xf32>
      %28 = vector.broadcast %27 : vector<1x512xf32> to vector<2x512xf32>
      %29 = arith.addf %26, %28 : vector<2x512xf32>
      %30 = vector.extract_strided_slice %29 {offsets = [0, 0], sizes = [2, 128], strides = [1, 1]} : vector<2x512xf32> to vector<2x128xf32>
      %cst_29 = arith.constant 0.000000e+00 : f32
      %31 = vector.broadcast %cst_29 : f32 to vector<2x128xf32>
      %32 = arith.subf %31, %30 : vector<2x128xf32>
      %33 = math.exp %32 : vector<2x128xf32>
      %cst_30 = arith.constant 1.000000e+00 : f32
      %34 = vector.broadcast %cst_30 : f32 to vector<2x128xf32>
      %35 = arith.addf %34, %33 : vector<2x128xf32>
      %cst_31 = arith.constant 1.000000e+00 : f32
      %36 = vector.broadcast %cst_31 : f32 to vector<2x128xf32>
      %37 = arith.divf %36, %35 : vector<2x128xf32>
      %38 = vector.extract_strided_slice %29 {offsets = [0, 128], sizes = [2, 128], strides = [1, 1]} : vector<2x512xf32> to vector<2x128xf32>
      %cst_32 = arith.constant 0.000000e+00 : f32
      %39 = vector.broadcast %cst_32 : f32 to vector<2x128xf32>
      %40 = arith.subf %39, %38 : vector<2x128xf32>
      %41 = math.exp %40 : vector<2x128xf32>
      %cst_33 = arith.constant 1.000000e+00 : f32
      %42 = vector.broadcast %cst_33 : f32 to vector<2x128xf32>
      %43 = arith.addf %42, %41 : vector<2x128xf32>
      %cst_34 = arith.constant 1.000000e+00 : f32
      %44 = vector.broadcast %cst_34 : f32 to vector<2x128xf32>
      %45 = arith.divf %44, %43 : vector<2x128xf32>
      %46 = vector.extract_strided_slice %29 {offsets = [0, 256], sizes = [2, 128], strides = [1, 1]} : vector<2x512xf32> to vector<2x128xf32>
      %47 = math.tanh %46 : vector<2x128xf32>
      %48 = vector.extract_strided_slice %29 {offsets = [0, 384], sizes = [2, 128], strides = [1, 1]} : vector<2x512xf32> to vector<2x128xf32>
      %cst_35 = arith.constant 0.000000e+00 : f32
      %49 = vector.broadcast %cst_35 : f32 to vector<2x128xf32>
      %50 = arith.subf %49, %48 : vector<2x128xf32>
      %51 = math.exp %50 : vector<2x128xf32>
      %cst_36 = arith.constant 1.000000e+00 : f32
      %52 = vector.broadcast %cst_36 : f32 to vector<2x128xf32>
      %53 = arith.addf %52, %51 : vector<2x128xf32>
      %cst_37 = arith.constant 1.000000e+00 : f32
      %54 = vector.broadcast %cst_37 : f32 to vector<2x128xf32>
      %55 = arith.divf %54, %53 : vector<2x128xf32>
      %56 = arith.mulf %45, %arg15 : vector<2x128xf32>
      %57 = arith.mulf %37, %47 : vector<2x128xf32>
      %58 = arith.addf %56, %57 : vector<2x128xf32>
      %59 = math.tanh %58 : vector<2x128xf32>
      %60 = arith.mulf %55, %59 : vector<2x128xf32>
      %61 = arith.index_cast %arg13 : i32 to index
      %c0_38 = arith.constant 0 : index
      %c0_39 = arith.constant 0 : index
      %62 = vector.load %arg11[%61, %c0_38, %c0_39] : memref<4x2x128xf32, #tpu.memory_space<vmem>>, vector<1x2x128xf32>
      %63 = vector.shape_cast %62 : vector<1x2x128xf32> to vector<2x128xf32>
      %64 = vector.shape_cast %60 : vector<2x128xf32> to vector<1x2x128xf32>
      tpu.vector_store %arg11[%61, %c0_38, %c0_39], %64 {strides = array<i32>} : memref<4x2x128xf32, #tpu.memory_space<vmem>>, vector<1x2x128xf32>,
      %c3_i32 = arith.constant 3 : i32
      %65 = arith.subi %c3_i32, %arg13 : i32
      %c2_i32_40 = arith.constant 2 : i32
      %66 = arith.muli %c2_i32_40, %65 : i32
      %67 = arith.index_cast %66 : i32 to index
      %c0_41 = arith.constant 0 : index
      %c0_42 = arith.constant 0 : index
      %68 = vector.load %arg0[%67, %c0_41, %c0_42] : memref<8x2x256xf32, #tpu.memory_space<vmem>>, vector<1x2x256xf32>
      %69 = vector.shape_cast %68 : vector<1x2x256xf32> to vector<2x256xf32>
      %c0_43 = arith.constant 0 : index
      %c0_44 = arith.constant 0 : index
      %70 = vector.load %arg5[%c0_43, %c0_44] : memref<256x512xf32, #tpu.memory_space<vmem>>, vector<256x512xf32>
      %cst_45 = arith.constant dense<0.000000e+00> : vector<2x512xf32>
      %71 = tpu.matmul %69, %70, %cst_45 {dimension_numbers = #tpu.dot_dimension_numbers<[1], [0], [0], [1], [0, 0, 1, 1], [], []>} : vector<2x256xf32>, vector<256x512xf32>, vector<2x512xf32> -> vector<2x512xf32>
      %c2_i32_46 = arith.constant 2 : i32
      %72 = arith.muli %c2_i32_46, %65 : i32
      %c1_i32_47 = arith.constant 1 : i32
      %73 = arith.addi %72, %c1_i32_47 : i32
      %74 = arith.index_cast %73 : i32 to index
      %c0_48 = arith.constant 0 : index
      %c0_49 = arith.constant 0 : index
      %75 = vector.load %arg0[%74, %c0_48, %c0_49] : memref<8x2x256xf32, #tpu.memory_space<vmem>>, vector<1x2x256xf32>
      %76 = vector.shape_cast %75 : vector<1x2x256xf32> to vector<2x256xf32>
      %c0_50 = arith.constant 0 : index
      %c0_51 = arith.constant 0 : index
      %77 = vector.load %arg6[%c0_50, %c0_51] : memref<256x512xf32, #tpu.memory_space<vmem>>, vector<256x512xf32>
      %cst_52 = arith.constant dense<0.000000e+00> : vector<2x512xf32>
      %78 = tpu.matmul %76, %77, %cst_52 {dimension_numbers = #tpu.dot_dimension_numbers<[1], [0], [0], [1], [0, 0, 1, 1], [], []>} : vector<2x256xf32>, vector<256x512xf32>, vector<2x512xf32> -> vector<2x512xf32>
      %79 = arith.addf %71, %78 : vector<2x512xf32>
      %c0_53 = arith.constant 0 : index
      %c0_54 = arith.constant 0 : index
      %80 = vector.load %arg7[%c0_53, %c0_54] : memref<128x512xf32, #tpu.memory_space<vmem>>, vector<128x512xf32>
      %cst_55 = arith.constant dense<0.000000e+00> : vector<2x512xf32>
      %81 = tpu.matmul %arg16, %80, %cst_55 {dimension_numbers = #tpu.dot_dimension_numbers<[1], [0], [0], [1], [0, 0, 1, 1], [], []>} : vector<2x128xf32>, vector<128x512xf32>, vector<2x512xf32> -> vector<2x512xf32>
      %82 = arith.addf %79, %81 : vector<2x512xf32>
      %c0_56 = arith.constant 0 : index
      %c0_57 = arith.constant 0 : index
      %83 = vector.load %arg8[%c0_56, %c0_57] : memref<1x512xf32, #tpu.memory_space<vmem>>, vector<1x512xf32>
      %84 = vector.broadcast %83 : vector<1x512xf32> to vector<2x512xf32>
      %85 = arith.addf %82, %84 : vector<2x512xf32>
      %86 = vector.extract_strided_slice %85 {offsets = [0, 0], sizes = [2, 128], strides = [1, 1]} : vector<2x512xf32> to vector<2x128xf32>
      %cst_58 = arith.constant 0.000000e+00 : f32
      %87 = vector.broadcast %cst_58 : f32 to vector<2x128xf32>
      %88 = arith.subf %87, %86 : vector<2x128xf32>
      %89 = math.exp %88 : vector<2x128xf32>
      %cst_59 = arith.constant 1.000000e+00 : f32
      %90 = vector.broadcast %cst_59 : f32 to vector<2x128xf32>
      %91 = arith.addf %90, %89 : vector<2x128xf32>
      %cst_60 = arith.constant 1.000000e+00 : f32
      %92 = vector.broadcast %cst_60 : f32 to vector<2x128xf32>
      %93 = arith.divf %92, %91 : vector<2x128xf32>
      %94 = vector.extract_strided_slice %85 {offsets = [0, 128], sizes = [2, 128], strides = [1, 1]} : vector<2x512xf32> to vector<2x128xf32>
      %cst_61 = arith.constant 0.000000e+00 : f32
      %95 = vector.broadcast %cst_61 : f32 to vector<2x128xf32>
      %96 = arith.subf %95, %94 : vector<2x128xf32>
      %97 = math.exp %96 : vector<2x128xf32>
      %cst_62 = arith.constant 1.000000e+00 : f32
      %98 = vector.broadcast %cst_62 : f32 to vector<2x128xf32>
      %99 = arith.addf %98, %97 : vector<2x128xf32>
      %cst_63 = arith.constant 1.000000e+00 : f32
      %100 = vector.broadcast %cst_63 : f32 to vector<2x128xf32>
      %101 = arith.divf %100, %99 : vector<2x128xf32>
      %102 = vector.extract_strided_slice %85 {offsets = [0, 256], sizes = [2, 128], strides = [1, 1]} : vector<2x512xf32> to vector<2x128xf32>
      %103 = math.tanh %102 : vector<2x128xf32>
      %104 = vector.extract_strided_slice %85 {offsets = [0, 384], sizes = [2, 128], strides = [1, 1]} : vector<2x512xf32> to vector<2x128xf32>
      %cst_64 = arith.constant 0.000000e+00 : f32
      %105 = vector.broadcast %cst_64 : f32 to vector<2x128xf32>
      %106 = arith.subf %105, %104 : vector<2x128xf32>
      %107 = math.exp %106 : vector<2x128xf32>
      %cst_65 = arith.constant 1.000000e+00 : f32
      %108 = vector.broadcast %cst_65 : f32 to vector<2x128xf32>
      %109 = arith.addf %108, %107 : vector<2x128xf32>
      %cst_66 = arith.constant 1.000000e+00 : f32
      %110 = vector.broadcast %cst_66 : f32 to vector<2x128xf32>
      %111 = arith.divf %110, %109 : vector<2x128xf32>
      %112 = arith.mulf %101, %arg17 : vector<2x128xf32>
      %113 = arith.mulf %93, %103 : vector<2x128xf32>
      %114 = arith.addf %112, %113 : vector<2x128xf32>
      %115 = math.tanh %114 : vector<2x128xf32>
      %116 = arith.mulf %111, %115 : vector<2x128xf32>
      %117 = arith.index_cast %65 : i32 to index
      %c0_67 = arith.constant 0 : index
      %c0_68 = arith.constant 0 : index
      %118 = vector.load %arg12[%117, %c0_67, %c0_68] : memref<4x2x128xf32, #tpu.memory_space<vmem>>, vector<1x2x128xf32>
      %119 = vector.shape_cast %118 : vector<1x2x128xf32> to vector<2x128xf32>
      %120 = vector.shape_cast %116 : vector<2x128xf32> to vector<1x2x128xf32>
      tpu.vector_store %arg12[%117, %c0_67, %c0_68], %120 {strides = array<i32>} : memref<4x2x128xf32, #tpu.memory_space<vmem>>, vector<1x2x128xf32>,
      scf.yield %60, %58, %116, %114 : vector<2x128xf32>, vector<2x128xf32>, vector<2x128xf32>, vector<2x128xf32>
    }
    %c4_i32_1 = arith.constant 4 : i32
    %c0 = arith.constant 0 : index
    %c0_2 = arith.constant 0 : index
    %c0_3 = arith.constant 0 : index
    %4 = vector.load %arg11[%c0, %c0_2, %c0_3] : memref<4x2x128xf32, #tpu.memory_space<vmem>>, vector<4x2x128xf32>
    %c0_4 = arith.constant 0 : index
    %c0_5 = arith.constant 0 : index
    %c0_6 = arith.constant 0 : index
    %5 = vector.load %arg12[%c0_4, %c0_5, %c0_6] : memref<4x2x128xf32, #tpu.memory_space<vmem>>, vector<4x2x128xf32>
    %6 = tpu.concatenate %4, %5 in 2 : vector<4x2x128xf32>, vector<4x2x128xf32> -> vector<4x2x256xf32>
    %c0_7 = arith.constant 0 : index
    %c0_8 = arith.constant 0 : index
    %c0_9 = arith.constant 0 : index
    %7 = vector.load %arg9[%c0_7, %c0_8, %c0_9] : memref<4x2x256xf32, #tpu.memory_space<vmem>>, vector<4x2x256xf32>
    tpu.vector_store %arg9[%c0_7, %c0_8, %c0_9], %6 {strides = array<i32>} : memref<4x2x256xf32, #tpu.memory_space<vmem>>, vector<4x2x256xf32>,
    %8 = tpu.concatenate %3#0, %3#2 in 1 : vector<2x128xf32>, vector<2x128xf32> -> vector<2x256xf32>
    %c0_10 = arith.constant 0 : index
    %c0_11 = arith.constant 0 : index
    %9 = vector.load %arg10[%c0_10, %c0_11] : memref<2x256xf32, #tpu.memory_space<vmem>>, vector<2x256xf32>
    tpu.vector_store %arg10[%c0_10, %c0_11], %8 {strides = array<i32>} : memref<2x256xf32, #tpu.memory_space<vmem>>, vector<2x256xf32>,
    return
  }
}

module attributes {stable_mosaic.version = 11 : i64} {
  func.func @_bilstm_kernel(%arg0: memref<4x2x256xf32, #tpu.memory_space<vmem>>, %arg1: memref<256x512xf32, #tpu.memory_space<vmem>>, %arg2: memref<256x512xf32, #tpu.memory_space<vmem>>, %arg3: memref<128x512xf32, #tpu.memory_space<vmem>>, %arg4: memref<1x512xf32, #tpu.memory_space<vmem>>, %arg5: memref<256x512xf32, #tpu.memory_space<vmem>>, %arg6: memref<256x512xf32, #tpu.memory_space<vmem>>, %arg7: memref<128x512xf32, #tpu.memory_space<vmem>>, %arg8: memref<1x512xf32, #tpu.memory_space<vmem>>, %arg9: memref<2x2x256xf32, #tpu.memory_space<vmem>>, %arg10: memref<2x256xf32, #tpu.memory_space<vmem>>, %arg11: memref<2x2x128xf32, #tpu.memory_space<vmem>>, %arg12: memref<2x2x128xf32, #tpu.memory_space<vmem>>) attributes {dimension_semantics = [], scalar_prefetch = 0 : i64, scratch_operands = 2 : i64, tpu.core_type = #tpu.core_type<tc>} {
    %cst = arith.constant 0.000000e+00 : f32
    %0 = vector.broadcast %cst : f32 to vector<2x128xf32>
    %cst_0 = arith.constant 0.000000e+00 : f32
    %1 = vector.broadcast %cst_0 : f32 to vector<2x128xf32>
    %c0_i32 = arith.constant 0 : i32
    %c2_i32 = arith.constant 2 : i32
    %2 = arith.addi %c0_i32, %c2_i32 : i32
    %c1_i32 = arith.constant 1 : i32
    %3:4 = scf.for %arg13 = %c0_i32 to %2 step %c1_i32 iter_args(%arg14 = %0, %arg15 = %1, %arg16 = %0, %arg17 = %1) -> (vector<2x128xf32>, vector<2x128xf32>, vector<2x128xf32>, vector<2x128xf32>)  : i32 {
      %c2_i32_12 = arith.constant 2 : i32
      %10 = arith.muli %c2_i32_12, %arg13 : i32
      %11 = arith.index_cast %10 : i32 to index
      %c0_13 = arith.constant 0 : index
      %c0_14 = arith.constant 0 : index
      %12 = vector.load %arg0[%11, %c0_13, %c0_14] : memref<4x2x256xf32, #tpu.memory_space<vmem>>, vector<1x2x256xf32>
      %13 = vector.shape_cast %12 : vector<1x2x256xf32> to vector<2x256xf32>
      %c0_15 = arith.constant 0 : index
      %c0_16 = arith.constant 0 : index
      %14 = vector.load %arg1[%c0_15, %c0_16] : memref<256x512xf32, #tpu.memory_space<vmem>>, vector<256x512xf32>
      %cst_17 = arith.constant dense<0.000000e+00> : vector<2x512xf32>
      %15 = tpu.matmul %13, %14, %cst_17 {dimension_numbers = #tpu.dot_dimension_numbers<[1], [0], [0], [1], [0, 0, 1, 1], [], []>} : vector<2x256xf32>, vector<256x512xf32>, vector<2x512xf32> -> vector<2x512xf32>
      %c2_i32_18 = arith.constant 2 : i32
      %16 = arith.muli %c2_i32_18, %arg13 : i32
      %c1_i32_19 = arith.constant 1 : i32
      %17 = arith.addi %16, %c1_i32_19 : i32
      %18 = arith.index_cast %17 : i32 to index
      %c0_20 = arith.constant 0 : index
      %c0_21 = arith.constant 0 : index
      %19 = vector.load %arg0[%18, %c0_20, %c0_21] : memref<4x2x256xf32, #tpu.memory_space<vmem>>, vector<1x2x256xf32>
      %20 = vector.shape_cast %19 : vector<1x2x256xf32> to vector<2x256xf32>
      %c0_22 = arith.constant 0 : index
      %c0_23 = arith.constant 0 : index
      %21 = vector.load %arg2[%c0_22, %c0_23] : memref<256x512xf32, #tpu.memory_space<vmem>>, vector<256x512xf32>
      %cst_24 = arith.constant dense<0.000000e+00> : vector<2x512xf32>
      %22 = tpu.matmul %20, %21, %cst_24 {dimension_numbers = #tpu.dot_dimension_numbers<[1], [0], [0], [1], [0, 0, 1, 1], [], []>} : vector<2x256xf32>, vector<256x512xf32>, vector<2x512xf32> -> vector<2x512xf32>
      %23 = arith.addf %15, %22 : vector<2x512xf32>
      %c0_25 = arith.constant 0 : index
      %c0_26 = arith.constant 0 : index
      %24 = vector.load %arg3[%c0_25, %c0_26] : memref<128x512xf32, #tpu.memory_space<vmem>>, vector<128x512xf32>
      %cst_27 = arith.constant dense<0.000000e+00> : vector<2x512xf32>
      %25 = tpu.matmul %arg14, %24, %cst_27 {dimension_numbers = #tpu.dot_dimension_numbers<[1], [0], [0], [1], [0, 0, 1, 1], [], []>} : vector<2x128xf32>, vector<128x512xf32>, vector<2x512xf32> -> vector<2x512xf32>
      %26 = arith.addf %23, %25 : vector<2x512xf32>
      %c0_28 = arith.constant 0 : index
      %c0_29 = arith.constant 0 : index
      %27 = vector.load %arg4[%c0_28, %c0_29] : memref<1x512xf32, #tpu.memory_space<vmem>>, vector<1x512xf32>
      %28 = vector.broadcast %27 : vector<1x512xf32> to vector<2x512xf32>
      %29 = arith.addf %26, %28 : vector<2x512xf32>
      %30 = vector.extract_strided_slice %29 {offsets = [0, 0], sizes = [2, 128], strides = [1, 1]} : vector<2x512xf32> to vector<2x128xf32>
      %cst_30 = arith.constant 0.000000e+00 : f32
      %31 = vector.broadcast %cst_30 : f32 to vector<2x128xf32>
      %32 = arith.subf %31, %30 : vector<2x128xf32>
      %33 = math.exp %32 : vector<2x128xf32>
      %cst_31 = arith.constant 1.000000e+00 : f32
      %34 = vector.broadcast %cst_31 : f32 to vector<2x128xf32>
      %35 = arith.addf %34, %33 : vector<2x128xf32>
      %cst_32 = arith.constant 1.000000e+00 : f32
      %36 = vector.broadcast %cst_32 : f32 to vector<2x128xf32>
      %37 = arith.divf %36, %35 : vector<2x128xf32>
      %38 = vector.extract_strided_slice %29 {offsets = [0, 128], sizes = [2, 128], strides = [1, 1]} : vector<2x512xf32> to vector<2x128xf32>
      %cst_33 = arith.constant 0.000000e+00 : f32
      %39 = vector.broadcast %cst_33 : f32 to vector<2x128xf32>
      %40 = arith.subf %39, %38 : vector<2x128xf32>
      %41 = math.exp %40 : vector<2x128xf32>
      %cst_34 = arith.constant 1.000000e+00 : f32
      %42 = vector.broadcast %cst_34 : f32 to vector<2x128xf32>
      %43 = arith.addf %42, %41 : vector<2x128xf32>
      %cst_35 = arith.constant 1.000000e+00 : f32
      %44 = vector.broadcast %cst_35 : f32 to vector<2x128xf32>
      %45 = arith.divf %44, %43 : vector<2x128xf32>
      %46 = vector.extract_strided_slice %29 {offsets = [0, 256], sizes = [2, 128], strides = [1, 1]} : vector<2x512xf32> to vector<2x128xf32>
      %47 = math.tanh %46 : vector<2x128xf32>
      %48 = vector.extract_strided_slice %29 {offsets = [0, 384], sizes = [2, 128], strides = [1, 1]} : vector<2x512xf32> to vector<2x128xf32>
      %cst_36 = arith.constant 0.000000e+00 : f32
      %49 = vector.broadcast %cst_36 : f32 to vector<2x128xf32>
      %50 = arith.subf %49, %48 : vector<2x128xf32>
      %51 = math.exp %50 : vector<2x128xf32>
      %cst_37 = arith.constant 1.000000e+00 : f32
      %52 = vector.broadcast %cst_37 : f32 to vector<2x128xf32>
      %53 = arith.addf %52, %51 : vector<2x128xf32>
      %cst_38 = arith.constant 1.000000e+00 : f32
      %54 = vector.broadcast %cst_38 : f32 to vector<2x128xf32>
      %55 = arith.divf %54, %53 : vector<2x128xf32>
      %56 = arith.mulf %45, %arg15 : vector<2x128xf32>
      %57 = arith.mulf %37, %47 : vector<2x128xf32>
      %58 = arith.addf %56, %57 : vector<2x128xf32>
      %59 = math.tanh %58 : vector<2x128xf32>
      %60 = arith.mulf %55, %59 : vector<2x128xf32>
      %61 = arith.index_cast %arg13 : i32 to index
      %c0_39 = arith.constant 0 : index
      %c0_40 = arith.constant 0 : index
      %62 = vector.load %arg11[%61, %c0_39, %c0_40] : memref<2x2x128xf32, #tpu.memory_space<vmem>>, vector<1x2x128xf32>
      %63 = vector.shape_cast %62 : vector<1x2x128xf32> to vector<2x128xf32>
      %64 = vector.shape_cast %60 : vector<2x128xf32> to vector<1x2x128xf32>
      tpu.vector_store %arg11[%61, %c0_39, %c0_40], %64 {strides = array<i32>} : memref<2x2x128xf32, #tpu.memory_space<vmem>>, vector<1x2x128xf32>,
      %c1_i32_41 = arith.constant 1 : i32
      %65 = arith.subi %c1_i32_41, %arg13 : i32
      %c2_i32_42 = arith.constant 2 : i32
      %66 = arith.muli %c2_i32_42, %65 : i32
      %67 = arith.index_cast %66 : i32 to index
      %c0_43 = arith.constant 0 : index
      %c0_44 = arith.constant 0 : index
      %68 = vector.load %arg0[%67, %c0_43, %c0_44] : memref<4x2x256xf32, #tpu.memory_space<vmem>>, vector<1x2x256xf32>
      %69 = vector.shape_cast %68 : vector<1x2x256xf32> to vector<2x256xf32>
      %c0_45 = arith.constant 0 : index
      %c0_46 = arith.constant 0 : index
      %70 = vector.load %arg5[%c0_45, %c0_46] : memref<256x512xf32, #tpu.memory_space<vmem>>, vector<256x512xf32>
      %cst_47 = arith.constant dense<0.000000e+00> : vector<2x512xf32>
      %71 = tpu.matmul %69, %70, %cst_47 {dimension_numbers = #tpu.dot_dimension_numbers<[1], [0], [0], [1], [0, 0, 1, 1], [], []>} : vector<2x256xf32>, vector<256x512xf32>, vector<2x512xf32> -> vector<2x512xf32>
      %c2_i32_48 = arith.constant 2 : i32
      %72 = arith.muli %c2_i32_48, %65 : i32
      %c1_i32_49 = arith.constant 1 : i32
      %73 = arith.addi %72, %c1_i32_49 : i32
      %74 = arith.index_cast %73 : i32 to index
      %c0_50 = arith.constant 0 : index
      %c0_51 = arith.constant 0 : index
      %75 = vector.load %arg0[%74, %c0_50, %c0_51] : memref<4x2x256xf32, #tpu.memory_space<vmem>>, vector<1x2x256xf32>
      %76 = vector.shape_cast %75 : vector<1x2x256xf32> to vector<2x256xf32>
      %c0_52 = arith.constant 0 : index
      %c0_53 = arith.constant 0 : index
      %77 = vector.load %arg6[%c0_52, %c0_53] : memref<256x512xf32, #tpu.memory_space<vmem>>, vector<256x512xf32>
      %cst_54 = arith.constant dense<0.000000e+00> : vector<2x512xf32>
      %78 = tpu.matmul %76, %77, %cst_54 {dimension_numbers = #tpu.dot_dimension_numbers<[1], [0], [0], [1], [0, 0, 1, 1], [], []>} : vector<2x256xf32>, vector<256x512xf32>, vector<2x512xf32> -> vector<2x512xf32>
      %79 = arith.addf %71, %78 : vector<2x512xf32>
      %c0_55 = arith.constant 0 : index
      %c0_56 = arith.constant 0 : index
      %80 = vector.load %arg7[%c0_55, %c0_56] : memref<128x512xf32, #tpu.memory_space<vmem>>, vector<128x512xf32>
      %cst_57 = arith.constant dense<0.000000e+00> : vector<2x512xf32>
      %81 = tpu.matmul %arg16, %80, %cst_57 {dimension_numbers = #tpu.dot_dimension_numbers<[1], [0], [0], [1], [0, 0, 1, 1], [], []>} : vector<2x128xf32>, vector<128x512xf32>, vector<2x512xf32> -> vector<2x512xf32>
      %82 = arith.addf %79, %81 : vector<2x512xf32>
      %c0_58 = arith.constant 0 : index
      %c0_59 = arith.constant 0 : index
      %83 = vector.load %arg8[%c0_58, %c0_59] : memref<1x512xf32, #tpu.memory_space<vmem>>, vector<1x512xf32>
      %84 = vector.broadcast %83 : vector<1x512xf32> to vector<2x512xf32>
      %85 = arith.addf %82, %84 : vector<2x512xf32>
      %86 = vector.extract_strided_slice %85 {offsets = [0, 0], sizes = [2, 128], strides = [1, 1]} : vector<2x512xf32> to vector<2x128xf32>
      %cst_60 = arith.constant 0.000000e+00 : f32
      %87 = vector.broadcast %cst_60 : f32 to vector<2x128xf32>
      %88 = arith.subf %87, %86 : vector<2x128xf32>
      %89 = math.exp %88 : vector<2x128xf32>
      %cst_61 = arith.constant 1.000000e+00 : f32
      %90 = vector.broadcast %cst_61 : f32 to vector<2x128xf32>
      %91 = arith.addf %90, %89 : vector<2x128xf32>
      %cst_62 = arith.constant 1.000000e+00 : f32
      %92 = vector.broadcast %cst_62 : f32 to vector<2x128xf32>
      %93 = arith.divf %92, %91 : vector<2x128xf32>
      %94 = vector.extract_strided_slice %85 {offsets = [0, 128], sizes = [2, 128], strides = [1, 1]} : vector<2x512xf32> to vector<2x128xf32>
      %cst_63 = arith.constant 0.000000e+00 : f32
      %95 = vector.broadcast %cst_63 : f32 to vector<2x128xf32>
      %96 = arith.subf %95, %94 : vector<2x128xf32>
      %97 = math.exp %96 : vector<2x128xf32>
      %cst_64 = arith.constant 1.000000e+00 : f32
      %98 = vector.broadcast %cst_64 : f32 to vector<2x128xf32>
      %99 = arith.addf %98, %97 : vector<2x128xf32>
      %cst_65 = arith.constant 1.000000e+00 : f32
      %100 = vector.broadcast %cst_65 : f32 to vector<2x128xf32>
      %101 = arith.divf %100, %99 : vector<2x128xf32>
      %102 = vector.extract_strided_slice %85 {offsets = [0, 256], sizes = [2, 128], strides = [1, 1]} : vector<2x512xf32> to vector<2x128xf32>
      %103 = math.tanh %102 : vector<2x128xf32>
      %104 = vector.extract_strided_slice %85 {offsets = [0, 384], sizes = [2, 128], strides = [1, 1]} : vector<2x512xf32> to vector<2x128xf32>
      %cst_66 = arith.constant 0.000000e+00 : f32
      %105 = vector.broadcast %cst_66 : f32 to vector<2x128xf32>
      %106 = arith.subf %105, %104 : vector<2x128xf32>
      %107 = math.exp %106 : vector<2x128xf32>
      %cst_67 = arith.constant 1.000000e+00 : f32
      %108 = vector.broadcast %cst_67 : f32 to vector<2x128xf32>
      %109 = arith.addf %108, %107 : vector<2x128xf32>
      %cst_68 = arith.constant 1.000000e+00 : f32
      %110 = vector.broadcast %cst_68 : f32 to vector<2x128xf32>
      %111 = arith.divf %110, %109 : vector<2x128xf32>
      %112 = arith.mulf %101, %arg17 : vector<2x128xf32>
      %113 = arith.mulf %93, %103 : vector<2x128xf32>
      %114 = arith.addf %112, %113 : vector<2x128xf32>
      %115 = math.tanh %114 : vector<2x128xf32>
      %116 = arith.mulf %111, %115 : vector<2x128xf32>
      %117 = arith.index_cast %65 : i32 to index
      %c0_69 = arith.constant 0 : index
      %c0_70 = arith.constant 0 : index
      %118 = vector.load %arg12[%117, %c0_69, %c0_70] : memref<2x2x128xf32, #tpu.memory_space<vmem>>, vector<1x2x128xf32>
      %119 = vector.shape_cast %118 : vector<1x2x128xf32> to vector<2x128xf32>
      %120 = vector.shape_cast %116 : vector<2x128xf32> to vector<1x2x128xf32>
      tpu.vector_store %arg12[%117, %c0_69, %c0_70], %120 {strides = array<i32>} : memref<2x2x128xf32, #tpu.memory_space<vmem>>, vector<1x2x128xf32>,
      scf.yield %60, %58, %116, %114 : vector<2x128xf32>, vector<2x128xf32>, vector<2x128xf32>, vector<2x128xf32>
    }
    %c2_i32_1 = arith.constant 2 : i32
    %c0 = arith.constant 0 : index
    %c0_2 = arith.constant 0 : index
    %c0_3 = arith.constant 0 : index
    %4 = vector.load %arg11[%c0, %c0_2, %c0_3] : memref<2x2x128xf32, #tpu.memory_space<vmem>>, vector<2x2x128xf32>
    %c0_4 = arith.constant 0 : index
    %c0_5 = arith.constant 0 : index
    %c0_6 = arith.constant 0 : index
    %5 = vector.load %arg12[%c0_4, %c0_5, %c0_6] : memref<2x2x128xf32, #tpu.memory_space<vmem>>, vector<2x2x128xf32>
    %6 = tpu.concatenate %4, %5 in 2 : vector<2x2x128xf32>, vector<2x2x128xf32> -> vector<2x2x256xf32>
    %c0_7 = arith.constant 0 : index
    %c0_8 = arith.constant 0 : index
    %c0_9 = arith.constant 0 : index
    %7 = vector.load %arg9[%c0_7, %c0_8, %c0_9] : memref<2x2x256xf32, #tpu.memory_space<vmem>>, vector<2x2x256xf32>
    tpu.vector_store %arg9[%c0_7, %c0_8, %c0_9], %6 {strides = array<i32>} : memref<2x2x256xf32, #tpu.memory_space<vmem>>, vector<2x2x256xf32>,
    %8 = tpu.concatenate %3#0, %3#2 in 1 : vector<2x128xf32>, vector<2x128xf32> -> vector<2x256xf32>
    %c0_10 = arith.constant 0 : index
    %c0_11 = arith.constant 0 : index
    %9 = vector.load %arg10[%c0_10, %c0_11] : memref<2x256xf32, #tpu.memory_space<vmem>>, vector<2x256xf32>
    tpu.vector_store %arg10[%c0_10, %c0_11], %8 {strides = array<i32>} : memref<2x256xf32, #tpu.memory_space<vmem>>, vector<2x256xf32>,
    return
  }
}

module attributes {stable_mosaic.version = 11 : i64} {
  func.func @_fc_selu_kernel(%arg0: memref<4x256xf32, #tpu.memory_space<vmem>>, %arg1: memref<256x256xf32, #tpu.memory_space<vmem>>, %arg2: memref<1x256xf32, #tpu.memory_space<vmem>>, %arg3: memref<256x256xf32, #tpu.memory_space<vmem>>, %arg4: memref<1x256xf32, #tpu.memory_space<vmem>>, %arg5: memref<4x256xf32, #tpu.memory_space<vmem>>, %arg6: memref<4x256xf32, #tpu.memory_space<vmem>>) attributes {dimension_semantics = [], scalar_prefetch = 0 : i64, scratch_operands = 0 : i64, tpu.core_type = #tpu.core_type<tc>} {
    %c0 = arith.constant 0 : index
    %c0_0 = arith.constant 0 : index
    %0 = vector.load %arg0[%c0, %c0_0] : memref<4x256xf32, #tpu.memory_space<vmem>>, vector<4x256xf32>
    %c0_1 = arith.constant 0 : index
    %c0_2 = arith.constant 0 : index
    %1 = vector.load %arg1[%c0_1, %c0_2] : memref<256x256xf32, #tpu.memory_space<vmem>>, vector<256x256xf32>
    %cst = arith.constant dense<0.000000e+00> : vector<4x256xf32>
    %2 = tpu.matmul %0, %1, %cst {dimension_numbers = #tpu.dot_dimension_numbers<[1], [0], [0], [1], [0, 0, 1, 1], [], []>} : vector<4x256xf32>, vector<256x256xf32>, vector<4x256xf32> -> vector<4x256xf32>
    %c0_3 = arith.constant 0 : index
    %c0_4 = arith.constant 0 : index
    %3 = vector.load %arg2[%c0_3, %c0_4] : memref<1x256xf32, #tpu.memory_space<vmem>>, vector<1x256xf32>
    %4 = vector.broadcast %3 : vector<1x256xf32> to vector<4x256xf32>
    %5 = arith.addf %2, %4 : vector<4x256xf32>
    %c0_5 = arith.constant 0 : index
    %c0_6 = arith.constant 0 : index
    %6 = vector.load %arg3[%c0_5, %c0_6] : memref<256x256xf32, #tpu.memory_space<vmem>>, vector<256x256xf32>
    %cst_7 = arith.constant dense<0.000000e+00> : vector<4x256xf32>
    %7 = tpu.matmul %0, %6, %cst_7 {dimension_numbers = #tpu.dot_dimension_numbers<[1], [0], [0], [1], [0, 0, 1, 1], [], []>} : vector<4x256xf32>, vector<256x256xf32>, vector<4x256xf32> -> vector<4x256xf32>
    %c0_8 = arith.constant 0 : index
    %c0_9 = arith.constant 0 : index
    %8 = vector.load %arg4[%c0_8, %c0_9] : memref<1x256xf32, #tpu.memory_space<vmem>>, vector<1x256xf32>
    %9 = vector.broadcast %8 : vector<1x256xf32> to vector<4x256xf32>
    %10 = arith.addf %7, %9 : vector<4x256xf32>
    %cst_10 = arith.constant 0.000000e+00 : f32
    %11 = vector.broadcast %cst_10 : f32 to vector<4x256xf32>
    %12 = arith.cmpf ogt, %5, %11 : vector<4x256xf32>
    %13 = math.exp %5 : vector<4x256xf32>
    %cst_11 = arith.constant 1.000000e+00 : f32
    %14 = vector.broadcast %cst_11 : f32 to vector<4x256xf32>
    %15 = arith.subf %13, %14 : vector<4x256xf32>
    %cst_12 = arith.constant 1.67326319 : f32
    %16 = vector.broadcast %cst_12 : f32 to vector<4x256xf32>
    %17 = arith.mulf %16, %15 : vector<4x256xf32>
    %18 = arith.select %12, %5, %17 : vector<4x256xi1>, vector<4x256xf32>
    %cst_13 = arith.constant 1.05070102 : f32
    %19 = vector.broadcast %cst_13 : f32 to vector<4x256xf32>
    %20 = arith.mulf %19, %18 : vector<4x256xf32>
    %c0_14 = arith.constant 0 : index
    %c0_15 = arith.constant 0 : index
    %21 = vector.load %arg5[%c0_14, %c0_15] : memref<4x256xf32, #tpu.memory_space<vmem>>, vector<4x256xf32>
    tpu.vector_store %arg5[%c0_14, %c0_15], %20 {strides = array<i32>} : memref<4x256xf32, #tpu.memory_space<vmem>>, vector<4x256xf32>,
    %cst_16 = arith.constant 0.000000e+00 : f32
    %22 = vector.broadcast %cst_16 : f32 to vector<4x256xf32>
    %23 = arith.cmpf ogt, %10, %22 : vector<4x256xf32>
    %24 = math.exp %10 : vector<4x256xf32>
    %cst_17 = arith.constant 1.000000e+00 : f32
    %25 = vector.broadcast %cst_17 : f32 to vector<4x256xf32>
    %26 = arith.subf %24, %25 : vector<4x256xf32>
    %cst_18 = arith.constant 1.67326319 : f32
    %27 = vector.broadcast %cst_18 : f32 to vector<4x256xf32>
    %28 = arith.mulf %27, %26 : vector<4x256xf32>
    %29 = arith.select %23, %10, %28 : vector<4x256xi1>, vector<4x256xf32>
    %cst_19 = arith.constant 1.05070102 : f32
    %30 = vector.broadcast %cst_19 : f32 to vector<4x256xf32>
    %31 = arith.mulf %30, %29 : vector<4x256xf32>
    %c0_20 = arith.constant 0 : index
    %c0_21 = arith.constant 0 : index
    %32 = vector.load %arg6[%c0_20, %c0_21] : memref<4x256xf32, #tpu.memory_space<vmem>>, vector<4x256xf32>
    tpu.vector_store %arg6[%c0_20, %c0_21], %31 {strides = array<i32>} : memref<4x256xf32, #tpu.memory_space<vmem>>, vector<4x256xf32>,
    return
  }
}

</mosaic_0001>

<bundles_post_ra>
// kernel: encoder_forward.5
= control target key start
LH: loop header
LB: loop body
LE: loop exit
PB: predicated region body
PF: predicated region fallthrough
CT: control target
= control target key end

     0   :  { %14 = vsyncpa [#allocation5], 0  ;;  %s1691_s0 = inlined_call_operand.vmem [shape: f32[16,2,40], index: 0, kind: input, shape index: {}]   ;;  %s1692_s1 = inlined_call_operand.hbm [shape: f32[40,512], index: 1, kind: input, shape index: {}]   ;;  %s1693_s2 = inlined_call_operand.hbm [shape: f32[128,512], index: 2, kind: input, shape index: {}]   ;;  %s1694_s3 = inlined_call_operand.vmem [shape: f32[1,512], index: 3, kind: input, shape index: {}]   ;;  %s1695_s4 = inlined_call_operand.hbm [shape: f32[40,512], index: 4, kind: input, shape index: {}]   ;;  %s1696_s5 = inlined_call_operand.hbm [shape: f32[128,512], index: 5, kind: input, shape index: {}]   ;;  %s1697_s6 = inlined_call_operand.vmem [shape: f32[1,512], index: 6, kind: input, shape index: {}]   ;;  %s1698_s7 = inlined_call_operand.vmem [shape: f32[16,2,256], index: 7, kind: output, shape index: {0}]   ;;  %s1699_s8 = inlined_call_operand.hbm [shape: f32[2,256], index: 8, kind: output, shape index: {1}]  }
   0x1   :  { %15 = vsyncpa [#allocation8], 0 }
   0x2   :  { %16 = vsyncpa [#allocation11], 0 }
   0x3   :  { %17 = vsyncpa [#allocation6], 0  ;;  %s1481_s27 = smov [#allocation7]   ;;  %s1482_s29 = smov [#allocation4]  }
   0x4   :  { %s37_s28 = sshll.u32 %s1481_s27, 4  ;;  %s25_s30 = sshll.u32 %s1482_s29, 4  ;;  %s38_s28 = int_to_ptr.vmem [resolvable:$true] %s37_s28  ;;  %s26_s30 = int_to_ptr.vmem [resolvable:$true] %s25_s30 }
   0x5   :  { %s1341_s9 = scalar_lea.vmem %s38_s28, 8192  ;;  %p1346_p1 = scmp.lt.s32.totalorder %s38_s28, %s38_s28 }
   0x6   :  { %p1342_p0 = scmp.ne.s32.totalorder %s38_s28, %s1341_s9  ;;  %p1347_p2 = scmp.lt.s32.totalorder %s1341_s9, %s1341_s9 }
   0x8   :  { %p1348_p3 = por %p1347_p2, %p1346_p1 }
   0xa   :  { %p1349_p4 = pnand %p1348_p3, %p1342_p0 }
   0xc   :  { %1352 = shalt.err (!%p1349_p4)
}
   0xd   :  { %s1483_s10 = smov 512   ;;  %s1484_s11 = smov 32  }
   0xe   :  { %43 = dma.hbm_to_vmem [thread:$0]  %s1693_s2, 8192, %s38_s28, [#allocation8], %s1483_s10, %s1483_s10, %s1484_s11  }
   0xf   :  { %s1361_s14 = scalar_lea.vmem %s26_s30, 2560  ;;  %p1366_p6 = scmp.lt.s32.totalorder %s26_s30, %s26_s30 }
  0x10   :  { %p1362_p5 = scmp.ne.s32.totalorder %s26_s30, %s1361_s14  ;;  %p1367_p7 = scmp.lt.s32.totalorder %s1361_s14, %s1361_s14 }
  0x12   :  { %p1368_p8 = por %p1367_p7, %p1366_p6 }
  0x14   :  { %p1369_p9 = pnand %p1368_p8, %p1362_p5 }
  0x16   :  { %1372 = shalt.err (!%p1369_p9)
}
  0x17   :  { %31 = dma.hbm_to_vmem [thread:$0]  %s1692_s1, 2560, %s26_s30, [#allocation5], %s1483_s10, %s1483_s10, %s1484_s11  }
  0x18   :  { %s1485_s17 = smov [#allocation9]   ;;  %s1486_s19 = smov [#allocation10]  }
  0x19   :  { %s51_s18 = sshll.u32 %s1485_s17, 4  ;;  %s63_s20 = sshll.u32 %s1486_s19, 4  ;;  %s52_s18 = int_to_ptr.vmem [resolvable:$true] %s51_s18  ;;  %s64_s20 = int_to_ptr.vmem [resolvable:$true] %s63_s20 }
  0x1a   :  { %s1381_s2 = scalar_lea.vmem %s52_s18, 2560  ;;  %p1386_p11 = scmp.lt.s32.totalorder %s52_s18, %s52_s18 }
  0x1b   :  { %p1382_p10 = scmp.ne.s32.totalorder %s52_s18, %s1381_s2  ;;  %p1387_p12 = scmp.lt.s32.totalorder %s1381_s2, %s1381_s2 }
  0x1d   :  { %p1388_p13 = por %p1387_p12, %p1386_p11 }
  0x1f   :  { %p1389_p0 = pnand %p1388_p13, %p1382_p10 }
  0x21   :  { %1392 = shalt.err (!%p1389_p0)
}
  0x22   :  { %57 = dma.hbm_to_vmem [thread:$0]  %s1695_s4, 2560, %s52_s18, [#allocation8], %s1483_s10, %s1483_s10, %s1484_s11  }
  0x23   :  { %s1401_s1 = scalar_lea.vmem %s64_s20, 8192  ;;  %p1406_p2 = scmp.lt.s32.totalorder %s64_s20, %s64_s20 }
  0x24   :  { %p1402_p1 = scmp.ne.s32.totalorder %s64_s20, %s1401_s1  ;;  %p1407_p3 = scmp.lt.s32.totalorder %s1401_s1, %s1401_s1 }
  0x26   :  { %p1408_p4 = por %p1407_p3, %p1406_p2 }
  0x28   :  { %p1409_p5 = pnand %p1408_p4, %p1402_p1 }
  0x2a   :  { %1412 = shalt.err (!%p1409_p5)
}
  0x2b   :  { %69 = dma.hbm_to_vmem [thread:$0]  %s1696_s5, 8192, %s64_s20, [#allocation11], %s1483_s10, %s1483_s10, %s1484_s11  }
  0x2c   :  { %1453 = dma.done.wait [#allocation5], 2560  }
  0x2d   :  { %1454 = vsyncadd [#allocation5], 4294964736 }
  0x2e   :  { %1455 = dma.done.wait [#allocation8], 10752  }
  0x2f   :  { %1456 = vsyncadd [#allocation8], 4294956544 }
  0x30   :  { %1457 = dma.done.wait [#allocation11], 8192  }
  0x31   :  { %1458 = vsyncadd [#allocation11], 4294959104  ;;  %v1558_v0 = vmov 0.0   ;;  %v1560_v1 = vmov 0.0   ;;  %v1562_v2 = vmov 0.0   ;;  %v1564_v3 = vmov 0.0  }
  0x32   :  { %s1566_s4 = smov 0  }
  0x33 LB: > { %v178_v4 = vld [vmem:[#allocation7 + $0x1e8] sm:$0xff]  ;;  %v177_v5 = vld [vmem:[#allocation7 + $0x1e0] sm:$0xff]  ;;  %v1487_v8 = vmov 0.0   ;;  %v180_v10 = vld [vmem:[#allocation7 + $0x1f8] sm:$0xff]  ;;  %s1230_s5 = sshll.u32 %s1479_s4, 1  ;;  %vm323_vm0 = vcmask 326656   ;;  %s1479_s4 = sphi %s1566_s4, %s89_s4   ;;  %v1475_v3 = vphi %v1564_v3, %v1701_v3   ;;  %v1471_v2 = vphi %v1562_v2, %v516_v2   ;;  %v1467_v1 = vphi %v1560_v1, %v1700_v1   ;;  %v1463_v0 = vphi %v1558_v0, %v943_v0  }
  0x34   : > { %v174_v6 = vld [vmem:[#allocation7 + $0x1c8] sm:$0xff]  ;;  %181 = vmatprep.subr.mxu0 %v178_v4  ;;  %v173_v7 = vld [vmem:[#allocation7 + $0x1c0] sm:$0xff]  ;;  %245 = vmatprep.mubr.f32.mxu0 %v1487_v8  ;;  %v179_v12 = vld [vmem:[#allocation7 + $0x1f0] sm:$0xff]  ;;  %s95_s27 = scalar_lea.vmem %s1691_s0, %s1230_s5  ;;  %s521_s28 = ssub.s32 15, %s1479_s4 }
  0x35   : > { %182 = vmatpush1.msra.mxu0 %v177_v5  ;;  %v170_v9 = vld [vmem:[#allocation7 + $0x1a8] sm:$0xff]  ;;  %316 = vmatprep.mubr.f32.mxu1 %v1487_v8  ;;  %v169_v11 = vld [vmem:[#allocation7 + $0x1a0] sm:$0xff]  ;;  %v176_v14 = vld [vmem:[#allocation7 + $0x1d8] sm:$0xff]  ;;  %s1600_s29 = sshll.u32 %s521_s28, 1  ;;  %s519_s15 = scalar_lea.vmem [#allocation2], %s1230_s5 }
  0x36   : > { %183 = vmatprep.subr.mxu0 %v174_v6  ;;  %252 = vmatprep.subr.mxu1 %v180_v10  ;;  %v166_v13 = vld [vmem:[#allocation7 + $0x188] sm:$0xff]  ;;  %v175_v15 = vld [vmem:[#allocation7 + $0x1d0] sm:$0xff]  ;;  %v165_v16 = vld [vmem:[#allocation7 + $0x180] sm:$0xff]  ;;  %s523_s10 = scalar_lea.vmem %s1691_s0, %s1600_s29  ;;  %s946_s16 = scalar_lea.vmem [#allocation3], %s1600_s29 }
  0x37   : > { %184 = vmatpush1.msra.mxu0 %v173_v7  ;;  %253 = vmatpush1.msra.mxu1 %v179_v12  ;;  %v172_v17 = vld [vmem:[#allocation7 + $0x1b8] sm:$0xff]  ;;  %v162_v18 = vld [vmem:[#allocation7 + $0x168] sm:$0xff]  ;;  %v171_v19 = vld [vmem:[#allocation7 + $0x1b0] sm:$0xff]  ;;  %s89_s4 = sadd.s32 1, %s1479_s4  }
  0x38   : > { %185 = vmatprep.subr.mxu0 %v170_v9  ;;  %254 = vmatprep.subr.mxu1 %v176_v14  ;;  %v168_v20 = vld [vmem:[#allocation7 + $0x198] sm:$0xff]  ;;  %v161_v21 = vld [vmem:[#allocation7 + $0x160] sm:$0xff]  ;;  %v167_v22 = vld [vmem:[#allocation7 + $0x190] sm:$0xff]  ;;  %p86_p6 = scmp.ge.s32.totalorder %s89_s4, 16  }
  0x39   : > { %186 = vmatpush1.msra.mxu0 %v169_v11  ;;  %255 = vmatpush1.msra.mxu1 %v175_v15  ;;  %v158_v23 = vld [vmem:[#allocation7 + $0x148] sm:$0xff]  ;;  %v164_v24 = vld [vmem:[#allocation7 + $0x178] sm:$0xff]  ;;  %v157_v25 = vld [vmem:[#allocation7 + $0x140] sm:$0xff]  ;;  %s1488_s14 = smov (%p86_p6), [#allocation12]  }
  0x3a   : > { %187 = vmatprep.subr.mxu0 %v166_v13  ;;  %256 = vmatprep.subr.mxu1 %v172_v17  ;;  %v163_v26 = vld [vmem:[#allocation7 + $0x170] sm:$0xff]  ;;  %v154_v27 = vld [vmem:[#allocation7 + $0x128] sm:$0xff]  ;;  %v160_v28 = vld [vmem:[#allocation7 + $0x158] sm:$0xff] }
  0x3b   : > { %188 = vmatpush1.msra.mxu0 %v165_v16  ;;  %257 = vmatpush1.msra.mxu1 %v171_v19  ;;  %v153_v29 = vld [vmem:[#allocation7 + $0x120] sm:$0xff]  ;;  %v159_v30 = vld [vmem:[#allocation7 + $0x150] sm:$0xff]  ;;  %v150_v31 = vld [vmem:[#allocation7 + $0x108] sm:$0xff] }
  0x3c   : > { %189 = vmatprep.subr.mxu0 %v162_v18  ;;  %258 = vmatprep.subr.mxu1 %v168_v20  ;;  %v156_v32 = vld [vmem:[#allocation7 + $0x138] sm:$0xff]  ;;  %v149_v33 = vld [vmem:[#allocation7 + $0x100] sm:$0xff]  ;;  %v155_v34 = vld [vmem:[#allocation7 + $0x130] sm:$0xff] }
  0x3d   : > { %190 = vmatpush1.msra.mxu0 %v161_v21  ;;  %259 = vmatpush1.msra.mxu1 %v167_v22  ;;  %v146_v35 = vld [vmem:[#allocation7 + $0xe8] sm:$0xff]  ;;  %v152_v36 = vld [vmem:[#allocation7 + $0x118] sm:$0xff]  ;;  %v145_v37 = vld [vmem:[#allocation7 + $0xe0] sm:$0xff] }
  0x3e   : > { %191 = vmatprep.subr.mxu0 %v158_v23  ;;  %260 = vmatprep.subr.mxu1 %v164_v24  ;;  %v151_v38 = vld [vmem:[#allocation7 + $0x110] sm:$0xff]  ;;  %v142_v39 = vld [vmem:[#allocation7 + $0xc8] sm:$0xff]  ;;  %v148_v40 = vld [vmem:[#allocation7 + $0xf8] sm:$0xff] }
  0x3f   : > { %192 = vmatpush1.msra.mxu0 %v157_v25  ;;  %261 = vmatpush1.msra.mxu1 %v163_v26  ;;  %v141_v41 = vld [vmem:[#allocation7 + $0xc0] sm:$0xff]  ;;  %v147_v42 = vld [vmem:[#allocation7 + $0xf0] sm:$0xff]  ;;  %v138_v43 = vld [vmem:[#allocation7 + $0xa8] sm:$0xff] }
  0x40   : > { %193 = vmatprep.subr.mxu0 %v154_v27  ;;  %262 = vmatprep.subr.mxu1 %v160_v28  ;;  %v144_v44 = vld [vmem:[#allocation7 + $0xd8] sm:$0xff]  ;;  %v137_v45 = vld [vmem:[#allocation7 + $0xa0] sm:$0xff]  ;;  %v143_v46 = vld [vmem:[#allocation7 + $0xd0] sm:$0xff] }
  0x41   : > { %194 = vmatpush1.msra.mxu0 %v153_v29  ;;  %263 = vmatpush1.msra.mxu1 %v159_v30  ;;  %v134_v47 = vld [vmem:[#allocation7 + $0x88] sm:$0xff]  ;;  %v140_v48 = vld [vmem:[#allocation7 + $0xb8] sm:$0xff]  ;;  %v133_v49 = vld [vmem:[#allocation7 + $0x80] sm:$0xff] }
  0x42   : > { %195 = vmatprep.subr.mxu0 %v150_v31  ;;  %264 = vmatprep.subr.mxu1 %v156_v32  ;;  %v139_v50 = vld [vmem:[#allocation7 + $0xb0] sm:$0xff]  ;;  %v130_v51 = vld [vmem:[#allocation7 + $0x68] sm:$0xff]  ;;  %v136_v52 = vld [vmem:[#allocation7 + $0x98] sm:$0xff] }
  0x43   : > { %196 = vmatpush1.msra.mxu0 %v149_v33  ;;  %265 = vmatpush1.msra.mxu1 %v155_v34  ;;  %v129_v53 = vld [vmem:[#allocation7 + $0x60] sm:$0xff]  ;;  %v135_v54 = vld [vmem:[#allocation7 + $0x90] sm:$0xff]  ;;  %v126_v55 = vld [vmem:[#allocation7 + $0x48] sm:$0xff] }
  0x44   : > { %197 = vmatprep.subr.mxu0 %v146_v35  ;;  %266 = vmatprep.subr.mxu1 %v152_v36  ;;  %v132_v56 = vld [vmem:[#allocation7 + $0x78] sm:$0xff]  ;;  %v125_v57 = vld [vmem:[#allocation7 + $0x40] sm:$0xff]  ;;  %v131_v58 = vld [vmem:[#allocation7 + $0x70] sm:$0xff] }
  0x45   : > { %198 = vmatpush1.msra.mxu0 %v145_v37  ;;  %267 = vmatpush1.msra.mxu1 %v151_v38  ;;  %v122_v59 = vld [vmem:[#allocation7 + $0x28] sm:$0xff]  ;;  %v128_v60 = vld [vmem:[#allocation7 + $0x58] sm:$0xff]  ;;  %v121_v61 = vld [vmem:[#allocation7 + $0x20] sm:$0xff] }
  0x46   : > { %199 = vmatprep.subr.mxu0 %v142_v39  ;;  %268 = vmatprep.subr.mxu1 %v148_v40  ;;  %v127_v62 = vld [vmem:[#allocation7 + $0x50] sm:$0xff]  ;;  %v118_v63 = vld [vmem:[#allocation7 + $0x8] sm:$0xff]  ;;  %v124_v4 = vld [vmem:[#allocation7 + $0x38] sm:$0xff] }
  0x47   : > { %200 = vmatpush1.msra.mxu0 %v141_v41  ;;  %269 = vmatpush1.msra.mxu1 %v147_v42  ;;  %v117_v5 = vld [vmem:[#allocation7] sm:$0xff]  ;;  %v123_v6 = vld [vmem:[#allocation7 + $0x30] sm:$0xff]  ;;  %v114_v7 = vld [vmem:[#allocation4 + $0x88] sm:$0xff] }
  0x48   : > { %201 = vmatprep.subr.mxu0 %v138_v43  ;;  %270 = vmatprep.subr.mxu1 %v144_v44  ;;  %v113_v9 = vld [vmem:[#allocation4 + $0x80] sm:$0xff]  ;;  %v120_v10 = vld [vmem:[#allocation7 + $0x18] sm:$0xff]  ;;  %v110_v11 = vld [vmem:[#allocation4 + $0x68] sm:$0xff] }
  0x49   : > { %202 = vmatpush1.msra.mxu0 %v137_v45  ;;  %271 = vmatpush1.msra.mxu1 %v143_v46  ;;  %v119_v12 = vld [vmem:[#allocation7 + $0x10] sm:$0xff]  ;;  %v109_v13 = vld [vmem:[#allocation4 + $0x60] sm:$0xff]  ;;  %v116_v14 = vld [vmem:[#allocation4 + $0x98] sm:$0xff] }
  0x4a   : > { %203 = vmatprep.subr.mxu0 %v134_v47  ;;  %272 = vmatprep.subr.mxu1 %v140_v48  ;;  %v106_v15 = vld [vmem:[#allocation4 + $0x48] sm:$0xff]  ;;  %v105_v16 = vld [vmem:[#allocation4 + $0x40] sm:$0xff]  ;;  %v115_v17 = vld [vmem:[#allocation4 + $0x90] sm:$0xff] }
  0x4b   : > { %204 = vmatpush1.msra.mxu0 %v133_v49  ;;  %273 = vmatpush1.msra.mxu1 %v139_v50  ;;  %v102_v18 = vld [vmem:[#allocation4 + $0x28] sm:$0xff]  ;;  %v101_v19 = vld [vmem:[#allocation4 + $0x20] sm:$0xff]  ;;  %v112_v20 = vld [vmem:[#allocation4 + $0x78] sm:$0xff] }
  0x4c   : > { %205 = vmatprep.subr.mxu0 %v130_v51  ;;  %274 = vmatprep.subr.mxu1 %v136_v52  ;;  %v98_v21 = vld [vmem:[#allocation4 + $0x8] sm:$0xff]  ;;  %v111_v22 = vld [vmem:[#allocation4 + $0x70] sm:$0xff]  ;;  %v97_v23 = vld [vmem:[#allocation4] sm:$0xff] }
  0x4d   : > { %206 = vmatpush1.msra.mxu0 %v129_v53  ;;  %275 = vmatpush1.msra.mxu1 %v135_v54  ;;  %v108_v24 = vld [vmem:[#allocation4 + $0x58] sm:$0xff]  ;;  %v96_v25 = vld [vmem:[%s95_s27] sm:$0x3]  ;;  %v107_v27 = vld [vmem:[#allocation4 + $0x50] sm:$0xff] }
  0x4e   : > { %207 = vmatprep.subr.mxu0 %v126_v55  ;;  %276 = vmatprep.subr.mxu1 %v132_v56  ;;  %v605_v26 = vld [vmem:[#allocation10 + $0x1e0] sm:$0xff]  ;;  %v602_v28 = vld [vmem:[#allocation10 + $0x1c8] sm:$0xff]  ;;  %v104_v29 = vld [vmem:[#allocation4 + $0x38] sm:$0xff] }
  0x4f   : > { %208 = vmatpush1.msra.mxu0 %v125_v57  ;;  %277 = vmatpush1.msra.mxu1 %v131_v58  ;;  %v601_v30 = vld [vmem:[#allocation10 + $0x1c0] sm:$0xff]  ;;  %v103_v31 = vld [vmem:[#allocation4 + $0x30] sm:$0xff]  ;;  %v598_v32 = vld [vmem:[#allocation10 + $0x1a8] sm:$0xff] }
  0x50   : > { %209 = vmatprep.subr.mxu0 %v122_v59  ;;  %278 = vmatprep.subr.mxu1 %v128_v60  ;;  %v100_v33 = vld [vmem:[#allocation4 + $0x18] sm:$0xff]  ;;  %v597_v34 = vld [vmem:[#allocation10 + $0x1a0] sm:$0xff]  ;;  %v99_v35 = vld [vmem:[#allocation4 + $0x10] sm:$0xff] }
  0x51   : > { %210 = vmatpush1.msra.mxu0 %v121_v61  ;;  %279 = vmatpush1.msra.mxu1 %v127_v62  ;;  %v594_v36 = vld [vmem:[#allocation10 + $0x188] sm:$0xff]  ;;  %v593_v37 = vld [vmem:[#allocation10 + $0x180] sm:$0xff]  ;;  %v608_v38 = vld [vmem:[#allocation10 + $0x1f8] sm:$0xff] }
  0x52   : > { %211 = vmatprep.subr.mxu0 %v118_v63  ;;  %280 = vmatprep.subr.mxu1 %v124_v4  ;;  %v590_v39 = vld [vmem:[#allocation10 + $0x168] sm:$0xff]  ;;  %v607_v40 = vld [vmem:[#allocation10 + $0x1f0] sm:$0xff]  ;;  %v589_v41 = vld [vmem:[#allocation10 + $0x160] sm:$0xff] }
  0x53   : > { %212 = vmatpush1.msra.mxu0 %v117_v5  ;;  %281 = vmatpush1.msra.mxu1 %v123_v6  ;;  %v604_v42 = vld [vmem:[#allocation10 + $0x1d8] sm:$0xff]  ;;  %v586_v43 = vld [vmem:[#allocation10 + $0x148] sm:$0xff]  ;;  %v603_v44 = vld [vmem:[#allocation10 + $0x1d0] sm:$0xff] }
  0x54   : > { %246 = vmatmul.mubr.f32.vlgmr.msra.gmra.mxu0 %v1475_v3  ;;  %349 = vmatprep.subr.mxu0 %v114_v7  ;;  %v585_v45 = vld [vmem:[#allocation10 + $0x140] sm:$0xff]  ;;  %v600_v46 = vld [vmem:[#allocation10 + $0x1b8] sm:$0xff]  ;;  %v582_v47 = vld [vmem:[#allocation10 + $0x128] sm:$0xff] }
  0x55   : > { %350 = vmatpush1.msra.mxu0 %v113_v9  ;;  %282 = vmatprep.subr.mxu1 %v120_v10  ;;  %v599_v48 = vld [vmem:[#allocation10 + $0x1b0] sm:$0xff]  ;;  %v581_v49 = vld [vmem:[#allocation10 + $0x120] sm:$0xff]  ;;  %v596_v50 = vld [vmem:[#allocation10 + $0x198] sm:$0xff] }
  0x56   : > { %351 = vmatprep.subr.mxu0 %v110_v11  ;;  %283 = vmatpush1.msra.mxu1 %v119_v12  ;;  %v578_v51 = vld [vmem:[#allocation10 + $0x108] sm:$0xff]  ;;  %v595_v52 = vld [vmem:[#allocation10 + $0x190] sm:$0xff]  ;;  %v577_v53 = vld [vmem:[#allocation10 + $0x100] sm:$0xff] }
  0x57   : > { %352 = vmatpush1.msra.mxu0 %v109_v13  ;;  %420 = vmatprep.subr.mxu1 %v116_v14  ;;  %v592_v54 = vld [vmem:[#allocation10 + $0x178] sm:$0xff]  ;;  %v574_v55 = vld [vmem:[#allocation10 + $0xe8] sm:$0xff]  ;;  %v591_v56 = vld [vmem:[#allocation10 + $0x170] sm:$0xff] }
  0x58   : > { %353 = vmatprep.subr.mxu0 %v106_v15  ;;  %317 = vmatmul.mubr.f32.vlgmr.msra.gmra.mxu1 %v1475_v3  ;;  %v606_v3 = vld [vmem:[#allocation10 + $0x1e8] sm:$0xff]  ;;  %v573_v57 = vld [vmem:[#allocation10 + $0xe0] sm:$0xff]  ;;  %v588_v58 = vld [vmem:[#allocation10 + $0x158] sm:$0xff] }
  0x59   : > { %354 = vmatpush1.msra.mxu0 %v105_v16  ;;  %421 = vmatpush1.msra.mxu1 %v115_v17  ;;  %v570_v59 = vld [vmem:[#allocation10 + $0xc8] sm:$0xff]  ;;  %v587_v60 = vld [vmem:[#allocation10 + $0x150] sm:$0xff]  ;;  %v569_v61 = vld [vmem:[#allocation10 + $0xc0] sm:$0xff] }
  0x5a   : > { %355 = vmatprep.subr.mxu0 %v102_v18  ;;  %391 = vmatprep.mubr.f32.mxu0 %v1487_v8  ;;  %v584_v62 = vld [vmem:[#allocation10 + $0x138] sm:$0xff]  ;;  %v566_v63 = vld [vmem:[#allocation10 + $0xa8] sm:$0xff]  ;;  %v583_v4 = vld [vmem:[#allocation10 + $0x130] sm:$0xff] }
  0x5b   : > { %356 = vmatpush1.msra.mxu0 %v101_v19  ;;  %422 = vmatprep.subr.mxu1 %v112_v20  ;;  %v565_v5 = vld [vmem:[#allocation10 + $0xa0] sm:$0xff]  ;;  %v580_v6 = vld [vmem:[#allocation10 + $0x118] sm:$0xff]  ;;  %v562_v7 = vld [vmem:[#allocation10 + $0x88] sm:$0xff] }
  0x5c   : > { %357 = vmatprep.subr.mxu0 %v98_v21  ;;  %423 = vmatpush1.msra.mxu1 %v111_v22  ;;  %v579_v9 = vld [vmem:[#allocation10 + $0x110] sm:$0xff]  ;;  %v561_v10 = vld [vmem:[#allocation10 + $0x80] sm:$0xff]  ;;  %v576_v11 = vld [vmem:[#allocation10 + $0xf8] sm:$0xff] }
  0x5d   : > { %358 = vmatpush1.msra.mxu0 %v97_v23  ;;  %424 = vmatprep.subr.mxu1 %v108_v24  ;;  %v558_v12 = vld [vmem:[#allocation10 + $0x68] sm:$0xff]  ;;  %v575_v13 = vld [vmem:[#allocation10 + $0xf0] sm:$0xff]  ;;  %v557_v14 = vld [vmem:[#allocation10 + $0x60] sm:$0xff] }
  0x5e   : > { %1231 = vmatmul.mubr.msk.f32.vlgmr.msra.gmra.mxu0 %vm323_vm0, %v96_v25  ;;  %609 = vmatprep.subr.mxu0 %v606_v3  ;;  %v572_v15 = vld [vmem:[#allocation10 + $0xd8] sm:$0xff]  ;;  %v554_v16 = vld [vmem:[#allocation10 + $0x48] sm:$0xff]  ;;  %v571_v17 = vld [vmem:[#allocation10 + $0xd0] sm:$0xff] }
  0x5f   : > { %610 = vmatpush1.msra.mxu0 %v605_v26  ;;  %425 = vmatpush1.msra.mxu1 %v107_v27  ;;  %v553_v18 = vld [vmem:[#allocation10 + $0x40] sm:$0xff]  ;;  %v568_v19 = vld [vmem:[#allocation10 + $0xb8] sm:$0xff]  ;;  %v550_v20 = vld [vmem:[#allocation10 + $0x28] sm:$0xff] }
  0x60   : > { %611 = vmatprep.subr.mxu0 %v602_v28  ;;  %426 = vmatprep.subr.mxu1 %v104_v29  ;;  %v567_v21 = vld [vmem:[#allocation10 + $0xb0] sm:$0xff]  ;;  %v549_v22 = vld [vmem:[#allocation10 + $0x20] sm:$0xff]  ;;  %v564_v23 = vld [vmem:[#allocation10 + $0x98] sm:$0xff] }
  0x61   : > { %612 = vmatpush1.msra.mxu0 %v601_v30  ;;  %427 = vmatpush1.msra.mxu1 %v103_v31  ;;  %v546_v24 = vld [vmem:[#allocation10 + $0x8] sm:$0xff]  ;;  %v545_v3 = vld [vmem:[#allocation10] sm:$0xff]  ;;  %v560_v26 = vld [vmem:[#allocation10 + $0x78] sm:$0xff] }
  0x62   : > { %613 = vmatprep.subr.mxu0 %v598_v32  ;;  %428 = vmatprep.subr.mxu1 %v100_v33  ;;  %v559_v27 = vld [vmem:[#allocation10 + $0x70] sm:$0xff]  ;;  %v542_v28 = vld [vmem:[#allocation9 + $0x88] sm:$0xff]  ;;  %v556_v29 = vld [vmem:[#allocation10 + $0x58] sm:$0xff] }
  0x63   : > { %614 = vmatpush1.msra.mxu0 %v597_v34  ;;  %429 = vmatpush1.msra.mxu1 %v99_v35  ;;  %v541_v30 = vld [vmem:[#allocation9 + $0x80] sm:$0xff]  ;;  %v555_v31 = vld [vmem:[#allocation10 + $0x50] sm:$0xff]  ;;  %v538_v32 = vld [vmem:[#allocation9 + $0x68] sm:$0xff] }
  0x64   : > { %462 = vmatprep.mubr.f32.mxu1 %v1487_v8  ;;  %615 = vmatprep.subr.mxu0 %v594_v36  ;;  %v552_v33 = vld [vmem:[#allocation10 + $0x38] sm:$0xff]  ;;  %v537_v34 = vld [vmem:[#allocation9 + $0x60] sm:$0xff]  ;;  %v551_v35 = vld [vmem:[#allocation10 + $0x30] sm:$0xff] }
  0x65   : > { %1232 = vmatmul.mubr.msk.f32.vlgmr.msra.gmra.mxu1 %vm323_vm0, %v96_v25  ;;  %616 = vmatpush1.msra.mxu0 %v593_v37  ;;  %v563_v25 = vld [vmem:[#allocation10 + $0x90] sm:$0xff]  ;;  %v534_v36 = vld [vmem:[#allocation9 + $0x48] sm:$0xff]  ;;  %v548_v37 = vld [vmem:[#allocation10 + $0x18] sm:$0xff] }
  0x66   : > { %680 = vmatprep.subr.mxu1 %v608_v38  ;;  %617 = vmatprep.subr.mxu0 %v590_v39  ;;  %v533_v38 = vld [vmem:[#allocation9 + $0x40] sm:$0xff]  ;;  %v547_v39 = vld [vmem:[#allocation10 + $0x10] sm:$0xff] }
  0x67   : > { %681 = vmatpush1.msra.mxu1 %v607_v40  ;;  %618 = vmatpush1.msra.mxu0 %v589_v41  ;;  %v530_v40 = vld [vmem:[#allocation9 + $0x28] sm:$0xff]  ;;  %v529_v41 = vld [vmem:[#allocation9 + $0x20] sm:$0xff] }
  0x68   : > { %682 = vmatprep.subr.mxu1 %v604_v42  ;;  %619 = vmatprep.subr.mxu0 %v586_v43  ;;  %v544_v42 = vld [vmem:[#allocation9 + $0x98] sm:$0xff]  ;;  %v526_v43 = vld [vmem:[#allocation9 + $0x8] sm:$0xff] }
  0x69   : > { %683 = vmatpush1.msra.mxu1 %v603_v44  ;;  %620 = vmatpush1.msra.mxu0 %v585_v45  ;;  %v543_v44 = vld [vmem:[#allocation9 + $0x90] sm:$0xff]  ;;  %v525_v45 = vld [vmem:[#allocation9] sm:$0xff] }
  0x6a   : > { %684 = vmatprep.subr.mxu1 %v600_v46  ;;  %621 = vmatprep.subr.mxu0 %v582_v47  ;;  %v540_v46 = vld [vmem:[#allocation9 + $0x78] sm:$0xff]  ;;  %v524_v47 = vld [vmem:[%s523_s10] sm:$0x3] }
  0x6b   : > { %685 = vmatpush1.msra.mxu1 %v599_v48  ;;  %622 = vmatpush1.msra.mxu0 %v581_v49  ;;  %v539_v48 = vld [vmem:[#allocation9 + $0x70] sm:$0xff]  ;;  %v536_v49 = vld [vmem:[#allocation9 + $0x58] sm:$0xff] }
  0x6c   : > { %686 = vmatprep.subr.mxu1 %v596_v50  ;;  %623 = vmatprep.subr.mxu0 %v578_v51  ;;  %v535_v50 = vld [vmem:[#allocation9 + $0x50] sm:$0xff]  ;;  %v532_v51 = vld [vmem:[#allocation9 + $0x38] sm:$0xff] }
  0x6d   : > { %687 = vmatpush1.msra.mxu1 %v595_v52  ;;  %624 = vmatpush1.msra.mxu0 %v577_v53  ;;  %v531_v52 = vld [vmem:[#allocation9 + $0x30] sm:$0xff] }
  0x6e   : > { %688 = vmatprep.subr.mxu1 %v592_v54  ;;  %625 = vmatprep.subr.mxu0 %v574_v55  ;;  %v527_v53 = vld [vmem:[#allocation9 + $0x10] sm:$0xff]  ;;  %v471_v54 = vlaneseq }
  0x6f   : > { %689 = vmatpush1.msra.mxu1 %v591_v56  ;;  %626 = vmatpush1.msra.mxu0 %v573_v57 }
  0x70   : > { %690 = vmatprep.subr.mxu1 %v588_v58  ;;  %627 = vmatprep.subr.mxu0 %v570_v59  ;;  %v1612_v55 = vshrl.u32 %v471_v54, 7  ;;  %v469_v58 = vld [vmem:[%s1694_s3] sm:$0xf] }
  0x71   : > { %691 = vmatpush1.msra.mxu1 %v587_v60  ;;  %628 = vmatpush1.msra.mxu0 %v569_v61 }
  0x72   : > { %692 = vmatprep.subr.mxu1 %v584_v62  ;;  %629 = vmatprep.subr.mxu0 %v566_v63  ;;  %v473_v57 = vsub.s32 0, %v1612_v55 }
  0x73   : > { %693 = vmatpush1.msra.mxu1 %v583_v4  ;;  %630 = vmatpush1.msra.mxu0 %v565_v5 }
  0x74   : > { %694 = vmatprep.subr.mxu1 %v580_v6  ;;  %631 = vmatprep.subr.mxu0 %v562_v7  ;;  %v474_v60 = vrot.slane %v469_v58, %v473_v57 }
  0x75   : > { %695 = vmatpush1.msra.mxu1 %v579_v9  ;;  %632 = vmatpush1.msra.mxu0 %v561_v10  ;;  %v485_v10 = vsub.s32 3, %v1612_v55 }
  0x76   : > { %696 = vmatprep.subr.mxu1 %v576_v11  ;;  %633 = vmatprep.subr.mxu0 %v558_v12 }
  0x77   : > { %697 = vmatpush1.msra.mxu1 %v575_v13  ;;  %634 = vmatpush1.msra.mxu0 %v557_v14 }
  0x78   : > { %698 = vmatprep.subr.mxu1 %v572_v15  ;;  %635 = vmatprep.subr.mxu0 %v554_v16  ;;  %v486_v16 = vrot.slane %v469_v58, %v485_v10 }
  0x79   : > { %699 = vmatpush1.msra.mxu1 %v571_v17  ;;  %636 = vmatpush1.msra.mxu0 %v553_v18 }
  0x7a   : > { %700 = vmatprep.subr.mxu1 %v568_v19  ;;  %637 = vmatprep.subr.mxu0 %v550_v20 }
  0x7b   : > { %701 = vmatpush1.msra.mxu1 %v567_v21  ;;  %638 = vmatpush1.msra.mxu0 %v549_v22  ;;  %v481_v21 = vsub.s32 2, %v1612_v55 }
  0x7c   : > { %702 = vmatprep.subr.mxu1 %v564_v23  ;;  %639 = vmatprep.subr.mxu0 %v546_v24 }
  0x7d   : > { %703 = vmatpush1.msra.mxu1 %v563_v25  ;;  %640 = vmatpush1.msra.mxu0 %v545_v3  ;;  %v482_v24 = vrot.slane %v469_v58, %v481_v21 }
  0x7e   : > { %673 = vmatprep.mubr.f32.mxu0 %v1487_v8  ;;  %704 = vmatprep.subr.mxu1 %v560_v26 }
  0x7f   : > { %674 = vmatmul.mubr.f32.vlgmr.msra.gmra.mxu0 %v1467_v1  ;;  %705 = vmatpush1.msra.mxu1 %v559_v27 }
  0x80   : > { %776 = vmatprep.subr.mxu0 %v542_v28  ;;  %706 = vmatprep.subr.mxu1 %v556_v29 }
  0x81   : > { %777 = vmatpush1.msra.mxu0 %v541_v30  ;;  %707 = vmatpush1.msra.mxu1 %v555_v31 }
  0x82   : > { %778 = vmatprep.subr.mxu0 %v538_v32  ;;  %708 = vmatprep.subr.mxu1 %v552_v33 }
  0x83   : > { %779 = vmatpush1.msra.mxu0 %v537_v34  ;;  %709 = vmatpush1.msra.mxu1 %v551_v35 }
  0x84   : > { %780 = vmatprep.subr.mxu0 %v534_v36  ;;  %710 = vmatprep.subr.mxu1 %v548_v37 }
  0x85   : > { %781 = vmatpush1.msra.mxu0 %v533_v38  ;;  %711 = vmatpush1.msra.mxu1 %v547_v39  ;;  %v896_v38 = vld [vmem:[%s1697_s6] sm:$0xf] }
  0x86   : > { %782 = vmatprep.subr.mxu0 %v530_v40  ;;  %744 = vmatprep.mubr.f32.mxu1 %v1487_v8  ;;  %v901_v40 = vrot.slane %v896_v38, %v473_v57 }
  0x87   : > { %783 = vmatpush1.msra.mxu0 %v529_v41  ;;  %847 = vmatprep.subr.mxu1 %v544_v42 }
  0x88   : > { %745 = vmatmul.mubr.f32.vlgmr.msra.gmra.mxu1 %v1467_v1  ;;  %784 = vmatprep.subr.mxu0 %v526_v43  ;;  %v528_v1 = vld [vmem:[#allocation9 + $0x18] sm:$0xff] }
  0x89   : > { %848 = vmatpush1.msra.mxu1 %v543_v44  ;;  %785 = vmatpush1.msra.mxu0 %v525_v45 }
  0x8a   : > { %818 = vmatprep.mubr.f32.mxu0 %v1487_v8  ;;  %849 = vmatprep.subr.mxu1 %v540_v46 }
  0x8b   : > { %1234 = vmatmul.mubr.msk.f32.vlgmr.msra.gmra.mxu0 %vm323_vm0, %v524_v47  ;;  %850 = vmatpush1.msra.mxu1 %v539_v48 }
  0x8c   : > { %851 = vmatprep.subr.mxu1 %v536_v49  ;;  %889 = vmatprep.mubr.f32.mxu1 %v1487_v8  ;;  %v477_v8 = vsub.s32 1, %v1612_v55 }
  0x8d   : > { %852 = vmatpush1.msra.mxu1 %v535_v50 }
  0x8e   : > { %853 = vmatprep.subr.mxu1 %v532_v51  ;;  %v478_v4 = vrot.slane %v469_v58, %v477_v8  ;;  %v905_v44 = vrot.slane %v896_v38, %v477_v8 }
  0x8f   : > { %854 = vmatpush1.msra.mxu1 %v531_v52 }
  0x90   : > { %855 = vmatprep.subr.mxu1 %v528_v1 }
  0x91   : > { %856 = vmatpush1.msra.mxu1 %v527_v53  ;;  %v913_v53 = vrot.slane %v896_v38, %v485_v10 }
  0x92   : > { %1235 = vmatmul.mubr.msk.f32.vlgmr.msra.gmra.mxu1 %vm323_vm0, %v524_v47 }
 0x114   : > { %v247_v56 = vpop.f32.mrf.mxu0 }
 0x116   : > { %v249_v59 = vpop.f32.mrf.mxu0 }
 0x118   : > { %v318_v61 = vpop.f32.mrf.mxu1 }
 0x11a   : > { %v320_v9 = vpop.f32.mrf.mxu1 }
 0x11e   : > { %v393_v62 = vpop.f32.mrf.mxu0 }
 0x11f   : > { %v394_v63 = vadd.f32 %v393_v62, %v247_v56  ;;  %v909_v62 = vrot.slane %v896_v38, %v481_v21 }
 0x120   : > { %v395_v5 = vpop.f32.mrf.mxu0 }
 0x121   : > { %v491_v6 = vadd.f32 %v474_v60, %v394_v63  ;;  %v396_v7 = vadd.f32 %v395_v5, %v249_v59 }
 0x123   : > { %v495_v11 = vsub.f32 0.0, %v491_v6  ;;  %v492_v12 = vadd.f32 %v478_v4, %v396_v7 }
 0x125   : > { %v496_v13 = vmul.f32 1.442695, %v495_v11  ;;  %v501_v14 = vsub.f32 0.0, %v492_v12  ;;  %v464_v15 = vpop.f32.mrf.mxu1 }
 0x126   : > { %v465_v23 = vadd.f32 %v464_v15, %v318_v61 }
 0x127   : > { %1301 = vpow2.f32 %v496_v13  ;;  %v502_v17 = vmul.f32 1.442695, %v501_v14  ;;  %v466_v18 = vpop.f32.mrf.mxu1 }
 0x128   : > { %v467_v19 = vadd.f32 %v466_v18, %v320_v9  ;;  %v493_v26 = vadd.f32 %v482_v24, %v465_v23 }
 0x129   : > { %1303 = vpow2.f32 %v502_v17 }
 0x12a   : > { %v494_v20 = vadd.f32 %v486_v16, %v467_v19 }
 0x12c   : > { %v508_v22 = vsub.f32 0.0, %v494_v20 }
 0x12e   : > { %v509_v25 = vmul.f32 1.442695, %v508_v22 }
 0x130   : > { %1305 = vpow2.f32 %v509_v25 }
 0x134   : > { %v1302_v3 = vpop.eup %1301 }
 0x135   : > { %v498_v27 = vadd.f32 1.0, %v1302_v3 }
 0x136   : > { %v1304_v28 = vpop.eup %1303 }
 0x137   : > { %1307 = vrcp.f32 %v498_v27  ;;  %v504_v29 = vadd.f32 1.0, %v1304_v28 }
 0x138   : > { %1309 = vtanh.f32 %v493_v26 }
 0x139   : > { %1311 = vrcp.f32 %v504_v29 }
 0x13d   : > { %v1306_v30 = vpop.eup %1305 }
 0x13e   : > { %v511_v35 = vadd.f32 1.0, %v1306_v30 }
 0x13f   : > { %v675_v33 = vpop.f32.mrf.mxu0 }
 0x140   : > { %1313 = vrcp.f32 %v511_v35 }
 0x141   : > { %v677_v39 = vpop.f32.mrf.mxu0 }
 0x144   : > { %v1308_v31 = vpop.eup %1307 }
 0x145   : > { %v1310_v32 = vpop.eup %1309 }
 0x146   : > { %v1312_v34 = vpop.eup %1311  ;;  %v515_v37 = vmul.f32 %v1310_v32, %v1308_v31 }
 0x147   : > { %v514_v36 = vmul.f32 %v1471_v2, %v1312_v34 }
 0x148   : > { %v746_v41 = vpop.f32.mrf.mxu1 }
 0x149   : > { %v516_v2 = vadd.f32 %v515_v37, %v514_v36  }
 0x14a   : > { %v748_v48 = vpop.f32.mrf.mxu1 }
 0x14b   : > { %1315 = vtanh.f32 %v516_v2  ;;  %v820_v42 = vpop.f32.mrf.mxu0 }
 0x14c   : > { %v821_v43 = vadd.f32 %v820_v42, %v675_v33 }
 0x14d   : > { %v822_v45 = vpop.f32.mrf.mxu0  ;;  %v1314_v57 = vpop.eup %1313 }
 0x14e   : > { %v918_v46 = vadd.f32 %v901_v40, %v821_v43  ;;  %v823_v47 = vadd.f32 %v822_v45, %v677_v39 }
 0x150   : > { %v922_v49 = vsub.f32 0.0, %v918_v46  ;;  %v919_v50 = vadd.f32 %v905_v44, %v823_v47 }
 0x152   : > { %v923_v51 = vmul.f32 1.442695, %v922_v49  ;;  %v928_v52 = vsub.f32 0.0, %v919_v50  ;;  %v891_v1 = vpop.f32.mrf.mxu1 }
 0x153   : > { %v892_v61 = vadd.f32 %v891_v1, %v746_v41 }
 0x154   : > { %1317 = vpow2.f32 %v923_v51  ;;  %v929_v54 = vmul.f32 1.442695, %v928_v52  ;;  %v893_v55 = vpop.f32.mrf.mxu1 }
 0x155   : > { %v894_v56 = vadd.f32 %v893_v55, %v748_v48  ;;  %v920_v5 = vadd.f32 %v909_v62, %v892_v61 }
 0x156   : > { %1319 = vpow2.f32 %v929_v54 }
 0x157   : > { %v921_v58 = vadd.f32 %v913_v53, %v894_v56 }
 0x158   : > { %v1316_v59 = vpop.eup %1315 }
 0x159   : > { %v518_v8 = vmul.f32 %v1316_v59, %v1314_v57   ;;  %v935_v60 = vsub.f32 0.0, %v921_v58 }
 0x15b   : > { %520 = vst [vmem:[%s519_s15] sm:$0x3] %v518_v8  ;;  %v936_v63 = vmul.f32 1.442695, %v935_v60  ;;  %v1701_v3 = vmov %v518_v8  ;;  %s1192_s15 = sshll.u32 (%p86_p6), %s1488_s14, 4  ;;  %s1193_s15 = int_to_ptr.vmem [resolvable:$true] %s1192_s15 }
 0x15c   :  { %s1413_s19 = scalar_lea.vmem (%p86_p6), %s1193_s15, 64  ;;  %p1418_p8 = scmp.lt.s32.totalorder (%p86_p6), %s1193_s15, %s1193_s15 }
 0x15d   : > { %1321 = vpow2.f32 %v936_v63  ;;  %p1414_p7 = scmp.ne.s32.totalorder (%p86_p6), %s1193_s15, %s1413_s19  ;;  %p1419_p9 = scmp.lt.s32.totalorder (%p86_p6), %s1413_s19, %s1413_s19 }
 0x15f   :  { %p1420_p10 = por (%p86_p6), %p1419_p9, %p1418_p8 }
 0x161   : > { %v1318_v4 = vpop.eup %1317  ;;  %p1421_p11 = pnand (%p86_p6), %p1420_p10, %p1414_p7 }
 0x162   : > { %v925_v6 = vadd.f32 1.0, %v1318_v4  ;;  %v948_v21 = vld [vmem:[#allocation2] sm:$0x3] (%p86_p6)  ;;  %v949_v23 = vld [vmem:[#allocation2 + $0x2] sm:$0x3] (%p86_p6) }
 0x163   : > { %v1320_v7 = vpop.eup %1319  ;;  %v950_v3 = vld [vmem:[#allocation2 + $0x4] sm:$0x3] (%p86_p6)  ;;  %v951_v29 = vld [vmem:[#allocation2 + $0x6] sm:$0x3] (%p86_p6)  ;;  %v952_v31 = vld [vmem:[#allocation2 + $0x8] sm:$0x3] (%p86_p6) }
 0x164   : > { %1323 = vrcp.f32 %v925_v6  ;;  %v931_v9 = vadd.f32 1.0, %v1320_v7  ;;  %v954_v36 = vld [vmem:[#allocation2 + $0xc] sm:$0x3] (%p86_p6)  ;;  %v955_v38 = vld [vmem:[#allocation2 + $0xe] sm:$0x3] (%p86_p6) }
 0x165   : > { %1325 = vtanh.f32 %v920_v5  ;;  %v956_v41 = vld [vmem:[#allocation2 + $0x10] sm:$0x3] (%p86_p6)  ;;  %v957_v45 = vld [vmem:[#allocation2 + $0x12] sm:$0x3] (%p86_p6)  ;;  %v958_v47 = vld [vmem:[#allocation2 + $0x14] sm:$0x3] (%p86_p6) }
 0x166   : > { %1327 = vrcp.f32 %v931_v9  ;;  %v959_v50 = vld [vmem:[#allocation2 + $0x16] sm:$0x3] (%p86_p6)  ;;  %v960_v53 = vld [vmem:[#allocation2 + $0x18] sm:$0x3] (%p86_p6)  ;;  %v961_v55 = vld [vmem:[#allocation2 + $0x1a] sm:$0x3] (%p86_p6) }
 0x167   :  { %v962_v58 = vld [vmem:[#allocation2 + $0x1c] sm:$0x3] (%p86_p6)  ;;  %v963_v61 = vld [vmem:[#allocation2 + $0x1e] sm:$0x3] (%p86_p6) }
 0x16a   : > { %v1322_v10 = vpop.eup %1321 }
 0x16b   : > { %v938_v14 = vadd.f32 1.0, %v1322_v10 }
 0x16d   : > { %1329 = vrcp.f32 %v938_v14 }
 0x171   : > { %v1324_v11 = vpop.eup %1323 }
 0x172   : > { %v1326_v12 = vpop.eup %1325 }
 0x173   : > { %v1328_v13 = vpop.eup %1327  ;;  %v942_v16 = vmul.f32 %v1326_v12, %v1324_v11 }
 0x174   : > { %v941_v15 = vmul.f32 %v1463_v0, %v1328_v13 }
 0x176   : > { %v943_v0 = vadd.f32 %v942_v16, %v941_v15  }
 0x178   : > { %1331 = vtanh.f32 %v943_v0  ;;  %v953_v0 = vld [vmem:[#allocation2 + $0xa] sm:$0x3] (%p86_p6) }
 0x17a   : > { %v1330_v17 = vpop.eup %1329 }
 0x184   :  { %88 = sbr.rel (!%p86_p6) target bundleno = 51 (0x33), region = 83 }
 0x185   : > { %v1332_v18 = vpop.eup %1331 }
 0x186   : > { %v945_v19 = vmul.f32 %v1332_v18, %v1330_v17  }
 0x188   : > { %947 = vst [vmem:[%s946_s16] sm:$0x3] %v945_v19  ;;  %v1700_v1 = vmov %v945_v19  ;;  %v1174_v20 = vcombine.low (%p86_p6), %v518_v8, %v945_v19 }
 0x18a   :  { %1252 = vst.sshfl [vmem:[#allocation12] sm:$0x33 pattern:$0x76325410] %v1174_v20 }
 0x18f   :  { %v964_v22 = vld [vmem:[#allocation3] sm:$0x3]  ;;  %v965_v25 = vld [vmem:[#allocation3 + $0x2] sm:$0x3]  ;;  %v966_v26 = vld [vmem:[#allocation3 + $0x4] sm:$0x3] }
 0x190   :  { %v1012_v24 = vcombine.low %v948_v21, %v964_v22  ;;  %v1020_v27 = vcombine.low %v949_v23, %v965_v25  ;;  %v1028_v28 = vcombine.low %v950_v3, %v966_v26  ;;  %v967_v30 = vld [vmem:[#allocation3 + $0x6] sm:$0x3]  ;;  %v968_v33 = vld [vmem:[#allocation3 + $0x8] sm:$0x3]  ;;  %v969_v2 = vld [vmem:[#allocation3 + $0xa] sm:$0x3] }
 0x191   :  { %v1036_v32 = vcombine.low %v951_v29, %v967_v30  ;;  %v1044_v34 = vcombine.low %v952_v31, %v968_v33  ;;  %v1052_v35 = vcombine.low %v953_v0, %v969_v2  ;;  %v970_v37 = vld [vmem:[#allocation3 + $0xc] sm:$0x3]  ;;  %v971_v40 = vld [vmem:[#allocation3 + $0xe] sm:$0x3]  ;;  %v972_v42 = vld [vmem:[#allocation3 + $0x10] sm:$0x3] }
 0x192   :  { %1236 = vst.sshfl [vmem:[%s1698_s7] sm:$0x33 pattern:$0x76325410] %v1012_v24  ;;  %v1060_v39 = vcombine.low %v954_v36, %v970_v37  ;;  %v1068_v43 = vcombine.low %v955_v38, %v971_v40  ;;  %v1076_v44 = vcombine.low %v956_v41, %v972_v42  ;;  %v973_v46 = vld [vmem:[#allocation3 + $0x12] sm:$0x3] }
 0x193   :  { %1237 = vst.sshfl [vmem:[%s1698_s7 + $0x4] sm:$0x33 pattern:$0x76325410] %v1020_v27  ;;  %v1084_v48 = vcombine.low %v957_v45, %v973_v46  ;;  %v974_v49 = vld [vmem:[#allocation3 + $0x14] sm:$0x3] }
 0x194   :  { %1238 = vst.sshfl [vmem:[%s1698_s7 + $0x8] sm:$0x33 pattern:$0x76325410] %v1028_v28  ;;  %v975_v51 = vld [vmem:[#allocation3 + $0x16] sm:$0x3]  ;;  %v1092_v52 = vcombine.low %v958_v47, %v974_v49 }
 0x195   :  { %1239 = vst.sshfl [vmem:[%s1698_s7 + $0xc] sm:$0x33 pattern:$0x76325410] %v1036_v32  ;;  %v1100_v1 = vcombine.low %v959_v50, %v975_v51  ;;  %v976_v54 = vld [vmem:[#allocation3 + $0x18] sm:$0x3] }
 0x196   :  { %1240 = vst.sshfl [vmem:[%s1698_s7 + $0x10] sm:$0x33 pattern:$0x76325410] %v1044_v34  ;;  %v1108_v56 = vcombine.low %v960_v53, %v976_v54  ;;  %v977_v57 = vld [vmem:[#allocation3 + $0x1a] sm:$0x3] }
 0x197   :  { %1241 = vst.sshfl [vmem:[%s1698_s7 + $0x14] sm:$0x33 pattern:$0x76325410] %v1052_v35  ;;  %v978_v59 = vld [vmem:[#allocation3 + $0x1c] sm:$0x3]  ;;  %v1116_v8 = vcombine.low %v961_v55, %v977_v57 }
 0x198   :  { %1242 = vst.sshfl [vmem:[%s1698_s7 + $0x18] sm:$0x33 pattern:$0x76325410] %v1060_v39  ;;  %v1124_v60 = vcombine.low %v962_v58, %v978_v59  ;;  %v979_v62 = vld [vmem:[#allocation3 + $0x1e] sm:$0x3] }
 0x199   :  { %1243 = vst.sshfl [vmem:[%s1698_s7 + $0x1c] sm:$0x33 pattern:$0x76325410] %v1068_v43  ;;  %v1132_v63 = vcombine.low %v963_v61, %v979_v62 }
 0x19a   :  { %1244 = vst.sshfl [vmem:[%s1698_s7 + $0x20] sm:$0x33 pattern:$0x76325410] %v1076_v44 }
 0x19b   :  { %1245 = vst.sshfl [vmem:[%s1698_s7 + $0x24] sm:$0x33 pattern:$0x76325410] %v1084_v48 }
 0x19c   :  { %1246 = vst.sshfl [vmem:[%s1698_s7 + $0x28] sm:$0x33 pattern:$0x76325410] %v1092_v52 }
 0x19d   :  { %1247 = vst.sshfl [vmem:[%s1698_s7 + $0x2c] sm:$0x33 pattern:$0x76325410] %v1100_v1 }
 0x19e   :  { %1248 = vst.sshfl [vmem:[%s1698_s7 + $0x30] sm:$0x33 pattern:$0x76325410] %v1108_v56 }
 0x19f   :  { %1249 = vst.sshfl [vmem:[%s1698_s7 + $0x34] sm:$0x33 pattern:$0x76325410] %v1116_v8 }
 0x1a0   :  { %1250 = vst.sshfl [vmem:[%s1698_s7 + $0x38] sm:$0x33 pattern:$0x76325410] %v1124_v60 }
 0x1a1   :  { %1251 = vst.sshfl [vmem:[%s1698_s7 + $0x3c] sm:$0x33 pattern:$0x76325410] %v1132_v63 }
 0x1a2   :  { %1424 = shalt.err (!%p1421_p11)
}
 0x1a3   :  { %1195 = dma.vmem_to_hbm [thread:$0]  %s1193_s15, 64, %s1699_s8, [#allocation6]  }
 0x1a4   :  { %1459 = dma.done.wait [#allocation6], 64  }
 0x1a5   :  { %1460 = vsyncadd [#allocation6], 4294967232 }
 0x1a6   :  { %1201 = vsyncpa [#allocation5], 1 }
 0x1a7   :  { %1202 = vsyncpa [#allocation8], 1 }
 0x1a8   :  { %1203 = vsyncpa [#allocation11], 1 }
 0x1a9   :  { %1204 = vsyncpa [#allocation6], 1 }

// kernel: encoder_forward.7
= control target key start
LH: loop header
LB: loop body
LE: loop exit
PB: predicated region body
PF: predicated region fallthrough
CT: control target
= control target key end

     0   :  { %16 = vsyncpa [#allocation5], 0  ;;  %v2053_v0 = vmov 0.0   ;;  %v2055_v1 = vmov 0.0   ;;  %v2057_v2 = vmov 0.0   ;;  %v2059_v3 = vmov 0.0   ;;  %s4092_s0 = inlined_call_operand.vmem [shape: f32[8,2,256], index: 0, kind: input, shape index: {}]   ;;  %s4093_s1 = inlined_call_operand.vmem [shape: f32[256,512], index: 1, kind: input, shape index: {}]   ;;  %s4094_s2 = inlined_call_operand.vmem [shape: f32[256,512], index: 2, kind: input, shape index: {}]   ;;  %s4095_s3 = inlined_call_operand.vmem [shape: f32[128,512], index: 3, kind: input, shape index: {}]   ;;  %s4096_s4 = inlined_call_operand.vmem [shape: f32[1,512], index: 4, kind: input, shape index: {}]   ;;  %s4097_s5 = inlined_call_operand.vmem [shape: f32[256,512], index: 5, kind: input, shape index: {}]   ;;  %s4098_s6 = inlined_call_operand.vmem [shape: f32[256,512], index: 6, kind: input, shape index: {}]   ;;  %s4099_s7 = inlined_call_operand.vmem [shape: f32[128,512], index: 7, kind: input, shape index: {}]   ;;  %s4100_s8 = inlined_call_operand.vmem [shape: f32[1,512], index: 8, kind: input, shape index: {}]   ;;  %s4101_s9 = inlined_call_operand.vmem [shape: f32[4,2,256], index: 9, kind: output, shape index: {0}]   ;;  %s4102_s10 = inlined_call_operand.hbm [shape: f32[2,256], index: 10, kind: output, shape index: {1}]  }
   0x1   :  { %s2061_s13 = smov 0  }
   0x2 LB: > { %v244_v4 = vld [vmem:[%s4094_s2 + $0x1e8] sm:$0xff]  ;;  %v246_v5 = vld [vmem:[%s4094_s2 + $0x1f8] sm:$0xff]  ;;  %v243_v6 = vld [vmem:[%s4094_s2 + $0x1e0] sm:$0xff]  ;;  %s1855_s21 = sshll.u32 %s1994_s13, 3  ;;  %s879_s22 = ssub.s32 3, %s1994_s13  ;;  %s1994_s13 = sphi %s2061_s13, %s40_s13   ;;  %v1990_v3 = vphi %v2059_v3, %v4105_v3   ;;  %v1986_v2 = vphi %v2057_v2, %v4042_v2   ;;  %v1982_v1 = vphi %v2055_v1, %v4104_v1   ;;  %v1978_v0 = vphi %v2053_v0, %v1709_v0  }
   0x3   : > { %322 = vmatprep.subr.mxu0 %v244_v4  ;;  %393 = vmatprep.subr.mxu1 %v246_v5  ;;  %v245_v7 = vld [vmem:[%s4094_s2 + $0x1f0] sm:$0xff]  ;;  %v240_v8 = vld [vmem:[%s4094_s2 + $0x1c8] sm:$0xff]  ;;  %v242_v9 = vld [vmem:[%s4094_s2 + $0x1d8] sm:$0xff]  ;;  %s2424_s17 = scalar_lea.vmem %s4092_s0, %s1855_s21  ;;  %s1858_s15 = sshll.u32 %s879_s22, 3 }
   0x4   : > { %323 = vmatpush1.msra.mxu0 %v243_v6  ;;  %394 = vmatpush1.msra.mxu1 %v245_v7  ;;  %v239_v10 = vld [vmem:[%s4094_s2 + $0x1c0] sm:$0xff]  ;;  %v241_v11 = vld [vmem:[%s4094_s2 + $0x1d0] sm:$0xff]  ;;  %v236_v12 = vld [vmem:[%s4094_s2 + $0x1a8] sm:$0xff]  ;;  %s3398_s11 = scalar_lea.vmem %s4092_s0, %s1858_s15  ;;  %s1833_s29 = sshll.u32 %s1994_s13, 1 }
   0x5   : > { %324 = vmatprep.subr.mxu0 %v240_v8  ;;  %395 = vmatprep.subr.mxu1 %v242_v9  ;;  %v238_v13 = vld [vmem:[%s4094_s2 + $0x1b8] sm:$0xff]  ;;  %v235_v14 = vld [vmem:[%s4094_s2 + $0x1a0] sm:$0xff]  ;;  %v237_v15 = vld [vmem:[%s4094_s2 + $0x1b0] sm:$0xff]  ;;  %s877_s30 = scalar_lea.vmem [#allocation2], %s1833_s29  ;;  %s1841_s16 = sshll.u32 %s879_s22, 1 }
   0x6   : > { %325 = vmatpush1.msra.mxu0 %v239_v10  ;;  %396 = vmatpush1.msra.mxu1 %v241_v11  ;;  %v232_v16 = vld [vmem:[%s4094_s2 + $0x188] sm:$0xff]  ;;  %v234_v17 = vld [vmem:[%s4094_s2 + $0x198] sm:$0xff]  ;;  %v231_v18 = vld [vmem:[%s4094_s2 + $0x180] sm:$0xff]  ;;  %s1712_s18 = scalar_lea.vmem [#allocation3], %s1841_s16  ;;  %s40_s13 = sadd.s32 1, %s1994_s13  }
   0x7   : > { %326 = vmatprep.subr.mxu0 %v236_v12  ;;  %397 = vmatprep.subr.mxu1 %v238_v13  ;;  %v233_v19 = vld [vmem:[%s4094_s2 + $0x190] sm:$0xff]  ;;  %v228_v20 = vld [vmem:[%s4094_s2 + $0x168] sm:$0xff]  ;;  %v230_v21 = vld [vmem:[%s4094_s2 + $0x178] sm:$0xff]  ;;  %p37_p0 = scmp.ge.s32.totalorder %s40_s13, 4  }
   0x8   : > { %327 = vmatpush1.msra.mxu0 %v235_v14  ;;  %398 = vmatpush1.msra.mxu1 %v237_v15  ;;  %v227_v22 = vld [vmem:[%s4094_s2 + $0x160] sm:$0xff]  ;;  %v229_v23 = vld [vmem:[%s4094_s2 + $0x170] sm:$0xff]  ;;  %v224_v24 = vld [vmem:[%s4094_s2 + $0x148] sm:$0xff]  ;;  %s1997_s13 = smov (%p37_p0), [#allocation4]  }
   0x9   : > { %328 = vmatprep.subr.mxu0 %v232_v16  ;;  %399 = vmatprep.subr.mxu1 %v234_v17  ;;  %v226_v25 = vld [vmem:[%s4094_s2 + $0x158] sm:$0xff]  ;;  %v223_v26 = vld [vmem:[%s4094_s2 + $0x140] sm:$0xff]  ;;  %v225_v27 = vld [vmem:[%s4094_s2 + $0x150] sm:$0xff]  ;;  %s1790_s0 = sshll.u32 (%p37_p0), %s1997_s13, 4  ;;  %s1791_s0 = int_to_ptr.vmem [resolvable:$true] %s1790_s0 }
   0xa   : > { %329 = vmatpush1.msra.mxu0 %v231_v18  ;;  %400 = vmatpush1.msra.mxu1 %v233_v19  ;;  %v220_v28 = vld [vmem:[%s4094_s2 + $0x128] sm:$0xff]  ;;  %v222_v29 = vld [vmem:[%s4094_s2 + $0x138] sm:$0xff]  ;;  %v219_v30 = vld [vmem:[%s4094_s2 + $0x120] sm:$0xff]  ;;  %p1939_p2 = scmp.lt.s32.totalorder (%p37_p0), %s1791_s0, %s1791_s0 }
   0xb   : > { %330 = vmatprep.subr.mxu0 %v228_v20  ;;  %401 = vmatprep.subr.mxu1 %v230_v21  ;;  %v221_v31 = vld [vmem:[%s4094_s2 + $0x130] sm:$0xff]  ;;  %v216_v32 = vld [vmem:[%s4094_s2 + $0x108] sm:$0xff]  ;;  %v218_v33 = vld [vmem:[%s4094_s2 + $0x118] sm:$0xff] }
   0xc   : > { %331 = vmatpush1.msra.mxu0 %v227_v22  ;;  %402 = vmatpush1.msra.mxu1 %v229_v23  ;;  %v215_v34 = vld [vmem:[%s4094_s2 + $0x100] sm:$0xff]  ;;  %v217_v35 = vld [vmem:[%s4094_s2 + $0x110] sm:$0xff]  ;;  %v212_v36 = vld [vmem:[%s4094_s2 + $0xe8] sm:$0xff] }
   0xd   : > { %332 = vmatprep.subr.mxu0 %v224_v24  ;;  %403 = vmatprep.subr.mxu1 %v226_v25  ;;  %v214_v37 = vld [vmem:[%s4094_s2 + $0xf8] sm:$0xff]  ;;  %v211_v38 = vld [vmem:[%s4094_s2 + $0xe0] sm:$0xff]  ;;  %v213_v39 = vld [vmem:[%s4094_s2 + $0xf0] sm:$0xff] }
   0xe   : > { %333 = vmatpush1.msra.mxu0 %v223_v26  ;;  %404 = vmatpush1.msra.mxu1 %v225_v27  ;;  %v208_v40 = vld [vmem:[%s4094_s2 + $0xc8] sm:$0xff]  ;;  %v210_v41 = vld [vmem:[%s4094_s2 + $0xd8] sm:$0xff]  ;;  %v207_v42 = vld [vmem:[%s4094_s2 + $0xc0] sm:$0xff] }
   0xf   : > { %334 = vmatprep.subr.mxu0 %v220_v28  ;;  %405 = vmatprep.subr.mxu1 %v222_v29  ;;  %v209_v43 = vld [vmem:[%s4094_s2 + $0xd0] sm:$0xff]  ;;  %v204_v44 = vld [vmem:[%s4094_s2 + $0xa8] sm:$0xff]  ;;  %v206_v45 = vld [vmem:[%s4094_s2 + $0xb8] sm:$0xff] }
  0x10   : > { %335 = vmatpush1.msra.mxu0 %v219_v30  ;;  %406 = vmatpush1.msra.mxu1 %v221_v31  ;;  %v203_v46 = vld [vmem:[%s4094_s2 + $0xa0] sm:$0xff]  ;;  %v205_v47 = vld [vmem:[%s4094_s2 + $0xb0] sm:$0xff]  ;;  %v200_v48 = vld [vmem:[%s4094_s2 + $0x88] sm:$0xff] }
  0x11   : > { %336 = vmatprep.subr.mxu0 %v216_v32  ;;  %407 = vmatprep.subr.mxu1 %v218_v33  ;;  %v202_v49 = vld [vmem:[%s4094_s2 + $0x98] sm:$0xff]  ;;  %v199_v50 = vld [vmem:[%s4094_s2 + $0x80] sm:$0xff]  ;;  %v201_v51 = vld [vmem:[%s4094_s2 + $0x90] sm:$0xff] }
  0x12   : > { %337 = vmatpush1.msra.mxu0 %v215_v34  ;;  %408 = vmatpush1.msra.mxu1 %v217_v35  ;;  %v196_v52 = vld [vmem:[%s4094_s2 + $0x68] sm:$0xff]  ;;  %v198_v53 = vld [vmem:[%s4094_s2 + $0x78] sm:$0xff]  ;;  %v195_v54 = vld [vmem:[%s4094_s2 + $0x60] sm:$0xff] }
  0x13   : > { %338 = vmatprep.subr.mxu0 %v212_v36  ;;  %409 = vmatprep.subr.mxu1 %v214_v37  ;;  %v197_v55 = vld [vmem:[%s4094_s2 + $0x70] sm:$0xff]  ;;  %v192_v56 = vld [vmem:[%s4094_s2 + $0x48] sm:$0xff]  ;;  %v194_v57 = vld [vmem:[%s4094_s2 + $0x58] sm:$0xff] }
  0x14   : > { %339 = vmatpush1.msra.mxu0 %v211_v38  ;;  %410 = vmatpush1.msra.mxu1 %v213_v39  ;;  %v191_v58 = vld [vmem:[%s4094_s2 + $0x40] sm:$0xff]  ;;  %v193_v59 = vld [vmem:[%s4094_s2 + $0x50] sm:$0xff]  ;;  %v188_v60 = vld [vmem:[%s4094_s2 + $0x28] sm:$0xff] }
  0x15   : > { %340 = vmatprep.subr.mxu0 %v208_v40  ;;  %411 = vmatprep.subr.mxu1 %v210_v41  ;;  %v190_v61 = vld [vmem:[%s4094_s2 + $0x38] sm:$0xff]  ;;  %v187_v62 = vld [vmem:[%s4094_s2 + $0x20] sm:$0xff]  ;;  %v189_v63 = vld [vmem:[%s4094_s2 + $0x30] sm:$0xff] }
  0x16   : > { %341 = vmatpush1.msra.mxu0 %v207_v42  ;;  %412 = vmatpush1.msra.mxu1 %v209_v43  ;;  %v184_v4 = vld [vmem:[%s4094_s2 + $0x8] sm:$0xff]  ;;  %v186_v5 = vld [vmem:[%s4094_s2 + $0x18] sm:$0xff]  ;;  %v183_v6 = vld [vmem:[%s4094_s2] sm:$0xff] }
  0x17   : > { %342 = vmatprep.subr.mxu0 %v204_v44  ;;  %413 = vmatprep.subr.mxu1 %v206_v45  ;;  %v185_v7 = vld [vmem:[%s4094_s2 + $0x10] sm:$0xff]  ;;  %v308_v8 = vld [vmem:[%s4094_s2 + $0x3e8] sm:$0xff]  ;;  %v310_v9 = vld [vmem:[%s4094_s2 + $0x3f8] sm:$0xff] }
  0x18   : > { %343 = vmatpush1.msra.mxu0 %v203_v46  ;;  %414 = vmatpush1.msra.mxu1 %v205_v47  ;;  %v307_v10 = vld [vmem:[%s4094_s2 + $0x3e0] sm:$0xff]  ;;  %v309_v11 = vld [vmem:[%s4094_s2 + $0x3f0] sm:$0xff]  ;;  %v304_v12 = vld [vmem:[%s4094_s2 + $0x3c8] sm:$0xff] }
  0x19   : > { %344 = vmatprep.subr.mxu0 %v200_v48  ;;  %415 = vmatprep.subr.mxu1 %v202_v49  ;;  %v306_v13 = vld [vmem:[%s4094_s2 + $0x3d8] sm:$0xff]  ;;  %v303_v14 = vld [vmem:[%s4094_s2 + $0x3c0] sm:$0xff]  ;;  %v305_v15 = vld [vmem:[%s4094_s2 + $0x3d0] sm:$0xff] }
  0x1a   : > { %345 = vmatpush1.msra.mxu0 %v199_v50  ;;  %416 = vmatpush1.msra.mxu1 %v201_v51  ;;  %v300_v16 = vld [vmem:[%s4094_s2 + $0x3a8] sm:$0xff]  ;;  %v302_v17 = vld [vmem:[%s4094_s2 + $0x3b8] sm:$0xff]  ;;  %v299_v18 = vld [vmem:[%s4094_s2 + $0x3a0] sm:$0xff] }
  0x1b   : > { %346 = vmatprep.subr.mxu0 %v196_v52  ;;  %417 = vmatprep.subr.mxu1 %v198_v53  ;;  %v301_v19 = vld [vmem:[%s4094_s2 + $0x3b0] sm:$0xff]  ;;  %v296_v20 = vld [vmem:[%s4094_s2 + $0x388] sm:$0xff]  ;;  %v298_v21 = vld [vmem:[%s4094_s2 + $0x398] sm:$0xff] }
  0x1c   : > { %347 = vmatpush1.msra.mxu0 %v195_v54  ;;  %418 = vmatpush1.msra.mxu1 %v197_v55  ;;  %v295_v22 = vld [vmem:[%s4094_s2 + $0x380] sm:$0xff]  ;;  %v297_v23 = vld [vmem:[%s4094_s2 + $0x390] sm:$0xff]  ;;  %v292_v24 = vld [vmem:[%s4094_s2 + $0x368] sm:$0xff] }
  0x1d   : > { %348 = vmatprep.subr.mxu0 %v192_v56  ;;  %419 = vmatprep.subr.mxu1 %v194_v57  ;;  %v294_v25 = vld [vmem:[%s4094_s2 + $0x378] sm:$0xff]  ;;  %v291_v26 = vld [vmem:[%s4094_s2 + $0x360] sm:$0xff]  ;;  %v293_v27 = vld [vmem:[%s4094_s2 + $0x370] sm:$0xff] }
  0x1e   : > { %349 = vmatpush1.msra.mxu0 %v191_v58  ;;  %420 = vmatpush1.msra.mxu1 %v193_v59  ;;  %v288_v28 = vld [vmem:[%s4094_s2 + $0x348] sm:$0xff]  ;;  %v290_v29 = vld [vmem:[%s4094_s2 + $0x358] sm:$0xff]  ;;  %v287_v30 = vld [vmem:[%s4094_s2 + $0x340] sm:$0xff] }
  0x1f   : > { %350 = vmatprep.subr.mxu0 %v188_v60  ;;  %421 = vmatprep.subr.mxu1 %v190_v61  ;;  %v289_v31 = vld [vmem:[%s4094_s2 + $0x350] sm:$0xff]  ;;  %v284_v32 = vld [vmem:[%s4094_s2 + $0x328] sm:$0xff]  ;;  %v286_v33 = vld [vmem:[%s4094_s2 + $0x338] sm:$0xff] }
  0x20   : > { %351 = vmatpush1.msra.mxu0 %v187_v62  ;;  %422 = vmatpush1.msra.mxu1 %v189_v63  ;;  %v283_v34 = vld [vmem:[%s4094_s2 + $0x320] sm:$0xff]  ;;  %v285_v35 = vld [vmem:[%s4094_s2 + $0x330] sm:$0xff]  ;;  %v280_v36 = vld [vmem:[%s4094_s2 + $0x308] sm:$0xff] }
  0x21   : > { %352 = vmatprep.subr.mxu0 %v184_v4  ;;  %423 = vmatprep.subr.mxu1 %v186_v5  ;;  %v282_v37 = vld [vmem:[%s4094_s2 + $0x318] sm:$0xff]  ;;  %v279_v38 = vld [vmem:[%s4094_s2 + $0x300] sm:$0xff]  ;;  %v281_v39 = vld [vmem:[%s4094_s2 + $0x310] sm:$0xff] }
  0x22   : > { %353 = vmatpush1.msra.mxu0 %v183_v6  ;;  %424 = vmatpush1.msra.mxu1 %v185_v7  ;;  %v276_v40 = vld [vmem:[%s4094_s2 + $0x2e8] sm:$0xff]  ;;  %v278_v41 = vld [vmem:[%s4094_s2 + $0x2f8] sm:$0xff]  ;;  %v275_v42 = vld [vmem:[%s4094_s2 + $0x2e0] sm:$0xff] }
  0x23   : > { %354 = vmatprep.subr.mxu0 %v308_v8  ;;  %425 = vmatprep.subr.mxu1 %v310_v9  ;;  %v277_v43 = vld [vmem:[%s4094_s2 + $0x2f0] sm:$0xff]  ;;  %v272_v44 = vld [vmem:[%s4094_s2 + $0x2c8] sm:$0xff]  ;;  %v274_v45 = vld [vmem:[%s4094_s2 + $0x2d8] sm:$0xff] }
  0x24   : > { %355 = vmatpush2.msra.mxu0 %v307_v10  ;;  %426 = vmatpush2.msra.mxu1 %v309_v11  ;;  %v271_v46 = vld [vmem:[%s4094_s2 + $0x2c0] sm:$0xff]  ;;  %v273_v47 = vld [vmem:[%s4094_s2 + $0x2d0] sm:$0xff]  ;;  %v268_v48 = vld [vmem:[%s4094_s2 + $0x2a8] sm:$0xff] }
  0x25   : > { %356 = vmatprep.subr.mxu0 %v304_v12  ;;  %427 = vmatprep.subr.mxu1 %v306_v13  ;;  %v270_v49 = vld [vmem:[%s4094_s2 + $0x2b8] sm:$0xff]  ;;  %v267_v50 = vld [vmem:[%s4094_s2 + $0x2a0] sm:$0xff]  ;;  %v269_v51 = vld [vmem:[%s4094_s2 + $0x2b0] sm:$0xff] }
  0x26   : > { %357 = vmatpush2.msra.mxu0 %v303_v14  ;;  %428 = vmatpush2.msra.mxu1 %v305_v15  ;;  %v264_v52 = vld [vmem:[%s4094_s2 + $0x288] sm:$0xff]  ;;  %v266_v53 = vld [vmem:[%s4094_s2 + $0x298] sm:$0xff]  ;;  %v263_v54 = vld [vmem:[%s4094_s2 + $0x280] sm:$0xff] }
  0x27   : > { %358 = vmatprep.subr.mxu0 %v300_v16  ;;  %429 = vmatprep.subr.mxu1 %v302_v17  ;;  %v265_v55 = vld [vmem:[%s4094_s2 + $0x290] sm:$0xff]  ;;  %v260_v56 = vld [vmem:[%s4094_s2 + $0x268] sm:$0xff]  ;;  %v262_v57 = vld [vmem:[%s4094_s2 + $0x278] sm:$0xff] }
  0x28   : > { %359 = vmatpush2.msra.mxu0 %v299_v18  ;;  %430 = vmatpush2.msra.mxu1 %v301_v19  ;;  %v259_v58 = vld [vmem:[%s4094_s2 + $0x260] sm:$0xff]  ;;  %v261_v59 = vld [vmem:[%s4094_s2 + $0x270] sm:$0xff]  ;;  %v256_v60 = vld [vmem:[%s4094_s2 + $0x248] sm:$0xff] }
  0x29   : > { %360 = vmatprep.subr.mxu0 %v296_v20  ;;  %431 = vmatprep.subr.mxu1 %v298_v21  ;;  %v258_v61 = vld [vmem:[%s4094_s2 + $0x258] sm:$0xff]  ;;  %v255_v62 = vld [vmem:[%s4094_s2 + $0x240] sm:$0xff]  ;;  %v257_v63 = vld [vmem:[%s4094_s2 + $0x250] sm:$0xff] }
  0x2a   : > { %361 = vmatpush2.msra.mxu0 %v295_v22  ;;  %432 = vmatpush2.msra.mxu1 %v297_v23  ;;  %v1839_v4 = vld.sshfl [vmem:[%s2424_s17 + $0x4] sm:$0x33 pattern:$0x76325410]  ;;  %v252_v5 = vld [vmem:[%s4094_s2 + $0x228] sm:$0xff]  ;;  %v254_v6 = vld [vmem:[%s4094_s2 + $0x238] sm:$0xff] }
  0x2b   : > { %362 = vmatprep.subr.mxu0 %v292_v24  ;;  %433 = vmatprep.subr.mxu1 %v294_v25  ;;  %v251_v7 = vld [vmem:[%s4094_s2 + $0x220] sm:$0xff]  ;;  %v253_v8 = vld [vmem:[%s4094_s2 + $0x230] sm:$0xff]  ;;  %v248_v9 = vld [vmem:[%s4094_s2 + $0x208] sm:$0xff]  ;;  %v319_v11 = vcombine.high %v1839_v4, %v1839_v4 }
  0x2c   : > { %363 = vmatpush2.msra.mxu0 %v291_v26  ;;  %434 = vmatpush2.msra.mxu1 %v293_v27  ;;  %v250_v10 = vld [vmem:[%s4094_s2 + $0x218] sm:$0xff]  ;;  %v247_v12 = vld [vmem:[%s4094_s2 + $0x200] sm:$0xff]  ;;  %v249_v13 = vld [vmem:[%s4094_s2 + $0x210] sm:$0xff] }
  0x2d   : > { %364 = vmatprep.subr.mxu0 %v288_v28  ;;  %435 = vmatprep.subr.mxu1 %v290_v29  ;;  %v111_v14 = vld [vmem:[%s4093_s1 + $0x1e8] sm:$0xff]  ;;  %v113_v15 = vld [vmem:[%s4093_s1 + $0x1f8] sm:$0xff]  ;;  %v110_v16 = vld [vmem:[%s4093_s1 + $0x1e0] sm:$0xff] }
  0x2e   : > { %365 = vmatpush2.msra.mxu0 %v287_v30  ;;  %436 = vmatpush2.msra.mxu1 %v289_v31  ;;  %v112_v17 = vld [vmem:[%s4093_s1 + $0x1f0] sm:$0xff]  ;;  %v107_v18 = vld [vmem:[%s4093_s1 + $0x1c8] sm:$0xff]  ;;  %v109_v19 = vld [vmem:[%s4093_s1 + $0x1d8] sm:$0xff] }
  0x2f   : > { %366 = vmatprep.subr.mxu0 %v284_v32  ;;  %437 = vmatprep.subr.mxu1 %v286_v33  ;;  %v106_v20 = vld [vmem:[%s4093_s1 + $0x1c0] sm:$0xff]  ;;  %v108_v21 = vld [vmem:[%s4093_s1 + $0x1d0] sm:$0xff]  ;;  %v103_v22 = vld [vmem:[%s4093_s1 + $0x1a8] sm:$0xff] }
  0x30   : > { %367 = vmatpush2.msra.mxu0 %v283_v34  ;;  %438 = vmatpush2.msra.mxu1 %v285_v35  ;;  %v105_v23 = vld [vmem:[%s4093_s1 + $0x1b8] sm:$0xff]  ;;  %v102_v24 = vld [vmem:[%s4093_s1 + $0x1a0] sm:$0xff]  ;;  %v104_v25 = vld [vmem:[%s4093_s1 + $0x1b0] sm:$0xff] }
  0x31   : > { %368 = vmatprep.subr.mxu0 %v280_v36  ;;  %439 = vmatprep.subr.mxu1 %v282_v37  ;;  %v99_v26 = vld [vmem:[%s4093_s1 + $0x188] sm:$0xff]  ;;  %v101_v27 = vld [vmem:[%s4093_s1 + $0x198] sm:$0xff]  ;;  %v98_v28 = vld [vmem:[%s4093_s1 + $0x180] sm:$0xff] }
  0x32   : > { %369 = vmatpush2.msra.mxu0 %v279_v38  ;;  %440 = vmatpush2.msra.mxu1 %v281_v39  ;;  %v100_v29 = vld [vmem:[%s4093_s1 + $0x190] sm:$0xff]  ;;  %v95_v30 = vld [vmem:[%s4093_s1 + $0x168] sm:$0xff]  ;;  %v97_v31 = vld [vmem:[%s4093_s1 + $0x178] sm:$0xff] }
  0x33   : > { %370 = vmatprep.subr.mxu0 %v276_v40  ;;  %441 = vmatprep.subr.mxu1 %v278_v41  ;;  %v94_v32 = vld [vmem:[%s4093_s1 + $0x160] sm:$0xff]  ;;  %v96_v33 = vld [vmem:[%s4093_s1 + $0x170] sm:$0xff]  ;;  %v91_v34 = vld [vmem:[%s4093_s1 + $0x148] sm:$0xff] }
  0x34   : > { %371 = vmatpush2.msra.mxu0 %v275_v42  ;;  %442 = vmatpush2.msra.mxu1 %v277_v43  ;;  %v93_v35 = vld [vmem:[%s4093_s1 + $0x158] sm:$0xff]  ;;  %v90_v36 = vld [vmem:[%s4093_s1 + $0x140] sm:$0xff]  ;;  %v92_v37 = vld [vmem:[%s4093_s1 + $0x150] sm:$0xff] }
  0x35   : > { %372 = vmatprep.subr.mxu0 %v272_v44  ;;  %443 = vmatprep.subr.mxu1 %v274_v45  ;;  %v87_v38 = vld [vmem:[%s4093_s1 + $0x128] sm:$0xff]  ;;  %v89_v39 = vld [vmem:[%s4093_s1 + $0x138] sm:$0xff]  ;;  %v86_v40 = vld [vmem:[%s4093_s1 + $0x120] sm:$0xff] }
  0x36   : > { %373 = vmatpush2.msra.mxu0 %v271_v46  ;;  %444 = vmatpush2.msra.mxu1 %v273_v47  ;;  %v88_v41 = vld [vmem:[%s4093_s1 + $0x130] sm:$0xff]  ;;  %v83_v42 = vld [vmem:[%s4093_s1 + $0x108] sm:$0xff]  ;;  %v85_v43 = vld [vmem:[%s4093_s1 + $0x118] sm:$0xff] }
  0x37   : > { %374 = vmatprep.subr.mxu0 %v268_v48  ;;  %445 = vmatprep.subr.mxu1 %v270_v49  ;;  %v82_v44 = vld [vmem:[%s4093_s1 + $0x100] sm:$0xff]  ;;  %v84_v45 = vld [vmem:[%s4093_s1 + $0x110] sm:$0xff]  ;;  %v79_v46 = vld [vmem:[%s4093_s1 + $0xe8] sm:$0xff] }
  0x38   : > { %375 = vmatpush2.msra.mxu0 %v267_v50  ;;  %446 = vmatpush2.msra.mxu1 %v269_v51  ;;  %v81_v47 = vld [vmem:[%s4093_s1 + $0xf8] sm:$0xff]  ;;  %v78_v48 = vld [vmem:[%s4093_s1 + $0xe0] sm:$0xff]  ;;  %v80_v49 = vld [vmem:[%s4093_s1 + $0xf0] sm:$0xff] }
  0x39   : > { %376 = vmatprep.subr.mxu0 %v264_v52  ;;  %447 = vmatprep.subr.mxu1 %v266_v53  ;;  %v75_v50 = vld [vmem:[%s4093_s1 + $0xc8] sm:$0xff]  ;;  %v77_v51 = vld [vmem:[%s4093_s1 + $0xd8] sm:$0xff]  ;;  %v74_v52 = vld [vmem:[%s4093_s1 + $0xc0] sm:$0xff] }
  0x3a   : > { %377 = vmatpush2.msra.mxu0 %v263_v54  ;;  %448 = vmatpush2.msra.mxu1 %v265_v55  ;;  %v76_v53 = vld [vmem:[%s4093_s1 + $0xd0] sm:$0xff]  ;;  %v71_v54 = vld [vmem:[%s4093_s1 + $0xa8] sm:$0xff]  ;;  %v73_v55 = vld [vmem:[%s4093_s1 + $0xb8] sm:$0xff] }
  0x3b   : > { %378 = vmatprep.subr.mxu0 %v260_v56  ;;  %449 = vmatprep.subr.mxu1 %v262_v57  ;;  %v70_v56 = vld [vmem:[%s4093_s1 + $0xa0] sm:$0xff]  ;;  %v72_v57 = vld [vmem:[%s4093_s1 + $0xb0] sm:$0xff] }
  0x3c   : > { %379 = vmatpush2.msra.mxu0 %v259_v58  ;;  %450 = vmatpush2.msra.mxu1 %v261_v59  ;;  %v67_v58 = vld [vmem:[%s4093_s1 + $0x88] sm:$0xff]  ;;  %v69_v59 = vld [vmem:[%s4093_s1 + $0x98] sm:$0xff] }
  0x3d   : > { %380 = vmatprep.subr.mxu0 %v256_v60  ;;  %451 = vmatprep.subr.mxu1 %v258_v61  ;;  %v66_v60 = vld [vmem:[%s4093_s1 + $0x80] sm:$0xff]  ;;  %v68_v61 = vld [vmem:[%s4093_s1 + $0x90] sm:$0xff] }
  0x3e   : > { %381 = vmatpush2.msra.mxu0 %v255_v62  ;;  %452 = vmatpush2.msra.mxu1 %v257_v63  ;;  %v63_v62 = vld [vmem:[%s4093_s1 + $0x68] sm:$0xff]  ;;  %v65_v63 = vld [vmem:[%s4093_s1 + $0x78] sm:$0xff] }
  0x3f   : > { %382 = vmatprep.subr.mxu0 %v252_v5  ;;  %453 = vmatprep.subr.mxu1 %v254_v6  ;;  %v64_v5 = vld [vmem:[%s4093_s1 + $0x70] sm:$0xff]  ;;  %v59_v6 = vld [vmem:[%s4093_s1 + $0x48] sm:$0xff] }
  0x40   : > { %383 = vmatpush2.msra.mxu0 %v251_v7  ;;  %454 = vmatpush2.msra.mxu1 %v253_v8  ;;  %v61_v7 = vld [vmem:[%s4093_s1 + $0x58] sm:$0xff]  ;;  %v58_v8 = vld [vmem:[%s4093_s1 + $0x40] sm:$0xff] }
  0x41   : > { %384 = vmatprep.subr.mxu0 %v248_v9  ;;  %455 = vmatprep.subr.mxu1 %v250_v10  ;;  %v60_v9 = vld [vmem:[%s4093_s1 + $0x50] sm:$0xff]  ;;  %v55_v10 = vld [vmem:[%s4093_s1 + $0x28] sm:$0xff] }
  0x42   : > { %385 = vmatpush2.msra.mxu0 %v247_v12  ;;  %386 = vmatprep.mubr.f32.mxu0 %v319_v11  ;;  %v54_v12 = vld [vmem:[%s4093_s1 + $0x20] sm:$0xff] }
  0x43   : > { %456 = vmatpush2.msra.mxu1 %v249_v13  ;;  %387 = vmatmul.mubr.f32.vlgmr.msra.gmra.mxu0 %v1839_v4  ;;  %v56_v13 = vld [vmem:[%s4093_s1 + $0x30] sm:$0xff] }
  0x44   : > { %457 = vmatprep.mubr.f32.mxu1 %v319_v11  ;;  %475 = vmatprep.subr.mxu0 %v111_v14  ;;  %v57_v11 = vld [vmem:[%s4093_s1 + $0x38] sm:$0xff]  ;;  %v51_v14 = vld [vmem:[%s4093_s1 + $0x8] sm:$0xff] }
  0x45   : > { %546 = vmatprep.subr.mxu1 %v113_v15  ;;  %458 = vmatmul.mubr.f32.vlgmr.msra.gmra.mxu1 %v1839_v4  ;;  %v62_v4 = vld [vmem:[%s4093_s1 + $0x60] sm:$0xff]  ;;  %v53_v15 = vld [vmem:[%s4093_s1 + $0x18] sm:$0xff] }
  0x46   : > { %476 = vmatpush1.msra.mxu0 %v110_v16  ;;  %547 = vmatpush1.msra.mxu1 %v112_v17  ;;  %v50_v16 = vld [vmem:[%s4093_s1] sm:$0xff]  ;;  %v52_v17 = vld [vmem:[%s4093_s1 + $0x10] sm:$0xff] }
  0x47   : > { %477 = vmatprep.subr.mxu0 %v107_v18  ;;  %548 = vmatprep.subr.mxu1 %v109_v19  ;;  %v175_v18 = vld [vmem:[%s4093_s1 + $0x3e8] sm:$0xff]  ;;  %v177_v19 = vld [vmem:[%s4093_s1 + $0x3f8] sm:$0xff] }
  0x48   : > { %478 = vmatpush1.msra.mxu0 %v106_v20  ;;  %549 = vmatpush1.msra.mxu1 %v108_v21  ;;  %v174_v20 = vld [vmem:[%s4093_s1 + $0x3e0] sm:$0xff]  ;;  %v176_v21 = vld [vmem:[%s4093_s1 + $0x3f0] sm:$0xff] }
  0x49   : > { %479 = vmatprep.subr.mxu0 %v103_v22  ;;  %550 = vmatprep.subr.mxu1 %v105_v23  ;;  %v171_v22 = vld [vmem:[%s4093_s1 + $0x3c8] sm:$0xff]  ;;  %v173_v23 = vld [vmem:[%s4093_s1 + $0x3d8] sm:$0xff] }
  0x4a   : > { %480 = vmatpush1.msra.mxu0 %v102_v24  ;;  %551 = vmatpush1.msra.mxu1 %v104_v25  ;;  %v170_v24 = vld [vmem:[%s4093_s1 + $0x3c0] sm:$0xff]  ;;  %v172_v25 = vld [vmem:[%s4093_s1 + $0x3d0] sm:$0xff] }
  0x4b   : > { %481 = vmatprep.subr.mxu0 %v99_v26  ;;  %552 = vmatprep.subr.mxu1 %v101_v27  ;;  %v167_v26 = vld [vmem:[%s4093_s1 + $0x3a8] sm:$0xff]  ;;  %v169_v27 = vld [vmem:[%s4093_s1 + $0x3b8] sm:$0xff] }
  0x4c   : > { %482 = vmatpush1.msra.mxu0 %v98_v28  ;;  %553 = vmatpush1.msra.mxu1 %v100_v29  ;;  %v166_v28 = vld [vmem:[%s4093_s1 + $0x3a0] sm:$0xff]  ;;  %v168_v29 = vld [vmem:[%s4093_s1 + $0x3b0] sm:$0xff] }
  0x4d   : > { %483 = vmatprep.subr.mxu0 %v95_v30  ;;  %554 = vmatprep.subr.mxu1 %v97_v31  ;;  %v163_v30 = vld [vmem:[%s4093_s1 + $0x388] sm:$0xff]  ;;  %v165_v31 = vld [vmem:[%s4093_s1 + $0x398] sm:$0xff] }
  0x4e   : > { %484 = vmatpush1.msra.mxu0 %v94_v32  ;;  %555 = vmatpush1.msra.mxu1 %v96_v33  ;;  %v162_v32 = vld [vmem:[%s4093_s1 + $0x380] sm:$0xff]  ;;  %v164_v33 = vld [vmem:[%s4093_s1 + $0x390] sm:$0xff] }
  0x4f   : > { %485 = vmatprep.subr.mxu0 %v91_v34  ;;  %556 = vmatprep.subr.mxu1 %v93_v35  ;;  %v159_v34 = vld [vmem:[%s4093_s1 + $0x368] sm:$0xff]  ;;  %v161_v35 = vld [vmem:[%s4093_s1 + $0x378] sm:$0xff] }
  0x50   : > { %486 = vmatpush1.msra.mxu0 %v90_v36  ;;  %557 = vmatpush1.msra.mxu1 %v92_v37  ;;  %v158_v36 = vld [vmem:[%s4093_s1 + $0x360] sm:$0xff]  ;;  %v160_v37 = vld [vmem:[%s4093_s1 + $0x370] sm:$0xff] }
  0x51   : > { %487 = vmatprep.subr.mxu0 %v87_v38  ;;  %558 = vmatprep.subr.mxu1 %v89_v39  ;;  %v155_v38 = vld [vmem:[%s4093_s1 + $0x348] sm:$0xff]  ;;  %v157_v39 = vld [vmem:[%s4093_s1 + $0x358] sm:$0xff] }
  0x52   : > { %488 = vmatpush1.msra.mxu0 %v86_v40  ;;  %559 = vmatpush1.msra.mxu1 %v88_v41  ;;  %v154_v40 = vld [vmem:[%s4093_s1 + $0x340] sm:$0xff]  ;;  %v156_v41 = vld [vmem:[%s4093_s1 + $0x350] sm:$0xff] }
  0x53   : > { %489 = vmatprep.subr.mxu0 %v83_v42  ;;  %560 = vmatprep.subr.mxu1 %v85_v43  ;;  %v151_v42 = vld [vmem:[%s4093_s1 + $0x328] sm:$0xff]  ;;  %v153_v43 = vld [vmem:[%s4093_s1 + $0x338] sm:$0xff] }
  0x54   : > { %490 = vmatpush1.msra.mxu0 %v82_v44  ;;  %561 = vmatpush1.msra.mxu1 %v84_v45  ;;  %v150_v44 = vld [vmem:[%s4093_s1 + $0x320] sm:$0xff]  ;;  %v152_v45 = vld [vmem:[%s4093_s1 + $0x330] sm:$0xff] }
  0x55   : > { %491 = vmatprep.subr.mxu0 %v79_v46  ;;  %562 = vmatprep.subr.mxu1 %v81_v47  ;;  %v147_v46 = vld [vmem:[%s4093_s1 + $0x308] sm:$0xff]  ;;  %v149_v47 = vld [vmem:[%s4093_s1 + $0x318] sm:$0xff] }
  0x56   : > { %492 = vmatpush1.msra.mxu0 %v78_v48  ;;  %563 = vmatpush1.msra.mxu1 %v80_v49  ;;  %v146_v48 = vld [vmem:[%s4093_s1 + $0x300] sm:$0xff]  ;;  %v148_v49 = vld [vmem:[%s4093_s1 + $0x310] sm:$0xff] }
  0x57   : > { %493 = vmatprep.subr.mxu0 %v75_v50  ;;  %564 = vmatprep.subr.mxu1 %v77_v51  ;;  %v143_v50 = vld [vmem:[%s4093_s1 + $0x2e8] sm:$0xff]  ;;  %v145_v51 = vld [vmem:[%s4093_s1 + $0x2f8] sm:$0xff] }
  0x58   : > { %494 = vmatpush1.msra.mxu0 %v74_v52  ;;  %565 = vmatpush1.msra.mxu1 %v76_v53  ;;  %v142_v52 = vld [vmem:[%s4093_s1 + $0x2e0] sm:$0xff]  ;;  %v144_v53 = vld [vmem:[%s4093_s1 + $0x2f0] sm:$0xff] }
  0x59   : > { %495 = vmatprep.subr.mxu0 %v71_v54  ;;  %566 = vmatprep.subr.mxu1 %v73_v55  ;;  %v139_v54 = vld [vmem:[%s4093_s1 + $0x2c8] sm:$0xff]  ;;  %v141_v55 = vld [vmem:[%s4093_s1 + $0x2d8] sm:$0xff] }
  0x5a   : > { %496 = vmatpush1.msra.mxu0 %v70_v56  ;;  %567 = vmatpush1.msra.mxu1 %v72_v57  ;;  %v138_v56 = vld [vmem:[%s4093_s1 + $0x2c0] sm:$0xff]  ;;  %v140_v57 = vld [vmem:[%s4093_s1 + $0x2d0] sm:$0xff] }
  0x5b   : > { %497 = vmatprep.subr.mxu0 %v67_v58  ;;  %568 = vmatprep.subr.mxu1 %v69_v59  ;;  %v135_v58 = vld [vmem:[%s4093_s1 + $0x2a8] sm:$0xff]  ;;  %v137_v59 = vld [vmem:[%s4093_s1 + $0x2b8] sm:$0xff] }
  0x5c   : > { %498 = vmatpush1.msra.mxu0 %v66_v60  ;;  %569 = vmatpush1.msra.mxu1 %v68_v61  ;;  %v134_v60 = vld [vmem:[%s4093_s1 + $0x2a0] sm:$0xff]  ;;  %v136_v61 = vld [vmem:[%s4093_s1 + $0x2b0] sm:$0xff] }
  0x5d   : > { %499 = vmatprep.subr.mxu0 %v63_v62  ;;  %570 = vmatprep.subr.mxu1 %v65_v63  ;;  %v131_v62 = vld [vmem:[%s4093_s1 + $0x288] sm:$0xff]  ;;  %v133_v63 = vld [vmem:[%s4093_s1 + $0x298] sm:$0xff] }
  0x5e   : > { %500 = vmatpush1.msra.mxu0 %v62_v4  ;;  %571 = vmatpush1.msra.mxu1 %v64_v5  ;;  %v130_v4 = vld [vmem:[%s4093_s1 + $0x280] sm:$0xff]  ;;  %v132_v5 = vld [vmem:[%s4093_s1 + $0x290] sm:$0xff] }
  0x5f   : > { %501 = vmatprep.subr.mxu0 %v59_v6  ;;  %572 = vmatprep.subr.mxu1 %v61_v7  ;;  %v127_v6 = vld [vmem:[%s4093_s1 + $0x268] sm:$0xff]  ;;  %v129_v7 = vld [vmem:[%s4093_s1 + $0x278] sm:$0xff] }
  0x60   : > { %502 = vmatpush1.msra.mxu0 %v58_v8  ;;  %573 = vmatpush1.msra.mxu1 %v60_v9  ;;  %v126_v8 = vld [vmem:[%s4093_s1 + $0x260] sm:$0xff]  ;;  %v128_v9 = vld [vmem:[%s4093_s1 + $0x270] sm:$0xff] }
  0x61   : > { %503 = vmatprep.subr.mxu0 %v55_v10  ;;  %574 = vmatprep.subr.mxu1 %v57_v11  ;;  %v123_v10 = vld [vmem:[%s4093_s1 + $0x248] sm:$0xff]  ;;  %v125_v11 = vld [vmem:[%s4093_s1 + $0x258] sm:$0xff] }
  0x62   : > { %504 = vmatpush1.msra.mxu0 %v54_v12  ;;  %575 = vmatpush1.msra.mxu1 %v56_v13  ;;  %v1840_v12 = vld.sshfl [vmem:[%s2424_s17] sm:$0x33 pattern:$0x76325410] }
  0x63   : > { %505 = vmatprep.subr.mxu0 %v51_v14  ;;  %576 = vmatprep.subr.mxu1 %v53_v15  ;;  %v122_v13 = vld [vmem:[%s4093_s1 + $0x240] sm:$0xff]  ;;  %v124_v14 = vld [vmem:[%s4093_s1 + $0x250] sm:$0xff]  ;;  %v119_v15 = vld [vmem:[%s4093_s1 + $0x228] sm:$0xff] }
  0x64   : > { %506 = vmatpush1.msra.mxu0 %v50_v16  ;;  %577 = vmatpush1.msra.mxu1 %v52_v17  ;;  %v121_v16 = vld [vmem:[%s4093_s1 + $0x238] sm:$0xff]  ;;  %v118_v17 = vld [vmem:[%s4093_s1 + $0x220] sm:$0xff] }
  0x65   : > { %507 = vmatprep.subr.mxu0 %v175_v18  ;;  %578 = vmatprep.subr.mxu1 %v177_v19  ;;  %v120_v18 = vld [vmem:[%s4093_s1 + $0x230] sm:$0xff]  ;;  %v115_v19 = vld [vmem:[%s4093_s1 + $0x208] sm:$0xff] }
  0x66   : > { %508 = vmatpush2.msra.mxu0 %v174_v20  ;;  %579 = vmatpush2.msra.mxu1 %v176_v21  ;;  %v117_v20 = vld [vmem:[%s4093_s1 + $0x218] sm:$0xff]  ;;  %v472_v21 = vcombine.high %v1840_v12, %v1840_v12 }
  0x67   : > { %509 = vmatprep.subr.mxu0 %v171_v22  ;;  %580 = vmatprep.subr.mxu1 %v173_v23  ;;  %v114_v22 = vld [vmem:[%s4093_s1 + $0x200] sm:$0xff]  ;;  %v116_v23 = vld [vmem:[%s4093_s1 + $0x210] sm:$0xff] }
  0x68   : > { %510 = vmatpush2.msra.mxu0 %v170_v24  ;;  %581 = vmatpush2.msra.mxu1 %v172_v25  ;;  %v678_v24 = vld [vmem:[%s4095_s3 + $0x1e8] sm:$0xff]  ;;  %v680_v25 = vld [vmem:[%s4095_s3 + $0x1f8] sm:$0xff] }
  0x69   : > { %511 = vmatprep.subr.mxu0 %v167_v26  ;;  %582 = vmatprep.subr.mxu1 %v169_v27  ;;  %v677_v26 = vld [vmem:[%s4095_s3 + $0x1e0] sm:$0xff]  ;;  %v679_v27 = vld [vmem:[%s4095_s3 + $0x1f0] sm:$0xff] }
  0x6a   : > { %512 = vmatpush2.msra.mxu0 %v166_v28  ;;  %583 = vmatpush2.msra.mxu1 %v168_v29  ;;  %v674_v28 = vld [vmem:[%s4095_s3 + $0x1c8] sm:$0xff]  ;;  %v676_v29 = vld [vmem:[%s4095_s3 + $0x1d8] sm:$0xff] }
  0x6b   : > { %513 = vmatprep.subr.mxu0 %v163_v30  ;;  %584 = vmatprep.subr.mxu1 %v165_v31  ;;  %v673_v30 = vld [vmem:[%s4095_s3 + $0x1c0] sm:$0xff]  ;;  %v675_v31 = vld [vmem:[%s4095_s3 + $0x1d0] sm:$0xff] }
  0x6c   : > { %514 = vmatpush2.msra.mxu0 %v162_v32  ;;  %585 = vmatpush2.msra.mxu1 %v164_v33  ;;  %v670_v32 = vld [vmem:[%s4095_s3 + $0x1a8] sm:$0xff]  ;;  %v672_v33 = vld [vmem:[%s4095_s3 + $0x1b8] sm:$0xff] }
  0x6d   : > { %515 = vmatprep.subr.mxu0 %v159_v34  ;;  %586 = vmatprep.subr.mxu1 %v161_v35  ;;  %v669_v34 = vld [vmem:[%s4095_s3 + $0x1a0] sm:$0xff]  ;;  %v671_v35 = vld [vmem:[%s4095_s3 + $0x1b0] sm:$0xff] }
  0x6e   : > { %516 = vmatpush2.msra.mxu0 %v158_v36  ;;  %587 = vmatpush2.msra.mxu1 %v160_v37  ;;  %v666_v36 = vld [vmem:[%s4095_s3 + $0x188] sm:$0xff]  ;;  %v668_v37 = vld [vmem:[%s4095_s3 + $0x198] sm:$0xff] }
  0x6f   : > { %517 = vmatprep.subr.mxu0 %v155_v38  ;;  %588 = vmatprep.subr.mxu1 %v157_v39  ;;  %v665_v38 = vld [vmem:[%s4095_s3 + $0x180] sm:$0xff]  ;;  %v667_v39 = vld [vmem:[%s4095_s3 + $0x190] sm:$0xff] }
  0x70   : > { %518 = vmatpush2.msra.mxu0 %v154_v40  ;;  %589 = vmatpush2.msra.mxu1 %v156_v41  ;;  %v662_v40 = vld [vmem:[%s4095_s3 + $0x168] sm:$0xff]  ;;  %v664_v41 = vld [vmem:[%s4095_s3 + $0x178] sm:$0xff] }
  0x71   : > { %519 = vmatprep.subr.mxu0 %v151_v42  ;;  %590 = vmatprep.subr.mxu1 %v153_v43  ;;  %v661_v42 = vld [vmem:[%s4095_s3 + $0x160] sm:$0xff]  ;;  %v663_v43 = vld [vmem:[%s4095_s3 + $0x170] sm:$0xff] }
  0x72   : > { %520 = vmatpush2.msra.mxu0 %v150_v44  ;;  %591 = vmatpush2.msra.mxu1 %v152_v45  ;;  %v658_v44 = vld [vmem:[%s4095_s3 + $0x148] sm:$0xff]  ;;  %v660_v45 = vld [vmem:[%s4095_s3 + $0x158] sm:$0xff] }
  0x73   : > { %521 = vmatprep.subr.mxu0 %v147_v46  ;;  %592 = vmatprep.subr.mxu1 %v149_v47  ;;  %v657_v46 = vld [vmem:[%s4095_s3 + $0x140] sm:$0xff]  ;;  %v659_v47 = vld [vmem:[%s4095_s3 + $0x150] sm:$0xff] }
  0x74   : > { %522 = vmatpush2.msra.mxu0 %v146_v48  ;;  %593 = vmatpush2.msra.mxu1 %v148_v49  ;;  %v654_v48 = vld [vmem:[%s4095_s3 + $0x128] sm:$0xff]  ;;  %v656_v49 = vld [vmem:[%s4095_s3 + $0x138] sm:$0xff] }
  0x75   : > { %523 = vmatprep.subr.mxu0 %v143_v50  ;;  %594 = vmatprep.subr.mxu1 %v145_v51  ;;  %v653_v50 = vld [vmem:[%s4095_s3 + $0x120] sm:$0xff]  ;;  %v655_v51 = vld [vmem:[%s4095_s3 + $0x130] sm:$0xff] }
  0x76   : > { %524 = vmatpush2.msra.mxu0 %v142_v52  ;;  %595 = vmatpush2.msra.mxu1 %v144_v53  ;;  %v650_v52 = vld [vmem:[%s4095_s3 + $0x108] sm:$0xff]  ;;  %v652_v53 = vld [vmem:[%s4095_s3 + $0x118] sm:$0xff] }
  0x77   : > { %525 = vmatprep.subr.mxu0 %v139_v54  ;;  %596 = vmatprep.subr.mxu1 %v141_v55  ;;  %v649_v54 = vld [vmem:[%s4095_s3 + $0x100] sm:$0xff]  ;;  %v651_v55 = vld [vmem:[%s4095_s3 + $0x110] sm:$0xff] }
  0x78   : > { %526 = vmatpush2.msra.mxu0 %v138_v56  ;;  %597 = vmatpush2.msra.mxu1 %v140_v57  ;;  %v646_v56 = vld [vmem:[%s4095_s3 + $0xe8] sm:$0xff]  ;;  %v648_v57 = vld [vmem:[%s4095_s3 + $0xf8] sm:$0xff] }
  0x79   : > { %527 = vmatprep.subr.mxu0 %v135_v58  ;;  %598 = vmatprep.subr.mxu1 %v137_v59  ;;  %v645_v58 = vld [vmem:[%s4095_s3 + $0xe0] sm:$0xff]  ;;  %v647_v59 = vld [vmem:[%s4095_s3 + $0xf0] sm:$0xff] }
  0x7a   : > { %528 = vmatpush2.msra.mxu0 %v134_v60  ;;  %599 = vmatpush2.msra.mxu1 %v136_v61  ;;  %v642_v60 = vld [vmem:[%s4095_s3 + $0xc8] sm:$0xff]  ;;  %v644_v61 = vld [vmem:[%s4095_s3 + $0xd8] sm:$0xff] }
  0x7b   : > { %529 = vmatprep.subr.mxu0 %v131_v62  ;;  %600 = vmatprep.subr.mxu1 %v133_v63  ;;  %v641_v62 = vld [vmem:[%s4095_s3 + $0xc0] sm:$0xff]  ;;  %v643_v63 = vld [vmem:[%s4095_s3 + $0xd0] sm:$0xff] }
  0x7c   : > { %530 = vmatpush2.msra.mxu0 %v130_v4  ;;  %601 = vmatpush2.msra.mxu1 %v132_v5  ;;  %v638_v4 = vld [vmem:[%s4095_s3 + $0xa8] sm:$0xff]  ;;  %v640_v5 = vld [vmem:[%s4095_s3 + $0xb8] sm:$0xff] }
  0x7d   : > { %531 = vmatprep.subr.mxu0 %v127_v6  ;;  %602 = vmatprep.subr.mxu1 %v129_v7  ;;  %v637_v6 = vld [vmem:[%s4095_s3 + $0xa0] sm:$0xff]  ;;  %v639_v7 = vld [vmem:[%s4095_s3 + $0xb0] sm:$0xff] }
  0x7e   : > { %532 = vmatpush2.msra.mxu0 %v126_v8  ;;  %603 = vmatpush2.msra.mxu1 %v128_v9  ;;  %v634_v8 = vld [vmem:[%s4095_s3 + $0x88] sm:$0xff]  ;;  %v636_v9 = vld [vmem:[%s4095_s3 + $0x98] sm:$0xff] }
  0x7f   : > { %533 = vmatprep.subr.mxu0 %v123_v10  ;;  %604 = vmatprep.subr.mxu1 %v125_v11  ;;  %v633_v10 = vld [vmem:[%s4095_s3 + $0x80] sm:$0xff]  ;;  %v635_v11 = vld [vmem:[%s4095_s3 + $0x90] sm:$0xff] }
  0x80   : > { %534 = vmatpush2.msra.mxu0 %v122_v13  ;;  %605 = vmatpush2.msra.mxu1 %v124_v14  ;;  %v632_v13 = vld [vmem:[%s4095_s3 + $0x78] sm:$0xff]  ;;  %v629_v14 = vld [vmem:[%s4095_s3 + $0x60] sm:$0xff] }
  0x81   : > { %535 = vmatprep.subr.mxu0 %v119_v15  ;;  %606 = vmatprep.subr.mxu1 %v121_v16  ;;  %v631_v15 = vld [vmem:[%s4095_s3 + $0x70] sm:$0xff]  ;;  %v626_v16 = vld [vmem:[%s4095_s3 + $0x48] sm:$0xff] }
  0x82   : > { %536 = vmatpush2.msra.mxu0 %v118_v17  ;;  %607 = vmatpush2.msra.mxu1 %v120_v18  ;;  %v628_v17 = vld [vmem:[%s4095_s3 + $0x58] sm:$0xff]  ;;  %v625_v18 = vld [vmem:[%s4095_s3 + $0x40] sm:$0xff] }
  0x83   : > { %537 = vmatprep.subr.mxu0 %v115_v19  ;;  %608 = vmatprep.subr.mxu1 %v117_v20  ;;  %v627_v19 = vld [vmem:[%s4095_s3 + $0x50] sm:$0xff]  ;;  %v622_v20 = vld [vmem:[%s4095_s3 + $0x28] sm:$0xff] }
  0x84   : > { %538 = vmatpush2.msra.mxu0 %v114_v22  ;;  %539 = vmatprep.mubr.f32.mxu0 %v472_v21  ;;  %v621_v22 = vld [vmem:[%s4095_s3 + $0x20] sm:$0xff] }
  0x85   : > { %609 = vmatpush2.msra.mxu1 %v116_v23  ;;  %610 = vmatprep.mubr.f32.mxu1 %v472_v21  ;;  %v624_v21 = vld [vmem:[%s4095_s3 + $0x38] sm:$0xff]  ;;  %v623_v23 = vld [vmem:[%s4095_s3 + $0x30] sm:$0xff] }
  0x86   : > { %540 = vmatmul.mubr.f32.vlgmr.msra.gmra.mxu0 %v1840_v12  ;;  %611 = vmatmul.mubr.f32.vlgmr.msra.gmra.mxu1 %v1840_v12  ;;  %v630_v12 = vld [vmem:[%s4095_s3 + $0x68] sm:$0xff] }
  0x87   : > { %681 = vmatprep.subr.mxu0 %v678_v24  ;;  %752 = vmatprep.subr.mxu1 %v680_v25  ;;  %v618_v24 = vld [vmem:[%s4095_s3 + $0x8] sm:$0xff]  ;;  %v620_v25 = vld [vmem:[%s4095_s3 + $0x18] sm:$0xff] }
  0x88   : > { %682 = vmatpush1.msra.mxu0 %v677_v26  ;;  %753 = vmatpush1.msra.mxu1 %v679_v27  ;;  %v617_v26 = vld [vmem:[%s4095_s3] sm:$0xff]  ;;  %v619_v27 = vld [vmem:[%s4095_s3 + $0x10] sm:$0xff] }
  0x89   : > { %683 = vmatprep.subr.mxu0 %v674_v28  ;;  %754 = vmatprep.subr.mxu1 %v676_v29  ;;  %v1996_v28 = vmov 0.0   ;;  %v1079_v29 = vld [vmem:[%s4098_s6 + $0x1e8] sm:$0xff] }
  0x8a   : > { %684 = vmatpush1.msra.mxu0 %v673_v30  ;;  %755 = vmatpush1.msra.mxu1 %v675_v31  ;;  %v1081_v30 = vld [vmem:[%s4098_s6 + $0x1f8] sm:$0xff]  ;;  %v1078_v31 = vld [vmem:[%s4098_s6 + $0x1e0] sm:$0xff] }
  0x8b   : > { %685 = vmatprep.subr.mxu0 %v670_v32  ;;  %756 = vmatprep.subr.mxu1 %v672_v33  ;;  %v1080_v32 = vld [vmem:[%s4098_s6 + $0x1f0] sm:$0xff]  ;;  %v1075_v33 = vld [vmem:[%s4098_s6 + $0x1c8] sm:$0xff] }
  0x8c   : > { %686 = vmatpush1.msra.mxu0 %v669_v34  ;;  %757 = vmatpush1.msra.mxu1 %v671_v35  ;;  %v1077_v34 = vld [vmem:[%s4098_s6 + $0x1d8] sm:$0xff]  ;;  %v1074_v35 = vld [vmem:[%s4098_s6 + $0x1c0] sm:$0xff] }
  0x8d   : > { %687 = vmatprep.subr.mxu0 %v666_v36  ;;  %758 = vmatprep.subr.mxu1 %v668_v37  ;;  %v1076_v36 = vld [vmem:[%s4098_s6 + $0x1d0] sm:$0xff]  ;;  %v1073_v37 = vld [vmem:[%s4098_s6 + $0x1b8] sm:$0xff] }
  0x8e   : > { %688 = vmatpush1.msra.mxu0 %v665_v38  ;;  %759 = vmatpush1.msra.mxu1 %v667_v39  ;;  %v1070_v38 = vld [vmem:[%s4098_s6 + $0x1a0] sm:$0xff]  ;;  %v1072_v39 = vld [vmem:[%s4098_s6 + $0x1b0] sm:$0xff] }
  0x8f   : > { %689 = vmatprep.subr.mxu0 %v662_v40  ;;  %760 = vmatprep.subr.mxu1 %v664_v41  ;;  %v1067_v40 = vld [vmem:[%s4098_s6 + $0x188] sm:$0xff]  ;;  %v1069_v41 = vld [vmem:[%s4098_s6 + $0x198] sm:$0xff] }
  0x90   : > { %690 = vmatpush1.msra.mxu0 %v661_v42  ;;  %761 = vmatpush1.msra.mxu1 %v663_v43  ;;  %v1066_v42 = vld [vmem:[%s4098_s6 + $0x180] sm:$0xff]  ;;  %v1068_v43 = vld [vmem:[%s4098_s6 + $0x190] sm:$0xff] }
  0x91   : > { %691 = vmatprep.subr.mxu0 %v658_v44  ;;  %762 = vmatprep.subr.mxu1 %v660_v45  ;;  %v1063_v44 = vld [vmem:[%s4098_s6 + $0x168] sm:$0xff]  ;;  %v1065_v45 = vld [vmem:[%s4098_s6 + $0x178] sm:$0xff] }
  0x92   : > { %692 = vmatpush1.msra.mxu0 %v657_v46  ;;  %763 = vmatpush1.msra.mxu1 %v659_v47  ;;  %v1062_v46 = vld [vmem:[%s4098_s6 + $0x160] sm:$0xff]  ;;  %v1064_v47 = vld [vmem:[%s4098_s6 + $0x170] sm:$0xff] }
  0x93   : > { %693 = vmatprep.subr.mxu0 %v654_v48  ;;  %764 = vmatprep.subr.mxu1 %v656_v49  ;;  %v1059_v48 = vld [vmem:[%s4098_s6 + $0x148] sm:$0xff]  ;;  %v1061_v49 = vld [vmem:[%s4098_s6 + $0x158] sm:$0xff] }
  0x94   : > { %694 = vmatpush1.msra.mxu0 %v653_v50  ;;  %765 = vmatpush1.msra.mxu1 %v655_v51  ;;  %v1058_v50 = vld [vmem:[%s4098_s6 + $0x140] sm:$0xff]  ;;  %v1060_v51 = vld [vmem:[%s4098_s6 + $0x150] sm:$0xff] }
  0x95   : > { %695 = vmatprep.subr.mxu0 %v650_v52  ;;  %766 = vmatprep.subr.mxu1 %v652_v53  ;;  %v1055_v52 = vld [vmem:[%s4098_s6 + $0x128] sm:$0xff]  ;;  %v1057_v53 = vld [vmem:[%s4098_s6 + $0x138] sm:$0xff] }
  0x96   : > { %696 = vmatpush1.msra.mxu0 %v649_v54  ;;  %767 = vmatpush1.msra.mxu1 %v651_v55  ;;  %v1054_v54 = vld [vmem:[%s4098_s6 + $0x120] sm:$0xff]  ;;  %v1056_v55 = vld [vmem:[%s4098_s6 + $0x130] sm:$0xff] }
  0x97   : > { %697 = vmatprep.subr.mxu0 %v646_v56  ;;  %768 = vmatprep.subr.mxu1 %v648_v57  ;;  %v1051_v56 = vld [vmem:[%s4098_s6 + $0x108] sm:$0xff]  ;;  %v1053_v57 = vld [vmem:[%s4098_s6 + $0x118] sm:$0xff] }
  0x98   : > { %698 = vmatpush1.msra.mxu0 %v645_v58  ;;  %769 = vmatpush1.msra.mxu1 %v647_v59  ;;  %v1050_v58 = vld [vmem:[%s4098_s6 + $0x100] sm:$0xff]  ;;  %v1052_v59 = vld [vmem:[%s4098_s6 + $0x110] sm:$0xff] }
  0x99   : > { %699 = vmatprep.subr.mxu0 %v642_v60  ;;  %770 = vmatprep.subr.mxu1 %v644_v61  ;;  %v1047_v60 = vld [vmem:[%s4098_s6 + $0xe8] sm:$0xff]  ;;  %v1049_v61 = vld [vmem:[%s4098_s6 + $0xf8] sm:$0xff] }
  0x9a   : > { %700 = vmatpush1.msra.mxu0 %v641_v62  ;;  %771 = vmatpush1.msra.mxu1 %v643_v63  ;;  %v1046_v62 = vld [vmem:[%s4098_s6 + $0xe0] sm:$0xff]  ;;  %v1048_v63 = vld [vmem:[%s4098_s6 + $0xf0] sm:$0xff] }
  0x9b   : > { %701 = vmatprep.subr.mxu0 %v638_v4  ;;  %772 = vmatprep.subr.mxu1 %v640_v5  ;;  %v1043_v4 = vld [vmem:[%s4098_s6 + $0xc8] sm:$0xff]  ;;  %v1045_v5 = vld [vmem:[%s4098_s6 + $0xd8] sm:$0xff] }
  0x9c   : > { %702 = vmatpush1.msra.mxu0 %v637_v6  ;;  %773 = vmatpush1.msra.mxu1 %v639_v7  ;;  %v1042_v6 = vld [vmem:[%s4098_s6 + $0xc0] sm:$0xff]  ;;  %v1044_v7 = vld [vmem:[%s4098_s6 + $0xd0] sm:$0xff] }
  0x9d   : > { %703 = vmatprep.subr.mxu0 %v634_v8  ;;  %774 = vmatprep.subr.mxu1 %v636_v9  ;;  %v1039_v8 = vld [vmem:[%s4098_s6 + $0xa8] sm:$0xff]  ;;  %v1041_v9 = vld [vmem:[%s4098_s6 + $0xb8] sm:$0xff] }
  0x9e   : > { %704 = vmatpush1.msra.mxu0 %v633_v10  ;;  %775 = vmatpush1.msra.mxu1 %v635_v11  ;;  %v1038_v10 = vld [vmem:[%s4098_s6 + $0xa0] sm:$0xff]  ;;  %v1040_v11 = vld [vmem:[%s4098_s6 + $0xb0] sm:$0xff] }
  0x9f   : > { %705 = vmatprep.subr.mxu0 %v630_v12  ;;  %776 = vmatprep.subr.mxu1 %v632_v13  ;;  %v1035_v12 = vld [vmem:[%s4098_s6 + $0x88] sm:$0xff]  ;;  %v1037_v13 = vld [vmem:[%s4098_s6 + $0x98] sm:$0xff] }
  0xa0   : > { %706 = vmatpush1.msra.mxu0 %v629_v14  ;;  %777 = vmatpush1.msra.mxu1 %v631_v15  ;;  %v1034_v14 = vld [vmem:[%s4098_s6 + $0x80] sm:$0xff]  ;;  %v1036_v15 = vld [vmem:[%s4098_s6 + $0x90] sm:$0xff] }
  0xa1   : > { %707 = vmatprep.subr.mxu0 %v626_v16  ;;  %778 = vmatprep.subr.mxu1 %v628_v17  ;;  %v1031_v16 = vld [vmem:[%s4098_s6 + $0x68] sm:$0xff]  ;;  %v1033_v17 = vld [vmem:[%s4098_s6 + $0x78] sm:$0xff] }
  0xa2   : > { %708 = vmatpush1.msra.mxu0 %v625_v18  ;;  %779 = vmatpush1.msra.mxu1 %v627_v19  ;;  %v1030_v18 = vld [vmem:[%s4098_s6 + $0x60] sm:$0xff]  ;;  %v1032_v19 = vld [vmem:[%s4098_s6 + $0x70] sm:$0xff] }
  0xa3   : > { %709 = vmatprep.subr.mxu0 %v622_v20  ;;  %780 = vmatprep.subr.mxu1 %v624_v21  ;;  %v1027_v20 = vld [vmem:[%s4098_s6 + $0x48] sm:$0xff]  ;;  %v1029_v21 = vld [vmem:[%s4098_s6 + $0x58] sm:$0xff] }
  0xa4   : > { %710 = vmatpush1.msra.mxu0 %v621_v22  ;;  %781 = vmatpush1.msra.mxu1 %v623_v23  ;;  %v1026_v22 = vld [vmem:[%s4098_s6 + $0x40] sm:$0xff]  ;;  %v1028_v23 = vld [vmem:[%s4098_s6 + $0x50] sm:$0xff] }
  0xa5   : > { %711 = vmatprep.subr.mxu0 %v618_v24  ;;  %782 = vmatprep.subr.mxu1 %v620_v25  ;;  %v1023_v24 = vld [vmem:[%s4098_s6 + $0x28] sm:$0xff]  ;;  %v1025_v25 = vld [vmem:[%s4098_s6 + $0x38] sm:$0xff] }
  0xa6   : > { %712 = vmatpush1.msra.mxu0 %v617_v26  ;;  %745 = vmatprep.mubr.f32.mxu0 %v1996_v28  ;;  %v1022_v26 = vld [vmem:[%s4098_s6 + $0x20] sm:$0xff] }
  0xa7   : > { %783 = vmatpush1.msra.mxu1 %v619_v27  ;;  %816 = vmatprep.mubr.f32.mxu1 %v1996_v28  ;;  %v1024_v27 = vld [vmem:[%s4098_s6 + $0x30] sm:$0xff] }
  0xa8   : > { %746 = vmatmul.mubr.f32.vlgmr.msra.gmra.mxu0 %v1990_v3  ;;  %817 = vmatmul.mubr.f32.vlgmr.msra.gmra.mxu1 %v1990_v3  ;;  %v1071_v3 = vld [vmem:[%s4098_s6 + $0x1a8] sm:$0xff] }
  0xa9   : > { %1157 = vmatprep.subr.mxu0 %v1079_v29  ;;  %1228 = vmatprep.subr.mxu1 %v1081_v30  ;;  %v1019_v29 = vld [vmem:[%s4098_s6 + $0x8] sm:$0xff]  ;;  %v1021_v30 = vld [vmem:[%s4098_s6 + $0x18] sm:$0xff] }
  0xaa   : > { %1158 = vmatpush1.msra.mxu0 %v1078_v31  ;;  %1229 = vmatpush1.msra.mxu1 %v1080_v32  ;;  %v1018_v31 = vld [vmem:[%s4098_s6] sm:$0xff]  ;;  %v1020_v32 = vld [vmem:[%s4098_s6 + $0x10] sm:$0xff] }
  0xab   : > { %1159 = vmatprep.subr.mxu0 %v1075_v33  ;;  %1230 = vmatprep.subr.mxu1 %v1077_v34  ;;  %v1143_v33 = vld [vmem:[%s4098_s6 + $0x3e8] sm:$0xff]  ;;  %v1145_v34 = vld [vmem:[%s4098_s6 + $0x3f8] sm:$0xff] }
  0xac   : > { %1160 = vmatpush1.msra.mxu0 %v1074_v35  ;;  %1231 = vmatpush1.msra.mxu1 %v1076_v36  ;;  %v1142_v35 = vld [vmem:[%s4098_s6 + $0x3e0] sm:$0xff]  ;;  %v1144_v36 = vld [vmem:[%s4098_s6 + $0x3f0] sm:$0xff] }
  0xad   : > { %1161 = vmatprep.subr.mxu0 %v1071_v3  ;;  %1232 = vmatprep.subr.mxu1 %v1073_v37  ;;  %v1139_v3 = vld [vmem:[%s4098_s6 + $0x3c8] sm:$0xff]  ;;  %v1141_v37 = vld [vmem:[%s4098_s6 + $0x3d8] sm:$0xff] }
  0xae   : > { %1162 = vmatpush1.msra.mxu0 %v1070_v38  ;;  %1233 = vmatpush1.msra.mxu1 %v1072_v39  ;;  %v1138_v38 = vld [vmem:[%s4098_s6 + $0x3c0] sm:$0xff]  ;;  %v1140_v39 = vld [vmem:[%s4098_s6 + $0x3d0] sm:$0xff] }
  0xaf   : > { %1163 = vmatprep.subr.mxu0 %v1067_v40  ;;  %1234 = vmatprep.subr.mxu1 %v1069_v41  ;;  %v1135_v40 = vld [vmem:[%s4098_s6 + $0x3a8] sm:$0xff]  ;;  %v1137_v41 = vld [vmem:[%s4098_s6 + $0x3b8] sm:$0xff] }
  0xb0   : > { %1164 = vmatpush1.msra.mxu0 %v1066_v42  ;;  %1235 = vmatpush1.msra.mxu1 %v1068_v43  ;;  %v1134_v42 = vld [vmem:[%s4098_s6 + $0x3a0] sm:$0xff]  ;;  %v1136_v43 = vld [vmem:[%s4098_s6 + $0x3b0] sm:$0xff] }
  0xb1   : > { %1165 = vmatprep.subr.mxu0 %v1063_v44  ;;  %1236 = vmatprep.subr.mxu1 %v1065_v45  ;;  %v1131_v44 = vld [vmem:[%s4098_s6 + $0x388] sm:$0xff]  ;;  %v1133_v45 = vld [vmem:[%s4098_s6 + $0x398] sm:$0xff] }
  0xb2   : > { %1166 = vmatpush1.msra.mxu0 %v1062_v46  ;;  %1237 = vmatpush1.msra.mxu1 %v1064_v47  ;;  %v1130_v46 = vld [vmem:[%s4098_s6 + $0x380] sm:$0xff]  ;;  %v1132_v47 = vld [vmem:[%s4098_s6 + $0x390] sm:$0xff] }
  0xb3   : > { %1167 = vmatprep.subr.mxu0 %v1059_v48  ;;  %1238 = vmatprep.subr.mxu1 %v1061_v49  ;;  %v1127_v48 = vld [vmem:[%s4098_s6 + $0x368] sm:$0xff]  ;;  %v1129_v49 = vld [vmem:[%s4098_s6 + $0x378] sm:$0xff] }
  0xb4   : > { %1168 = vmatpush1.msra.mxu0 %v1058_v50  ;;  %1239 = vmatpush1.msra.mxu1 %v1060_v51  ;;  %v1126_v50 = vld [vmem:[%s4098_s6 + $0x360] sm:$0xff]  ;;  %v1128_v51 = vld [vmem:[%s4098_s6 + $0x370] sm:$0xff] }
  0xb5   : > { %1169 = vmatprep.subr.mxu0 %v1055_v52  ;;  %1240 = vmatprep.subr.mxu1 %v1057_v53  ;;  %v1123_v52 = vld [vmem:[%s4098_s6 + $0x348] sm:$0xff]  ;;  %v1125_v53 = vld [vmem:[%s4098_s6 + $0x358] sm:$0xff] }
  0xb6   : > { %1170 = vmatpush1.msra.mxu0 %v1054_v54  ;;  %1241 = vmatpush1.msra.mxu1 %v1056_v55  ;;  %v1122_v54 = vld [vmem:[%s4098_s6 + $0x340] sm:$0xff]  ;;  %v1124_v55 = vld [vmem:[%s4098_s6 + $0x350] sm:$0xff] }
  0xb7   : > { %1171 = vmatprep.subr.mxu0 %v1051_v56  ;;  %1242 = vmatprep.subr.mxu1 %v1053_v57  ;;  %v1119_v56 = vld [vmem:[%s4098_s6 + $0x328] sm:$0xff]  ;;  %v1121_v57 = vld [vmem:[%s4098_s6 + $0x338] sm:$0xff] }
  0xb8   : > { %1172 = vmatpush1.msra.mxu0 %v1050_v58  ;;  %1243 = vmatpush1.msra.mxu1 %v1052_v59  ;;  %v1118_v58 = vld [vmem:[%s4098_s6 + $0x320] sm:$0xff]  ;;  %v1120_v59 = vld [vmem:[%s4098_s6 + $0x330] sm:$0xff] }
  0xb9   : > { %1173 = vmatprep.subr.mxu0 %v1047_v60  ;;  %1244 = vmatprep.subr.mxu1 %v1049_v61  ;;  %v1115_v60 = vld [vmem:[%s4098_s6 + $0x308] sm:$0xff]  ;;  %v1117_v61 = vld [vmem:[%s4098_s6 + $0x318] sm:$0xff] }
  0xba   : > { %1174 = vmatpush1.msra.mxu0 %v1046_v62  ;;  %1245 = vmatpush1.msra.mxu1 %v1048_v63  ;;  %v1114_v62 = vld [vmem:[%s4098_s6 + $0x300] sm:$0xff]  ;;  %v1116_v63 = vld [vmem:[%s4098_s6 + $0x310] sm:$0xff] }
  0xbb   : > { %1175 = vmatprep.subr.mxu0 %v1043_v4  ;;  %1246 = vmatprep.subr.mxu1 %v1045_v5  ;;  %v1111_v4 = vld [vmem:[%s4098_s6 + $0x2e8] sm:$0xff]  ;;  %v1113_v5 = vld [vmem:[%s4098_s6 + $0x2f8] sm:$0xff] }
  0xbc   : > { %1176 = vmatpush1.msra.mxu0 %v1042_v6  ;;  %1247 = vmatpush1.msra.mxu1 %v1044_v7  ;;  %v1110_v6 = vld [vmem:[%s4098_s6 + $0x2e0] sm:$0xff]  ;;  %v1112_v7 = vld [vmem:[%s4098_s6 + $0x2f0] sm:$0xff] }
  0xbd   : > { %1177 = vmatprep.subr.mxu0 %v1039_v8  ;;  %1248 = vmatprep.subr.mxu1 %v1041_v9  ;;  %v1107_v8 = vld [vmem:[%s4098_s6 + $0x2c8] sm:$0xff]  ;;  %v1109_v9 = vld [vmem:[%s4098_s6 + $0x2d8] sm:$0xff] }
  0xbe   : > { %1178 = vmatpush1.msra.mxu0 %v1038_v10  ;;  %1249 = vmatpush1.msra.mxu1 %v1040_v11  ;;  %v1106_v10 = vld [vmem:[%s4098_s6 + $0x2c0] sm:$0xff]  ;;  %v1108_v11 = vld [vmem:[%s4098_s6 + $0x2d0] sm:$0xff] }
  0xbf   : > { %1179 = vmatprep.subr.mxu0 %v1035_v12  ;;  %1250 = vmatprep.subr.mxu1 %v1037_v13  ;;  %v1103_v12 = vld [vmem:[%s4098_s6 + $0x2a8] sm:$0xff]  ;;  %v1105_v13 = vld [vmem:[%s4098_s6 + $0x2b8] sm:$0xff] }
  0xc0   : > { %1180 = vmatpush1.msra.mxu0 %v1034_v14  ;;  %1251 = vmatpush1.msra.mxu1 %v1036_v15  ;;  %v1102_v14 = vld [vmem:[%s4098_s6 + $0x2a0] sm:$0xff]  ;;  %v1104_v15 = vld [vmem:[%s4098_s6 + $0x2b0] sm:$0xff] }
  0xc1   : > { %1181 = vmatprep.subr.mxu0 %v1031_v16  ;;  %1252 = vmatprep.subr.mxu1 %v1033_v17  ;;  %v1099_v16 = vld [vmem:[%s4098_s6 + $0x288] sm:$0xff]  ;;  %v1101_v17 = vld [vmem:[%s4098_s6 + $0x298] sm:$0xff] }
  0xc2   : > { %1182 = vmatpush1.msra.mxu0 %v1030_v18  ;;  %1253 = vmatpush1.msra.mxu1 %v1032_v19  ;;  %v1098_v18 = vld [vmem:[%s4098_s6 + $0x280] sm:$0xff]  ;;  %v1100_v19 = vld [vmem:[%s4098_s6 + $0x290] sm:$0xff] }
  0xc3   : > { %1183 = vmatprep.subr.mxu0 %v1027_v20  ;;  %1254 = vmatprep.subr.mxu1 %v1029_v21  ;;  %v1095_v20 = vld [vmem:[%s4098_s6 + $0x268] sm:$0xff]  ;;  %v1097_v21 = vld [vmem:[%s4098_s6 + $0x278] sm:$0xff] }
  0xc4   : > { %1184 = vmatpush1.msra.mxu0 %v1026_v22  ;;  %1255 = vmatpush1.msra.mxu1 %v1028_v23  ;;  %v1094_v22 = vld [vmem:[%s4098_s6 + $0x260] sm:$0xff]  ;;  %v1096_v23 = vld [vmem:[%s4098_s6 + $0x270] sm:$0xff] }
  0xc5   : > { %1185 = vmatprep.subr.mxu0 %v1023_v24  ;;  %1256 = vmatprep.subr.mxu1 %v1025_v25  ;;  %v1091_v24 = vld [vmem:[%s4098_s6 + $0x248] sm:$0xff]  ;;  %v1093_v25 = vld [vmem:[%s4098_s6 + $0x258] sm:$0xff] }
  0xc6   : > { %1186 = vmatpush1.msra.mxu0 %v1022_v26  ;;  %1257 = vmatpush1.msra.mxu1 %v1024_v27  ;;  %v1090_v26 = vld [vmem:[%s4098_s6 + $0x240] sm:$0xff]  ;;  %v1092_v27 = vld [vmem:[%s4098_s6 + $0x250] sm:$0xff] }
  0xc7   : > { %1187 = vmatprep.subr.mxu0 %v1019_v29  ;;  %1258 = vmatprep.subr.mxu1 %v1021_v30  ;;  %v1847_v29 = vld.sshfl [vmem:[%s3398_s11 + $0x4] sm:$0x33 pattern:$0x76325410]  ;;  %v1087_v30 = vld [vmem:[%s4098_s6 + $0x228] sm:$0xff] }
  0xc8   : > { %1188 = vmatpush1.msra.mxu0 %v1018_v31  ;;  %1259 = vmatpush1.msra.mxu1 %v1020_v32  ;;  %v1089_v31 = vld [vmem:[%s4098_s6 + $0x238] sm:$0xff]  ;;  %v1086_v32 = vld [vmem:[%s4098_s6 + $0x220] sm:$0xff] }
  0xc9   : > { %1189 = vmatprep.subr.mxu0 %v1143_v33  ;;  %1260 = vmatprep.subr.mxu1 %v1145_v34  ;;  %v1088_v33 = vld [vmem:[%s4098_s6 + $0x230] sm:$0xff]  ;;  %v1083_v34 = vld [vmem:[%s4098_s6 + $0x208] sm:$0xff] }
  0xca   : > { %1190 = vmatpush2.msra.mxu0 %v1142_v35  ;;  %1261 = vmatpush2.msra.mxu1 %v1144_v36  ;;  %v1085_v35 = vld [vmem:[%s4098_s6 + $0x218] sm:$0xff]  ;;  %v1154_v36 = vcombine.high %v1847_v29, %v1847_v29 }
  0xcb   : > { %1191 = vmatprep.subr.mxu0 %v1139_v3  ;;  %1262 = vmatprep.subr.mxu1 %v1141_v37  ;;  %v1082_v3 = vld [vmem:[%s4098_s6 + $0x200] sm:$0xff]  ;;  %v1084_v37 = vld [vmem:[%s4098_s6 + $0x210] sm:$0xff] }
  0xcc   : > { %1192 = vmatpush2.msra.mxu0 %v1138_v38  ;;  %1263 = vmatpush2.msra.mxu1 %v1140_v39  ;;  %v946_v38 = vld [vmem:[%s4097_s5 + $0x1e8] sm:$0xff]  ;;  %v948_v39 = vld [vmem:[%s4097_s5 + $0x1f8] sm:$0xff] }
  0xcd   : > { %1193 = vmatprep.subr.mxu0 %v1135_v40  ;;  %1264 = vmatprep.subr.mxu1 %v1137_v41  ;;  %v945_v40 = vld [vmem:[%s4097_s5 + $0x1e0] sm:$0xff]  ;;  %v947_v41 = vld [vmem:[%s4097_s5 + $0x1f0] sm:$0xff] }
  0xce   : > { %1194 = vmatpush2.msra.mxu0 %v1134_v42  ;;  %1265 = vmatpush2.msra.mxu1 %v1136_v43  ;;  %v942_v42 = vld [vmem:[%s4097_s5 + $0x1c8] sm:$0xff]  ;;  %v944_v43 = vld [vmem:[%s4097_s5 + $0x1d8] sm:$0xff] }
  0xcf   : > { %1195 = vmatprep.subr.mxu0 %v1131_v44  ;;  %1266 = vmatprep.subr.mxu1 %v1133_v45  ;;  %v941_v44 = vld [vmem:[%s4097_s5 + $0x1c0] sm:$0xff]  ;;  %v943_v45 = vld [vmem:[%s4097_s5 + $0x1d0] sm:$0xff] }
  0xd0   : > { %1196 = vmatpush2.msra.mxu0 %v1130_v46  ;;  %1267 = vmatpush2.msra.mxu1 %v1132_v47  ;;  %v938_v46 = vld [vmem:[%s4097_s5 + $0x1a8] sm:$0xff]  ;;  %v940_v47 = vld [vmem:[%s4097_s5 + $0x1b8] sm:$0xff] }
  0xd1   : > { %1197 = vmatprep.subr.mxu0 %v1127_v48  ;;  %1268 = vmatprep.subr.mxu1 %v1129_v49  ;;  %v937_v48 = vld [vmem:[%s4097_s5 + $0x1a0] sm:$0xff]  ;;  %v939_v49 = vld [vmem:[%s4097_s5 + $0x1b0] sm:$0xff] }
  0xd2   : > { %1198 = vmatpush2.msra.mxu0 %v1126_v50  ;;  %1269 = vmatpush2.msra.mxu1 %v1128_v51  ;;  %v934_v50 = vld [vmem:[%s4097_s5 + $0x188] sm:$0xff]  ;;  %v936_v51 = vld [vmem:[%s4097_s5 + $0x198] sm:$0xff] }
  0xd3   : > { %1199 = vmatprep.subr.mxu0 %v1123_v52  ;;  %1270 = vmatprep.subr.mxu1 %v1125_v53  ;;  %v933_v52 = vld [vmem:[%s4097_s5 + $0x180] sm:$0xff]  ;;  %v935_v53 = vld [vmem:[%s4097_s5 + $0x190] sm:$0xff] }
  0xd4   : > { %1200 = vmatpush2.msra.mxu0 %v1122_v54  ;;  %1271 = vmatpush2.msra.mxu1 %v1124_v55  ;;  %v930_v54 = vld [vmem:[%s4097_s5 + $0x168] sm:$0xff]  ;;  %v932_v55 = vld [vmem:[%s4097_s5 + $0x178] sm:$0xff] }
  0xd5   : > { %1201 = vmatprep.subr.mxu0 %v1119_v56  ;;  %1272 = vmatprep.subr.mxu1 %v1121_v57  ;;  %v929_v56 = vld [vmem:[%s4097_s5 + $0x160] sm:$0xff]  ;;  %v931_v57 = vld [vmem:[%s4097_s5 + $0x170] sm:$0xff] }
  0xd6   : > { %1202 = vmatpush2.msra.mxu0 %v1118_v58  ;;  %1273 = vmatpush2.msra.mxu1 %v1120_v59  ;;  %v926_v58 = vld [vmem:[%s4097_s5 + $0x148] sm:$0xff]  ;;  %v928_v59 = vld [vmem:[%s4097_s5 + $0x158] sm:$0xff] }
  0xd7   : > { %1203 = vmatprep.subr.mxu0 %v1115_v60  ;;  %1274 = vmatprep.subr.mxu1 %v1117_v61  ;;  %v925_v60 = vld [vmem:[%s4097_s5 + $0x140] sm:$0xff]  ;;  %v927_v61 = vld [vmem:[%s4097_s5 + $0x150] sm:$0xff] }
  0xd8   : > { %1204 = vmatpush2.msra.mxu0 %v1114_v62  ;;  %1275 = vmatpush2.msra.mxu1 %v1116_v63  ;;  %v922_v62 = vld [vmem:[%s4097_s5 + $0x128] sm:$0xff]  ;;  %v924_v63 = vld [vmem:[%s4097_s5 + $0x138] sm:$0xff] }
  0xd9   : > { %1205 = vmatprep.subr.mxu0 %v1111_v4  ;;  %1276 = vmatprep.subr.mxu1 %v1113_v5  ;;  %v921_v4 = vld [vmem:[%s4097_s5 + $0x120] sm:$0xff]  ;;  %v923_v5 = vld [vmem:[%s4097_s5 + $0x130] sm:$0xff] }
  0xda   : > { %1206 = vmatpush2.msra.mxu0 %v1110_v6  ;;  %1277 = vmatpush2.msra.mxu1 %v1112_v7  ;;  %v918_v6 = vld [vmem:[%s4097_s5 + $0x108] sm:$0xff]  ;;  %v920_v7 = vld [vmem:[%s4097_s5 + $0x118] sm:$0xff] }
  0xdb   : > { %1207 = vmatprep.subr.mxu0 %v1107_v8  ;;  %1278 = vmatprep.subr.mxu1 %v1109_v9  ;;  %v917_v8 = vld [vmem:[%s4097_s5 + $0x100] sm:$0xff]  ;;  %v919_v9 = vld [vmem:[%s4097_s5 + $0x110] sm:$0xff] }
  0xdc   : > { %1208 = vmatpush2.msra.mxu0 %v1106_v10  ;;  %1279 = vmatpush2.msra.mxu1 %v1108_v11  ;;  %v914_v10 = vld [vmem:[%s4097_s5 + $0xe8] sm:$0xff]  ;;  %v916_v11 = vld [vmem:[%s4097_s5 + $0xf8] sm:$0xff] }
  0xdd   : > { %1209 = vmatprep.subr.mxu0 %v1103_v12  ;;  %1280 = vmatprep.subr.mxu1 %v1105_v13  ;;  %v913_v12 = vld [vmem:[%s4097_s5 + $0xe0] sm:$0xff]  ;;  %v915_v13 = vld [vmem:[%s4097_s5 + $0xf0] sm:$0xff] }
  0xde   : > { %1210 = vmatpush2.msra.mxu0 %v1102_v14  ;;  %1281 = vmatpush2.msra.mxu1 %v1104_v15  ;;  %v910_v14 = vld [vmem:[%s4097_s5 + $0xc8] sm:$0xff]  ;;  %v912_v15 = vld [vmem:[%s4097_s5 + $0xd8] sm:$0xff] }
  0xdf   : > { %1211 = vmatprep.subr.mxu0 %v1099_v16  ;;  %1282 = vmatprep.subr.mxu1 %v1101_v17  ;;  %v909_v16 = vld [vmem:[%s4097_s5 + $0xc0] sm:$0xff]  ;;  %v911_v17 = vld [vmem:[%s4097_s5 + $0xd0] sm:$0xff] }
  0xe0   : > { %1212 = vmatpush2.msra.mxu0 %v1098_v18  ;;  %1283 = vmatpush2.msra.mxu1 %v1100_v19  ;;  %v906_v18 = vld [vmem:[%s4097_s5 + $0xa8] sm:$0xff]  ;;  %v908_v19 = vld [vmem:[%s4097_s5 + $0xb8] sm:$0xff] }
  0xe1   : > { %1213 = vmatprep.subr.mxu0 %v1095_v20  ;;  %1284 = vmatprep.subr.mxu1 %v1097_v21  ;;  %v905_v20 = vld [vmem:[%s4097_s5 + $0xa0] sm:$0xff]  ;;  %v907_v21 = vld [vmem:[%s4097_s5 + $0xb0] sm:$0xff] }
  0xe2   : > { %1214 = vmatpush2.msra.mxu0 %v1094_v22  ;;  %1285 = vmatpush2.msra.mxu1 %v1096_v23  ;;  %v902_v22 = vld [vmem:[%s4097_s5 + $0x88] sm:$0xff]  ;;  %v904_v23 = vld [vmem:[%s4097_s5 + $0x98] sm:$0xff] }
  0xe3   : > { %1215 = vmatprep.subr.mxu0 %v1091_v24  ;;  %1286 = vmatprep.subr.mxu1 %v1093_v25  ;;  %v901_v24 = vld [vmem:[%s4097_s5 + $0x80] sm:$0xff]  ;;  %v903_v25 = vld [vmem:[%s4097_s5 + $0x90] sm:$0xff] }
  0xe4   : > { %1216 = vmatpush2.msra.mxu0 %v1090_v26  ;;  %1287 = vmatpush2.msra.mxu1 %v1092_v27  ;;  %v898_v26 = vld [vmem:[%s4097_s5 + $0x68] sm:$0xff]  ;;  %v900_v27 = vld [vmem:[%s4097_s5 + $0x78] sm:$0xff] }
  0xe5   : > { %1217 = vmatprep.subr.mxu0 %v1087_v30  ;;  %1288 = vmatprep.subr.mxu1 %v1089_v31  ;;  %v899_v30 = vld [vmem:[%s4097_s5 + $0x70] sm:$0xff]  ;;  %v894_v31 = vld [vmem:[%s4097_s5 + $0x48] sm:$0xff] }
  0xe6   : > { %1218 = vmatpush2.msra.mxu0 %v1086_v32  ;;  %1289 = vmatpush2.msra.mxu1 %v1088_v33  ;;  %v896_v32 = vld [vmem:[%s4097_s5 + $0x58] sm:$0xff]  ;;  %v893_v33 = vld [vmem:[%s4097_s5 + $0x40] sm:$0xff] }
  0xe7   : > { %1219 = vmatprep.subr.mxu0 %v1083_v34  ;;  %1290 = vmatprep.subr.mxu1 %v1085_v35  ;;  %v895_v34 = vld [vmem:[%s4097_s5 + $0x50] sm:$0xff]  ;;  %v890_v35 = vld [vmem:[%s4097_s5 + $0x28] sm:$0xff] }
  0xe8   : > { %1220 = vmatpush2.msra.mxu0 %v1082_v3  ;;  %1221 = vmatprep.mubr.f32.mxu0 %v1154_v36  ;;  %v889_v3 = vld [vmem:[%s4097_s5 + $0x20] sm:$0xff] }
  0xe9   : > { %1291 = vmatpush2.msra.mxu1 %v1084_v37  ;;  %1222 = vmatmul.mubr.f32.vlgmr.msra.gmra.mxu0 %v1847_v29  ;;  %v891_v37 = vld [vmem:[%s4097_s5 + $0x30] sm:$0xff] }
  0xea   : > { %1292 = vmatprep.mubr.f32.mxu1 %v1154_v36  ;;  %1310 = vmatprep.subr.mxu0 %v946_v38  ;;  %v892_v36 = vld [vmem:[%s4097_s5 + $0x38] sm:$0xff]  ;;  %v886_v38 = vld [vmem:[%s4097_s5 + $0x8] sm:$0xff] }
  0xeb   : > { %1381 = vmatprep.subr.mxu1 %v948_v39  ;;  %1293 = vmatmul.mubr.f32.vlgmr.msra.gmra.mxu1 %v1847_v29  ;;  %v897_v29 = vld [vmem:[%s4097_s5 + $0x60] sm:$0xff]  ;;  %v888_v39 = vld [vmem:[%s4097_s5 + $0x18] sm:$0xff] }
  0xec   : > { %1311 = vmatpush1.msra.mxu0 %v945_v40  ;;  %1382 = vmatpush1.msra.mxu1 %v947_v41  ;;  %v885_v40 = vld [vmem:[%s4097_s5] sm:$0xff]  ;;  %v887_v41 = vld [vmem:[%s4097_s5 + $0x10] sm:$0xff] }
  0xed   : > { %1312 = vmatprep.subr.mxu0 %v942_v42  ;;  %1383 = vmatprep.subr.mxu1 %v944_v43  ;;  %v1010_v42 = vld [vmem:[%s4097_s5 + $0x3e8] sm:$0xff]  ;;  %v1012_v43 = vld [vmem:[%s4097_s5 + $0x3f8] sm:$0xff] }
  0xee   : > { %1313 = vmatpush1.msra.mxu0 %v941_v44  ;;  %1384 = vmatpush1.msra.mxu1 %v943_v45  ;;  %v1009_v44 = vld [vmem:[%s4097_s5 + $0x3e0] sm:$0xff]  ;;  %v1011_v45 = vld [vmem:[%s4097_s5 + $0x3f0] sm:$0xff] }
  0xef   : > { %1314 = vmatprep.subr.mxu0 %v938_v46  ;;  %1385 = vmatprep.subr.mxu1 %v940_v47  ;;  %v1006_v46 = vld [vmem:[%s4097_s5 + $0x3c8] sm:$0xff]  ;;  %v1008_v47 = vld [vmem:[%s4097_s5 + $0x3d8] sm:$0xff] }
  0xf0   : > { %1315 = vmatpush1.msra.mxu0 %v937_v48  ;;  %1386 = vmatpush1.msra.mxu1 %v939_v49  ;;  %v1005_v48 = vld [vmem:[%s4097_s5 + $0x3c0] sm:$0xff]  ;;  %v1007_v49 = vld [vmem:[%s4097_s5 + $0x3d0] sm:$0xff] }
  0xf1   : > { %1316 = vmatprep.subr.mxu0 %v934_v50  ;;  %1387 = vmatprep.subr.mxu1 %v936_v51  ;;  %v1002_v50 = vld [vmem:[%s4097_s5 + $0x3a8] sm:$0xff]  ;;  %v1004_v51 = vld [vmem:[%s4097_s5 + $0x3b8] sm:$0xff] }
  0xf2   : > { %1317 = vmatpush1.msra.mxu0 %v933_v52  ;;  %1388 = vmatpush1.msra.mxu1 %v935_v53  ;;  %v1001_v52 = vld [vmem:[%s4097_s5 + $0x3a0] sm:$0xff]  ;;  %v1003_v53 = vld [vmem:[%s4097_s5 + $0x3b0] sm:$0xff] }
  0xf3   : > { %1318 = vmatprep.subr.mxu0 %v930_v54  ;;  %1389 = vmatprep.subr.mxu1 %v932_v55  ;;  %v998_v54 = vld [vmem:[%s4097_s5 + $0x388] sm:$0xff]  ;;  %v1000_v55 = vld [vmem:[%s4097_s5 + $0x398] sm:$0xff] }
  0xf4   : > { %1319 = vmatpush1.msra.mxu0 %v929_v56  ;;  %1390 = vmatpush1.msra.mxu1 %v931_v57  ;;  %v997_v56 = vld [vmem:[%s4097_s5 + $0x380] sm:$0xff]  ;;  %v999_v57 = vld [vmem:[%s4097_s5 + $0x390] sm:$0xff] }
  0xf5   : > { %1320 = vmatprep.subr.mxu0 %v926_v58  ;;  %1391 = vmatprep.subr.mxu1 %v928_v59  ;;  %v994_v58 = vld [vmem:[%s4097_s5 + $0x368] sm:$0xff]  ;;  %v996_v59 = vld [vmem:[%s4097_s5 + $0x378] sm:$0xff] }
  0xf6   : > { %1321 = vmatpush1.msra.mxu0 %v925_v60  ;;  %1392 = vmatpush1.msra.mxu1 %v927_v61  ;;  %v993_v60 = vld [vmem:[%s4097_s5 + $0x360] sm:$0xff]  ;;  %v995_v61 = vld [vmem:[%s4097_s5 + $0x370] sm:$0xff] }
  0xf7   : > { %1322 = vmatprep.subr.mxu0 %v922_v62  ;;  %1393 = vmatprep.subr.mxu1 %v924_v63  ;;  %v990_v62 = vld [vmem:[%s4097_s5 + $0x348] sm:$0xff]  ;;  %v992_v63 = vld [vmem:[%s4097_s5 + $0x358] sm:$0xff] }
  0xf8   : > { %1323 = vmatpush1.msra.mxu0 %v921_v4  ;;  %1394 = vmatpush1.msra.mxu1 %v923_v5  ;;  %v989_v4 = vld [vmem:[%s4097_s5 + $0x340] sm:$0xff]  ;;  %v991_v5 = vld [vmem:[%s4097_s5 + $0x350] sm:$0xff] }
  0xf9   : > { %1324 = vmatprep.subr.mxu0 %v918_v6  ;;  %1395 = vmatprep.subr.mxu1 %v920_v7  ;;  %v986_v6 = vld [vmem:[%s4097_s5 + $0x328] sm:$0xff]  ;;  %v988_v7 = vld [vmem:[%s4097_s5 + $0x338] sm:$0xff] }
  0xfa   : > { %1325 = vmatpush1.msra.mxu0 %v917_v8  ;;  %1396 = vmatpush1.msra.mxu1 %v919_v9  ;;  %v985_v8 = vld [vmem:[%s4097_s5 + $0x320] sm:$0xff]  ;;  %v987_v9 = vld [vmem:[%s4097_s5 + $0x330] sm:$0xff] }
  0xfb   : > { %1326 = vmatprep.subr.mxu0 %v914_v10  ;;  %1397 = vmatprep.subr.mxu1 %v916_v11  ;;  %v982_v10 = vld [vmem:[%s4097_s5 + $0x308] sm:$0xff]  ;;  %v984_v11 = vld [vmem:[%s4097_s5 + $0x318] sm:$0xff] }
  0xfc   : > { %1327 = vmatpush1.msra.mxu0 %v913_v12  ;;  %1398 = vmatpush1.msra.mxu1 %v915_v13  ;;  %v981_v12 = vld [vmem:[%s4097_s5 + $0x300] sm:$0xff]  ;;  %v983_v13 = vld [vmem:[%s4097_s5 + $0x310] sm:$0xff] }
  0xfd   : > { %1328 = vmatprep.subr.mxu0 %v910_v14  ;;  %1399 = vmatprep.subr.mxu1 %v912_v15  ;;  %v978_v14 = vld [vmem:[%s4097_s5 + $0x2e8] sm:$0xff]  ;;  %v980_v15 = vld [vmem:[%s4097_s5 + $0x2f8] sm:$0xff] }
  0xfe   : > { %1329 = vmatpush1.msra.mxu0 %v909_v16  ;;  %1400 = vmatpush1.msra.mxu1 %v911_v17  ;;  %v977_v16 = vld [vmem:[%s4097_s5 + $0x2e0] sm:$0xff]  ;;  %v979_v17 = vld [vmem:[%s4097_s5 + $0x2f0] sm:$0xff] }
  0xff   : > { %1330 = vmatprep.subr.mxu0 %v906_v18  ;;  %1401 = vmatprep.subr.mxu1 %v908_v19  ;;  %v974_v18 = vld [vmem:[%s4097_s5 + $0x2c8] sm:$0xff]  ;;  %v976_v19 = vld [vmem:[%s4097_s5 + $0x2d8] sm:$0xff] }
 0x100   : > { %1331 = vmatpush1.msra.mxu0 %v905_v20  ;;  %1402 = vmatpush1.msra.mxu1 %v907_v21  ;;  %v973_v20 = vld [vmem:[%s4097_s5 + $0x2c0] sm:$0xff]  ;;  %v975_v21 = vld [vmem:[%s4097_s5 + $0x2d0] sm:$0xff] }
 0x101   : > { %1332 = vmatprep.subr.mxu0 %v902_v22  ;;  %1403 = vmatprep.subr.mxu1 %v904_v23  ;;  %v970_v22 = vld [vmem:[%s4097_s5 + $0x2a8] sm:$0xff]  ;;  %v972_v23 = vld [vmem:[%s4097_s5 + $0x2b8] sm:$0xff] }
 0x102   : > { %1333 = vmatpush1.msra.mxu0 %v901_v24  ;;  %1404 = vmatpush1.msra.mxu1 %v903_v25  ;;  %v969_v24 = vld [vmem:[%s4097_s5 + $0x2a0] sm:$0xff]  ;;  %v971_v25 = vld [vmem:[%s4097_s5 + $0x2b0] sm:$0xff] }
 0x103   : > { %1334 = vmatprep.subr.mxu0 %v898_v26  ;;  %1405 = vmatprep.subr.mxu1 %v900_v27  ;;  %v966_v26 = vld [vmem:[%s4097_s5 + $0x288] sm:$0xff]  ;;  %v968_v27 = vld [vmem:[%s4097_s5 + $0x298] sm:$0xff] }
 0x104   : > { %1335 = vmatpush1.msra.mxu0 %v897_v29  ;;  %1406 = vmatpush1.msra.mxu1 %v899_v30  ;;  %v965_v29 = vld [vmem:[%s4097_s5 + $0x280] sm:$0xff]  ;;  %v967_v30 = vld [vmem:[%s4097_s5 + $0x290] sm:$0xff] }
 0x105   : > { %1336 = vmatprep.subr.mxu0 %v894_v31  ;;  %1407 = vmatprep.subr.mxu1 %v896_v32  ;;  %v962_v31 = vld [vmem:[%s4097_s5 + $0x268] sm:$0xff]  ;;  %v964_v32 = vld [vmem:[%s4097_s5 + $0x278] sm:$0xff] }
 0x106   : > { %1337 = vmatpush1.msra.mxu0 %v893_v33  ;;  %1408 = vmatpush1.msra.mxu1 %v895_v34  ;;  %v961_v33 = vld [vmem:[%s4097_s5 + $0x260] sm:$0xff]  ;;  %v963_v34 = vld [vmem:[%s4097_s5 + $0x270] sm:$0xff] }
 0x107   : > { %1338 = vmatprep.subr.mxu0 %v890_v35  ;;  %1409 = vmatprep.subr.mxu1 %v892_v36  ;;  %v958_v35 = vld [vmem:[%s4097_s5 + $0x248] sm:$0xff]  ;;  %v960_v36 = vld [vmem:[%s4097_s5 + $0x258] sm:$0xff] }
 0x108   : > { %1339 = vmatpush1.msra.mxu0 %v889_v3  ;;  %1410 = vmatpush1.msra.mxu1 %v891_v37  ;;  %v957_v3 = vld [vmem:[%s4097_s5 + $0x240] sm:$0xff]  ;;  %v959_v37 = vld [vmem:[%s4097_s5 + $0x250] sm:$0xff] }
 0x109   : > { %1340 = vmatprep.subr.mxu0 %v886_v38  ;;  %1411 = vmatprep.subr.mxu1 %v888_v39  ;;  %v1848_v38 = vld.sshfl [vmem:[%s3398_s11] sm:$0x33 pattern:$0x76325410]  ;;  %v954_v39 = vld [vmem:[%s4097_s5 + $0x228] sm:$0xff] }
 0x10a   : > { %1341 = vmatpush1.msra.mxu0 %v885_v40  ;;  %1412 = vmatpush1.msra.mxu1 %v887_v41  ;;  %v956_v40 = vld [vmem:[%s4097_s5 + $0x238] sm:$0xff]  ;;  %v953_v41 = vld [vmem:[%s4097_s5 + $0x220] sm:$0xff] }
 0x10b   : > { %1342 = vmatprep.subr.mxu0 %v1010_v42  ;;  %1413 = vmatprep.subr.mxu1 %v1012_v43  ;;  %v955_v42 = vld [vmem:[%s4097_s5 + $0x230] sm:$0xff]  ;;  %v950_v43 = vld [vmem:[%s4097_s5 + $0x208] sm:$0xff] }
 0x10c   : > { %1343 = vmatpush2.msra.mxu0 %v1009_v44  ;;  %1414 = vmatpush2.msra.mxu1 %v1011_v45  ;;  %v952_v44 = vld [vmem:[%s4097_s5 + $0x218] sm:$0xff]  ;;  %v1307_v45 = vcombine.high %v1848_v38, %v1848_v38 }
 0x10d   : > { %1344 = vmatprep.subr.mxu0 %v1006_v46  ;;  %1415 = vmatprep.subr.mxu1 %v1008_v47  ;;  %v949_v46 = vld [vmem:[%s4097_s5 + $0x200] sm:$0xff]  ;;  %v951_v47 = vld [vmem:[%s4097_s5 + $0x210] sm:$0xff] }
 0x10e   : > { %1345 = vmatpush2.msra.mxu0 %v1005_v48  ;;  %1416 = vmatpush2.msra.mxu1 %v1007_v49  ;;  %v1513_v48 = vld [vmem:[%s4099_s7 + $0x1e8] sm:$0xff]  ;;  %v1515_v49 = vld [vmem:[%s4099_s7 + $0x1f8] sm:$0xff] }
 0x10f   : > { %1346 = vmatprep.subr.mxu0 %v1002_v50  ;;  %1417 = vmatprep.subr.mxu1 %v1004_v51  ;;  %v1512_v50 = vld [vmem:[%s4099_s7 + $0x1e0] sm:$0xff]  ;;  %v1514_v51 = vld [vmem:[%s4099_s7 + $0x1f0] sm:$0xff] }
 0x110   : > { %1347 = vmatpush2.msra.mxu0 %v1001_v52  ;;  %1418 = vmatpush2.msra.mxu1 %v1003_v53  ;;  %v1509_v52 = vld [vmem:[%s4099_s7 + $0x1c8] sm:$0xff]  ;;  %v1511_v53 = vld [vmem:[%s4099_s7 + $0x1d8] sm:$0xff] }
 0x111   : > { %1348 = vmatprep.subr.mxu0 %v998_v54  ;;  %1419 = vmatprep.subr.mxu1 %v1000_v55  ;;  %v1508_v54 = vld [vmem:[%s4099_s7 + $0x1c0] sm:$0xff]  ;;  %v1510_v55 = vld [vmem:[%s4099_s7 + $0x1d0] sm:$0xff] }
 0x112   : > { %1349 = vmatpush2.msra.mxu0 %v997_v56  ;;  %1420 = vmatpush2.msra.mxu1 %v999_v57  ;;  %v1505_v56 = vld [vmem:[%s4099_s7 + $0x1a8] sm:$0xff]  ;;  %v1507_v57 = vld [vmem:[%s4099_s7 + $0x1b8] sm:$0xff] }
 0x113   : > { %1350 = vmatprep.subr.mxu0 %v994_v58  ;;  %1421 = vmatprep.subr.mxu1 %v996_v59  ;;  %v1504_v58 = vld [vmem:[%s4099_s7 + $0x1a0] sm:$0xff]  ;;  %v1506_v59 = vld [vmem:[%s4099_s7 + $0x1b0] sm:$0xff] }
 0x114   : > { %1351 = vmatpush2.msra.mxu0 %v993_v60  ;;  %1422 = vmatpush2.msra.mxu1 %v995_v61  ;;  %v1501_v60 = vld [vmem:[%s4099_s7 + $0x188] sm:$0xff]  ;;  %v1503_v61 = vld [vmem:[%s4099_s7 + $0x198] sm:$0xff] }
 0x115   : > { %1352 = vmatprep.subr.mxu0 %v990_v62  ;;  %1423 = vmatprep.subr.mxu1 %v992_v63  ;;  %v1500_v62 = vld [vmem:[%s4099_s7 + $0x180] sm:$0xff]  ;;  %v1502_v63 = vld [vmem:[%s4099_s7 + $0x190] sm:$0xff] }
 0x116   : > { %1353 = vmatpush2.msra.mxu0 %v989_v4  ;;  %1424 = vmatpush2.msra.mxu1 %v991_v5  ;;  %v1497_v4 = vld [vmem:[%s4099_s7 + $0x168] sm:$0xff]  ;;  %v1499_v5 = vld [vmem:[%s4099_s7 + $0x178] sm:$0xff] }
 0x117   : > { %1354 = vmatprep.subr.mxu0 %v986_v6  ;;  %1425 = vmatprep.subr.mxu1 %v988_v7  ;;  %v1496_v6 = vld [vmem:[%s4099_s7 + $0x160] sm:$0xff]  ;;  %v1498_v7 = vld [vmem:[%s4099_s7 + $0x170] sm:$0xff] }
 0x118   : > { %1355 = vmatpush2.msra.mxu0 %v985_v8  ;;  %1426 = vmatpush2.msra.mxu1 %v987_v9  ;;  %v1493_v8 = vld [vmem:[%s4099_s7 + $0x148] sm:$0xff]  ;;  %v1495_v9 = vld [vmem:[%s4099_s7 + $0x158] sm:$0xff] }
 0x119   : > { %1356 = vmatprep.subr.mxu0 %v982_v10  ;;  %1427 = vmatprep.subr.mxu1 %v984_v11  ;;  %v1492_v10 = vld [vmem:[%s4099_s7 + $0x140] sm:$0xff]  ;;  %v1494_v11 = vld [vmem:[%s4099_s7 + $0x150] sm:$0xff] }
 0x11a   : > { %1357 = vmatpush2.msra.mxu0 %v981_v12  ;;  %1428 = vmatpush2.msra.mxu1 %v983_v13  ;;  %v1489_v12 = vld [vmem:[%s4099_s7 + $0x128] sm:$0xff]  ;;  %v1491_v13 = vld [vmem:[%s4099_s7 + $0x138] sm:$0xff] }
 0x11b   : > { %1358 = vmatprep.subr.mxu0 %v978_v14  ;;  %1429 = vmatprep.subr.mxu1 %v980_v15  ;;  %v1488_v14 = vld [vmem:[%s4099_s7 + $0x120] sm:$0xff]  ;;  %v1490_v15 = vld [vmem:[%s4099_s7 + $0x130] sm:$0xff] }
 0x11c   : > { %1359 = vmatpush2.msra.mxu0 %v977_v16  ;;  %1430 = vmatpush2.msra.mxu1 %v979_v17  ;;  %v1485_v16 = vld [vmem:[%s4099_s7 + $0x108] sm:$0xff]  ;;  %v1487_v17 = vld [vmem:[%s4099_s7 + $0x118] sm:$0xff] }
 0x11d   : > { %1360 = vmatprep.subr.mxu0 %v974_v18  ;;  %1431 = vmatprep.subr.mxu1 %v976_v19  ;;  %v1484_v18 = vld [vmem:[%s4099_s7 + $0x100] sm:$0xff]  ;;  %v1486_v19 = vld [vmem:[%s4099_s7 + $0x110] sm:$0xff] }
 0x11e   : > { %1361 = vmatpush2.msra.mxu0 %v973_v20  ;;  %1432 = vmatpush2.msra.mxu1 %v975_v21  ;;  %v1481_v20 = vld [vmem:[%s4099_s7 + $0xe8] sm:$0xff]  ;;  %v1483_v21 = vld [vmem:[%s4099_s7 + $0xf8] sm:$0xff] }
 0x11f   : > { %1362 = vmatprep.subr.mxu0 %v970_v22  ;;  %1433 = vmatprep.subr.mxu1 %v972_v23  ;;  %v1480_v22 = vld [vmem:[%s4099_s7 + $0xe0] sm:$0xff]  ;;  %v1482_v23 = vld [vmem:[%s4099_s7 + $0xf0] sm:$0xff] }
 0x120   : > { %1363 = vmatpush2.msra.mxu0 %v969_v24  ;;  %1434 = vmatpush2.msra.mxu1 %v971_v25  ;;  %v1477_v24 = vld [vmem:[%s4099_s7 + $0xc8] sm:$0xff]  ;;  %v1479_v25 = vld [vmem:[%s4099_s7 + $0xd8] sm:$0xff] }
 0x121   : > { %1364 = vmatprep.subr.mxu0 %v966_v26  ;;  %1435 = vmatprep.subr.mxu1 %v968_v27  ;;  %v1476_v26 = vld [vmem:[%s4099_s7 + $0xc0] sm:$0xff]  ;;  %v1478_v27 = vld [vmem:[%s4099_s7 + $0xd0] sm:$0xff] }
 0x122   : > { %1365 = vmatpush2.msra.mxu0 %v965_v29  ;;  %1436 = vmatpush2.msra.mxu1 %v967_v30  ;;  %v1473_v29 = vld [vmem:[%s4099_s7 + $0xa8] sm:$0xff]  ;;  %v1475_v30 = vld [vmem:[%s4099_s7 + $0xb8] sm:$0xff] }
 0x123   : > { %1366 = vmatprep.subr.mxu0 %v962_v31  ;;  %1437 = vmatprep.subr.mxu1 %v964_v32  ;;  %v1472_v31 = vld [vmem:[%s4099_s7 + $0xa0] sm:$0xff]  ;;  %v1474_v32 = vld [vmem:[%s4099_s7 + $0xb0] sm:$0xff] }
 0x124   : > { %1367 = vmatpush2.msra.mxu0 %v961_v33  ;;  %1438 = vmatpush2.msra.mxu1 %v963_v34  ;;  %v1469_v33 = vld [vmem:[%s4099_s7 + $0x88] sm:$0xff]  ;;  %v1471_v34 = vld [vmem:[%s4099_s7 + $0x98] sm:$0xff] }
 0x125   : > { %1368 = vmatprep.subr.mxu0 %v958_v35  ;;  %1439 = vmatprep.subr.mxu1 %v960_v36  ;;  %v1468_v35 = vld [vmem:[%s4099_s7 + $0x80] sm:$0xff]  ;;  %v1470_v36 = vld [vmem:[%s4099_s7 + $0x90] sm:$0xff] }
 0x126   : > { %1369 = vmatpush2.msra.mxu0 %v957_v3  ;;  %1440 = vmatpush2.msra.mxu1 %v959_v37  ;;  %v1465_v3 = vld [vmem:[%s4099_s7 + $0x68] sm:$0xff]  ;;  %v1467_v37 = vld [vmem:[%s4099_s7 + $0x78] sm:$0xff] }
 0x127   : > { %1370 = vmatprep.subr.mxu0 %v954_v39  ;;  %1441 = vmatprep.subr.mxu1 %v956_v40  ;;  %v1466_v39 = vld [vmem:[%s4099_s7 + $0x70] sm:$0xff]  ;;  %v1461_v40 = vld [vmem:[%s4099_s7 + $0x48] sm:$0xff] }
 0x128   : > { %1371 = vmatpush2.msra.mxu0 %v953_v41  ;;  %1442 = vmatpush2.msra.mxu1 %v955_v42  ;;  %v1463_v41 = vld [vmem:[%s4099_s7 + $0x58] sm:$0xff]  ;;  %v1460_v42 = vld [vmem:[%s4099_s7 + $0x40] sm:$0xff] }
 0x129   : > { %1372 = vmatprep.subr.mxu0 %v950_v43  ;;  %1443 = vmatprep.subr.mxu1 %v952_v44  ;;  %v1462_v43 = vld [vmem:[%s4099_s7 + $0x50] sm:$0xff]  ;;  %v1457_v44 = vld [vmem:[%s4099_s7 + $0x28] sm:$0xff] }
 0x12a   : > { %1373 = vmatpush2.msra.mxu0 %v949_v46  ;;  %1374 = vmatprep.mubr.f32.mxu0 %v1307_v45  ;;  %v1456_v46 = vld [vmem:[%s4099_s7 + $0x20] sm:$0xff] }
 0x12b   : > { %1444 = vmatpush2.msra.mxu1 %v951_v47  ;;  %1445 = vmatprep.mubr.f32.mxu1 %v1307_v45  ;;  %v1459_v45 = vld [vmem:[%s4099_s7 + $0x38] sm:$0xff]  ;;  %v1458_v47 = vld [vmem:[%s4099_s7 + $0x30] sm:$0xff] }
 0x12c   : > { %1375 = vmatmul.mubr.f32.vlgmr.msra.gmra.mxu0 %v1848_v38  ;;  %1446 = vmatmul.mubr.f32.vlgmr.msra.gmra.mxu1 %v1848_v38  ;;  %v1464_v38 = vld [vmem:[%s4099_s7 + $0x60] sm:$0xff] }
 0x12d   : > { %1516 = vmatprep.subr.mxu0 %v1513_v48  ;;  %1587 = vmatprep.subr.mxu1 %v1515_v49  ;;  %v1453_v48 = vld [vmem:[%s4099_s7 + $0x8] sm:$0xff]  ;;  %v1455_v49 = vld [vmem:[%s4099_s7 + $0x18] sm:$0xff] }
 0x12e   : > { %1517 = vmatpush1.msra.mxu0 %v1512_v50  ;;  %1588 = vmatpush1.msra.mxu1 %v1514_v51  ;;  %v1452_v50 = vld [vmem:[%s4099_s7] sm:$0xff]  ;;  %v1454_v51 = vld [vmem:[%s4099_s7 + $0x10] sm:$0xff]  ;;  %s1934_s7 = scalar_lea.vmem (%p37_p0), %s1791_s0, 64 }
 0x12f   : > { %1518 = vmatprep.subr.mxu0 %v1509_v52  ;;  %1589 = vmatprep.subr.mxu1 %v1511_v53  ;;  %v829_v52 = vlaneseq  ;;  %v388_v53 = vpop.f32.mrf.mxu0  ;;  %p1935_p1 = scmp.ne.s32.totalorder (%p37_p0), %s1791_s0, %s1934_s7  ;;  %p1940_p3 = scmp.lt.s32.totalorder (%p37_p0), %s1934_s7, %s1934_s7 }
 0x130   : > { %1519 = vmatpush1.msra.mxu0 %v1508_v54  ;;  %1590 = vmatpush1.msra.mxu1 %v1510_v55  ;;  %v459_v54 = vpop.f32.mrf.mxu1 }
 0x131   : > { %1520 = vmatprep.subr.mxu0 %v1505_v56  ;;  %1591 = vmatprep.subr.mxu1 %v1507_v57  ;;  %v4024_v55 = vshrl.u32 %v829_v52, 7  ;;  %v390_v56 = vpop.f32.mrf.mxu0  ;;  %p1941_p4 = por (%p37_p0), %p1940_p3, %p1939_p2 }
 0x132   : > { %1521 = vmatpush1.msra.mxu0 %v1504_v58  ;;  %1592 = vmatpush1.msra.mxu1 %v1506_v59  ;;  %v461_v57 = vpop.f32.mrf.mxu1 }
 0x133   : > { %1522 = vmatprep.subr.mxu0 %v1501_v60  ;;  %1593 = vmatprep.subr.mxu1 %v1503_v61  ;;  %v831_v60 = vsub.s32 0, %v4024_v55  ;;  %v827_v61 = vld [vmem:[%s4096_s4] sm:$0xf]  ;;  %p1942_p5 = pnand (%p37_p0), %p1941_p4, %p1935_p1 }
 0x134   : > { %1523 = vmatpush1.msra.mxu0 %v1500_v62  ;;  %1594 = vmatpush1.msra.mxu1 %v1502_v63 }
 0x135   : > { %1524 = vmatprep.subr.mxu0 %v1497_v4  ;;  %1595 = vmatprep.subr.mxu1 %v1499_v5  ;;  %v832_v4 = vrot.slane %v827_v61, %v831_v60 }
 0x136   : > { %1525 = vmatpush1.msra.mxu0 %v1496_v6  ;;  %1596 = vmatpush1.msra.mxu1 %v1498_v7 }
 0x137   : > { %1526 = vmatprep.subr.mxu0 %v1493_v8  ;;  %1597 = vmatprep.subr.mxu1 %v1495_v9 }
 0x138   : > { %1527 = vmatpush1.msra.mxu0 %v1492_v10  ;;  %1598 = vmatpush1.msra.mxu1 %v1494_v11 }
 0x139   : > { %1528 = vmatprep.subr.mxu0 %v1489_v12  ;;  %1599 = vmatprep.subr.mxu1 %v1491_v13  ;;  %v843_v13 = vsub.s32 3, %v4024_v55 }
 0x13a   : > { %1529 = vmatpush1.msra.mxu0 %v1488_v14  ;;  %1600 = vmatpush1.msra.mxu1 %v1490_v15 }
 0x13b   : > { %1530 = vmatprep.subr.mxu0 %v1485_v16  ;;  %1601 = vmatprep.subr.mxu1 %v1487_v17 }
 0x13c   : > { %1531 = vmatpush1.msra.mxu0 %v1484_v18  ;;  %1602 = vmatpush1.msra.mxu1 %v1486_v19 }
 0x13d   : > { %1532 = vmatprep.subr.mxu0 %v1481_v20  ;;  %1603 = vmatprep.subr.mxu1 %v1483_v21  ;;  %v844_v21 = vrot.slane %v827_v61, %v843_v13 }
 0x13e   : > { %1533 = vmatpush1.msra.mxu0 %v1480_v22  ;;  %1604 = vmatpush1.msra.mxu1 %v1482_v23 }
 0x13f   : > { %1534 = vmatprep.subr.mxu0 %v1477_v24  ;;  %1605 = vmatprep.subr.mxu1 %v1479_v25  ;;  %v839_v24 = vsub.s32 2, %v4024_v55 }
 0x140   : > { %1535 = vmatpush1.msra.mxu0 %v1476_v26  ;;  %1606 = vmatpush1.msra.mxu1 %v1478_v27 }
 0x141   : > { %1536 = vmatprep.subr.mxu0 %v1473_v29  ;;  %1607 = vmatprep.subr.mxu1 %v1475_v30  ;;  %v840_v29 = vrot.slane %v827_v61, %v839_v24 }
 0x142   : > { %1537 = vmatpush1.msra.mxu0 %v1472_v31  ;;  %1608 = vmatpush1.msra.mxu1 %v1474_v32 }
 0x143   : > { %1538 = vmatprep.subr.mxu0 %v1469_v33  ;;  %1609 = vmatprep.subr.mxu1 %v1471_v34 }
 0x144   : > { %1539 = vmatpush1.msra.mxu0 %v1468_v35  ;;  %1610 = vmatpush1.msra.mxu1 %v1470_v36 }
 0x145   : > { %1540 = vmatprep.subr.mxu0 %v1465_v3  ;;  %1611 = vmatprep.subr.mxu1 %v1467_v37 }
 0x146   : > { %1541 = vmatpush1.msra.mxu0 %v1464_v38  ;;  %1612 = vmatpush1.msra.mxu1 %v1466_v39  ;;  %v541_v58 = vpop.f32.mrf.mxu0  ;;  %v612_v59 = vpop.f32.mrf.mxu1 }
 0x147   : > { %1542 = vmatprep.subr.mxu0 %v1461_v40  ;;  %1613 = vmatprep.subr.mxu1 %v1463_v41  ;;  %v542_v63 = vadd.f32 %v541_v58, %v388_v53  ;;  %v613_v25 = vadd.f32 %v612_v59, %v459_v54 }
 0x148   : > { %1543 = vmatpush1.msra.mxu0 %v1460_v42  ;;  %1614 = vmatpush1.msra.mxu1 %v1462_v43  ;;  %v543_v62 = vpop.f32.mrf.mxu0 }
 0x149   : > { %1544 = vmatprep.subr.mxu0 %v1457_v44  ;;  %1615 = vmatprep.subr.mxu1 %v1459_v45  ;;  %v544_v6 = vadd.f32 %v543_v62, %v390_v56 }
 0x14a   : > { %1545 = vmatpush1.msra.mxu0 %v1456_v46  ;;  %1616 = vmatpush1.msra.mxu1 %v1458_v47 }
 0x14b   : > { %1546 = vmatprep.subr.mxu0 %v1453_v48  ;;  %1617 = vmatprep.subr.mxu1 %v1455_v49 }
 0x14c   : > { %1547 = vmatpush1.msra.mxu0 %v1452_v50  ;;  %1580 = vmatprep.mubr.f32.mxu0 %v1996_v28 }
 0x14d   : > { %1618 = vmatpush1.msra.mxu1 %v1454_v51  ;;  %1651 = vmatprep.mubr.f32.mxu1 %v1996_v28  ;;  %v835_v28 = vsub.s32 1, %v4024_v55  ;;  %v1662_v51 = vld [vmem:[%s4100_s8] sm:$0xf] }
 0x14e   : > { %1581 = vmatmul.mubr.f32.vlgmr.msra.gmra.mxu0 %v1982_v1  ;;  %1652 = vmatmul.mubr.f32.vlgmr.msra.gmra.mxu1 %v1982_v1  ;;  %v614_v1 = vpop.f32.mrf.mxu1  ;;  %v1667_v56 = vrot.slane %v1662_v51, %v831_v60  ;;  %v1679_v60 = vrot.slane %v1662_v51, %v843_v13 }
 0x14f   : > { %v836_v9 = vrot.slane %v827_v61, %v835_v28  ;;  %v615_v17 = vadd.f32 %v614_v1, %v461_v57  ;;  %v1671_v62 = vrot.slane %v1662_v51, %v835_v28 }
 0x168   : > { %v747_v5 = vpop.f32.mrf.mxu0  ;;  %v818_v8 = vpop.f32.mrf.mxu1 }
 0x169   : > { %v823_v7 = vadd.f32 %v747_v5, %v542_v63  ;;  %v825_v27 = vadd.f32 %v818_v8, %v613_v25 }
 0x16a   : > { %v749_v10 = vpop.f32.mrf.mxu0  ;;  %v820_v16 = vpop.f32.mrf.mxu1 }
 0x16b   : > { %v849_v11 = vadd.f32 %v832_v4, %v823_v7  ;;  %v824_v12 = vadd.f32 %v749_v10, %v544_v6  ;;  %v826_v20 = vadd.f32 %v820_v16, %v615_v17  ;;  %v851_v32 = vadd.f32 %v840_v29, %v825_v27 }
 0x16c   : > { %v1675_v17 = vrot.slane %v1662_v51, %v839_v24 }
 0x16d   : > { %v853_v14 = vsub.f32 0.0, %v849_v11  ;;  %v850_v15 = vadd.f32 %v836_v9, %v824_v12  ;;  %v852_v23 = vadd.f32 %v844_v21, %v826_v20 }
 0x16f   : > { %v854_v18 = vmul.f32 1.442695, %v853_v14  ;;  %v859_v19 = vsub.f32 0.0, %v850_v15  ;;  %v866_v26 = vsub.f32 0.0, %v852_v23 }
 0x171   : > { %1902 = vpow2.f32 %v854_v18  ;;  %v860_v22 = vmul.f32 1.442695, %v859_v19  ;;  %v867_v30 = vmul.f32 1.442695, %v866_v26 }
 0x173   : > { %1904 = vpow2.f32 %v860_v22 }
 0x174   : > { %1906 = vpow2.f32 %v867_v30 }
 0x17e   : > { %v1903_v31 = vpop.eup %1902 }
 0x17f   : > { %v856_v33 = vadd.f32 1.0, %v1903_v31 }
 0x180   : > { %v1905_v34 = vpop.eup %1904 }
 0x181   : > { %1908 = vrcp.f32 %v856_v33  ;;  %v862_v35 = vadd.f32 1.0, %v1905_v34  ;;  %v1907_v36 = vpop.eup %1906 }
 0x182   : > { %1910 = vtanh.f32 %v851_v32  ;;  %v869_v39 = vadd.f32 1.0, %v1907_v36 }
 0x183   : > { %1912 = vrcp.f32 %v862_v35 }
 0x184   : > { %1914 = vrcp.f32 %v869_v39 }
 0x18e   : > { %v1909_v3 = vpop.eup %1908 }
 0x18f   : > { %v1911_v37 = vpop.eup %1910 }
 0x190   : > { %v1913_v38 = vpop.eup %1912  ;;  %v873_v40 = vmul.f32 %v1911_v37, %v1909_v3 }
 0x191   : > { %v872_v41 = vmul.f32 %v1986_v2, %v1913_v38  ;;  %v1915_v42 = vpop.eup %1914 }
 0x193   : > { %v4042_v2 = vadd.f32 %v873_v40, %v872_v41  }
 0x195   : > { %1916 = vtanh.f32 %v4042_v2 }
 0x1a2   : > { %v1917_v43 = vpop.eup %1916 }
 0x1a3   : > { %v4046_v3 = vmul.f32 %v1917_v43, %v1915_v42  }
 0x1a5   : > { %v4103_v44 = vmov %v4046_v3 }
 0x1a6   : > { %878 = vst [vmem:[%s877_s30] sm:$0x3] %v4103_v44  ;;  %v4105_v3 = vmov %v4103_v44 }
 0x1a9   : > { %v1223_v45 = vpop.f32.mrf.mxu0 }
 0x1ab   : > { %v1294_v46 = vpop.f32.mrf.mxu1  ;;  %v1225_v47 = vpop.f32.mrf.mxu0 }
 0x1ad   : > { %v1296_v48 = vpop.f32.mrf.mxu1  ;;  %v1714_v34 = vld [vmem:[#allocation2] sm:$0x3] (%p37_p0)  ;;  %v1715_v36 = vld [vmem:[#allocation2 + $0x2] sm:$0x3] (%p37_p0)  ;;  %v1716_v38 = vld [vmem:[#allocation2 + $0x4] sm:$0x3] (%p37_p0) }
 0x1ae   :  { %v1717_v42 = vld [vmem:[#allocation2 + $0x6] sm:$0x3] (%p37_p0) }
 0x1ec   : > { %v1376_v49 = vpop.f32.mrf.mxu0  ;;  %v1447_v50 = vpop.f32.mrf.mxu1 }
 0x1ed   : > { %v1377_v53 = vadd.f32 %v1376_v49, %v1223_v45  ;;  %v1448_v15 = vadd.f32 %v1447_v50, %v1294_v46 }
 0x1ee   : > { %v1378_v52 = vpop.f32.mrf.mxu0  ;;  %v1449_v54 = vpop.f32.mrf.mxu1 }
 0x1ef   : > { %v1379_v58 = vadd.f32 %v1378_v52, %v1225_v47  ;;  %v1450_v8 = vadd.f32 %v1449_v54, %v1296_v48 }
 0x20e   : > { %v1582_v57 = vpop.f32.mrf.mxu0  ;;  %v1653_v61 = vpop.f32.mrf.mxu1 }
 0x20f   : > { %v1658_v59 = vadd.f32 %v1582_v57, %v1377_v53  ;;  %v1660_v28 = vadd.f32 %v1653_v61, %v1448_v15 }
 0x210   : > { %v1584_v63 = vpop.f32.mrf.mxu0  ;;  %v1655_v7 = vpop.f32.mrf.mxu1 }
 0x211   : > { %v1684_v1 = vadd.f32 %v1667_v56, %v1658_v59  ;;  %v1659_v4 = vadd.f32 %v1584_v63, %v1379_v58  ;;  %v1661_v11 = vadd.f32 %v1655_v7, %v1450_v8  ;;  %v1686_v20 = vadd.f32 %v1675_v17, %v1660_v28 }
 0x213   : > { %v1688_v5 = vsub.f32 0.0, %v1684_v1  ;;  %v1685_v6 = vadd.f32 %v1671_v62, %v1659_v4  ;;  %v1687_v14 = vadd.f32 %v1679_v60, %v1661_v11 }
 0x215   : > { %v1689_v9 = vmul.f32 1.442695, %v1688_v5  ;;  %v1694_v10 = vsub.f32 0.0, %v1685_v6  ;;  %v1701_v16 = vsub.f32 0.0, %v1687_v14 }
 0x217   : > { %1918 = vpow2.f32 %v1689_v9  ;;  %v1695_v12 = vmul.f32 1.442695, %v1694_v10  ;;  %v1702_v18 = vmul.f32 1.442695, %v1701_v16 }
 0x219   : > { %1920 = vpow2.f32 %v1695_v12 }
 0x21a   : > { %1922 = vpow2.f32 %v1702_v18 }
 0x224   : > { %v1919_v19 = vpop.eup %1918 }
 0x225   : > { %v1691_v21 = vadd.f32 1.0, %v1919_v19 }
 0x226   : > { %v1921_v22 = vpop.eup %1920 }
 0x227   : > { %1924 = vrcp.f32 %v1691_v21  ;;  %v1697_v23 = vadd.f32 1.0, %v1921_v22  ;;  %v1923_v13 = vpop.eup %1922 }
 0x228   : > { %1926 = vtanh.f32 %v1686_v20  ;;  %v1704_v29 = vadd.f32 1.0, %v1923_v13 }
 0x229   : > { %1928 = vrcp.f32 %v1697_v23 }
 0x22a   : > { %1930 = vrcp.f32 %v1704_v29 }
 0x234   : > { %v1925_v25 = vpop.eup %1924 }
 0x235   : > { %v1927_v26 = vpop.eup %1926 }
 0x236   : > { %v1929_v27 = vpop.eup %1928  ;;  %v1708_v30 = vmul.f32 %v1927_v26, %v1925_v25 }
 0x237   : > { %v1707_v55 = vmul.f32 %v1978_v0, %v1929_v27  ;;  %v1931_v24 = vpop.eup %1930 }
 0x239   : > { %v1709_v0 = vadd.f32 %v1708_v30, %v1707_v55  }
 0x23b   : > { %1932 = vtanh.f32 %v1709_v0 }
 0x247   :  { %39 = sbr.rel (!%p37_p0) target bundleno = 2 (0x2), region = 77 }
 0x248   : > { %v1933_v31 = vpop.eup %1932 }
 0x249   : > { %v1711_v32 = vmul.f32 %v1933_v31, %v1931_v24  }
 0x24b   : > { %1713 = vst [vmem:[%s1712_s18] sm:$0x3] %v1711_v32  ;;  %v4104_v1 = vmov %v1711_v32  ;;  %v1772_v33 = vcombine.low (%p37_p0), %v4103_v44, %v1711_v32 }
 0x24d   :  { %1853 = vst.sshfl [vmem:[#allocation4] sm:$0x33 pattern:$0x76325410] %v1772_v33 }
 0x252   :  { %v1718_v35 = vld [vmem:[#allocation3] sm:$0x3]  ;;  %v1719_v37 = vld [vmem:[#allocation3 + $0x2] sm:$0x3]  ;;  %v1720_v39 = vld [vmem:[#allocation3 + $0x4] sm:$0x3] }
 0x253   :  { %v1730_v3 = vcombine.low %v1714_v34, %v1718_v35  ;;  %v1738_v40 = vcombine.low %v1715_v36, %v1719_v37  ;;  %v1746_v41 = vcombine.low %v1716_v38, %v1720_v39  ;;  %v1721_v43 = vld [vmem:[#allocation3 + $0x6] sm:$0x3] }
 0x254   :  { %v1754_v45 = vcombine.low %v1717_v42, %v1721_v43 }
 0x255   :  { %1849 = vst.sshfl [vmem:[%s4101_s9] sm:$0x33 pattern:$0x76325410] %v1730_v3 }
 0x256   :  { %1850 = vst.sshfl [vmem:[%s4101_s9 + $0x4] sm:$0x33 pattern:$0x76325410] %v1738_v40 }
 0x257   :  { %1851 = vst.sshfl [vmem:[%s4101_s9 + $0x8] sm:$0x33 pattern:$0x76325410] %v1746_v41 }
 0x258   :  { %1852 = vst.sshfl [vmem:[%s4101_s9 + $0xc] sm:$0x33 pattern:$0x76325410] %v1754_v45 }
 0x259   :  { %1945 = shalt.err (!%p1942_p5)
}
 0x25a   :  { %1793 = dma.vmem_to_hbm [thread:$0]  %s1791_s0, 64, %s4102_s10, [#allocation5]  }
 0x25b   :  { %1974 = dma.done.wait [#allocation5], 64  }
 0x25c   :  { %1975 = vsyncadd [#allocation5], 4294967232 }
 0x25d   :  { %1799 = vsyncpa [#allocation5], 1 }

// kernel: encoder_forward.8
= control target key start
LH: loop header
LB: loop body
LE: loop exit
PB: predicated region body
PF: predicated region fallthrough
CT: control target
= control target key end

     0   :  { %16 = vsyncpa [#allocation5], 0  ;;  %v2023_v0 = vmov 0.0   ;;  %v2025_v1 = vmov 0.0   ;;  %v2027_v2 = vmov 0.0   ;;  %v2029_v3 = vmov 0.0   ;;  %s4056_s0 = inlined_call_operand.vmem [shape: f32[4,2,256], index: 0, kind: input, shape index: {}]   ;;  %s4057_s1 = inlined_call_operand.vmem [shape: f32[256,512], index: 1, kind: input, shape index: {}]   ;;  %s4058_s2 = inlined_call_operand.vmem [shape: f32[256,512], index: 2, kind: input, shape index: {}]   ;;  %s4059_s3 = inlined_call_operand.vmem [shape: f32[128,512], index: 3, kind: input, shape index: {}]   ;;  %s4060_s4 = inlined_call_operand.vmem [shape: f32[1,512], index: 4, kind: input, shape index: {}]   ;;  %s4061_s5 = inlined_call_operand.vmem [shape: f32[256,512], index: 5, kind: input, shape index: {}]   ;;  %s4062_s6 = inlined_call_operand.vmem [shape: f32[256,512], index: 6, kind: input, shape index: {}]   ;;  %s4063_s7 = inlined_call_operand.vmem [shape: f32[128,512], index: 7, kind: input, shape index: {}]   ;;  %s4064_s8 = inlined_call_operand.vmem [shape: f32[1,512], index: 8, kind: input, shape index: {}]   ;;  %s4065_s9 = inlined_call_operand.vmem [shape: f32[2,2,256], index: 9, kind: output, shape index: {0}]   ;;  %s4066_s10 = inlined_call_operand.hbm [shape: f32[2,256], index: 10, kind: output, shape index: {1}]  }
   0x1   :  { %s2031_s13 = smov 0  }
   0x2 LB: > { %v244_v4 = vld [vmem:[%s4058_s2 + $0x1e8] sm:$0xff]  ;;  %v246_v5 = vld [vmem:[%s4058_s2 + $0x1f8] sm:$0xff]  ;;  %v243_v6 = vld [vmem:[%s4058_s2 + $0x1e0] sm:$0xff]  ;;  %s1825_s21 = sshll.u32 %s1964_s13, 3  ;;  %s879_s22 = ssub.s32 1, %s1964_s13  ;;  %s1964_s13 = sphi %s2031_s13, %s40_s13   ;;  %v1960_v3 = vphi %v2029_v3, %v4069_v3   ;;  %v1956_v2 = vphi %v2027_v2, %v4012_v2   ;;  %v1952_v1 = vphi %v2025_v1, %v4068_v1   ;;  %v1948_v0 = vphi %v2023_v0, %v1709_v0  }
   0x3   : > { %322 = vmatprep.subr.mxu0 %v244_v4  ;;  %393 = vmatprep.subr.mxu1 %v246_v5  ;;  %v245_v7 = vld [vmem:[%s4058_s2 + $0x1f0] sm:$0xff]  ;;  %v240_v8 = vld [vmem:[%s4058_s2 + $0x1c8] sm:$0xff]  ;;  %v242_v9 = vld [vmem:[%s4058_s2 + $0x1d8] sm:$0xff]  ;;  %s2394_s17 = scalar_lea.vmem %s4056_s0, %s1825_s21  ;;  %s1828_s15 = sshll.u32 %s879_s22, 3 }
   0x4   : > { %323 = vmatpush1.msra.mxu0 %v243_v6  ;;  %394 = vmatpush1.msra.mxu1 %v245_v7  ;;  %v239_v10 = vld [vmem:[%s4058_s2 + $0x1c0] sm:$0xff]  ;;  %v241_v11 = vld [vmem:[%s4058_s2 + $0x1d0] sm:$0xff]  ;;  %v236_v12 = vld [vmem:[%s4058_s2 + $0x1a8] sm:$0xff]  ;;  %s3368_s11 = scalar_lea.vmem %s4056_s0, %s1828_s15  ;;  %s1805_s29 = sshll.u32 %s1964_s13, 1 }
   0x5   : > { %324 = vmatprep.subr.mxu0 %v240_v8  ;;  %395 = vmatprep.subr.mxu1 %v242_v9  ;;  %v238_v13 = vld [vmem:[%s4058_s2 + $0x1b8] sm:$0xff]  ;;  %v235_v14 = vld [vmem:[%s4058_s2 + $0x1a0] sm:$0xff]  ;;  %v237_v15 = vld [vmem:[%s4058_s2 + $0x1b0] sm:$0xff]  ;;  %s877_s30 = scalar_lea.vmem [#allocation2], %s1805_s29  ;;  %s1813_s16 = sshll.u32 %s879_s22, 1 }
   0x6   : > { %325 = vmatpush1.msra.mxu0 %v239_v10  ;;  %396 = vmatpush1.msra.mxu1 %v241_v11  ;;  %v232_v16 = vld [vmem:[%s4058_s2 + $0x188] sm:$0xff]  ;;  %v234_v17 = vld [vmem:[%s4058_s2 + $0x198] sm:$0xff]  ;;  %v231_v18 = vld [vmem:[%s4058_s2 + $0x180] sm:$0xff]  ;;  %s1712_s18 = scalar_lea.vmem [#allocation3], %s1813_s16  ;;  %s40_s13 = sadd.s32 1, %s1964_s13  }
   0x7   : > { %326 = vmatprep.subr.mxu0 %v236_v12  ;;  %397 = vmatprep.subr.mxu1 %v238_v13  ;;  %v233_v19 = vld [vmem:[%s4058_s2 + $0x190] sm:$0xff]  ;;  %v228_v20 = vld [vmem:[%s4058_s2 + $0x168] sm:$0xff]  ;;  %v230_v21 = vld [vmem:[%s4058_s2 + $0x178] sm:$0xff]  ;;  %p37_p0 = scmp.ge.s32.totalorder %s40_s13, 2  }
   0x8   : > { %327 = vmatpush1.msra.mxu0 %v235_v14  ;;  %398 = vmatpush1.msra.mxu1 %v237_v15  ;;  %v227_v22 = vld [vmem:[%s4058_s2 + $0x160] sm:$0xff]  ;;  %v229_v23 = vld [vmem:[%s4058_s2 + $0x170] sm:$0xff]  ;;  %v224_v24 = vld [vmem:[%s4058_s2 + $0x148] sm:$0xff]  ;;  %s1967_s22 = smov (%p37_p0), [#allocation4]  }
   0x9   : > { %328 = vmatprep.subr.mxu0 %v232_v16  ;;  %399 = vmatprep.subr.mxu1 %v234_v17  ;;  %v226_v25 = vld [vmem:[%s4058_s2 + $0x158] sm:$0xff]  ;;  %v223_v26 = vld [vmem:[%s4058_s2 + $0x140] sm:$0xff]  ;;  %v225_v27 = vld [vmem:[%s4058_s2 + $0x150] sm:$0xff] }
   0xa   : > { %329 = vmatpush1.msra.mxu0 %v231_v18  ;;  %400 = vmatpush1.msra.mxu1 %v233_v19  ;;  %v220_v28 = vld [vmem:[%s4058_s2 + $0x128] sm:$0xff]  ;;  %v222_v29 = vld [vmem:[%s4058_s2 + $0x138] sm:$0xff]  ;;  %v219_v30 = vld [vmem:[%s4058_s2 + $0x120] sm:$0xff] }
   0xb   : > { %330 = vmatprep.subr.mxu0 %v228_v20  ;;  %401 = vmatprep.subr.mxu1 %v230_v21  ;;  %v221_v31 = vld [vmem:[%s4058_s2 + $0x130] sm:$0xff]  ;;  %v216_v32 = vld [vmem:[%s4058_s2 + $0x108] sm:$0xff]  ;;  %v218_v33 = vld [vmem:[%s4058_s2 + $0x118] sm:$0xff] }
   0xc   : > { %331 = vmatpush1.msra.mxu0 %v227_v22  ;;  %402 = vmatpush1.msra.mxu1 %v229_v23  ;;  %v215_v34 = vld [vmem:[%s4058_s2 + $0x100] sm:$0xff]  ;;  %v217_v35 = vld [vmem:[%s4058_s2 + $0x110] sm:$0xff]  ;;  %v212_v36 = vld [vmem:[%s4058_s2 + $0xe8] sm:$0xff] }
   0xd   : > { %332 = vmatprep.subr.mxu0 %v224_v24  ;;  %403 = vmatprep.subr.mxu1 %v226_v25  ;;  %v214_v37 = vld [vmem:[%s4058_s2 + $0xf8] sm:$0xff]  ;;  %v211_v38 = vld [vmem:[%s4058_s2 + $0xe0] sm:$0xff]  ;;  %v213_v39 = vld [vmem:[%s4058_s2 + $0xf0] sm:$0xff] }
   0xe   : > { %333 = vmatpush1.msra.mxu0 %v223_v26  ;;  %404 = vmatpush1.msra.mxu1 %v225_v27  ;;  %v208_v40 = vld [vmem:[%s4058_s2 + $0xc8] sm:$0xff]  ;;  %v210_v41 = vld [vmem:[%s4058_s2 + $0xd8] sm:$0xff]  ;;  %v207_v42 = vld [vmem:[%s4058_s2 + $0xc0] sm:$0xff] }
   0xf   : > { %334 = vmatprep.subr.mxu0 %v220_v28  ;;  %405 = vmatprep.subr.mxu1 %v222_v29  ;;  %v209_v43 = vld [vmem:[%s4058_s2 + $0xd0] sm:$0xff]  ;;  %v204_v44 = vld [vmem:[%s4058_s2 + $0xa8] sm:$0xff]  ;;  %v206_v45 = vld [vmem:[%s4058_s2 + $0xb8] sm:$0xff] }
  0x10   : > { %335 = vmatpush1.msra.mxu0 %v219_v30  ;;  %406 = vmatpush1.msra.mxu1 %v221_v31  ;;  %v203_v46 = vld [vmem:[%s4058_s2 + $0xa0] sm:$0xff]  ;;  %v205_v47 = vld [vmem:[%s4058_s2 + $0xb0] sm:$0xff]  ;;  %v200_v48 = vld [vmem:[%s4058_s2 + $0x88] sm:$0xff] }
  0x11   : > { %336 = vmatprep.subr.mxu0 %v216_v32  ;;  %407 = vmatprep.subr.mxu1 %v218_v33  ;;  %v202_v49 = vld [vmem:[%s4058_s2 + $0x98] sm:$0xff]  ;;  %v199_v50 = vld [vmem:[%s4058_s2 + $0x80] sm:$0xff]  ;;  %v201_v51 = vld [vmem:[%s4058_s2 + $0x90] sm:$0xff] }
  0x12   : > { %337 = vmatpush1.msra.mxu0 %v215_v34  ;;  %408 = vmatpush1.msra.mxu1 %v217_v35  ;;  %v196_v52 = vld [vmem:[%s4058_s2 + $0x68] sm:$0xff]  ;;  %v198_v53 = vld [vmem:[%s4058_s2 + $0x78] sm:$0xff]  ;;  %v195_v54 = vld [vmem:[%s4058_s2 + $0x60] sm:$0xff] }
  0x13   : > { %338 = vmatprep.subr.mxu0 %v212_v36  ;;  %409 = vmatprep.subr.mxu1 %v214_v37  ;;  %v197_v55 = vld [vmem:[%s4058_s2 + $0x70] sm:$0xff]  ;;  %v192_v56 = vld [vmem:[%s4058_s2 + $0x48] sm:$0xff]  ;;  %v194_v57 = vld [vmem:[%s4058_s2 + $0x58] sm:$0xff] }
  0x14   : > { %339 = vmatpush1.msra.mxu0 %v211_v38  ;;  %410 = vmatpush1.msra.mxu1 %v213_v39  ;;  %v191_v58 = vld [vmem:[%s4058_s2 + $0x40] sm:$0xff]  ;;  %v193_v59 = vld [vmem:[%s4058_s2 + $0x50] sm:$0xff]  ;;  %v188_v60 = vld [vmem:[%s4058_s2 + $0x28] sm:$0xff] }
  0x15   : > { %340 = vmatprep.subr.mxu0 %v208_v40  ;;  %411 = vmatprep.subr.mxu1 %v210_v41  ;;  %v190_v61 = vld [vmem:[%s4058_s2 + $0x38] sm:$0xff]  ;;  %v187_v62 = vld [vmem:[%s4058_s2 + $0x20] sm:$0xff]  ;;  %v189_v63 = vld [vmem:[%s4058_s2 + $0x30] sm:$0xff] }
  0x16   : > { %341 = vmatpush1.msra.mxu0 %v207_v42  ;;  %412 = vmatpush1.msra.mxu1 %v209_v43  ;;  %v184_v4 = vld [vmem:[%s4058_s2 + $0x8] sm:$0xff]  ;;  %v186_v5 = vld [vmem:[%s4058_s2 + $0x18] sm:$0xff]  ;;  %v183_v6 = vld [vmem:[%s4058_s2] sm:$0xff] }
  0x17   : > { %342 = vmatprep.subr.mxu0 %v204_v44  ;;  %413 = vmatprep.subr.mxu1 %v206_v45  ;;  %v185_v7 = vld [vmem:[%s4058_s2 + $0x10] sm:$0xff]  ;;  %v308_v8 = vld [vmem:[%s4058_s2 + $0x3e8] sm:$0xff]  ;;  %v310_v9 = vld [vmem:[%s4058_s2 + $0x3f8] sm:$0xff] }
  0x18   : > { %343 = vmatpush1.msra.mxu0 %v203_v46  ;;  %414 = vmatpush1.msra.mxu1 %v205_v47  ;;  %v307_v10 = vld [vmem:[%s4058_s2 + $0x3e0] sm:$0xff]  ;;  %v309_v11 = vld [vmem:[%s4058_s2 + $0x3f0] sm:$0xff]  ;;  %v304_v12 = vld [vmem:[%s4058_s2 + $0x3c8] sm:$0xff] }
  0x19   : > { %344 = vmatprep.subr.mxu0 %v200_v48  ;;  %415 = vmatprep.subr.mxu1 %v202_v49  ;;  %v306_v13 = vld [vmem:[%s4058_s2 + $0x3d8] sm:$0xff]  ;;  %v303_v14 = vld [vmem:[%s4058_s2 + $0x3c0] sm:$0xff]  ;;  %v305_v15 = vld [vmem:[%s4058_s2 + $0x3d0] sm:$0xff] }
  0x1a   : > { %345 = vmatpush1.msra.mxu0 %v199_v50  ;;  %416 = vmatpush1.msra.mxu1 %v201_v51  ;;  %v300_v16 = vld [vmem:[%s4058_s2 + $0x3a8] sm:$0xff]  ;;  %v302_v17 = vld [vmem:[%s4058_s2 + $0x3b8] sm:$0xff]  ;;  %v299_v18 = vld [vmem:[%s4058_s2 + $0x3a0] sm:$0xff] }
  0x1b   : > { %346 = vmatprep.subr.mxu0 %v196_v52  ;;  %417 = vmatprep.subr.mxu1 %v198_v53  ;;  %v301_v19 = vld [vmem:[%s4058_s2 + $0x3b0] sm:$0xff]  ;;  %v296_v20 = vld [vmem:[%s4058_s2 + $0x388] sm:$0xff]  ;;  %v298_v21 = vld [vmem:[%s4058_s2 + $0x398] sm:$0xff] }
  0x1c   : > { %347 = vmatpush1.msra.mxu0 %v195_v54  ;;  %418 = vmatpush1.msra.mxu1 %v197_v55  ;;  %v295_v22 = vld [vmem:[%s4058_s2 + $0x380] sm:$0xff]  ;;  %v297_v23 = vld [vmem:[%s4058_s2 + $0x390] sm:$0xff]  ;;  %v292_v24 = vld [vmem:[%s4058_s2 + $0x368] sm:$0xff] }
  0x1d   : > { %348 = vmatprep.subr.mxu0 %v192_v56  ;;  %419 = vmatprep.subr.mxu1 %v194_v57  ;;  %v294_v25 = vld [vmem:[%s4058_s2 + $0x378] sm:$0xff]  ;;  %v291_v26 = vld [vmem:[%s4058_s2 + $0x360] sm:$0xff]  ;;  %v293_v27 = vld [vmem:[%s4058_s2 + $0x370] sm:$0xff] }
  0x1e   : > { %349 = vmatpush1.msra.mxu0 %v191_v58  ;;  %420 = vmatpush1.msra.mxu1 %v193_v59  ;;  %v288_v28 = vld [vmem:[%s4058_s2 + $0x348] sm:$0xff]  ;;  %v290_v29 = vld [vmem:[%s4058_s2 + $0x358] sm:$0xff]  ;;  %v287_v30 = vld [vmem:[%s4058_s2 + $0x340] sm:$0xff] }
  0x1f   : > { %350 = vmatprep.subr.mxu0 %v188_v60  ;;  %421 = vmatprep.subr.mxu1 %v190_v61  ;;  %v289_v31 = vld [vmem:[%s4058_s2 + $0x350] sm:$0xff]  ;;  %v284_v32 = vld [vmem:[%s4058_s2 + $0x328] sm:$0xff]  ;;  %v286_v33 = vld [vmem:[%s4058_s2 + $0x338] sm:$0xff] }
  0x20   : > { %351 = vmatpush1.msra.mxu0 %v187_v62  ;;  %422 = vmatpush1.msra.mxu1 %v189_v63  ;;  %v283_v34 = vld [vmem:[%s4058_s2 + $0x320] sm:$0xff]  ;;  %v285_v35 = vld [vmem:[%s4058_s2 + $0x330] sm:$0xff]  ;;  %v280_v36 = vld [vmem:[%s4058_s2 + $0x308] sm:$0xff] }
  0x21   : > { %352 = vmatprep.subr.mxu0 %v184_v4  ;;  %423 = vmatprep.subr.mxu1 %v186_v5  ;;  %v282_v37 = vld [vmem:[%s4058_s2 + $0x318] sm:$0xff]  ;;  %v279_v38 = vld [vmem:[%s4058_s2 + $0x300] sm:$0xff]  ;;  %v281_v39 = vld [vmem:[%s4058_s2 + $0x310] sm:$0xff] }
  0x22   : > { %353 = vmatpush1.msra.mxu0 %v183_v6  ;;  %424 = vmatpush1.msra.mxu1 %v185_v7  ;;  %v276_v40 = vld [vmem:[%s4058_s2 + $0x2e8] sm:$0xff]  ;;  %v278_v41 = vld [vmem:[%s4058_s2 + $0x2f8] sm:$0xff]  ;;  %v275_v42 = vld [vmem:[%s4058_s2 + $0x2e0] sm:$0xff] }
  0x23   : > { %354 = vmatprep.subr.mxu0 %v308_v8  ;;  %425 = vmatprep.subr.mxu1 %v310_v9  ;;  %v277_v43 = vld [vmem:[%s4058_s2 + $0x2f0] sm:$0xff]  ;;  %v272_v44 = vld [vmem:[%s4058_s2 + $0x2c8] sm:$0xff]  ;;  %v274_v45 = vld [vmem:[%s4058_s2 + $0x2d8] sm:$0xff] }
  0x24   : > { %355 = vmatpush2.msra.mxu0 %v307_v10  ;;  %426 = vmatpush2.msra.mxu1 %v309_v11  ;;  %v271_v46 = vld [vmem:[%s4058_s2 + $0x2c0] sm:$0xff]  ;;  %v273_v47 = vld [vmem:[%s4058_s2 + $0x2d0] sm:$0xff]  ;;  %v268_v48 = vld [vmem:[%s4058_s2 + $0x2a8] sm:$0xff] }
  0x25   : > { %356 = vmatprep.subr.mxu0 %v304_v12  ;;  %427 = vmatprep.subr.mxu1 %v306_v13  ;;  %v270_v49 = vld [vmem:[%s4058_s2 + $0x2b8] sm:$0xff]  ;;  %v267_v50 = vld [vmem:[%s4058_s2 + $0x2a0] sm:$0xff]  ;;  %v269_v51 = vld [vmem:[%s4058_s2 + $0x2b0] sm:$0xff] }
  0x26   : > { %357 = vmatpush2.msra.mxu0 %v303_v14  ;;  %428 = vmatpush2.msra.mxu1 %v305_v15  ;;  %v264_v52 = vld [vmem:[%s4058_s2 + $0x288] sm:$0xff]  ;;  %v266_v53 = vld [vmem:[%s4058_s2 + $0x298] sm:$0xff]  ;;  %v263_v54 = vld [vmem:[%s4058_s2 + $0x280] sm:$0xff] }
  0x27   : > { %358 = vmatprep.subr.mxu0 %v300_v16  ;;  %429 = vmatprep.subr.mxu1 %v302_v17  ;;  %v265_v55 = vld [vmem:[%s4058_s2 + $0x290] sm:$0xff]  ;;  %v260_v56 = vld [vmem:[%s4058_s2 + $0x268] sm:$0xff]  ;;  %v262_v57 = vld [vmem:[%s4058_s2 + $0x278] sm:$0xff] }
  0x28   : > { %359 = vmatpush2.msra.mxu0 %v299_v18  ;;  %430 = vmatpush2.msra.mxu1 %v301_v19  ;;  %v259_v58 = vld [vmem:[%s4058_s2 + $0x260] sm:$0xff]  ;;  %v261_v59 = vld [vmem:[%s4058_s2 + $0x270] sm:$0xff]  ;;  %v256_v60 = vld [vmem:[%s4058_s2 + $0x248] sm:$0xff] }
  0x29   : > { %360 = vmatprep.subr.mxu0 %v296_v20  ;;  %431 = vmatprep.subr.mxu1 %v298_v21  ;;  %v258_v61 = vld [vmem:[%s4058_s2 + $0x258] sm:$0xff]  ;;  %v255_v62 = vld [vmem:[%s4058_s2 + $0x240] sm:$0xff]  ;;  %v257_v63 = vld [vmem:[%s4058_s2 + $0x250] sm:$0xff] }
  0x2a   : > { %361 = vmatpush2.msra.mxu0 %v295_v22  ;;  %432 = vmatpush2.msra.mxu1 %v297_v23  ;;  %v1811_v4 = vld.sshfl [vmem:[%s2394_s17 + $0x4] sm:$0x33 pattern:$0x76325410]  ;;  %v252_v5 = vld [vmem:[%s4058_s2 + $0x228] sm:$0xff]  ;;  %v254_v6 = vld [vmem:[%s4058_s2 + $0x238] sm:$0xff] }
  0x2b   : > { %362 = vmatprep.subr.mxu0 %v292_v24  ;;  %433 = vmatprep.subr.mxu1 %v294_v25  ;;  %v251_v7 = vld [vmem:[%s4058_s2 + $0x220] sm:$0xff]  ;;  %v253_v8 = vld [vmem:[%s4058_s2 + $0x230] sm:$0xff]  ;;  %v248_v9 = vld [vmem:[%s4058_s2 + $0x208] sm:$0xff]  ;;  %v319_v11 = vcombine.high %v1811_v4, %v1811_v4 }
  0x2c   : > { %363 = vmatpush2.msra.mxu0 %v291_v26  ;;  %434 = vmatpush2.msra.mxu1 %v293_v27  ;;  %v250_v10 = vld [vmem:[%s4058_s2 + $0x218] sm:$0xff]  ;;  %v247_v12 = vld [vmem:[%s4058_s2 + $0x200] sm:$0xff]  ;;  %v249_v13 = vld [vmem:[%s4058_s2 + $0x210] sm:$0xff] }
  0x2d   : > { %364 = vmatprep.subr.mxu0 %v288_v28  ;;  %435 = vmatprep.subr.mxu1 %v290_v29  ;;  %v111_v14 = vld [vmem:[%s4057_s1 + $0x1e8] sm:$0xff]  ;;  %v113_v15 = vld [vmem:[%s4057_s1 + $0x1f8] sm:$0xff]  ;;  %v110_v16 = vld [vmem:[%s4057_s1 + $0x1e0] sm:$0xff] }
  0x2e   : > { %365 = vmatpush2.msra.mxu0 %v287_v30  ;;  %436 = vmatpush2.msra.mxu1 %v289_v31  ;;  %v112_v17 = vld [vmem:[%s4057_s1 + $0x1f0] sm:$0xff]  ;;  %v107_v18 = vld [vmem:[%s4057_s1 + $0x1c8] sm:$0xff]  ;;  %v109_v19 = vld [vmem:[%s4057_s1 + $0x1d8] sm:$0xff] }
  0x2f   : > { %366 = vmatprep.subr.mxu0 %v284_v32  ;;  %437 = vmatprep.subr.mxu1 %v286_v33  ;;  %v106_v20 = vld [vmem:[%s4057_s1 + $0x1c0] sm:$0xff]  ;;  %v108_v21 = vld [vmem:[%s4057_s1 + $0x1d0] sm:$0xff]  ;;  %v103_v22 = vld [vmem:[%s4057_s1 + $0x1a8] sm:$0xff] }
  0x30   : > { %367 = vmatpush2.msra.mxu0 %v283_v34  ;;  %438 = vmatpush2.msra.mxu1 %v285_v35  ;;  %v105_v23 = vld [vmem:[%s4057_s1 + $0x1b8] sm:$0xff]  ;;  %v102_v24 = vld [vmem:[%s4057_s1 + $0x1a0] sm:$0xff]  ;;  %v104_v25 = vld [vmem:[%s4057_s1 + $0x1b0] sm:$0xff] }
  0x31   : > { %368 = vmatprep.subr.mxu0 %v280_v36  ;;  %439 = vmatprep.subr.mxu1 %v282_v37  ;;  %v99_v26 = vld [vmem:[%s4057_s1 + $0x188] sm:$0xff]  ;;  %v101_v27 = vld [vmem:[%s4057_s1 + $0x198] sm:$0xff]  ;;  %v98_v28 = vld [vmem:[%s4057_s1 + $0x180] sm:$0xff] }
  0x32   : > { %369 = vmatpush2.msra.mxu0 %v279_v38  ;;  %440 = vmatpush2.msra.mxu1 %v281_v39  ;;  %v100_v29 = vld [vmem:[%s4057_s1 + $0x190] sm:$0xff]  ;;  %v95_v30 = vld [vmem:[%s4057_s1 + $0x168] sm:$0xff]  ;;  %v97_v31 = vld [vmem:[%s4057_s1 + $0x178] sm:$0xff] }
  0x33   : > { %370 = vmatprep.subr.mxu0 %v276_v40  ;;  %441 = vmatprep.subr.mxu1 %v278_v41  ;;  %v94_v32 = vld [vmem:[%s4057_s1 + $0x160] sm:$0xff]  ;;  %v96_v33 = vld [vmem:[%s4057_s1 + $0x170] sm:$0xff]  ;;  %v91_v34 = vld [vmem:[%s4057_s1 + $0x148] sm:$0xff] }
  0x34   : > { %371 = vmatpush2.msra.mxu0 %v275_v42  ;;  %442 = vmatpush2.msra.mxu1 %v277_v43  ;;  %v93_v35 = vld [vmem:[%s4057_s1 + $0x158] sm:$0xff]  ;;  %v90_v36 = vld [vmem:[%s4057_s1 + $0x140] sm:$0xff]  ;;  %v92_v37 = vld [vmem:[%s4057_s1 + $0x150] sm:$0xff] }
  0x35   : > { %372 = vmatprep.subr.mxu0 %v272_v44  ;;  %443 = vmatprep.subr.mxu1 %v274_v45  ;;  %v87_v38 = vld [vmem:[%s4057_s1 + $0x128] sm:$0xff]  ;;  %v89_v39 = vld [vmem:[%s4057_s1 + $0x138] sm:$0xff]  ;;  %v86_v40 = vld [vmem:[%s4057_s1 + $0x120] sm:$0xff] }
  0x36   : > { %373 = vmatpush2.msra.mxu0 %v271_v46  ;;  %444 = vmatpush2.msra.mxu1 %v273_v47  ;;  %v88_v41 = vld [vmem:[%s4057_s1 + $0x130] sm:$0xff]  ;;  %v83_v42 = vld [vmem:[%s4057_s1 + $0x108] sm:$0xff]  ;;  %v85_v43 = vld [vmem:[%s4057_s1 + $0x118] sm:$0xff] }
  0x37   : > { %374 = vmatprep.subr.mxu0 %v268_v48  ;;  %445 = vmatprep.subr.mxu1 %v270_v49  ;;  %v82_v44 = vld [vmem:[%s4057_s1 + $0x100] sm:$0xff]  ;;  %v84_v45 = vld [vmem:[%s4057_s1 + $0x110] sm:$0xff]  ;;  %v79_v46 = vld [vmem:[%s4057_s1 + $0xe8] sm:$0xff] }
  0x38   : > { %375 = vmatpush2.msra.mxu0 %v267_v50  ;;  %446 = vmatpush2.msra.mxu1 %v269_v51  ;;  %v81_v47 = vld [vmem:[%s4057_s1 + $0xf8] sm:$0xff]  ;;  %v78_v48 = vld [vmem:[%s4057_s1 + $0xe0] sm:$0xff]  ;;  %v80_v49 = vld [vmem:[%s4057_s1 + $0xf0] sm:$0xff] }
  0x39   : > { %376 = vmatprep.subr.mxu0 %v264_v52  ;;  %447 = vmatprep.subr.mxu1 %v266_v53  ;;  %v75_v50 = vld [vmem:[%s4057_s1 + $0xc8] sm:$0xff]  ;;  %v77_v51 = vld [vmem:[%s4057_s1 + $0xd8] sm:$0xff]  ;;  %v74_v52 = vld [vmem:[%s4057_s1 + $0xc0] sm:$0xff] }
  0x3a   : > { %377 = vmatpush2.msra.mxu0 %v263_v54  ;;  %448 = vmatpush2.msra.mxu1 %v265_v55  ;;  %v76_v53 = vld [vmem:[%s4057_s1 + $0xd0] sm:$0xff]  ;;  %v71_v54 = vld [vmem:[%s4057_s1 + $0xa8] sm:$0xff]  ;;  %v73_v55 = vld [vmem:[%s4057_s1 + $0xb8] sm:$0xff] }
  0x3b   : > { %378 = vmatprep.subr.mxu0 %v260_v56  ;;  %449 = vmatprep.subr.mxu1 %v262_v57  ;;  %v70_v56 = vld [vmem:[%s4057_s1 + $0xa0] sm:$0xff]  ;;  %v72_v57 = vld [vmem:[%s4057_s1 + $0xb0] sm:$0xff] }
  0x3c   : > { %379 = vmatpush2.msra.mxu0 %v259_v58  ;;  %450 = vmatpush2.msra.mxu1 %v261_v59  ;;  %v67_v58 = vld [vmem:[%s4057_s1 + $0x88] sm:$0xff]  ;;  %v69_v59 = vld [vmem:[%s4057_s1 + $0x98] sm:$0xff] }
  0x3d   : > { %380 = vmatprep.subr.mxu0 %v256_v60  ;;  %451 = vmatprep.subr.mxu1 %v258_v61  ;;  %v66_v60 = vld [vmem:[%s4057_s1 + $0x80] sm:$0xff]  ;;  %v68_v61 = vld [vmem:[%s4057_s1 + $0x90] sm:$0xff] }
  0x3e   : > { %381 = vmatpush2.msra.mxu0 %v255_v62  ;;  %452 = vmatpush2.msra.mxu1 %v257_v63  ;;  %v63_v62 = vld [vmem:[%s4057_s1 + $0x68] sm:$0xff]  ;;  %v65_v63 = vld [vmem:[%s4057_s1 + $0x78] sm:$0xff] }
  0x3f   : > { %382 = vmatprep.subr.mxu0 %v252_v5  ;;  %453 = vmatprep.subr.mxu1 %v254_v6  ;;  %v64_v5 = vld [vmem:[%s4057_s1 + $0x70] sm:$0xff]  ;;  %v59_v6 = vld [vmem:[%s4057_s1 + $0x48] sm:$0xff] }
  0x40   : > { %383 = vmatpush2.msra.mxu0 %v251_v7  ;;  %454 = vmatpush2.msra.mxu1 %v253_v8  ;;  %v61_v7 = vld [vmem:[%s4057_s1 + $0x58] sm:$0xff]  ;;  %v58_v8 = vld [vmem:[%s4057_s1 + $0x40] sm:$0xff] }
  0x41   : > { %384 = vmatprep.subr.mxu0 %v248_v9  ;;  %455 = vmatprep.subr.mxu1 %v250_v10  ;;  %v60_v9 = vld [vmem:[%s4057_s1 + $0x50] sm:$0xff]  ;;  %v55_v10 = vld [vmem:[%s4057_s1 + $0x28] sm:$0xff] }
  0x42   : > { %385 = vmatpush2.msra.mxu0 %v247_v12  ;;  %386 = vmatprep.mubr.f32.mxu0 %v319_v11  ;;  %v54_v12 = vld [vmem:[%s4057_s1 + $0x20] sm:$0xff] }
  0x43   : > { %456 = vmatpush2.msra.mxu1 %v249_v13  ;;  %387 = vmatmul.mubr.f32.vlgmr.msra.gmra.mxu0 %v1811_v4  ;;  %v56_v13 = vld [vmem:[%s4057_s1 + $0x30] sm:$0xff] }
  0x44   : > { %457 = vmatprep.mubr.f32.mxu1 %v319_v11  ;;  %475 = vmatprep.subr.mxu0 %v111_v14  ;;  %v57_v11 = vld [vmem:[%s4057_s1 + $0x38] sm:$0xff]  ;;  %v51_v14 = vld [vmem:[%s4057_s1 + $0x8] sm:$0xff] }
  0x45   : > { %546 = vmatprep.subr.mxu1 %v113_v15  ;;  %458 = vmatmul.mubr.f32.vlgmr.msra.gmra.mxu1 %v1811_v4  ;;  %v62_v4 = vld [vmem:[%s4057_s1 + $0x60] sm:$0xff]  ;;  %v53_v15 = vld [vmem:[%s4057_s1 + $0x18] sm:$0xff] }
  0x46   : > { %476 = vmatpush1.msra.mxu0 %v110_v16  ;;  %547 = vmatpush1.msra.mxu1 %v112_v17  ;;  %v50_v16 = vld [vmem:[%s4057_s1] sm:$0xff]  ;;  %v52_v17 = vld [vmem:[%s4057_s1 + $0x10] sm:$0xff] }
  0x47   : > { %477 = vmatprep.subr.mxu0 %v107_v18  ;;  %548 = vmatprep.subr.mxu1 %v109_v19  ;;  %v175_v18 = vld [vmem:[%s4057_s1 + $0x3e8] sm:$0xff]  ;;  %v177_v19 = vld [vmem:[%s4057_s1 + $0x3f8] sm:$0xff] }
  0x48   : > { %478 = vmatpush1.msra.mxu0 %v106_v20  ;;  %549 = vmatpush1.msra.mxu1 %v108_v21  ;;  %v174_v20 = vld [vmem:[%s4057_s1 + $0x3e0] sm:$0xff]  ;;  %v176_v21 = vld [vmem:[%s4057_s1 + $0x3f0] sm:$0xff] }
  0x49   : > { %479 = vmatprep.subr.mxu0 %v103_v22  ;;  %550 = vmatprep.subr.mxu1 %v105_v23  ;;  %v171_v22 = vld [vmem:[%s4057_s1 + $0x3c8] sm:$0xff]  ;;  %v173_v23 = vld [vmem:[%s4057_s1 + $0x3d8] sm:$0xff] }
  0x4a   : > { %480 = vmatpush1.msra.mxu0 %v102_v24  ;;  %551 = vmatpush1.msra.mxu1 %v104_v25  ;;  %v170_v24 = vld [vmem:[%s4057_s1 + $0x3c0] sm:$0xff]  ;;  %v172_v25 = vld [vmem:[%s4057_s1 + $0x3d0] sm:$0xff] }
  0x4b   : > { %481 = vmatprep.subr.mxu0 %v99_v26  ;;  %552 = vmatprep.subr.mxu1 %v101_v27  ;;  %v167_v26 = vld [vmem:[%s4057_s1 + $0x3a8] sm:$0xff]  ;;  %v169_v27 = vld [vmem:[%s4057_s1 + $0x3b8] sm:$0xff] }
  0x4c   : > { %482 = vmatpush1.msra.mxu0 %v98_v28  ;;  %553 = vmatpush1.msra.mxu1 %v100_v29  ;;  %v166_v28 = vld [vmem:[%s4057_s1 + $0x3a0] sm:$0xff]  ;;  %v168_v29 = vld [vmem:[%s4057_s1 + $0x3b0] sm:$0xff] }
  0x4d   : > { %483 = vmatprep.subr.mxu0 %v95_v30  ;;  %554 = vmatprep.subr.mxu1 %v97_v31  ;;  %v163_v30 = vld [vmem:[%s4057_s1 + $0x388] sm:$0xff]  ;;  %v165_v31 = vld [vmem:[%s4057_s1 + $0x398] sm:$0xff] }
  0x4e   : > { %484 = vmatpush1.msra.mxu0 %v94_v32  ;;  %555 = vmatpush1.msra.mxu1 %v96_v33  ;;  %v162_v32 = vld [vmem:[%s4057_s1 + $0x380] sm:$0xff]  ;;  %v164_v33 = vld [vmem:[%s4057_s1 + $0x390] sm:$0xff] }
  0x4f   : > { %485 = vmatprep.subr.mxu0 %v91_v34  ;;  %556 = vmatprep.subr.mxu1 %v93_v35  ;;  %v159_v34 = vld [vmem:[%s4057_s1 + $0x368] sm:$0xff]  ;;  %v161_v35 = vld [vmem:[%s4057_s1 + $0x378] sm:$0xff] }
  0x50   : > { %486 = vmatpush1.msra.mxu0 %v90_v36  ;;  %557 = vmatpush1.msra.mxu1 %v92_v37  ;;  %v158_v36 = vld [vmem:[%s4057_s1 + $0x360] sm:$0xff]  ;;  %v160_v37 = vld [vmem:[%s4057_s1 + $0x370] sm:$0xff] }
  0x51   : > { %487 = vmatprep.subr.mxu0 %v87_v38  ;;  %558 = vmatprep.subr.mxu1 %v89_v39  ;;  %v155_v38 = vld [vmem:[%s4057_s1 + $0x348] sm:$0xff]  ;;  %v157_v39 = vld [vmem:[%s4057_s1 + $0x358] sm:$0xff] }
  0x52   : > { %488 = vmatpush1.msra.mxu0 %v86_v40  ;;  %559 = vmatpush1.msra.mxu1 %v88_v41  ;;  %v154_v40 = vld [vmem:[%s4057_s1 + $0x340] sm:$0xff]  ;;  %v156_v41 = vld [vmem:[%s4057_s1 + $0x350] sm:$0xff] }
  0x53   : > { %489 = vmatprep.subr.mxu0 %v83_v42  ;;  %560 = vmatprep.subr.mxu1 %v85_v43  ;;  %v151_v42 = vld [vmem:[%s4057_s1 + $0x328] sm:$0xff]  ;;  %v153_v43 = vld [vmem:[%s4057_s1 + $0x338] sm:$0xff] }
  0x54   : > { %490 = vmatpush1.msra.mxu0 %v82_v44  ;;  %561 = vmatpush1.msra.mxu1 %v84_v45  ;;  %v150_v44 = vld [vmem:[%s4057_s1 + $0x320] sm:$0xff]  ;;  %v152_v45 = vld [vmem:[%s4057_s1 + $0x330] sm:$0xff] }
  0x55   : > { %491 = vmatprep.subr.mxu0 %v79_v46  ;;  %562 = vmatprep.subr.mxu1 %v81_v47  ;;  %v147_v46 = vld [vmem:[%s4057_s1 + $0x308] sm:$0xff]  ;;  %v149_v47 = vld [vmem:[%s4057_s1 + $0x318] sm:$0xff] }
  0x56   : > { %492 = vmatpush1.msra.mxu0 %v78_v48  ;;  %563 = vmatpush1.msra.mxu1 %v80_v49  ;;  %v146_v48 = vld [vmem:[%s4057_s1 + $0x300] sm:$0xff]  ;;  %v148_v49 = vld [vmem:[%s4057_s1 + $0x310] sm:$0xff] }
  0x57   : > { %493 = vmatprep.subr.mxu0 %v75_v50  ;;  %564 = vmatprep.subr.mxu1 %v77_v51  ;;  %v143_v50 = vld [vmem:[%s4057_s1 + $0x2e8] sm:$0xff]  ;;  %v145_v51 = vld [vmem:[%s4057_s1 + $0x2f8] sm:$0xff] }
  0x58   : > { %494 = vmatpush1.msra.mxu0 %v74_v52  ;;  %565 = vmatpush1.msra.mxu1 %v76_v53  ;;  %v142_v52 = vld [vmem:[%s4057_s1 + $0x2e0] sm:$0xff]  ;;  %v144_v53 = vld [vmem:[%s4057_s1 + $0x2f0] sm:$0xff] }
  0x59   : > { %495 = vmatprep.subr.mxu0 %v71_v54  ;;  %566 = vmatprep.subr.mxu1 %v73_v55  ;;  %v139_v54 = vld [vmem:[%s4057_s1 + $0x2c8] sm:$0xff]  ;;  %v141_v55 = vld [vmem:[%s4057_s1 + $0x2d8] sm:$0xff] }
  0x5a   : > { %496 = vmatpush1.msra.mxu0 %v70_v56  ;;  %567 = vmatpush1.msra.mxu1 %v72_v57  ;;  %v138_v56 = vld [vmem:[%s4057_s1 + $0x2c0] sm:$0xff]  ;;  %v140_v57 = vld [vmem:[%s4057_s1 + $0x2d0] sm:$0xff] }
  0x5b   : > { %497 = vmatprep.subr.mxu0 %v67_v58  ;;  %568 = vmatprep.subr.mxu1 %v69_v59  ;;  %v135_v58 = vld [vmem:[%s4057_s1 + $0x2a8] sm:$0xff]  ;;  %v137_v59 = vld [vmem:[%s4057_s1 + $0x2b8] sm:$0xff] }
  0x5c   : > { %498 = vmatpush1.msra.mxu0 %v66_v60  ;;  %569 = vmatpush1.msra.mxu1 %v68_v61  ;;  %v134_v60 = vld [vmem:[%s4057_s1 + $0x2a0] sm:$0xff]  ;;  %v136_v61 = vld [vmem:[%s4057_s1 + $0x2b0] sm:$0xff] }
  0x5d   : > { %499 = vmatprep.subr.mxu0 %v63_v62  ;;  %570 = vmatprep.subr.mxu1 %v65_v63  ;;  %v131_v62 = vld [vmem:[%s4057_s1 + $0x288] sm:$0xff]  ;;  %v133_v63 = vld [vmem:[%s4057_s1 + $0x298] sm:$0xff] }
  0x5e   : > { %500 = vmatpush1.msra.mxu0 %v62_v4  ;;  %571 = vmatpush1.msra.mxu1 %v64_v5  ;;  %v130_v4 = vld [vmem:[%s4057_s1 + $0x280] sm:$0xff]  ;;  %v132_v5 = vld [vmem:[%s4057_s1 + $0x290] sm:$0xff] }
  0x5f   : > { %501 = vmatprep.subr.mxu0 %v59_v6  ;;  %572 = vmatprep.subr.mxu1 %v61_v7  ;;  %v127_v6 = vld [vmem:[%s4057_s1 + $0x268] sm:$0xff]  ;;  %v129_v7 = vld [vmem:[%s4057_s1 + $0x278] sm:$0xff] }
  0x60   : > { %502 = vmatpush1.msra.mxu0 %v58_v8  ;;  %573 = vmatpush1.msra.mxu1 %v60_v9  ;;  %v126_v8 = vld [vmem:[%s4057_s1 + $0x260] sm:$0xff]  ;;  %v128_v9 = vld [vmem:[%s4057_s1 + $0x270] sm:$0xff] }
  0x61   : > { %503 = vmatprep.subr.mxu0 %v55_v10  ;;  %574 = vmatprep.subr.mxu1 %v57_v11  ;;  %v123_v10 = vld [vmem:[%s4057_s1 + $0x248] sm:$0xff]  ;;  %v125_v11 = vld [vmem:[%s4057_s1 + $0x258] sm:$0xff] }
  0x62   : > { %504 = vmatpush1.msra.mxu0 %v54_v12  ;;  %575 = vmatpush1.msra.mxu1 %v56_v13  ;;  %v1812_v12 = vld.sshfl [vmem:[%s2394_s17] sm:$0x33 pattern:$0x76325410] }
  0x63   : > { %505 = vmatprep.subr.mxu0 %v51_v14  ;;  %576 = vmatprep.subr.mxu1 %v53_v15  ;;  %v122_v13 = vld [vmem:[%s4057_s1 + $0x240] sm:$0xff]  ;;  %v124_v14 = vld [vmem:[%s4057_s1 + $0x250] sm:$0xff]  ;;  %v119_v15 = vld [vmem:[%s4057_s1 + $0x228] sm:$0xff] }
  0x64   : > { %506 = vmatpush1.msra.mxu0 %v50_v16  ;;  %577 = vmatpush1.msra.mxu1 %v52_v17  ;;  %v121_v16 = vld [vmem:[%s4057_s1 + $0x238] sm:$0xff]  ;;  %v118_v17 = vld [vmem:[%s4057_s1 + $0x220] sm:$0xff] }
  0x65   : > { %507 = vmatprep.subr.mxu0 %v175_v18  ;;  %578 = vmatprep.subr.mxu1 %v177_v19  ;;  %v120_v18 = vld [vmem:[%s4057_s1 + $0x230] sm:$0xff]  ;;  %v115_v19 = vld [vmem:[%s4057_s1 + $0x208] sm:$0xff] }
  0x66   : > { %508 = vmatpush2.msra.mxu0 %v174_v20  ;;  %579 = vmatpush2.msra.mxu1 %v176_v21  ;;  %v117_v20 = vld [vmem:[%s4057_s1 + $0x218] sm:$0xff]  ;;  %v472_v21 = vcombine.high %v1812_v12, %v1812_v12 }
  0x67   : > { %509 = vmatprep.subr.mxu0 %v171_v22  ;;  %580 = vmatprep.subr.mxu1 %v173_v23  ;;  %v114_v22 = vld [vmem:[%s4057_s1 + $0x200] sm:$0xff]  ;;  %v116_v23 = vld [vmem:[%s4057_s1 + $0x210] sm:$0xff] }
  0x68   : > { %510 = vmatpush2.msra.mxu0 %v170_v24  ;;  %581 = vmatpush2.msra.mxu1 %v172_v25  ;;  %v678_v24 = vld [vmem:[%s4059_s3 + $0x1e8] sm:$0xff]  ;;  %v680_v25 = vld [vmem:[%s4059_s3 + $0x1f8] sm:$0xff] }
  0x69   : > { %511 = vmatprep.subr.mxu0 %v167_v26  ;;  %582 = vmatprep.subr.mxu1 %v169_v27  ;;  %v677_v26 = vld [vmem:[%s4059_s3 + $0x1e0] sm:$0xff]  ;;  %v679_v27 = vld [vmem:[%s4059_s3 + $0x1f0] sm:$0xff] }
  0x6a   : > { %512 = vmatpush2.msra.mxu0 %v166_v28  ;;  %583 = vmatpush2.msra.mxu1 %v168_v29  ;;  %v674_v28 = vld [vmem:[%s4059_s3 + $0x1c8] sm:$0xff]  ;;  %v676_v29 = vld [vmem:[%s4059_s3 + $0x1d8] sm:$0xff] }
  0x6b   : > { %513 = vmatprep.subr.mxu0 %v163_v30  ;;  %584 = vmatprep.subr.mxu1 %v165_v31  ;;  %v673_v30 = vld [vmem:[%s4059_s3 + $0x1c0] sm:$0xff]  ;;  %v675_v31 = vld [vmem:[%s4059_s3 + $0x1d0] sm:$0xff] }
  0x6c   : > { %514 = vmatpush2.msra.mxu0 %v162_v32  ;;  %585 = vmatpush2.msra.mxu1 %v164_v33  ;;  %v670_v32 = vld [vmem:[%s4059_s3 + $0x1a8] sm:$0xff]  ;;  %v672_v33 = vld [vmem:[%s4059_s3 + $0x1b8] sm:$0xff] }
  0x6d   : > { %515 = vmatprep.subr.mxu0 %v159_v34  ;;  %586 = vmatprep.subr.mxu1 %v161_v35  ;;  %v669_v34 = vld [vmem:[%s4059_s3 + $0x1a0] sm:$0xff]  ;;  %v671_v35 = vld [vmem:[%s4059_s3 + $0x1b0] sm:$0xff] }
  0x6e   : > { %516 = vmatpush2.msra.mxu0 %v158_v36  ;;  %587 = vmatpush2.msra.mxu1 %v160_v37  ;;  %v666_v36 = vld [vmem:[%s4059_s3 + $0x188] sm:$0xff]  ;;  %v668_v37 = vld [vmem:[%s4059_s3 + $0x198] sm:$0xff] }
  0x6f   : > { %517 = vmatprep.subr.mxu0 %v155_v38  ;;  %588 = vmatprep.subr.mxu1 %v157_v39  ;;  %v665_v38 = vld [vmem:[%s4059_s3 + $0x180] sm:$0xff]  ;;  %v667_v39 = vld [vmem:[%s4059_s3 + $0x190] sm:$0xff] }
  0x70   : > { %518 = vmatpush2.msra.mxu0 %v154_v40  ;;  %589 = vmatpush2.msra.mxu1 %v156_v41  ;;  %v662_v40 = vld [vmem:[%s4059_s3 + $0x168] sm:$0xff]  ;;  %v664_v41 = vld [vmem:[%s4059_s3 + $0x178] sm:$0xff] }
  0x71   : > { %519 = vmatprep.subr.mxu0 %v151_v42  ;;  %590 = vmatprep.subr.mxu1 %v153_v43  ;;  %v661_v42 = vld [vmem:[%s4059_s3 + $0x160] sm:$0xff]  ;;  %v663_v43 = vld [vmem:[%s4059_s3 + $0x170] sm:$0xff] }
  0x72   : > { %520 = vmatpush2.msra.mxu0 %v150_v44  ;;  %591 = vmatpush2.msra.mxu1 %v152_v45  ;;  %v658_v44 = vld [vmem:[%s4059_s3 + $0x148] sm:$0xff]  ;;  %v660_v45 = vld [vmem:[%s4059_s3 + $0x158] sm:$0xff] }
  0x73   : > { %521 = vmatprep.subr.mxu0 %v147_v46  ;;  %592 = vmatprep.subr.mxu1 %v149_v47  ;;  %v657_v46 = vld [vmem:[%s4059_s3 + $0x140] sm:$0xff]  ;;  %v659_v47 = vld [vmem:[%s4059_s3 + $0x150] sm:$0xff] }
  0x74   : > { %522 = vmatpush2.msra.mxu0 %v146_v48  ;;  %593 = vmatpush2.msra.mxu1 %v148_v49  ;;  %v654_v48 = vld [vmem:[%s4059_s3 + $0x128] sm:$0xff]  ;;  %v656_v49 = vld [vmem:[%s4059_s3 + $0x138] sm:$0xff] }
  0x75   : > { %523 = vmatprep.subr.mxu0 %v143_v50  ;;  %594 = vmatprep.subr.mxu1 %v145_v51  ;;  %v653_v50 = vld [vmem:[%s4059_s3 + $0x120] sm:$0xff]  ;;  %v655_v51 = vld [vmem:[%s4059_s3 + $0x130] sm:$0xff] }
  0x76   : > { %524 = vmatpush2.msra.mxu0 %v142_v52  ;;  %595 = vmatpush2.msra.mxu1 %v144_v53  ;;  %v650_v52 = vld [vmem:[%s4059_s3 + $0x108] sm:$0xff]  ;;  %v652_v53 = vld [vmem:[%s4059_s3 + $0x118] sm:$0xff] }
  0x77   : > { %525 = vmatprep.subr.mxu0 %v139_v54  ;;  %596 = vmatprep.subr.mxu1 %v141_v55  ;;  %v649_v54 = vld [vmem:[%s4059_s3 + $0x100] sm:$0xff]  ;;  %v651_v55 = vld [vmem:[%s4059_s3 + $0x110] sm:$0xff] }
  0x78   : > { %526 = vmatpush2.msra.mxu0 %v138_v56  ;;  %597 = vmatpush2.msra.mxu1 %v140_v57  ;;  %v646_v56 = vld [vmem:[%s4059_s3 + $0xe8] sm:$0xff]  ;;  %v648_v57 = vld [vmem:[%s4059_s3 + $0xf8] sm:$0xff] }
  0x79   : > { %527 = vmatprep.subr.mxu0 %v135_v58  ;;  %598 = vmatprep.subr.mxu1 %v137_v59  ;;  %v645_v58 = vld [vmem:[%s4059_s3 + $0xe0] sm:$0xff]  ;;  %v647_v59 = vld [vmem:[%s4059_s3 + $0xf0] sm:$0xff] }
  0x7a   : > { %528 = vmatpush2.msra.mxu0 %v134_v60  ;;  %599 = vmatpush2.msra.mxu1 %v136_v61  ;;  %v642_v60 = vld [vmem:[%s4059_s3 + $0xc8] sm:$0xff]  ;;  %v644_v61 = vld [vmem:[%s4059_s3 + $0xd8] sm:$0xff] }
  0x7b   : > { %529 = vmatprep.subr.mxu0 %v131_v62  ;;  %600 = vmatprep.subr.mxu1 %v133_v63  ;;  %v641_v62 = vld [vmem:[%s4059_s3 + $0xc0] sm:$0xff]  ;;  %v643_v63 = vld [vmem:[%s4059_s3 + $0xd0] sm:$0xff] }
  0x7c   : > { %530 = vmatpush2.msra.mxu0 %v130_v4  ;;  %601 = vmatpush2.msra.mxu1 %v132_v5  ;;  %v638_v4 = vld [vmem:[%s4059_s3 + $0xa8] sm:$0xff]  ;;  %v640_v5 = vld [vmem:[%s4059_s3 + $0xb8] sm:$0xff] }
  0x7d   : > { %531 = vmatprep.subr.mxu0 %v127_v6  ;;  %602 = vmatprep.subr.mxu1 %v129_v7  ;;  %v637_v6 = vld [vmem:[%s4059_s3 + $0xa0] sm:$0xff]  ;;  %v639_v7 = vld [vmem:[%s4059_s3 + $0xb0] sm:$0xff] }
  0x7e   : > { %532 = vmatpush2.msra.mxu0 %v126_v8  ;;  %603 = vmatpush2.msra.mxu1 %v128_v9  ;;  %v634_v8 = vld [vmem:[%s4059_s3 + $0x88] sm:$0xff]  ;;  %v636_v9 = vld [vmem:[%s4059_s3 + $0x98] sm:$0xff] }
  0x7f   : > { %533 = vmatprep.subr.mxu0 %v123_v10  ;;  %604 = vmatprep.subr.mxu1 %v125_v11  ;;  %v633_v10 = vld [vmem:[%s4059_s3 + $0x80] sm:$0xff]  ;;  %v635_v11 = vld [vmem:[%s4059_s3 + $0x90] sm:$0xff] }
  0x80   : > { %534 = vmatpush2.msra.mxu0 %v122_v13  ;;  %605 = vmatpush2.msra.mxu1 %v124_v14  ;;  %v632_v13 = vld [vmem:[%s4059_s3 + $0x78] sm:$0xff]  ;;  %v629_v14 = vld [vmem:[%s4059_s3 + $0x60] sm:$0xff] }
  0x81   : > { %535 = vmatprep.subr.mxu0 %v119_v15  ;;  %606 = vmatprep.subr.mxu1 %v121_v16  ;;  %v631_v15 = vld [vmem:[%s4059_s3 + $0x70] sm:$0xff]  ;;  %v626_v16 = vld [vmem:[%s4059_s3 + $0x48] sm:$0xff] }
  0x82   : > { %536 = vmatpush2.msra.mxu0 %v118_v17  ;;  %607 = vmatpush2.msra.mxu1 %v120_v18  ;;  %v628_v17 = vld [vmem:[%s4059_s3 + $0x58] sm:$0xff]  ;;  %v625_v18 = vld [vmem:[%s4059_s3 + $0x40] sm:$0xff] }
  0x83   : > { %537 = vmatprep.subr.mxu0 %v115_v19  ;;  %608 = vmatprep.subr.mxu1 %v117_v20  ;;  %v627_v19 = vld [vmem:[%s4059_s3 + $0x50] sm:$0xff]  ;;  %v622_v20 = vld [vmem:[%s4059_s3 + $0x28] sm:$0xff] }
  0x84   : > { %538 = vmatpush2.msra.mxu0 %v114_v22  ;;  %539 = vmatprep.mubr.f32.mxu0 %v472_v21  ;;  %v621_v22 = vld [vmem:[%s4059_s3 + $0x20] sm:$0xff] }
  0x85   : > { %609 = vmatpush2.msra.mxu1 %v116_v23  ;;  %610 = vmatprep.mubr.f32.mxu1 %v472_v21  ;;  %v624_v21 = vld [vmem:[%s4059_s3 + $0x38] sm:$0xff]  ;;  %v623_v23 = vld [vmem:[%s4059_s3 + $0x30] sm:$0xff] }
  0x86   : > { %540 = vmatmul.mubr.f32.vlgmr.msra.gmra.mxu0 %v1812_v12  ;;  %611 = vmatmul.mubr.f32.vlgmr.msra.gmra.mxu1 %v1812_v12  ;;  %v630_v12 = vld [vmem:[%s4059_s3 + $0x68] sm:$0xff] }
  0x87   : > { %681 = vmatprep.subr.mxu0 %v678_v24  ;;  %752 = vmatprep.subr.mxu1 %v680_v25  ;;  %v618_v24 = vld [vmem:[%s4059_s3 + $0x8] sm:$0xff]  ;;  %v620_v25 = vld [vmem:[%s4059_s3 + $0x18] sm:$0xff] }
  0x88   : > { %682 = vmatpush1.msra.mxu0 %v677_v26  ;;  %753 = vmatpush1.msra.mxu1 %v679_v27  ;;  %v617_v26 = vld [vmem:[%s4059_s3] sm:$0xff]  ;;  %v619_v27 = vld [vmem:[%s4059_s3 + $0x10] sm:$0xff] }
  0x89   : > { %683 = vmatprep.subr.mxu0 %v674_v28  ;;  %754 = vmatprep.subr.mxu1 %v676_v29  ;;  %v1966_v28 = vmov 0.0   ;;  %v1079_v29 = vld [vmem:[%s4062_s6 + $0x1e8] sm:$0xff] }
  0x8a   : > { %684 = vmatpush1.msra.mxu0 %v673_v30  ;;  %755 = vmatpush1.msra.mxu1 %v675_v31  ;;  %v1081_v30 = vld [vmem:[%s4062_s6 + $0x1f8] sm:$0xff]  ;;  %v1078_v31 = vld [vmem:[%s4062_s6 + $0x1e0] sm:$0xff] }
  0x8b   : > { %685 = vmatprep.subr.mxu0 %v670_v32  ;;  %756 = vmatprep.subr.mxu1 %v672_v33  ;;  %v1080_v32 = vld [vmem:[%s4062_s6 + $0x1f0] sm:$0xff]  ;;  %v1075_v33 = vld [vmem:[%s4062_s6 + $0x1c8] sm:$0xff] }
  0x8c   : > { %686 = vmatpush1.msra.mxu0 %v669_v34  ;;  %757 = vmatpush1.msra.mxu1 %v671_v35  ;;  %v1077_v34 = vld [vmem:[%s4062_s6 + $0x1d8] sm:$0xff]  ;;  %v1074_v35 = vld [vmem:[%s4062_s6 + $0x1c0] sm:$0xff] }
  0x8d   : > { %687 = vmatprep.subr.mxu0 %v666_v36  ;;  %758 = vmatprep.subr.mxu1 %v668_v37  ;;  %v1076_v36 = vld [vmem:[%s4062_s6 + $0x1d0] sm:$0xff]  ;;  %v1073_v37 = vld [vmem:[%s4062_s6 + $0x1b8] sm:$0xff] }
  0x8e   : > { %688 = vmatpush1.msra.mxu0 %v665_v38  ;;  %759 = vmatpush1.msra.mxu1 %v667_v39  ;;  %v1070_v38 = vld [vmem:[%s4062_s6 + $0x1a0] sm:$0xff]  ;;  %v1072_v39 = vld [vmem:[%s4062_s6 + $0x1b0] sm:$0xff] }
  0x8f   : > { %689 = vmatprep.subr.mxu0 %v662_v40  ;;  %760 = vmatprep.subr.mxu1 %v664_v41  ;;  %v1067_v40 = vld [vmem:[%s4062_s6 + $0x188] sm:$0xff]  ;;  %v1069_v41 = vld [vmem:[%s4062_s6 + $0x198] sm:$0xff] }
  0x90   : > { %690 = vmatpush1.msra.mxu0 %v661_v42  ;;  %761 = vmatpush1.msra.mxu1 %v663_v43  ;;  %v1066_v42 = vld [vmem:[%s4062_s6 + $0x180] sm:$0xff]  ;;  %v1068_v43 = vld [vmem:[%s4062_s6 + $0x190] sm:$0xff] }
  0x91   : > { %691 = vmatprep.subr.mxu0 %v658_v44  ;;  %762 = vmatprep.subr.mxu1 %v660_v45  ;;  %v1063_v44 = vld [vmem:[%s4062_s6 + $0x168] sm:$0xff]  ;;  %v1065_v45 = vld [vmem:[%s4062_s6 + $0x178] sm:$0xff] }
  0x92   : > { %692 = vmatpush1.msra.mxu0 %v657_v46  ;;  %763 = vmatpush1.msra.mxu1 %v659_v47  ;;  %v1062_v46 = vld [vmem:[%s4062_s6 + $0x160] sm:$0xff]  ;;  %v1064_v47 = vld [vmem:[%s4062_s6 + $0x170] sm:$0xff] }
  0x93   : > { %693 = vmatprep.subr.mxu0 %v654_v48  ;;  %764 = vmatprep.subr.mxu1 %v656_v49  ;;  %v1059_v48 = vld [vmem:[%s4062_s6 + $0x148] sm:$0xff]  ;;  %v1061_v49 = vld [vmem:[%s4062_s6 + $0x158] sm:$0xff] }
  0x94   : > { %694 = vmatpush1.msra.mxu0 %v653_v50  ;;  %765 = vmatpush1.msra.mxu1 %v655_v51  ;;  %v1058_v50 = vld [vmem:[%s4062_s6 + $0x140] sm:$0xff]  ;;  %v1060_v51 = vld [vmem:[%s4062_s6 + $0x150] sm:$0xff] }
  0x95   : > { %695 = vmatprep.subr.mxu0 %v650_v52  ;;  %766 = vmatprep.subr.mxu1 %v652_v53  ;;  %v1055_v52 = vld [vmem:[%s4062_s6 + $0x128] sm:$0xff]  ;;  %v1057_v53 = vld [vmem:[%s4062_s6 + $0x138] sm:$0xff] }
  0x96   : > { %696 = vmatpush1.msra.mxu0 %v649_v54  ;;  %767 = vmatpush1.msra.mxu1 %v651_v55  ;;  %v1054_v54 = vld [vmem:[%s4062_s6 + $0x120] sm:$0xff]  ;;  %v1056_v55 = vld [vmem:[%s4062_s6 + $0x130] sm:$0xff] }
  0x97   : > { %697 = vmatprep.subr.mxu0 %v646_v56  ;;  %768 = vmatprep.subr.mxu1 %v648_v57  ;;  %v1051_v56 = vld [vmem:[%s4062_s6 + $0x108] sm:$0xff]  ;;  %v1053_v57 = vld [vmem:[%s4062_s6 + $0x118] sm:$0xff] }
  0x98   : > { %698 = vmatpush1.msra.mxu0 %v645_v58  ;;  %769 = vmatpush1.msra.mxu1 %v647_v59  ;;  %v1050_v58 = vld [vmem:[%s4062_s6 + $0x100] sm:$0xff]  ;;  %v1052_v59 = vld [vmem:[%s4062_s6 + $0x110] sm:$0xff] }
  0x99   : > { %699 = vmatprep.subr.mxu0 %v642_v60  ;;  %770 = vmatprep.subr.mxu1 %v644_v61  ;;  %v1047_v60 = vld [vmem:[%s4062_s6 + $0xe8] sm:$0xff]  ;;  %v1049_v61 = vld [vmem:[%s4062_s6 + $0xf8] sm:$0xff] }
  0x9a   : > { %700 = vmatpush1.msra.mxu0 %v641_v62  ;;  %771 = vmatpush1.msra.mxu1 %v643_v63  ;;  %v1046_v62 = vld [vmem:[%s4062_s6 + $0xe0] sm:$0xff]  ;;  %v1048_v63 = vld [vmem:[%s4062_s6 + $0xf0] sm:$0xff] }
  0x9b   : > { %701 = vmatprep.subr.mxu0 %v638_v4  ;;  %772 = vmatprep.subr.mxu1 %v640_v5  ;;  %v1043_v4 = vld [vmem:[%s4062_s6 + $0xc8] sm:$0xff]  ;;  %v1045_v5 = vld [vmem:[%s4062_s6 + $0xd8] sm:$0xff] }
  0x9c   : > { %702 = vmatpush1.msra.mxu0 %v637_v6  ;;  %773 = vmatpush1.msra.mxu1 %v639_v7  ;;  %v1042_v6 = vld [vmem:[%s4062_s6 + $0xc0] sm:$0xff]  ;;  %v1044_v7 = vld [vmem:[%s4062_s6 + $0xd0] sm:$0xff] }
  0x9d   : > { %703 = vmatprep.subr.mxu0 %v634_v8  ;;  %774 = vmatprep.subr.mxu1 %v636_v9  ;;  %v1039_v8 = vld [vmem:[%s4062_s6 + $0xa8] sm:$0xff]  ;;  %v1041_v9 = vld [vmem:[%s4062_s6 + $0xb8] sm:$0xff] }
  0x9e   : > { %704 = vmatpush1.msra.mxu0 %v633_v10  ;;  %775 = vmatpush1.msra.mxu1 %v635_v11  ;;  %v1038_v10 = vld [vmem:[%s4062_s6 + $0xa0] sm:$0xff]  ;;  %v1040_v11 = vld [vmem:[%s4062_s6 + $0xb0] sm:$0xff] }
  0x9f   : > { %705 = vmatprep.subr.mxu0 %v630_v12  ;;  %776 = vmatprep.subr.mxu1 %v632_v13  ;;  %v1035_v12 = vld [vmem:[%s4062_s6 + $0x88] sm:$0xff]  ;;  %v1037_v13 = vld [vmem:[%s4062_s6 + $0x98] sm:$0xff] }
  0xa0   : > { %706 = vmatpush1.msra.mxu0 %v629_v14  ;;  %777 = vmatpush1.msra.mxu1 %v631_v15  ;;  %v1034_v14 = vld [vmem:[%s4062_s6 + $0x80] sm:$0xff]  ;;  %v1036_v15 = vld [vmem:[%s4062_s6 + $0x90] sm:$0xff] }
  0xa1   : > { %707 = vmatprep.subr.mxu0 %v626_v16  ;;  %778 = vmatprep.subr.mxu1 %v628_v17  ;;  %v1031_v16 = vld [vmem:[%s4062_s6 + $0x68] sm:$0xff]  ;;  %v1033_v17 = vld [vmem:[%s4062_s6 + $0x78] sm:$0xff] }
  0xa2   : > { %708 = vmatpush1.msra.mxu0 %v625_v18  ;;  %779 = vmatpush1.msra.mxu1 %v627_v19  ;;  %v1030_v18 = vld [vmem:[%s4062_s6 + $0x60] sm:$0xff]  ;;  %v1032_v19 = vld [vmem:[%s4062_s6 + $0x70] sm:$0xff] }
  0xa3   : > { %709 = vmatprep.subr.mxu0 %v622_v20  ;;  %780 = vmatprep.subr.mxu1 %v624_v21  ;;  %v1027_v20 = vld [vmem:[%s4062_s6 + $0x48] sm:$0xff]  ;;  %v1029_v21 = vld [vmem:[%s4062_s6 + $0x58] sm:$0xff] }
  0xa4   : > { %710 = vmatpush1.msra.mxu0 %v621_v22  ;;  %781 = vmatpush1.msra.mxu1 %v623_v23  ;;  %v1026_v22 = vld [vmem:[%s4062_s6 + $0x40] sm:$0xff]  ;;  %v1028_v23 = vld [vmem:[%s4062_s6 + $0x50] sm:$0xff] }
  0xa5   : > { %711 = vmatprep.subr.mxu0 %v618_v24  ;;  %782 = vmatprep.subr.mxu1 %v620_v25  ;;  %v1023_v24 = vld [vmem:[%s4062_s6 + $0x28] sm:$0xff]  ;;  %v1025_v25 = vld [vmem:[%s4062_s6 + $0x38] sm:$0xff] }
  0xa6   : > { %712 = vmatpush1.msra.mxu0 %v617_v26  ;;  %745 = vmatprep.mubr.f32.mxu0 %v1966_v28  ;;  %v1022_v26 = vld [vmem:[%s4062_s6 + $0x20] sm:$0xff] }
  0xa7   : > { %783 = vmatpush1.msra.mxu1 %v619_v27  ;;  %816 = vmatprep.mubr.f32.mxu1 %v1966_v28  ;;  %v1024_v27 = vld [vmem:[%s4062_s6 + $0x30] sm:$0xff] }
  0xa8   : > { %746 = vmatmul.mubr.f32.vlgmr.msra.gmra.mxu0 %v1960_v3  ;;  %817 = vmatmul.mubr.f32.vlgmr.msra.gmra.mxu1 %v1960_v3  ;;  %v1071_v3 = vld [vmem:[%s4062_s6 + $0x1a8] sm:$0xff] }
  0xa9   : > { %1157 = vmatprep.subr.mxu0 %v1079_v29  ;;  %1228 = vmatprep.subr.mxu1 %v1081_v30  ;;  %v1019_v29 = vld [vmem:[%s4062_s6 + $0x8] sm:$0xff]  ;;  %v1021_v30 = vld [vmem:[%s4062_s6 + $0x18] sm:$0xff] }
  0xaa   : > { %1158 = vmatpush1.msra.mxu0 %v1078_v31  ;;  %1229 = vmatpush1.msra.mxu1 %v1080_v32  ;;  %v1018_v31 = vld [vmem:[%s4062_s6] sm:$0xff]  ;;  %v1020_v32 = vld [vmem:[%s4062_s6 + $0x10] sm:$0xff] }
  0xab   : > { %1159 = vmatprep.subr.mxu0 %v1075_v33  ;;  %1230 = vmatprep.subr.mxu1 %v1077_v34  ;;  %v1143_v33 = vld [vmem:[%s4062_s6 + $0x3e8] sm:$0xff]  ;;  %v1145_v34 = vld [vmem:[%s4062_s6 + $0x3f8] sm:$0xff] }
  0xac   : > { %1160 = vmatpush1.msra.mxu0 %v1074_v35  ;;  %1231 = vmatpush1.msra.mxu1 %v1076_v36  ;;  %v1142_v35 = vld [vmem:[%s4062_s6 + $0x3e0] sm:$0xff]  ;;  %v1144_v36 = vld [vmem:[%s4062_s6 + $0x3f0] sm:$0xff] }
  0xad   : > { %1161 = vmatprep.subr.mxu0 %v1071_v3  ;;  %1232 = vmatprep.subr.mxu1 %v1073_v37  ;;  %v1139_v3 = vld [vmem:[%s4062_s6 + $0x3c8] sm:$0xff]  ;;  %v1141_v37 = vld [vmem:[%s4062_s6 + $0x3d8] sm:$0xff] }
  0xae   : > { %1162 = vmatpush1.msra.mxu0 %v1070_v38  ;;  %1233 = vmatpush1.msra.mxu1 %v1072_v39  ;;  %v1138_v38 = vld [vmem:[%s4062_s6 + $0x3c0] sm:$0xff]  ;;  %v1140_v39 = vld [vmem:[%s4062_s6 + $0x3d0] sm:$0xff] }
  0xaf   : > { %1163 = vmatprep.subr.mxu0 %v1067_v40  ;;  %1234 = vmatprep.subr.mxu1 %v1069_v41  ;;  %v1135_v40 = vld [vmem:[%s4062_s6 + $0x3a8] sm:$0xff]  ;;  %v1137_v41 = vld [vmem:[%s4062_s6 + $0x3b8] sm:$0xff] }
  0xb0   : > { %1164 = vmatpush1.msra.mxu0 %v1066_v42  ;;  %1235 = vmatpush1.msra.mxu1 %v1068_v43  ;;  %v1134_v42 = vld [vmem:[%s4062_s6 + $0x3a0] sm:$0xff]  ;;  %v1136_v43 = vld [vmem:[%s4062_s6 + $0x3b0] sm:$0xff] }
  0xb1   : > { %1165 = vmatprep.subr.mxu0 %v1063_v44  ;;  %1236 = vmatprep.subr.mxu1 %v1065_v45  ;;  %v1131_v44 = vld [vmem:[%s4062_s6 + $0x388] sm:$0xff]  ;;  %v1133_v45 = vld [vmem:[%s4062_s6 + $0x398] sm:$0xff] }
  0xb2   : > { %1166 = vmatpush1.msra.mxu0 %v1062_v46  ;;  %1237 = vmatpush1.msra.mxu1 %v1064_v47  ;;  %v1130_v46 = vld [vmem:[%s4062_s6 + $0x380] sm:$0xff]  ;;  %v1132_v47 = vld [vmem:[%s4062_s6 + $0x390] sm:$0xff] }
  0xb3   : > { %1167 = vmatprep.subr.mxu0 %v1059_v48  ;;  %1238 = vmatprep.subr.mxu1 %v1061_v49  ;;  %v1127_v48 = vld [vmem:[%s4062_s6 + $0x368] sm:$0xff]  ;;  %v1129_v49 = vld [vmem:[%s4062_s6 + $0x378] sm:$0xff] }
  0xb4   : > { %1168 = vmatpush1.msra.mxu0 %v1058_v50  ;;  %1239 = vmatpush1.msra.mxu1 %v1060_v51  ;;  %v1126_v50 = vld [vmem:[%s4062_s6 + $0x360] sm:$0xff]  ;;  %v1128_v51 = vld [vmem:[%s4062_s6 + $0x370] sm:$0xff] }
  0xb5   : > { %1169 = vmatprep.subr.mxu0 %v1055_v52  ;;  %1240 = vmatprep.subr.mxu1 %v1057_v53  ;;  %v1123_v52 = vld [vmem:[%s4062_s6 + $0x348] sm:$0xff]  ;;  %v1125_v53 = vld [vmem:[%s4062_s6 + $0x358] sm:$0xff] }
  0xb6   : > { %1170 = vmatpush1.msra.mxu0 %v1054_v54  ;;  %1241 = vmatpush1.msra.mxu1 %v1056_v55  ;;  %v1122_v54 = vld [vmem:[%s4062_s6 + $0x340] sm:$0xff]  ;;  %v1124_v55 = vld [vmem:[%s4062_s6 + $0x350] sm:$0xff] }
  0xb7   : > { %1171 = vmatprep.subr.mxu0 %v1051_v56  ;;  %1242 = vmatprep.subr.mxu1 %v1053_v57  ;;  %v1119_v56 = vld [vmem:[%s4062_s6 + $0x328] sm:$0xff]  ;;  %v1121_v57 = vld [vmem:[%s4062_s6 + $0x338] sm:$0xff] }
  0xb8   : > { %1172 = vmatpush1.msra.mxu0 %v1050_v58  ;;  %1243 = vmatpush1.msra.mxu1 %v1052_v59  ;;  %v1118_v58 = vld [vmem:[%s4062_s6 + $0x320] sm:$0xff]  ;;  %v1120_v59 = vld [vmem:[%s4062_s6 + $0x330] sm:$0xff] }
  0xb9   : > { %1173 = vmatprep.subr.mxu0 %v1047_v60  ;;  %1244 = vmatprep.subr.mxu1 %v1049_v61  ;;  %v1115_v60 = vld [vmem:[%s4062_s6 + $0x308] sm:$0xff]  ;;  %v1117_v61 = vld [vmem:[%s4062_s6 + $0x318] sm:$0xff] }
  0xba   : > { %1174 = vmatpush1.msra.mxu0 %v1046_v62  ;;  %1245 = vmatpush1.msra.mxu1 %v1048_v63  ;;  %v1114_v62 = vld [vmem:[%s4062_s6 + $0x300] sm:$0xff]  ;;  %v1116_v63 = vld [vmem:[%s4062_s6 + $0x310] sm:$0xff] }
  0xbb   : > { %1175 = vmatprep.subr.mxu0 %v1043_v4  ;;  %1246 = vmatprep.subr.mxu1 %v1045_v5  ;;  %v1111_v4 = vld [vmem:[%s4062_s6 + $0x2e8] sm:$0xff]  ;;  %v1113_v5 = vld [vmem:[%s4062_s6 + $0x2f8] sm:$0xff] }
  0xbc   : > { %1176 = vmatpush1.msra.mxu0 %v1042_v6  ;;  %1247 = vmatpush1.msra.mxu1 %v1044_v7  ;;  %v1110_v6 = vld [vmem:[%s4062_s6 + $0x2e0] sm:$0xff]  ;;  %v1112_v7 = vld [vmem:[%s4062_s6 + $0x2f0] sm:$0xff] }
  0xbd   : > { %1177 = vmatprep.subr.mxu0 %v1039_v8  ;;  %1248 = vmatprep.subr.mxu1 %v1041_v9  ;;  %v1107_v8 = vld [vmem:[%s4062_s6 + $0x2c8] sm:$0xff]  ;;  %v1109_v9 = vld [vmem:[%s4062_s6 + $0x2d8] sm:$0xff] }
  0xbe   : > { %1178 = vmatpush1.msra.mxu0 %v1038_v10  ;;  %1249 = vmatpush1.msra.mxu1 %v1040_v11  ;;  %v1106_v10 = vld [vmem:[%s4062_s6 + $0x2c0] sm:$0xff]  ;;  %v1108_v11 = vld [vmem:[%s4062_s6 + $0x2d0] sm:$0xff] }
  0xbf   : > { %1179 = vmatprep.subr.mxu0 %v1035_v12  ;;  %1250 = vmatprep.subr.mxu1 %v1037_v13  ;;  %v1103_v12 = vld [vmem:[%s4062_s6 + $0x2a8] sm:$0xff]  ;;  %v1105_v13 = vld [vmem:[%s4062_s6 + $0x2b8] sm:$0xff] }
  0xc0   : > { %1180 = vmatpush1.msra.mxu0 %v1034_v14  ;;  %1251 = vmatpush1.msra.mxu1 %v1036_v15  ;;  %v1102_v14 = vld [vmem:[%s4062_s6 + $0x2a0] sm:$0xff]  ;;  %v1104_v15 = vld [vmem:[%s4062_s6 + $0x2b0] sm:$0xff] }
  0xc1   : > { %1181 = vmatprep.subr.mxu0 %v1031_v16  ;;  %1252 = vmatprep.subr.mxu1 %v1033_v17  ;;  %v1099_v16 = vld [vmem:[%s4062_s6 + $0x288] sm:$0xff]  ;;  %v1101_v17 = vld [vmem:[%s4062_s6 + $0x298] sm:$0xff] }
  0xc2   : > { %1182 = vmatpush1.msra.mxu0 %v1030_v18  ;;  %1253 = vmatpush1.msra.mxu1 %v1032_v19  ;;  %v1098_v18 = vld [vmem:[%s4062_s6 + $0x280] sm:$0xff]  ;;  %v1100_v19 = vld [vmem:[%s4062_s6 + $0x290] sm:$0xff] }
  0xc3   : > { %1183 = vmatprep.subr.mxu0 %v1027_v20  ;;  %1254 = vmatprep.subr.mxu1 %v1029_v21  ;;  %v1095_v20 = vld [vmem:[%s4062_s6 + $0x268] sm:$0xff]  ;;  %v1097_v21 = vld [vmem:[%s4062_s6 + $0x278] sm:$0xff] }
  0xc4   : > { %1184 = vmatpush1.msra.mxu0 %v1026_v22  ;;  %1255 = vmatpush1.msra.mxu1 %v1028_v23  ;;  %v1094_v22 = vld [vmem:[%s4062_s6 + $0x260] sm:$0xff]  ;;  %v1096_v23 = vld [vmem:[%s4062_s6 + $0x270] sm:$0xff] }
  0xc5   : > { %1185 = vmatprep.subr.mxu0 %v1023_v24  ;;  %1256 = vmatprep.subr.mxu1 %v1025_v25  ;;  %v1091_v24 = vld [vmem:[%s4062_s6 + $0x248] sm:$0xff]  ;;  %v1093_v25 = vld [vmem:[%s4062_s6 + $0x258] sm:$0xff] }
  0xc6   : > { %1186 = vmatpush1.msra.mxu0 %v1022_v26  ;;  %1257 = vmatpush1.msra.mxu1 %v1024_v27  ;;  %v1090_v26 = vld [vmem:[%s4062_s6 + $0x240] sm:$0xff]  ;;  %v1092_v27 = vld [vmem:[%s4062_s6 + $0x250] sm:$0xff] }
  0xc7   : > { %1187 = vmatprep.subr.mxu0 %v1019_v29  ;;  %1258 = vmatprep.subr.mxu1 %v1021_v30  ;;  %v1819_v29 = vld.sshfl [vmem:[%s3368_s11 + $0x4] sm:$0x33 pattern:$0x76325410]  ;;  %v1087_v30 = vld [vmem:[%s4062_s6 + $0x228] sm:$0xff] }
  0xc8   : > { %1188 = vmatpush1.msra.mxu0 %v1018_v31  ;;  %1259 = vmatpush1.msra.mxu1 %v1020_v32  ;;  %v1089_v31 = vld [vmem:[%s4062_s6 + $0x238] sm:$0xff]  ;;  %v1086_v32 = vld [vmem:[%s4062_s6 + $0x220] sm:$0xff] }
  0xc9   : > { %1189 = vmatprep.subr.mxu0 %v1143_v33  ;;  %1260 = vmatprep.subr.mxu1 %v1145_v34  ;;  %v1088_v33 = vld [vmem:[%s4062_s6 + $0x230] sm:$0xff]  ;;  %v1083_v34 = vld [vmem:[%s4062_s6 + $0x208] sm:$0xff] }
  0xca   : > { %1190 = vmatpush2.msra.mxu0 %v1142_v35  ;;  %1261 = vmatpush2.msra.mxu1 %v1144_v36  ;;  %v1085_v35 = vld [vmem:[%s4062_s6 + $0x218] sm:$0xff]  ;;  %v1154_v36 = vcombine.high %v1819_v29, %v1819_v29 }
  0xcb   : > { %1191 = vmatprep.subr.mxu0 %v1139_v3  ;;  %1262 = vmatprep.subr.mxu1 %v1141_v37  ;;  %v1082_v3 = vld [vmem:[%s4062_s6 + $0x200] sm:$0xff]  ;;  %v1084_v37 = vld [vmem:[%s4062_s6 + $0x210] sm:$0xff] }
  0xcc   : > { %1192 = vmatpush2.msra.mxu0 %v1138_v38  ;;  %1263 = vmatpush2.msra.mxu1 %v1140_v39  ;;  %v946_v38 = vld [vmem:[%s4061_s5 + $0x1e8] sm:$0xff]  ;;  %v948_v39 = vld [vmem:[%s4061_s5 + $0x1f8] sm:$0xff] }
  0xcd   : > { %1193 = vmatprep.subr.mxu0 %v1135_v40  ;;  %1264 = vmatprep.subr.mxu1 %v1137_v41  ;;  %v945_v40 = vld [vmem:[%s4061_s5 + $0x1e0] sm:$0xff]  ;;  %v947_v41 = vld [vmem:[%s4061_s5 + $0x1f0] sm:$0xff] }
  0xce   : > { %1194 = vmatpush2.msra.mxu0 %v1134_v42  ;;  %1265 = vmatpush2.msra.mxu1 %v1136_v43  ;;  %v942_v42 = vld [vmem:[%s4061_s5 + $0x1c8] sm:$0xff]  ;;  %v944_v43 = vld [vmem:[%s4061_s5 + $0x1d8] sm:$0xff] }
  0xcf   : > { %1195 = vmatprep.subr.mxu0 %v1131_v44  ;;  %1266 = vmatprep.subr.mxu1 %v1133_v45  ;;  %v941_v44 = vld [vmem:[%s4061_s5 + $0x1c0] sm:$0xff]  ;;  %v943_v45 = vld [vmem:[%s4061_s5 + $0x1d0] sm:$0xff] }
  0xd0   : > { %1196 = vmatpush2.msra.mxu0 %v1130_v46  ;;  %1267 = vmatpush2.msra.mxu1 %v1132_v47  ;;  %v938_v46 = vld [vmem:[%s4061_s5 + $0x1a8] sm:$0xff]  ;;  %v940_v47 = vld [vmem:[%s4061_s5 + $0x1b8] sm:$0xff] }
  0xd1   : > { %1197 = vmatprep.subr.mxu0 %v1127_v48  ;;  %1268 = vmatprep.subr.mxu1 %v1129_v49  ;;  %v937_v48 = vld [vmem:[%s4061_s5 + $0x1a0] sm:$0xff]  ;;  %v939_v49 = vld [vmem:[%s4061_s5 + $0x1b0] sm:$0xff] }
  0xd2   : > { %1198 = vmatpush2.msra.mxu0 %v1126_v50  ;;  %1269 = vmatpush2.msra.mxu1 %v1128_v51  ;;  %v934_v50 = vld [vmem:[%s4061_s5 + $0x188] sm:$0xff]  ;;  %v936_v51 = vld [vmem:[%s4061_s5 + $0x198] sm:$0xff] }
  0xd3   : > { %1199 = vmatprep.subr.mxu0 %v1123_v52  ;;  %1270 = vmatprep.subr.mxu1 %v1125_v53  ;;  %v933_v52 = vld [vmem:[%s4061_s5 + $0x180] sm:$0xff]  ;;  %v935_v53 = vld [vmem:[%s4061_s5 + $0x190] sm:$0xff] }
  0xd4   : > { %1200 = vmatpush2.msra.mxu0 %v1122_v54  ;;  %1271 = vmatpush2.msra.mxu1 %v1124_v55  ;;  %v930_v54 = vld [vmem:[%s4061_s5 + $0x168] sm:$0xff]  ;;  %v932_v55 = vld [vmem:[%s4061_s5 + $0x178] sm:$0xff] }
  0xd5   : > { %1201 = vmatprep.subr.mxu0 %v1119_v56  ;;  %1272 = vmatprep.subr.mxu1 %v1121_v57  ;;  %v929_v56 = vld [vmem:[%s4061_s5 + $0x160] sm:$0xff]  ;;  %v931_v57 = vld [vmem:[%s4061_s5 + $0x170] sm:$0xff] }
  0xd6   : > { %1202 = vmatpush2.msra.mxu0 %v1118_v58  ;;  %1273 = vmatpush2.msra.mxu1 %v1120_v59  ;;  %v926_v58 = vld [vmem:[%s4061_s5 + $0x148] sm:$0xff]  ;;  %v928_v59 = vld [vmem:[%s4061_s5 + $0x158] sm:$0xff] }
  0xd7   : > { %1203 = vmatprep.subr.mxu0 %v1115_v60  ;;  %1274 = vmatprep.subr.mxu1 %v1117_v61  ;;  %v925_v60 = vld [vmem:[%s4061_s5 + $0x140] sm:$0xff]  ;;  %v927_v61 = vld [vmem:[%s4061_s5 + $0x150] sm:$0xff] }
  0xd8   : > { %1204 = vmatpush2.msra.mxu0 %v1114_v62  ;;  %1275 = vmatpush2.msra.mxu1 %v1116_v63  ;;  %v922_v62 = vld [vmem:[%s4061_s5 + $0x128] sm:$0xff]  ;;  %v924_v63 = vld [vmem:[%s4061_s5 + $0x138] sm:$0xff] }
  0xd9   : > { %1205 = vmatprep.subr.mxu0 %v1111_v4  ;;  %1276 = vmatprep.subr.mxu1 %v1113_v5  ;;  %v921_v4 = vld [vmem:[%s4061_s5 + $0x120] sm:$0xff]  ;;  %v923_v5 = vld [vmem:[%s4061_s5 + $0x130] sm:$0xff] }
  0xda   : > { %1206 = vmatpush2.msra.mxu0 %v1110_v6  ;;  %1277 = vmatpush2.msra.mxu1 %v1112_v7  ;;  %v918_v6 = vld [vmem:[%s4061_s5 + $0x108] sm:$0xff]  ;;  %v920_v7 = vld [vmem:[%s4061_s5 + $0x118] sm:$0xff] }
  0xdb   : > { %1207 = vmatprep.subr.mxu0 %v1107_v8  ;;  %1278 = vmatprep.subr.mxu1 %v1109_v9  ;;  %v917_v8 = vld [vmem:[%s4061_s5 + $0x100] sm:$0xff]  ;;  %v919_v9 = vld [vmem:[%s4061_s5 + $0x110] sm:$0xff] }
  0xdc   : > { %1208 = vmatpush2.msra.mxu0 %v1106_v10  ;;  %1279 = vmatpush2.msra.mxu1 %v1108_v11  ;;  %v914_v10 = vld [vmem:[%s4061_s5 + $0xe8] sm:$0xff]  ;;  %v916_v11 = vld [vmem:[%s4061_s5 + $0xf8] sm:$0xff] }
  0xdd   : > { %1209 = vmatprep.subr.mxu0 %v1103_v12  ;;  %1280 = vmatprep.subr.mxu1 %v1105_v13  ;;  %v913_v12 = vld [vmem:[%s4061_s5 + $0xe0] sm:$0xff]  ;;  %v915_v13 = vld [vmem:[%s4061_s5 + $0xf0] sm:$0xff] }
  0xde   : > { %1210 = vmatpush2.msra.mxu0 %v1102_v14  ;;  %1281 = vmatpush2.msra.mxu1 %v1104_v15  ;;  %v910_v14 = vld [vmem:[%s4061_s5 + $0xc8] sm:$0xff]  ;;  %v912_v15 = vld [vmem:[%s4061_s5 + $0xd8] sm:$0xff] }
  0xdf   : > { %1211 = vmatprep.subr.mxu0 %v1099_v16  ;;  %1282 = vmatprep.subr.mxu1 %v1101_v17  ;;  %v909_v16 = vld [vmem:[%s4061_s5 + $0xc0] sm:$0xff]  ;;  %v911_v17 = vld [vmem:[%s4061_s5 + $0xd0] sm:$0xff] }
  0xe0   : > { %1212 = vmatpush2.msra.mxu0 %v1098_v18  ;;  %1283 = vmatpush2.msra.mxu1 %v1100_v19  ;;  %v906_v18 = vld [vmem:[%s4061_s5 + $0xa8] sm:$0xff]  ;;  %v908_v19 = vld [vmem:[%s4061_s5 + $0xb8] sm:$0xff] }
  0xe1   : > { %1213 = vmatprep.subr.mxu0 %v1095_v20  ;;  %1284 = vmatprep.subr.mxu1 %v1097_v21  ;;  %v905_v20 = vld [vmem:[%s4061_s5 + $0xa0] sm:$0xff]  ;;  %v907_v21 = vld [vmem:[%s4061_s5 + $0xb0] sm:$0xff] }
  0xe2   : > { %1214 = vmatpush2.msra.mxu0 %v1094_v22  ;;  %1285 = vmatpush2.msra.mxu1 %v1096_v23  ;;  %v902_v22 = vld [vmem:[%s4061_s5 + $0x88] sm:$0xff]  ;;  %v904_v23 = vld [vmem:[%s4061_s5 + $0x98] sm:$0xff] }
  0xe3   : > { %1215 = vmatprep.subr.mxu0 %v1091_v24  ;;  %1286 = vmatprep.subr.mxu1 %v1093_v25  ;;  %v901_v24 = vld [vmem:[%s4061_s5 + $0x80] sm:$0xff]  ;;  %v903_v25 = vld [vmem:[%s4061_s5 + $0x90] sm:$0xff] }
  0xe4   : > { %1216 = vmatpush2.msra.mxu0 %v1090_v26  ;;  %1287 = vmatpush2.msra.mxu1 %v1092_v27  ;;  %v898_v26 = vld [vmem:[%s4061_s5 + $0x68] sm:$0xff]  ;;  %v900_v27 = vld [vmem:[%s4061_s5 + $0x78] sm:$0xff] }
  0xe5   : > { %1217 = vmatprep.subr.mxu0 %v1087_v30  ;;  %1288 = vmatprep.subr.mxu1 %v1089_v31  ;;  %v899_v30 = vld [vmem:[%s4061_s5 + $0x70] sm:$0xff]  ;;  %v894_v31 = vld [vmem:[%s4061_s5 + $0x48] sm:$0xff] }
  0xe6   : > { %1218 = vmatpush2.msra.mxu0 %v1086_v32  ;;  %1289 = vmatpush2.msra.mxu1 %v1088_v33  ;;  %v896_v32 = vld [vmem:[%s4061_s5 + $0x58] sm:$0xff]  ;;  %v893_v33 = vld [vmem:[%s4061_s5 + $0x40] sm:$0xff] }
  0xe7   : > { %1219 = vmatprep.subr.mxu0 %v1083_v34  ;;  %1290 = vmatprep.subr.mxu1 %v1085_v35  ;;  %v895_v34 = vld [vmem:[%s4061_s5 + $0x50] sm:$0xff]  ;;  %v890_v35 = vld [vmem:[%s4061_s5 + $0x28] sm:$0xff] }
  0xe8   : > { %1220 = vmatpush2.msra.mxu0 %v1082_v3  ;;  %1221 = vmatprep.mubr.f32.mxu0 %v1154_v36  ;;  %v889_v3 = vld [vmem:[%s4061_s5 + $0x20] sm:$0xff] }
  0xe9   : > { %1291 = vmatpush2.msra.mxu1 %v1084_v37  ;;  %1222 = vmatmul.mubr.f32.vlgmr.msra.gmra.mxu0 %v1819_v29  ;;  %v891_v37 = vld [vmem:[%s4061_s5 + $0x30] sm:$0xff] }
  0xea   : > { %1292 = vmatprep.mubr.f32.mxu1 %v1154_v36  ;;  %1310 = vmatprep.subr.mxu0 %v946_v38  ;;  %v892_v36 = vld [vmem:[%s4061_s5 + $0x38] sm:$0xff]  ;;  %v886_v38 = vld [vmem:[%s4061_s5 + $0x8] sm:$0xff] }
  0xeb   : > { %1381 = vmatprep.subr.mxu1 %v948_v39  ;;  %1293 = vmatmul.mubr.f32.vlgmr.msra.gmra.mxu1 %v1819_v29  ;;  %v897_v29 = vld [vmem:[%s4061_s5 + $0x60] sm:$0xff]  ;;  %v888_v39 = vld [vmem:[%s4061_s5 + $0x18] sm:$0xff] }
  0xec   : > { %1311 = vmatpush1.msra.mxu0 %v945_v40  ;;  %1382 = vmatpush1.msra.mxu1 %v947_v41  ;;  %v885_v40 = vld [vmem:[%s4061_s5] sm:$0xff]  ;;  %v887_v41 = vld [vmem:[%s4061_s5 + $0x10] sm:$0xff] }
  0xed   : > { %1312 = vmatprep.subr.mxu0 %v942_v42  ;;  %1383 = vmatprep.subr.mxu1 %v944_v43  ;;  %v1010_v42 = vld [vmem:[%s4061_s5 + $0x3e8] sm:$0xff]  ;;  %v1012_v43 = vld [vmem:[%s4061_s5 + $0x3f8] sm:$0xff] }
  0xee   : > { %1313 = vmatpush1.msra.mxu0 %v941_v44  ;;  %1384 = vmatpush1.msra.mxu1 %v943_v45  ;;  %v1009_v44 = vld [vmem:[%s4061_s5 + $0x3e0] sm:$0xff]  ;;  %v1011_v45 = vld [vmem:[%s4061_s5 + $0x3f0] sm:$0xff] }
  0xef   : > { %1314 = vmatprep.subr.mxu0 %v938_v46  ;;  %1385 = vmatprep.subr.mxu1 %v940_v47  ;;  %v1006_v46 = vld [vmem:[%s4061_s5 + $0x3c8] sm:$0xff]  ;;  %v1008_v47 = vld [vmem:[%s4061_s5 + $0x3d8] sm:$0xff] }
  0xf0   : > { %1315 = vmatpush1.msra.mxu0 %v937_v48  ;;  %1386 = vmatpush1.msra.mxu1 %v939_v49  ;;  %v1005_v48 = vld [vmem:[%s4061_s5 + $0x3c0] sm:$0xff]  ;;  %v1007_v49 = vld [vmem:[%s4061_s5 + $0x3d0] sm:$0xff] }
  0xf1   : > { %1316 = vmatprep.subr.mxu0 %v934_v50  ;;  %1387 = vmatprep.subr.mxu1 %v936_v51  ;;  %v1002_v50 = vld [vmem:[%s4061_s5 + $0x3a8] sm:$0xff]  ;;  %v1004_v51 = vld [vmem:[%s4061_s5 + $0x3b8] sm:$0xff] }
  0xf2   : > { %1317 = vmatpush1.msra.mxu0 %v933_v52  ;;  %1388 = vmatpush1.msra.mxu1 %v935_v53  ;;  %v1001_v52 = vld [vmem:[%s4061_s5 + $0x3a0] sm:$0xff]  ;;  %v1003_v53 = vld [vmem:[%s4061_s5 + $0x3b0] sm:$0xff] }
  0xf3   : > { %1318 = vmatprep.subr.mxu0 %v930_v54  ;;  %1389 = vmatprep.subr.mxu1 %v932_v55  ;;  %v998_v54 = vld [vmem:[%s4061_s5 + $0x388] sm:$0xff]  ;;  %v1000_v55 = vld [vmem:[%s4061_s5 + $0x398] sm:$0xff] }
  0xf4   : > { %1319 = vmatpush1.msra.mxu0 %v929_v56  ;;  %1390 = vmatpush1.msra.mxu1 %v931_v57  ;;  %v997_v56 = vld [vmem:[%s4061_s5 + $0x380] sm:$0xff]  ;;  %v999_v57 = vld [vmem:[%s4061_s5 + $0x390] sm:$0xff] }
  0xf5   : > { %1320 = vmatprep.subr.mxu0 %v926_v58  ;;  %1391 = vmatprep.subr.mxu1 %v928_v59  ;;  %v994_v58 = vld [vmem:[%s4061_s5 + $0x368] sm:$0xff]  ;;  %v996_v59 = vld [vmem:[%s4061_s5 + $0x378] sm:$0xff] }
  0xf6   : > { %1321 = vmatpush1.msra.mxu0 %v925_v60  ;;  %1392 = vmatpush1.msra.mxu1 %v927_v61  ;;  %v993_v60 = vld [vmem:[%s4061_s5 + $0x360] sm:$0xff]  ;;  %v995_v61 = vld [vmem:[%s4061_s5 + $0x370] sm:$0xff] }
  0xf7   : > { %1322 = vmatprep.subr.mxu0 %v922_v62  ;;  %1393 = vmatprep.subr.mxu1 %v924_v63  ;;  %v990_v62 = vld [vmem:[%s4061_s5 + $0x348] sm:$0xff]  ;;  %v992_v63 = vld [vmem:[%s4061_s5 + $0x358] sm:$0xff] }
  0xf8   : > { %1323 = vmatpush1.msra.mxu0 %v921_v4  ;;  %1394 = vmatpush1.msra.mxu1 %v923_v5  ;;  %v989_v4 = vld [vmem:[%s4061_s5 + $0x340] sm:$0xff]  ;;  %v991_v5 = vld [vmem:[%s4061_s5 + $0x350] sm:$0xff] }
  0xf9   : > { %1324 = vmatprep.subr.mxu0 %v918_v6  ;;  %1395 = vmatprep.subr.mxu1 %v920_v7  ;;  %v986_v6 = vld [vmem:[%s4061_s5 + $0x328] sm:$0xff]  ;;  %v988_v7 = vld [vmem:[%s4061_s5 + $0x338] sm:$0xff] }
  0xfa   : > { %1325 = vmatpush1.msra.mxu0 %v917_v8  ;;  %1396 = vmatpush1.msra.mxu1 %v919_v9  ;;  %v985_v8 = vld [vmem:[%s4061_s5 + $0x320] sm:$0xff]  ;;  %v987_v9 = vld [vmem:[%s4061_s5 + $0x330] sm:$0xff] }
  0xfb   : > { %1326 = vmatprep.subr.mxu0 %v914_v10  ;;  %1397 = vmatprep.subr.mxu1 %v916_v11  ;;  %v982_v10 = vld [vmem:[%s4061_s5 + $0x308] sm:$0xff]  ;;  %v984_v11 = vld [vmem:[%s4061_s5 + $0x318] sm:$0xff] }
  0xfc   : > { %1327 = vmatpush1.msra.mxu0 %v913_v12  ;;  %1398 = vmatpush1.msra.mxu1 %v915_v13  ;;  %v981_v12 = vld [vmem:[%s4061_s5 + $0x300] sm:$0xff]  ;;  %v983_v13 = vld [vmem:[%s4061_s5 + $0x310] sm:$0xff] }
  0xfd   : > { %1328 = vmatprep.subr.mxu0 %v910_v14  ;;  %1399 = vmatprep.subr.mxu1 %v912_v15  ;;  %v978_v14 = vld [vmem:[%s4061_s5 + $0x2e8] sm:$0xff]  ;;  %v980_v15 = vld [vmem:[%s4061_s5 + $0x2f8] sm:$0xff] }
  0xfe   : > { %1329 = vmatpush1.msra.mxu0 %v909_v16  ;;  %1400 = vmatpush1.msra.mxu1 %v911_v17  ;;  %v977_v16 = vld [vmem:[%s4061_s5 + $0x2e0] sm:$0xff]  ;;  %v979_v17 = vld [vmem:[%s4061_s5 + $0x2f0] sm:$0xff] }
  0xff   : > { %1330 = vmatprep.subr.mxu0 %v906_v18  ;;  %1401 = vmatprep.subr.mxu1 %v908_v19  ;;  %v974_v18 = vld [vmem:[%s4061_s5 + $0x2c8] sm:$0xff]  ;;  %v976_v19 = vld [vmem:[%s4061_s5 + $0x2d8] sm:$0xff] }
 0x100   : > { %1331 = vmatpush1.msra.mxu0 %v905_v20  ;;  %1402 = vmatpush1.msra.mxu1 %v907_v21  ;;  %v973_v20 = vld [vmem:[%s4061_s5 + $0x2c0] sm:$0xff]  ;;  %v975_v21 = vld [vmem:[%s4061_s5 + $0x2d0] sm:$0xff] }
 0x101   : > { %1332 = vmatprep.subr.mxu0 %v902_v22  ;;  %1403 = vmatprep.subr.mxu1 %v904_v23  ;;  %v970_v22 = vld [vmem:[%s4061_s5 + $0x2a8] sm:$0xff]  ;;  %v972_v23 = vld [vmem:[%s4061_s5 + $0x2b8] sm:$0xff] }
 0x102   : > { %1333 = vmatpush1.msra.mxu0 %v901_v24  ;;  %1404 = vmatpush1.msra.mxu1 %v903_v25  ;;  %v969_v24 = vld [vmem:[%s4061_s5 + $0x2a0] sm:$0xff]  ;;  %v971_v25 = vld [vmem:[%s4061_s5 + $0x2b0] sm:$0xff] }
 0x103   : > { %1334 = vmatprep.subr.mxu0 %v898_v26  ;;  %1405 = vmatprep.subr.mxu1 %v900_v27  ;;  %v966_v26 = vld [vmem:[%s4061_s5 + $0x288] sm:$0xff]  ;;  %v968_v27 = vld [vmem:[%s4061_s5 + $0x298] sm:$0xff] }
 0x104   : > { %1335 = vmatpush1.msra.mxu0 %v897_v29  ;;  %1406 = vmatpush1.msra.mxu1 %v899_v30  ;;  %v965_v29 = vld [vmem:[%s4061_s5 + $0x280] sm:$0xff]  ;;  %v967_v30 = vld [vmem:[%s4061_s5 + $0x290] sm:$0xff] }
 0x105   : > { %1336 = vmatprep.subr.mxu0 %v894_v31  ;;  %1407 = vmatprep.subr.mxu1 %v896_v32  ;;  %v962_v31 = vld [vmem:[%s4061_s5 + $0x268] sm:$0xff]  ;;  %v964_v32 = vld [vmem:[%s4061_s5 + $0x278] sm:$0xff] }
 0x106   : > { %1337 = vmatpush1.msra.mxu0 %v893_v33  ;;  %1408 = vmatpush1.msra.mxu1 %v895_v34  ;;  %v961_v33 = vld [vmem:[%s4061_s5 + $0x260] sm:$0xff]  ;;  %v963_v34 = vld [vmem:[%s4061_s5 + $0x270] sm:$0xff] }
 0x107   : > { %1338 = vmatprep.subr.mxu0 %v890_v35  ;;  %1409 = vmatprep.subr.mxu1 %v892_v36  ;;  %v958_v35 = vld [vmem:[%s4061_s5 + $0x248] sm:$0xff]  ;;  %v960_v36 = vld [vmem:[%s4061_s5 + $0x258] sm:$0xff] }
 0x108   : > { %1339 = vmatpush1.msra.mxu0 %v889_v3  ;;  %1410 = vmatpush1.msra.mxu1 %v891_v37  ;;  %v957_v3 = vld [vmem:[%s4061_s5 + $0x240] sm:$0xff]  ;;  %v959_v37 = vld [vmem:[%s4061_s5 + $0x250] sm:$0xff] }
 0x109   : > { %1340 = vmatprep.subr.mxu0 %v886_v38  ;;  %1411 = vmatprep.subr.mxu1 %v888_v39  ;;  %v1820_v38 = vld.sshfl [vmem:[%s3368_s11] sm:$0x33 pattern:$0x76325410]  ;;  %v954_v39 = vld [vmem:[%s4061_s5 + $0x228] sm:$0xff]  ;;  %s1762_s11 = sshll.u32 (%p37_p0), %s1967_s22, 4  ;;  %s1763_s11 = int_to_ptr.vmem [resolvable:$true] %s1762_s11 }
 0x10a   : > { %1341 = vmatpush1.msra.mxu0 %v885_v40  ;;  %1412 = vmatpush1.msra.mxu1 %v887_v41  ;;  %v956_v40 = vld [vmem:[%s4061_s5 + $0x238] sm:$0xff]  ;;  %v953_v41 = vld [vmem:[%s4061_s5 + $0x220] sm:$0xff]  ;;  %s1904_s0 = scalar_lea.vmem (%p37_p0), %s1763_s11, 64  ;;  %p1909_p2 = scmp.lt.s32.totalorder (%p37_p0), %s1763_s11, %s1763_s11 }
 0x10b   : > { %1342 = vmatprep.subr.mxu0 %v1010_v42  ;;  %1413 = vmatprep.subr.mxu1 %v1012_v43  ;;  %v955_v42 = vld [vmem:[%s4061_s5 + $0x230] sm:$0xff]  ;;  %v950_v43 = vld [vmem:[%s4061_s5 + $0x208] sm:$0xff]  ;;  %p1905_p1 = scmp.ne.s32.totalorder (%p37_p0), %s1763_s11, %s1904_s0  ;;  %p1910_p3 = scmp.lt.s32.totalorder (%p37_p0), %s1904_s0, %s1904_s0 }
 0x10c   : > { %1343 = vmatpush2.msra.mxu0 %v1009_v44  ;;  %1414 = vmatpush2.msra.mxu1 %v1011_v45  ;;  %v952_v44 = vld [vmem:[%s4061_s5 + $0x218] sm:$0xff]  ;;  %v1307_v45 = vcombine.high %v1820_v38, %v1820_v38 }
 0x10d   : > { %1344 = vmatprep.subr.mxu0 %v1006_v46  ;;  %1415 = vmatprep.subr.mxu1 %v1008_v47  ;;  %v949_v46 = vld [vmem:[%s4061_s5 + $0x200] sm:$0xff]  ;;  %v951_v47 = vld [vmem:[%s4061_s5 + $0x210] sm:$0xff]  ;;  %p1911_p4 = por (%p37_p0), %p1910_p3, %p1909_p2 }
 0x10e   : > { %1345 = vmatpush2.msra.mxu0 %v1005_v48  ;;  %1416 = vmatpush2.msra.mxu1 %v1007_v49  ;;  %v1513_v48 = vld [vmem:[%s4063_s7 + $0x1e8] sm:$0xff]  ;;  %v1515_v49 = vld [vmem:[%s4063_s7 + $0x1f8] sm:$0xff] }
 0x10f   : > { %1346 = vmatprep.subr.mxu0 %v1002_v50  ;;  %1417 = vmatprep.subr.mxu1 %v1004_v51  ;;  %v1512_v50 = vld [vmem:[%s4063_s7 + $0x1e0] sm:$0xff]  ;;  %v1514_v51 = vld [vmem:[%s4063_s7 + $0x1f0] sm:$0xff]  ;;  %p1912_p5 = pnand (%p37_p0), %p1911_p4, %p1905_p1 }
 0x110   : > { %1347 = vmatpush2.msra.mxu0 %v1001_v52  ;;  %1418 = vmatpush2.msra.mxu1 %v1003_v53  ;;  %v1509_v52 = vld [vmem:[%s4063_s7 + $0x1c8] sm:$0xff]  ;;  %v1511_v53 = vld [vmem:[%s4063_s7 + $0x1d8] sm:$0xff] }
 0x111   : > { %1348 = vmatprep.subr.mxu0 %v998_v54  ;;  %1419 = vmatprep.subr.mxu1 %v1000_v55  ;;  %v1508_v54 = vld [vmem:[%s4063_s7 + $0x1c0] sm:$0xff]  ;;  %v1510_v55 = vld [vmem:[%s4063_s7 + $0x1d0] sm:$0xff] }
 0x112   : > { %1349 = vmatpush2.msra.mxu0 %v997_v56  ;;  %1420 = vmatpush2.msra.mxu1 %v999_v57  ;;  %v1505_v56 = vld [vmem:[%s4063_s7 + $0x1a8] sm:$0xff]  ;;  %v1507_v57 = vld [vmem:[%s4063_s7 + $0x1b8] sm:$0xff] }
 0x113   : > { %1350 = vmatprep.subr.mxu0 %v994_v58  ;;  %1421 = vmatprep.subr.mxu1 %v996_v59  ;;  %v1504_v58 = vld [vmem:[%s4063_s7 + $0x1a0] sm:$0xff]  ;;  %v1506_v59 = vld [vmem:[%s4063_s7 + $0x1b0] sm:$0xff] }
 0x114   : > { %1351 = vmatpush2.msra.mxu0 %v993_v60  ;;  %1422 = vmatpush2.msra.mxu1 %v995_v61  ;;  %v1501_v60 = vld [vmem:[%s4063_s7 + $0x188] sm:$0xff]  ;;  %v1503_v61 = vld [vmem:[%s4063_s7 + $0x198] sm:$0xff] }
 0x115   : > { %1352 = vmatprep.subr.mxu0 %v990_v62  ;;  %1423 = vmatprep.subr.mxu1 %v992_v63  ;;  %v1500_v62 = vld [vmem:[%s4063_s7 + $0x180] sm:$0xff]  ;;  %v1502_v63 = vld [vmem:[%s4063_s7 + $0x190] sm:$0xff] }
 0x116   : > { %1353 = vmatpush2.msra.mxu0 %v989_v4  ;;  %1424 = vmatpush2.msra.mxu1 %v991_v5  ;;  %v1497_v4 = vld [vmem:[%s4063_s7 + $0x168] sm:$0xff]  ;;  %v1499_v5 = vld [vmem:[%s4063_s7 + $0x178] sm:$0xff] }
 0x117   : > { %1354 = vmatprep.subr.mxu0 %v986_v6  ;;  %1425 = vmatprep.subr.mxu1 %v988_v7  ;;  %v1496_v6 = vld [vmem:[%s4063_s7 + $0x160] sm:$0xff]  ;;  %v1498_v7 = vld [vmem:[%s4063_s7 + $0x170] sm:$0xff] }
 0x118   : > { %1355 = vmatpush2.msra.mxu0 %v985_v8  ;;  %1426 = vmatpush2.msra.mxu1 %v987_v9  ;;  %v1493_v8 = vld [vmem:[%s4063_s7 + $0x148] sm:$0xff]  ;;  %v1495_v9 = vld [vmem:[%s4063_s7 + $0x158] sm:$0xff] }
 0x119   : > { %1356 = vmatprep.subr.mxu0 %v982_v10  ;;  %1427 = vmatprep.subr.mxu1 %v984_v11  ;;  %v1492_v10 = vld [vmem:[%s4063_s7 + $0x140] sm:$0xff]  ;;  %v1494_v11 = vld [vmem:[%s4063_s7 + $0x150] sm:$0xff] }
 0x11a   : > { %1357 = vmatpush2.msra.mxu0 %v981_v12  ;;  %1428 = vmatpush2.msra.mxu1 %v983_v13  ;;  %v1489_v12 = vld [vmem:[%s4063_s7 + $0x128] sm:$0xff]  ;;  %v1491_v13 = vld [vmem:[%s4063_s7 + $0x138] sm:$0xff] }
 0x11b   : > { %1358 = vmatprep.subr.mxu0 %v978_v14  ;;  %1429 = vmatprep.subr.mxu1 %v980_v15  ;;  %v1488_v14 = vld [vmem:[%s4063_s7 + $0x120] sm:$0xff]  ;;  %v1490_v15 = vld [vmem:[%s4063_s7 + $0x130] sm:$0xff] }
 0x11c   : > { %1359 = vmatpush2.msra.mxu0 %v977_v16  ;;  %1430 = vmatpush2.msra.mxu1 %v979_v17  ;;  %v1485_v16 = vld [vmem:[%s4063_s7 + $0x108] sm:$0xff]  ;;  %v1487_v17 = vld [vmem:[%s4063_s7 + $0x118] sm:$0xff] }
 0x11d   : > { %1360 = vmatprep.subr.mxu0 %v974_v18  ;;  %1431 = vmatprep.subr.mxu1 %v976_v19  ;;  %v1484_v18 = vld [vmem:[%s4063_s7 + $0x100] sm:$0xff]  ;;  %v1486_v19 = vld [vmem:[%s4063_s7 + $0x110] sm:$0xff] }
 0x11e   : > { %1361 = vmatpush2.msra.mxu0 %v973_v20  ;;  %1432 = vmatpush2.msra.mxu1 %v975_v21  ;;  %v1481_v20 = vld [vmem:[%s4063_s7 + $0xe8] sm:$0xff]  ;;  %v1483_v21 = vld [vmem:[%s4063_s7 + $0xf8] sm:$0xff] }
 0x11f   : > { %1362 = vmatprep.subr.mxu0 %v970_v22  ;;  %1433 = vmatprep.subr.mxu1 %v972_v23  ;;  %v1480_v22 = vld [vmem:[%s4063_s7 + $0xe0] sm:$0xff]  ;;  %v1482_v23 = vld [vmem:[%s4063_s7 + $0xf0] sm:$0xff] }
 0x120   : > { %1363 = vmatpush2.msra.mxu0 %v969_v24  ;;  %1434 = vmatpush2.msra.mxu1 %v971_v25  ;;  %v1477_v24 = vld [vmem:[%s4063_s7 + $0xc8] sm:$0xff]  ;;  %v1479_v25 = vld [vmem:[%s4063_s7 + $0xd8] sm:$0xff] }
 0x121   : > { %1364 = vmatprep.subr.mxu0 %v966_v26  ;;  %1435 = vmatprep.subr.mxu1 %v968_v27  ;;  %v1476_v26 = vld [vmem:[%s4063_s7 + $0xc0] sm:$0xff]  ;;  %v1478_v27 = vld [vmem:[%s4063_s7 + $0xd0] sm:$0xff] }
 0x122   : > { %1365 = vmatpush2.msra.mxu0 %v965_v29  ;;  %1436 = vmatpush2.msra.mxu1 %v967_v30  ;;  %v1473_v29 = vld [vmem:[%s4063_s7 + $0xa8] sm:$0xff]  ;;  %v1475_v30 = vld [vmem:[%s4063_s7 + $0xb8] sm:$0xff] }
 0x123   : > { %1366 = vmatprep.subr.mxu0 %v962_v31  ;;  %1437 = vmatprep.subr.mxu1 %v964_v32  ;;  %v1472_v31 = vld [vmem:[%s4063_s7 + $0xa0] sm:$0xff]  ;;  %v1474_v32 = vld [vmem:[%s4063_s7 + $0xb0] sm:$0xff] }
 0x124   : > { %1367 = vmatpush2.msra.mxu0 %v961_v33  ;;  %1438 = vmatpush2.msra.mxu1 %v963_v34  ;;  %v1469_v33 = vld [vmem:[%s4063_s7 + $0x88] sm:$0xff]  ;;  %v1471_v34 = vld [vmem:[%s4063_s7 + $0x98] sm:$0xff] }
 0x125   : > { %1368 = vmatprep.subr.mxu0 %v958_v35  ;;  %1439 = vmatprep.subr.mxu1 %v960_v36  ;;  %v1468_v35 = vld [vmem:[%s4063_s7 + $0x80] sm:$0xff]  ;;  %v1470_v36 = vld [vmem:[%s4063_s7 + $0x90] sm:$0xff] }
 0x126   : > { %1369 = vmatpush2.msra.mxu0 %v957_v3  ;;  %1440 = vmatpush2.msra.mxu1 %v959_v37  ;;  %v1465_v3 = vld [vmem:[%s4063_s7 + $0x68] sm:$0xff]  ;;  %v1467_v37 = vld [vmem:[%s4063_s7 + $0x78] sm:$0xff] }
 0x127   : > { %1370 = vmatprep.subr.mxu0 %v954_v39  ;;  %1441 = vmatprep.subr.mxu1 %v956_v40  ;;  %v1466_v39 = vld [vmem:[%s4063_s7 + $0x70] sm:$0xff]  ;;  %v1461_v40 = vld [vmem:[%s4063_s7 + $0x48] sm:$0xff] }
 0x128   : > { %1371 = vmatpush2.msra.mxu0 %v953_v41  ;;  %1442 = vmatpush2.msra.mxu1 %v955_v42  ;;  %v1463_v41 = vld [vmem:[%s4063_s7 + $0x58] sm:$0xff]  ;;  %v1460_v42 = vld [vmem:[%s4063_s7 + $0x40] sm:$0xff] }
 0x129   : > { %1372 = vmatprep.subr.mxu0 %v950_v43  ;;  %1443 = vmatprep.subr.mxu1 %v952_v44  ;;  %v1462_v43 = vld [vmem:[%s4063_s7 + $0x50] sm:$0xff]  ;;  %v1457_v44 = vld [vmem:[%s4063_s7 + $0x28] sm:$0xff] }
 0x12a   : > { %1373 = vmatpush2.msra.mxu0 %v949_v46  ;;  %1374 = vmatprep.mubr.f32.mxu0 %v1307_v45  ;;  %v1456_v46 = vld [vmem:[%s4063_s7 + $0x20] sm:$0xff] }
 0x12b   : > { %1444 = vmatpush2.msra.mxu1 %v951_v47  ;;  %1445 = vmatprep.mubr.f32.mxu1 %v1307_v45  ;;  %v1459_v45 = vld [vmem:[%s4063_s7 + $0x38] sm:$0xff]  ;;  %v1458_v47 = vld [vmem:[%s4063_s7 + $0x30] sm:$0xff] }
 0x12c   : > { %1375 = vmatmul.mubr.f32.vlgmr.msra.gmra.mxu0 %v1820_v38  ;;  %1446 = vmatmul.mubr.f32.vlgmr.msra.gmra.mxu1 %v1820_v38  ;;  %v1464_v38 = vld [vmem:[%s4063_s7 + $0x60] sm:$0xff] }
 0x12d   : > { %1516 = vmatprep.subr.mxu0 %v1513_v48  ;;  %1587 = vmatprep.subr.mxu1 %v1515_v49  ;;  %v1453_v48 = vld [vmem:[%s4063_s7 + $0x8] sm:$0xff]  ;;  %v1455_v49 = vld [vmem:[%s4063_s7 + $0x18] sm:$0xff] }
 0x12e   : > { %1517 = vmatpush1.msra.mxu0 %v1512_v50  ;;  %1588 = vmatpush1.msra.mxu1 %v1514_v51  ;;  %v1452_v50 = vld [vmem:[%s4063_s7] sm:$0xff]  ;;  %v1454_v51 = vld [vmem:[%s4063_s7 + $0x10] sm:$0xff] }
 0x12f   : > { %1518 = vmatprep.subr.mxu0 %v1509_v52  ;;  %1589 = vmatprep.subr.mxu1 %v1511_v53  ;;  %v829_v52 = vlaneseq  ;;  %v388_v53 = vpop.f32.mrf.mxu0 }
 0x130   : > { %1519 = vmatpush1.msra.mxu0 %v1508_v54  ;;  %1590 = vmatpush1.msra.mxu1 %v1510_v55  ;;  %v459_v54 = vpop.f32.mrf.mxu1 }
 0x131   : > { %1520 = vmatprep.subr.mxu0 %v1505_v56  ;;  %1591 = vmatprep.subr.mxu1 %v1507_v57  ;;  %v3994_v55 = vshrl.u32 %v829_v52, 7  ;;  %v390_v56 = vpop.f32.mrf.mxu0 }
 0x132   : > { %1521 = vmatpush1.msra.mxu0 %v1504_v58  ;;  %1592 = vmatpush1.msra.mxu1 %v1506_v59  ;;  %v461_v57 = vpop.f32.mrf.mxu1 }
 0x133   : > { %1522 = vmatprep.subr.mxu0 %v1501_v60  ;;  %1593 = vmatprep.subr.mxu1 %v1503_v61  ;;  %v831_v60 = vsub.s32 0, %v3994_v55  ;;  %v827_v61 = vld [vmem:[%s4060_s4] sm:$0xf] }
 0x134   : > { %1523 = vmatpush1.msra.mxu0 %v1500_v62  ;;  %1594 = vmatpush1.msra.mxu1 %v1502_v63 }
 0x135   : > { %1524 = vmatprep.subr.mxu0 %v1497_v4  ;;  %1595 = vmatprep.subr.mxu1 %v1499_v5  ;;  %v832_v4 = vrot.slane %v827_v61, %v831_v60 }
 0x136   : > { %1525 = vmatpush1.msra.mxu0 %v1496_v6  ;;  %1596 = vmatpush1.msra.mxu1 %v1498_v7 }
 0x137   : > { %1526 = vmatprep.subr.mxu0 %v1493_v8  ;;  %1597 = vmatprep.subr.mxu1 %v1495_v9 }
 0x138   : > { %1527 = vmatpush1.msra.mxu0 %v1492_v10  ;;  %1598 = vmatpush1.msra.mxu1 %v1494_v11 }
 0x139   : > { %1528 = vmatprep.subr.mxu0 %v1489_v12  ;;  %1599 = vmatprep.subr.mxu1 %v1491_v13  ;;  %v843_v13 = vsub.s32 3, %v3994_v55 }
 0x13a   : > { %1529 = vmatpush1.msra.mxu0 %v1488_v14  ;;  %1600 = vmatpush1.msra.mxu1 %v1490_v15 }
 0x13b   : > { %1530 = vmatprep.subr.mxu0 %v1485_v16  ;;  %1601 = vmatprep.subr.mxu1 %v1487_v17 }
 0x13c   : > { %1531 = vmatpush1.msra.mxu0 %v1484_v18  ;;  %1602 = vmatpush1.msra.mxu1 %v1486_v19 }
 0x13d   : > { %1532 = vmatprep.subr.mxu0 %v1481_v20  ;;  %1603 = vmatprep.subr.mxu1 %v1483_v21  ;;  %v844_v21 = vrot.slane %v827_v61, %v843_v13 }
 0x13e   : > { %1533 = vmatpush1.msra.mxu0 %v1480_v22  ;;  %1604 = vmatpush1.msra.mxu1 %v1482_v23 }
 0x13f   : > { %1534 = vmatprep.subr.mxu0 %v1477_v24  ;;  %1605 = vmatprep.subr.mxu1 %v1479_v25  ;;  %v839_v24 = vsub.s32 2, %v3994_v55 }
 0x140   : > { %1535 = vmatpush1.msra.mxu0 %v1476_v26  ;;  %1606 = vmatpush1.msra.mxu1 %v1478_v27 }
 0x141   : > { %1536 = vmatprep.subr.mxu0 %v1473_v29  ;;  %1607 = vmatprep.subr.mxu1 %v1475_v30  ;;  %v840_v29 = vrot.slane %v827_v61, %v839_v24 }
 0x142   : > { %1537 = vmatpush1.msra.mxu0 %v1472_v31  ;;  %1608 = vmatpush1.msra.mxu1 %v1474_v32 }
 0x143   : > { %1538 = vmatprep.subr.mxu0 %v1469_v33  ;;  %1609 = vmatprep.subr.mxu1 %v1471_v34 }
 0x144   : > { %1539 = vmatpush1.msra.mxu0 %v1468_v35  ;;  %1610 = vmatpush1.msra.mxu1 %v1470_v36 }
 0x145   : > { %1540 = vmatprep.subr.mxu0 %v1465_v3  ;;  %1611 = vmatprep.subr.mxu1 %v1467_v37 }
 0x146   : > { %1541 = vmatpush1.msra.mxu0 %v1464_v38  ;;  %1612 = vmatpush1.msra.mxu1 %v1466_v39  ;;  %v541_v58 = vpop.f32.mrf.mxu0  ;;  %v612_v59 = vpop.f32.mrf.mxu1 }
 0x147   : > { %1542 = vmatprep.subr.mxu0 %v1461_v40  ;;  %1613 = vmatprep.subr.mxu1 %v1463_v41  ;;  %v542_v63 = vadd.f32 %v541_v58, %v388_v53  ;;  %v613_v25 = vadd.f32 %v612_v59, %v459_v54 }
 0x148   : > { %1543 = vmatpush1.msra.mxu0 %v1460_v42  ;;  %1614 = vmatpush1.msra.mxu1 %v1462_v43  ;;  %v543_v62 = vpop.f32.mrf.mxu0 }
 0x149   : > { %1544 = vmatprep.subr.mxu0 %v1457_v44  ;;  %1615 = vmatprep.subr.mxu1 %v1459_v45  ;;  %v544_v6 = vadd.f32 %v543_v62, %v390_v56 }
 0x14a   : > { %1545 = vmatpush1.msra.mxu0 %v1456_v46  ;;  %1616 = vmatpush1.msra.mxu1 %v1458_v47 }
 0x14b   : > { %1546 = vmatprep.subr.mxu0 %v1453_v48  ;;  %1617 = vmatprep.subr.mxu1 %v1455_v49 }
 0x14c   : > { %1547 = vmatpush1.msra.mxu0 %v1452_v50  ;;  %1580 = vmatprep.mubr.f32.mxu0 %v1966_v28 }
 0x14d   : > { %1618 = vmatpush1.msra.mxu1 %v1454_v51  ;;  %1651 = vmatprep.mubr.f32.mxu1 %v1966_v28  ;;  %v835_v28 = vsub.s32 1, %v3994_v55  ;;  %v1662_v51 = vld [vmem:[%s4064_s8] sm:$0xf] }
 0x14e   : > { %1581 = vmatmul.mubr.f32.vlgmr.msra.gmra.mxu0 %v1952_v1  ;;  %1652 = vmatmul.mubr.f32.vlgmr.msra.gmra.mxu1 %v1952_v1  ;;  %v614_v1 = vpop.f32.mrf.mxu1  ;;  %v1667_v56 = vrot.slane %v1662_v51, %v831_v60  ;;  %v1679_v60 = vrot.slane %v1662_v51, %v843_v13 }
 0x14f   : > { %v836_v9 = vrot.slane %v827_v61, %v835_v28  ;;  %v615_v17 = vadd.f32 %v614_v1, %v461_v57  ;;  %v1671_v62 = vrot.slane %v1662_v51, %v835_v28 }
 0x168   : > { %v747_v5 = vpop.f32.mrf.mxu0  ;;  %v818_v8 = vpop.f32.mrf.mxu1 }
 0x169   : > { %v823_v7 = vadd.f32 %v747_v5, %v542_v63  ;;  %v825_v27 = vadd.f32 %v818_v8, %v613_v25 }
 0x16a   : > { %v749_v10 = vpop.f32.mrf.mxu0  ;;  %v820_v16 = vpop.f32.mrf.mxu1 }
 0x16b   : > { %v849_v11 = vadd.f32 %v832_v4, %v823_v7  ;;  %v824_v12 = vadd.f32 %v749_v10, %v544_v6  ;;  %v826_v20 = vadd.f32 %v820_v16, %v615_v17  ;;  %v851_v32 = vadd.f32 %v840_v29, %v825_v27 }
 0x16c   : > { %v1675_v17 = vrot.slane %v1662_v51, %v839_v24 }
 0x16d   : > { %v853_v14 = vsub.f32 0.0, %v849_v11  ;;  %v850_v15 = vadd.f32 %v836_v9, %v824_v12  ;;  %v852_v23 = vadd.f32 %v844_v21, %v826_v20 }
 0x16f   : > { %v854_v18 = vmul.f32 1.442695, %v853_v14  ;;  %v859_v19 = vsub.f32 0.0, %v850_v15  ;;  %v866_v26 = vsub.f32 0.0, %v852_v23 }
 0x171   : > { %1872 = vpow2.f32 %v854_v18  ;;  %v860_v22 = vmul.f32 1.442695, %v859_v19  ;;  %v867_v30 = vmul.f32 1.442695, %v866_v26 }
 0x173   : > { %1874 = vpow2.f32 %v860_v22 }
 0x174   : > { %1876 = vpow2.f32 %v867_v30 }
 0x17e   : > { %v1873_v31 = vpop.eup %1872 }
 0x17f   : > { %v856_v33 = vadd.f32 1.0, %v1873_v31 }
 0x180   : > { %v1875_v34 = vpop.eup %1874 }
 0x181   : > { %1878 = vrcp.f32 %v856_v33  ;;  %v862_v35 = vadd.f32 1.0, %v1875_v34  ;;  %v1877_v36 = vpop.eup %1876 }
 0x182   : > { %1880 = vtanh.f32 %v851_v32  ;;  %v869_v39 = vadd.f32 1.0, %v1877_v36 }
 0x183   : > { %1882 = vrcp.f32 %v862_v35 }
 0x184   : > { %1884 = vrcp.f32 %v869_v39 }
 0x18e   : > { %v1879_v3 = vpop.eup %1878 }
 0x18f   : > { %v1881_v37 = vpop.eup %1880 }
 0x190   : > { %v1883_v38 = vpop.eup %1882  ;;  %v873_v40 = vmul.f32 %v1881_v37, %v1879_v3 }
 0x191   : > { %v872_v41 = vmul.f32 %v1956_v2, %v1883_v38  ;;  %v1885_v42 = vpop.eup %1884 }
 0x193   : > { %v4012_v2 = vadd.f32 %v873_v40, %v872_v41  }
 0x195   : > { %1886 = vtanh.f32 %v4012_v2 }
 0x1a2   : > { %v1887_v43 = vpop.eup %1886 }
 0x1a3   : > { %v4016_v3 = vmul.f32 %v1887_v43, %v1885_v42  }
 0x1a5   : > { %v4067_v44 = vmov %v4016_v3 }
 0x1a6   : > { %878 = vst [vmem:[%s877_s30] sm:$0x3] %v4067_v44  ;;  %v4069_v3 = vmov %v4067_v44 }
 0x1a9   : > { %v1223_v45 = vpop.f32.mrf.mxu0 }
 0x1ab   : > { %v1294_v46 = vpop.f32.mrf.mxu1  ;;  %v1225_v47 = vpop.f32.mrf.mxu0 }
 0x1ad   : > { %v1296_v48 = vpop.f32.mrf.mxu1  ;;  %v1714_v34 = vld [vmem:[#allocation2] sm:$0x3] (%p37_p0)  ;;  %v1715_v36 = vld [vmem:[#allocation2 + $0x2] sm:$0x3] (%p37_p0) }
 0x1ec   : > { %v1376_v49 = vpop.f32.mrf.mxu0  ;;  %v1447_v50 = vpop.f32.mrf.mxu1 }
 0x1ed   : > { %v1377_v53 = vadd.f32 %v1376_v49, %v1223_v45  ;;  %v1448_v15 = vadd.f32 %v1447_v50, %v1294_v46 }
 0x1ee   : > { %v1378_v52 = vpop.f32.mrf.mxu0  ;;  %v1449_v54 = vpop.f32.mrf.mxu1 }
 0x1ef   : > { %v1379_v58 = vadd.f32 %v1378_v52, %v1225_v47  ;;  %v1450_v8 = vadd.f32 %v1449_v54, %v1296_v48 }
 0x20e   : > { %v1582_v57 = vpop.f32.mrf.mxu0  ;;  %v1653_v61 = vpop.f32.mrf.mxu1 }
 0x20f   : > { %v1658_v59 = vadd.f32 %v1582_v57, %v1377_v53  ;;  %v1660_v28 = vadd.f32 %v1653_v61, %v1448_v15 }
 0x210   : > { %v1584_v63 = vpop.f32.mrf.mxu0  ;;  %v1655_v7 = vpop.f32.mrf.mxu1 }
 0x211   : > { %v1684_v1 = vadd.f32 %v1667_v56, %v1658_v59  ;;  %v1659_v4 = vadd.f32 %v1584_v63, %v1379_v58  ;;  %v1661_v11 = vadd.f32 %v1655_v7, %v1450_v8  ;;  %v1686_v20 = vadd.f32 %v1675_v17, %v1660_v28 }
 0x213   : > { %v1688_v5 = vsub.f32 0.0, %v1684_v1  ;;  %v1685_v6 = vadd.f32 %v1671_v62, %v1659_v4  ;;  %v1687_v14 = vadd.f32 %v1679_v60, %v1661_v11 }
 0x215   : > { %v1689_v9 = vmul.f32 1.442695, %v1688_v5  ;;  %v1694_v10 = vsub.f32 0.0, %v1685_v6  ;;  %v1701_v16 = vsub.f32 0.0, %v1687_v14 }
 0x217   : > { %1888 = vpow2.f32 %v1689_v9  ;;  %v1695_v12 = vmul.f32 1.442695, %v1694_v10  ;;  %v1702_v18 = vmul.f32 1.442695, %v1701_v16 }
 0x219   : > { %1890 = vpow2.f32 %v1695_v12 }
 0x21a   : > { %1892 = vpow2.f32 %v1702_v18 }
 0x224   : > { %v1889_v19 = vpop.eup %1888 }
 0x225   : > { %v1691_v21 = vadd.f32 1.0, %v1889_v19 }
 0x226   : > { %v1891_v22 = vpop.eup %1890 }
 0x227   : > { %1894 = vrcp.f32 %v1691_v21  ;;  %v1697_v23 = vadd.f32 1.0, %v1891_v22  ;;  %v1893_v13 = vpop.eup %1892 }
 0x228   : > { %1896 = vtanh.f32 %v1686_v20  ;;  %v1704_v29 = vadd.f32 1.0, %v1893_v13 }
 0x229   : > { %1898 = vrcp.f32 %v1697_v23 }
 0x22a   : > { %1900 = vrcp.f32 %v1704_v29 }
 0x234   : > { %v1895_v25 = vpop.eup %1894 }
 0x235   : > { %v1897_v26 = vpop.eup %1896 }
 0x236   : > { %v1899_v27 = vpop.eup %1898  ;;  %v1708_v30 = vmul.f32 %v1897_v26, %v1895_v25 }
 0x237   : > { %v1707_v55 = vmul.f32 %v1948_v0, %v1899_v27  ;;  %v1901_v24 = vpop.eup %1900 }
 0x239   : > { %v1709_v0 = vadd.f32 %v1708_v30, %v1707_v55  }
 0x23b   : > { %1902 = vtanh.f32 %v1709_v0 }
 0x247   :  { %39 = sbr.rel (!%p37_p0) target bundleno = 2 (0x2), region = 77 }
 0x248   : > { %v1903_v31 = vpop.eup %1902 }
 0x249   : > { %v1711_v32 = vmul.f32 %v1903_v31, %v1901_v24  }
 0x24b   : > { %1713 = vst [vmem:[%s1712_s18] sm:$0x3] %v1711_v32  ;;  %v4068_v1 = vmov %v1711_v32  ;;  %v1744_v33 = vcombine.low (%p37_p0), %v4067_v44, %v1711_v32 }
 0x24d   :  { %1823 = vst.sshfl [vmem:[#allocation4] sm:$0x33 pattern:$0x76325410] %v1744_v33 }
 0x252   :  { %v1716_v35 = vld [vmem:[#allocation3] sm:$0x3]  ;;  %v1717_v37 = vld [vmem:[#allocation3 + $0x2] sm:$0x3] }
 0x253   :  { %v1722_v3 = vcombine.low %v1714_v34, %v1716_v35  ;;  %v1730_v38 = vcombine.low %v1715_v36, %v1717_v37 }
 0x255   :  { %1821 = vst.sshfl [vmem:[%s4065_s9] sm:$0x33 pattern:$0x76325410] %v1722_v3 }
 0x256   :  { %1822 = vst.sshfl [vmem:[%s4065_s9 + $0x4] sm:$0x33 pattern:$0x76325410] %v1730_v38 }
 0x257   :  { %1915 = shalt.err (!%p1912_p5)
}
 0x258   :  { %1765 = dma.vmem_to_hbm [thread:$0]  %s1763_s11, 64, %s4066_s10, [#allocation5]  }
 0x259   :  { %1944 = dma.done.wait [#allocation5], 64  }
 0x25a   :  { %1945 = vsyncadd [#allocation5], 4294967232 }
 0x25b   :  { %1771 = vsyncpa [#allocation5], 1 }

// kernel: encoder_forward.6
= control target key start
LH: loop header
LB: loop body
LE: loop exit
PB: predicated region body
PF: predicated region fallthrough
CT: control target
= control target key end

     0   :  { %16 = vsyncpa [#allocation5], 0  ;;  %s2849_s0 = inlined_call_operand.vmem [shape: f32[16,2,256], index: 0, kind: input, shape index: {}]   ;;  %s2850_s1 = inlined_call_operand.vmem [shape: f32[256,512], index: 1, kind: input, shape index: {}]   ;;  %s2851_s2 = inlined_call_operand.hbm [shape: f32[256,512], index: 2, kind: input, shape index: {}]   ;;  %s2852_s3 = inlined_call_operand.hbm [shape: f32[128,512], index: 3, kind: input, shape index: {}]   ;;  %s2853_s4 = inlined_call_operand.vmem [shape: f32[1,512], index: 4, kind: input, shape index: {}]   ;;  %s2854_s5 = inlined_call_operand.hbm [shape: f32[256,512], index: 5, kind: input, shape index: {}]   ;;  %s2855_s6 = inlined_call_operand.hbm [shape: f32[256,512], index: 6, kind: input, shape index: {}]   ;;  %s2856_s7 = inlined_call_operand.hbm [shape: f32[128,512], index: 7, kind: input, shape index: {}]   ;;  %s2857_s8 = inlined_call_operand.vmem [shape: f32[1,512], index: 8, kind: input, shape index: {}]   ;;  %s2858_s9 = inlined_call_operand.vmem [shape: f32[8,2,256], index: 9, kind: output, shape index: {0}]   ;;  %s2859_s10 = inlined_call_operand.hbm [shape: f32[2,256], index: 10, kind: output, shape index: {1}]  }
   0x1   :  { %17 = vsyncpa [#allocation8], 0 }
   0x2   :  { %18 = vsyncpa [#allocation11], 0 }
   0x3   :  { %19 = vsyncpa [#allocation6], 0  ;;  %s2240_s13 = smov [#allocation7]   ;;  %s2241_s15 = smov [#allocation10]  }
   0x4   :  { %s41_s14 = sshll.u32 %s2240_s13, 4  ;;  %s67_s16 = sshll.u32 %s2241_s15, 4  ;;  %s42_s14 = int_to_ptr.vmem [resolvable:$true] %s41_s14  ;;  %s68_s16 = int_to_ptr.vmem [resolvable:$true] %s67_s16 }
   0x5   :  { %s2080_s17 = scalar_lea.vmem %s42_s14, 8192  ;;  %p2085_p1 = scmp.lt.s32.totalorder %s42_s14, %s42_s14 }
   0x6   :  { %p2081_p0 = scmp.ne.s32.totalorder %s42_s14, %s2080_s17  ;;  %p2086_p2 = scmp.lt.s32.totalorder %s2080_s17, %s2080_s17 }
   0x8   :  { %p2087_p3 = por %p2086_p2, %p2085_p1 }
   0xa   :  { %p2088_p4 = pnand %p2087_p3, %p2081_p0 }
   0xc   :  { %2091 = shalt.err (!%p2088_p4)
}
   0xd   :  { %s2242_s18 = smov 512   ;;  %s2243_s19 = smov 32  }
   0xe   :  { %47 = dma.hbm_to_vmem [thread:$0]  %s2852_s3, 8192, %s42_s14, [#allocation8], %s2242_s18, %s2242_s18, %s2243_s19  }
   0xf   :  { %s2100_s22 = scalar_lea.vmem %s68_s16, 16384  ;;  %p2105_p6 = scmp.lt.s32.totalorder %s68_s16, %s68_s16 }
  0x10   :  { %p2101_p5 = scmp.ne.s32.totalorder %s68_s16, %s2100_s22  ;;  %p2106_p7 = scmp.lt.s32.totalorder %s2100_s22, %s2100_s22 }
  0x12   :  { %p2107_p8 = por %p2106_p7, %p2105_p6 }
  0x14   :  { %p2108_p9 = pnand %p2107_p8, %p2101_p5 }
  0x16   :  { %2111 = shalt.err (!%p2108_p9)
}
  0x17   :  { %73 = dma.hbm_to_vmem [thread:$0]  %s2855_s6, 16384, %s68_s16, [#allocation11], %s2242_s18, %s2242_s18, %s2243_s19  }
  0x18   :  { %s2244_s25 = smov [#allocation4]   ;;  %s2245_s27 = smov [#allocation9]  }
  0x19   :  { %s29_s26 = sshll.u32 %s2244_s25, 4  ;;  %s55_s28 = sshll.u32 %s2245_s27, 4  ;;  %s30_s26 = int_to_ptr.vmem [resolvable:$true] %s29_s26  ;;  %s56_s28 = int_to_ptr.vmem [resolvable:$true] %s55_s28 }
  0x1a   :  { %s2120_s3 = scalar_lea.vmem %s30_s26, 16384  ;;  %p2125_p11 = scmp.lt.s32.totalorder %s30_s26, %s30_s26 }
  0x1b   :  { %p2121_p10 = scmp.ne.s32.totalorder %s30_s26, %s2120_s3  ;;  %p2126_p12 = scmp.lt.s32.totalorder %s2120_s3, %s2120_s3 }
  0x1d   :  { %p2127_p13 = por %p2126_p12, %p2125_p11 }
  0x1f   :  { %p2128_p0 = pnand %p2127_p13, %p2121_p10 }
  0x21   :  { %2131 = shalt.err (!%p2128_p0)
}
  0x22   :  { %35 = dma.hbm_to_vmem [thread:$0]  %s2851_s2, 16384, %s30_s26, [#allocation5], %s2242_s18, %s2242_s18, %s2243_s19  }
  0x23   :  { %s2140_s6 = scalar_lea.vmem %s56_s28, 16384  ;;  %p2145_p2 = scmp.lt.s32.totalorder %s56_s28, %s56_s28 }
  0x24   :  { %p2141_p1 = scmp.ne.s32.totalorder %s56_s28, %s2140_s6  ;;  %p2146_p3 = scmp.lt.s32.totalorder %s2140_s6, %s2140_s6 }
  0x26   :  { %p2147_p4 = por %p2146_p3, %p2145_p2 }
  0x28   :  { %p2148_p5 = pnand %p2147_p4, %p2141_p1 }
  0x2a   :  { %2151 = shalt.err (!%p2148_p5)
}
  0x2b   :  { %61 = dma.hbm_to_vmem [thread:$0]  %s2854_s5, 16384, %s56_s28, [#allocation8], %s2242_s18, %s2242_s18, %s2243_s19  }
  0x2c   :  { %s2246_s13 = smov [#allocation12]  }
  0x2d   :  { %s79_s14 = sshll.u32 %s2246_s13, 4  ;;  %s80_s14 = int_to_ptr.vmem [resolvable:$true] %s79_s14 }
  0x2e   :  { %s2160_s15 = scalar_lea.vmem %s80_s14, 8192  ;;  %p2165_p7 = scmp.lt.s32.totalorder %s80_s14, %s80_s14 }
  0x2f   :  { %p2161_p6 = scmp.ne.s32.totalorder %s80_s14, %s2160_s15  ;;  %p2166_p8 = scmp.lt.s32.totalorder %s2160_s15, %s2160_s15 }
  0x31   :  { %p2167_p9 = por %p2166_p8, %p2165_p7 }
  0x33   :  { %p2168_p10 = pnand %p2167_p9, %p2161_p6 }
  0x35   :  { %2171 = shalt.err (!%p2168_p10)
}
  0x36   :  { %85 = dma.hbm_to_vmem [thread:$0]  %s2856_s7, 8192, %s80_s14, [#allocation11], %s2242_s18, %s2242_s18, %s2243_s19  }
  0x37   :  { %2212 = dma.done.wait [#allocation5], 16384  }
  0x38   :  { %2213 = vsyncadd [#allocation5], 4294950912 }
  0x39   :  { %2214 = dma.done.wait [#allocation8], 24576  }
  0x3a   :  { %2215 = vsyncadd [#allocation8], 4294942720 }
  0x3b   :  { %2216 = dma.done.wait [#allocation11], 24576  }
  0x3c   :  { %2217 = vsyncadd [#allocation11], 4294942720  ;;  %v2334_v0 = vmov 0.0   ;;  %v2336_v1 = vmov 0.0   ;;  %v2338_v2 = vmov 0.0   ;;  %v2340_v3 = vmov 0.0  }
  0x3d   :  { %s2342_s5 = smov 0  }
  0x3e LB: > { %v312_v4 = vld [vmem:[#allocation4 + $0x1e8] sm:$0xff]  ;;  %v314_v5 = vld [vmem:[#allocation4 + $0x1f8] sm:$0xff]  ;;  %v311_v6 = vld [vmem:[#allocation4 + $0x1e0] sm:$0xff]  ;;  %s1986_s7 = sshll.u32 %s2238_s5, 3  ;;  %s947_s22 = ssub.s32 7, %s2238_s5  ;;  %s2238_s5 = sphi %s2342_s5, %s108_s5   ;;  %v2234_v3 = vphi %v2340_v3, %v2862_v3   ;;  %v2230_v2 = vphi %v2338_v2, %v2787_v2   ;;  %v2226_v1 = vphi %v2336_v1, %v2861_v1   ;;  %v2222_v0 = vphi %v2334_v0, %v1777_v0  }
  0x3f   : > { %390 = vmatprep.subr.mxu0 %v312_v4  ;;  %461 = vmatprep.subr.mxu1 %v314_v5  ;;  %v313_v7 = vld [vmem:[#allocation4 + $0x1f0] sm:$0xff]  ;;  %v308_v8 = vld [vmem:[#allocation4 + $0x1c8] sm:$0xff]  ;;  %v310_v9 = vld [vmem:[#allocation4 + $0x1d8] sm:$0xff]  ;;  %s2363_s19 = scalar_lea.vmem %s2849_s0, %s1986_s7  ;;  %s1989_s23 = sshll.u32 %s947_s22, 3 }
  0x40   : > { %391 = vmatpush1.msra.mxu0 %v311_v6  ;;  %462 = vmatpush1.msra.mxu1 %v313_v7  ;;  %v307_v10 = vld [vmem:[#allocation4 + $0x1c0] sm:$0xff]  ;;  %v309_v11 = vld [vmem:[#allocation4 + $0x1d0] sm:$0xff]  ;;  %v304_v12 = vld [vmem:[#allocation4 + $0x1a8] sm:$0xff]  ;;  %s2761_s26 = scalar_lea.vmem %s2849_s0, %s1989_s23  ;;  %s1960_s3 = sshll.u32 %s2238_s5, 1 }
  0x41   : > { %392 = vmatprep.subr.mxu0 %v308_v8  ;;  %463 = vmatprep.subr.mxu1 %v310_v9  ;;  %v306_v13 = vld [vmem:[#allocation4 + $0x1b8] sm:$0xff]  ;;  %v303_v14 = vld [vmem:[#allocation4 + $0x1a0] sm:$0xff]  ;;  %v305_v15 = vld [vmem:[#allocation4 + $0x1b0] sm:$0xff]  ;;  %s945_s29 = scalar_lea.vmem [#allocation2], %s1960_s3  ;;  %s1968_s11 = sshll.u32 %s947_s22, 1 }
  0x42   : > { %393 = vmatpush1.msra.mxu0 %v307_v10  ;;  %464 = vmatpush1.msra.mxu1 %v309_v11  ;;  %v300_v16 = vld [vmem:[#allocation4 + $0x188] sm:$0xff]  ;;  %v302_v17 = vld [vmem:[#allocation4 + $0x198] sm:$0xff]  ;;  %v299_v18 = vld [vmem:[#allocation4 + $0x180] sm:$0xff]  ;;  %s108_s5 = sadd.s32 1, %s2238_s5  }
  0x43   : > { %394 = vmatprep.subr.mxu0 %v304_v12  ;;  %465 = vmatprep.subr.mxu1 %v306_v13  ;;  %v301_v19 = vld [vmem:[#allocation4 + $0x190] sm:$0xff]  ;;  %v296_v20 = vld [vmem:[#allocation4 + $0x168] sm:$0xff]  ;;  %v298_v21 = vld [vmem:[#allocation4 + $0x178] sm:$0xff]  ;;  %p105_p11 = scmp.ge.s32.totalorder %s108_s5, 8  }
  0x44   : > { %395 = vmatpush1.msra.mxu0 %v303_v14  ;;  %466 = vmatpush1.msra.mxu1 %v305_v15  ;;  %v295_v22 = vld [vmem:[#allocation4 + $0x160] sm:$0xff]  ;;  %v297_v23 = vld [vmem:[#allocation4 + $0x170] sm:$0xff]  ;;  %v292_v24 = vld [vmem:[#allocation4 + $0x148] sm:$0xff]  ;;  %s2248_s17 = smov (%p105_p11), [#allocation13]  }
  0x45   : > { %396 = vmatprep.subr.mxu0 %v300_v16  ;;  %467 = vmatprep.subr.mxu1 %v302_v17  ;;  %v294_v25 = vld [vmem:[#allocation4 + $0x158] sm:$0xff]  ;;  %v291_v26 = vld [vmem:[#allocation4 + $0x140] sm:$0xff]  ;;  %v293_v27 = vld [vmem:[#allocation4 + $0x150] sm:$0xff]  ;;  %s1914_s18 = sshll.u32 (%p105_p11), %s2248_s17, 4  ;;  %s1915_s18 = int_to_ptr.vmem [resolvable:$true] %s1914_s18 }
  0x46   : > { %397 = vmatpush1.msra.mxu0 %v299_v18  ;;  %468 = vmatpush1.msra.mxu1 %v301_v19  ;;  %v288_v28 = vld [vmem:[#allocation4 + $0x128] sm:$0xff]  ;;  %v290_v29 = vld [vmem:[#allocation4 + $0x138] sm:$0xff]  ;;  %v287_v30 = vld [vmem:[#allocation4 + $0x120] sm:$0xff]  ;;  %s2172_s24 = scalar_lea.vmem (%p105_p11), %s1915_s18, 64  ;;  %p2177_p13 = scmp.lt.s32.totalorder (%p105_p11), %s1915_s18, %s1915_s18 }
  0x47   : > { %398 = vmatprep.subr.mxu0 %v296_v20  ;;  %469 = vmatprep.subr.mxu1 %v298_v21  ;;  %v289_v31 = vld [vmem:[#allocation4 + $0x130] sm:$0xff]  ;;  %v284_v32 = vld [vmem:[#allocation4 + $0x108] sm:$0xff]  ;;  %v286_v33 = vld [vmem:[#allocation4 + $0x118] sm:$0xff]  ;;  %p2173_p12 = scmp.ne.s32.totalorder (%p105_p11), %s1915_s18, %s2172_s24  ;;  %p2178_p0 = scmp.lt.s32.totalorder (%p105_p11), %s2172_s24, %s2172_s24 }
  0x48   : > { %399 = vmatpush1.msra.mxu0 %v295_v22  ;;  %470 = vmatpush1.msra.mxu1 %v297_v23  ;;  %v283_v34 = vld [vmem:[#allocation4 + $0x100] sm:$0xff]  ;;  %v285_v35 = vld [vmem:[#allocation4 + $0x110] sm:$0xff]  ;;  %v280_v36 = vld [vmem:[#allocation4 + $0xe8] sm:$0xff] }
  0x49   : > { %400 = vmatprep.subr.mxu0 %v292_v24  ;;  %471 = vmatprep.subr.mxu1 %v294_v25  ;;  %v282_v37 = vld [vmem:[#allocation4 + $0xf8] sm:$0xff]  ;;  %v279_v38 = vld [vmem:[#allocation4 + $0xe0] sm:$0xff]  ;;  %v281_v39 = vld [vmem:[#allocation4 + $0xf0] sm:$0xff]  ;;  %p2179_p1 = por (%p105_p11), %p2178_p0, %p2177_p13 }
  0x4a   : > { %401 = vmatpush1.msra.mxu0 %v291_v26  ;;  %472 = vmatpush1.msra.mxu1 %v293_v27  ;;  %v276_v40 = vld [vmem:[#allocation4 + $0xc8] sm:$0xff]  ;;  %v278_v41 = vld [vmem:[#allocation4 + $0xd8] sm:$0xff]  ;;  %v275_v42 = vld [vmem:[#allocation4 + $0xc0] sm:$0xff] }
  0x4b   : > { %402 = vmatprep.subr.mxu0 %v288_v28  ;;  %473 = vmatprep.subr.mxu1 %v290_v29  ;;  %v277_v43 = vld [vmem:[#allocation4 + $0xd0] sm:$0xff]  ;;  %v272_v44 = vld [vmem:[#allocation4 + $0xa8] sm:$0xff]  ;;  %v274_v45 = vld [vmem:[#allocation4 + $0xb8] sm:$0xff]  ;;  %p2180_p2 = pnand (%p105_p11), %p2179_p1, %p2173_p12 }
  0x4c   : > { %403 = vmatpush1.msra.mxu0 %v287_v30  ;;  %474 = vmatpush1.msra.mxu1 %v289_v31  ;;  %v271_v46 = vld [vmem:[#allocation4 + $0xa0] sm:$0xff]  ;;  %v273_v47 = vld [vmem:[#allocation4 + $0xb0] sm:$0xff]  ;;  %v268_v48 = vld [vmem:[#allocation4 + $0x88] sm:$0xff] }
  0x4d   : > { %404 = vmatprep.subr.mxu0 %v284_v32  ;;  %475 = vmatprep.subr.mxu1 %v286_v33  ;;  %v270_v49 = vld [vmem:[#allocation4 + $0x98] sm:$0xff]  ;;  %v267_v50 = vld [vmem:[#allocation4 + $0x80] sm:$0xff]  ;;  %v269_v51 = vld [vmem:[#allocation4 + $0x90] sm:$0xff] }
  0x4e   : > { %405 = vmatpush1.msra.mxu0 %v283_v34  ;;  %476 = vmatpush1.msra.mxu1 %v285_v35  ;;  %v264_v52 = vld [vmem:[#allocation4 + $0x68] sm:$0xff]  ;;  %v266_v53 = vld [vmem:[#allocation4 + $0x78] sm:$0xff]  ;;  %v263_v54 = vld [vmem:[#allocation4 + $0x60] sm:$0xff] }
  0x4f   : > { %406 = vmatprep.subr.mxu0 %v280_v36  ;;  %477 = vmatprep.subr.mxu1 %v282_v37  ;;  %v265_v55 = vld [vmem:[#allocation4 + $0x70] sm:$0xff]  ;;  %v260_v56 = vld [vmem:[#allocation4 + $0x48] sm:$0xff]  ;;  %v262_v57 = vld [vmem:[#allocation4 + $0x58] sm:$0xff] }
  0x50   : > { %407 = vmatpush1.msra.mxu0 %v279_v38  ;;  %478 = vmatpush1.msra.mxu1 %v281_v39  ;;  %v259_v58 = vld [vmem:[#allocation4 + $0x40] sm:$0xff]  ;;  %v261_v59 = vld [vmem:[#allocation4 + $0x50] sm:$0xff]  ;;  %v256_v60 = vld [vmem:[#allocation4 + $0x28] sm:$0xff] }
  0x51   : > { %408 = vmatprep.subr.mxu0 %v276_v40  ;;  %479 = vmatprep.subr.mxu1 %v278_v41  ;;  %v258_v61 = vld [vmem:[#allocation4 + $0x38] sm:$0xff]  ;;  %v255_v62 = vld [vmem:[#allocation4 + $0x20] sm:$0xff]  ;;  %v257_v63 = vld [vmem:[#allocation4 + $0x30] sm:$0xff] }
  0x52   : > { %409 = vmatpush1.msra.mxu0 %v275_v42  ;;  %480 = vmatpush1.msra.mxu1 %v277_v43  ;;  %v252_v4 = vld [vmem:[#allocation4 + $0x8] sm:$0xff]  ;;  %v254_v5 = vld [vmem:[#allocation4 + $0x18] sm:$0xff]  ;;  %v251_v6 = vld [vmem:[#allocation4] sm:$0xff] }
  0x53   : > { %410 = vmatprep.subr.mxu0 %v272_v44  ;;  %481 = vmatprep.subr.mxu1 %v274_v45  ;;  %v253_v7 = vld [vmem:[#allocation4 + $0x10] sm:$0xff]  ;;  %v376_v8 = vld [vmem:[#allocation4 + $0x3e8] sm:$0xff]  ;;  %v378_v9 = vld [vmem:[#allocation4 + $0x3f8] sm:$0xff] }
  0x54   : > { %411 = vmatpush1.msra.mxu0 %v271_v46  ;;  %482 = vmatpush1.msra.mxu1 %v273_v47  ;;  %v375_v10 = vld [vmem:[#allocation4 + $0x3e0] sm:$0xff]  ;;  %v377_v11 = vld [vmem:[#allocation4 + $0x3f0] sm:$0xff]  ;;  %v372_v12 = vld [vmem:[#allocation4 + $0x3c8] sm:$0xff] }
  0x55   : > { %412 = vmatprep.subr.mxu0 %v268_v48  ;;  %483 = vmatprep.subr.mxu1 %v270_v49  ;;  %v374_v13 = vld [vmem:[#allocation4 + $0x3d8] sm:$0xff]  ;;  %v371_v14 = vld [vmem:[#allocation4 + $0x3c0] sm:$0xff]  ;;  %v373_v15 = vld [vmem:[#allocation4 + $0x3d0] sm:$0xff] }
  0x56   : > { %413 = vmatpush1.msra.mxu0 %v267_v50  ;;  %484 = vmatpush1.msra.mxu1 %v269_v51  ;;  %v368_v16 = vld [vmem:[#allocation4 + $0x3a8] sm:$0xff]  ;;  %v370_v17 = vld [vmem:[#allocation4 + $0x3b8] sm:$0xff]  ;;  %v367_v18 = vld [vmem:[#allocation4 + $0x3a0] sm:$0xff] }
  0x57   : > { %414 = vmatprep.subr.mxu0 %v264_v52  ;;  %485 = vmatprep.subr.mxu1 %v266_v53  ;;  %v369_v19 = vld [vmem:[#allocation4 + $0x3b0] sm:$0xff]  ;;  %v364_v20 = vld [vmem:[#allocation4 + $0x388] sm:$0xff]  ;;  %v366_v21 = vld [vmem:[#allocation4 + $0x398] sm:$0xff] }
  0x58   : > { %415 = vmatpush1.msra.mxu0 %v263_v54  ;;  %486 = vmatpush1.msra.mxu1 %v265_v55  ;;  %v363_v22 = vld [vmem:[#allocation4 + $0x380] sm:$0xff]  ;;  %v365_v23 = vld [vmem:[#allocation4 + $0x390] sm:$0xff]  ;;  %v360_v24 = vld [vmem:[#allocation4 + $0x368] sm:$0xff] }
  0x59   : > { %416 = vmatprep.subr.mxu0 %v260_v56  ;;  %487 = vmatprep.subr.mxu1 %v262_v57  ;;  %v362_v25 = vld [vmem:[#allocation4 + $0x378] sm:$0xff]  ;;  %v359_v26 = vld [vmem:[#allocation4 + $0x360] sm:$0xff]  ;;  %v361_v27 = vld [vmem:[#allocation4 + $0x370] sm:$0xff] }
  0x5a   : > { %417 = vmatpush1.msra.mxu0 %v259_v58  ;;  %488 = vmatpush1.msra.mxu1 %v261_v59  ;;  %v356_v28 = vld [vmem:[#allocation4 + $0x348] sm:$0xff]  ;;  %v358_v29 = vld [vmem:[#allocation4 + $0x358] sm:$0xff]  ;;  %v355_v30 = vld [vmem:[#allocation4 + $0x340] sm:$0xff] }
  0x5b   : > { %418 = vmatprep.subr.mxu0 %v256_v60  ;;  %489 = vmatprep.subr.mxu1 %v258_v61  ;;  %v357_v31 = vld [vmem:[#allocation4 + $0x350] sm:$0xff]  ;;  %v352_v32 = vld [vmem:[#allocation4 + $0x328] sm:$0xff]  ;;  %v354_v33 = vld [vmem:[#allocation4 + $0x338] sm:$0xff] }
  0x5c   : > { %419 = vmatpush1.msra.mxu0 %v255_v62  ;;  %490 = vmatpush1.msra.mxu1 %v257_v63  ;;  %v351_v34 = vld [vmem:[#allocation4 + $0x320] sm:$0xff]  ;;  %v353_v35 = vld [vmem:[#allocation4 + $0x330] sm:$0xff]  ;;  %v348_v36 = vld [vmem:[#allocation4 + $0x308] sm:$0xff] }
  0x5d   : > { %420 = vmatprep.subr.mxu0 %v252_v4  ;;  %491 = vmatprep.subr.mxu1 %v254_v5  ;;  %v350_v37 = vld [vmem:[#allocation4 + $0x318] sm:$0xff]  ;;  %v347_v38 = vld [vmem:[#allocation4 + $0x300] sm:$0xff]  ;;  %v349_v39 = vld [vmem:[#allocation4 + $0x310] sm:$0xff] }
  0x5e   : > { %421 = vmatpush1.msra.mxu0 %v251_v6  ;;  %492 = vmatpush1.msra.mxu1 %v253_v7  ;;  %v344_v40 = vld [vmem:[#allocation4 + $0x2e8] sm:$0xff]  ;;  %v346_v41 = vld [vmem:[#allocation4 + $0x2f8] sm:$0xff]  ;;  %v343_v42 = vld [vmem:[#allocation4 + $0x2e0] sm:$0xff] }
  0x5f   : > { %422 = vmatprep.subr.mxu0 %v376_v8  ;;  %493 = vmatprep.subr.mxu1 %v378_v9  ;;  %v345_v43 = vld [vmem:[#allocation4 + $0x2f0] sm:$0xff]  ;;  %v340_v44 = vld [vmem:[#allocation4 + $0x2c8] sm:$0xff]  ;;  %v342_v45 = vld [vmem:[#allocation4 + $0x2d8] sm:$0xff] }
  0x60   : > { %423 = vmatpush2.msra.mxu0 %v375_v10  ;;  %494 = vmatpush2.msra.mxu1 %v377_v11  ;;  %v339_v46 = vld [vmem:[#allocation4 + $0x2c0] sm:$0xff]  ;;  %v341_v47 = vld [vmem:[#allocation4 + $0x2d0] sm:$0xff]  ;;  %v336_v48 = vld [vmem:[#allocation4 + $0x2a8] sm:$0xff] }
  0x61   : > { %424 = vmatprep.subr.mxu0 %v372_v12  ;;  %495 = vmatprep.subr.mxu1 %v374_v13  ;;  %v338_v49 = vld [vmem:[#allocation4 + $0x2b8] sm:$0xff]  ;;  %v335_v50 = vld [vmem:[#allocation4 + $0x2a0] sm:$0xff]  ;;  %v337_v51 = vld [vmem:[#allocation4 + $0x2b0] sm:$0xff] }
  0x62   : > { %425 = vmatpush2.msra.mxu0 %v371_v14  ;;  %496 = vmatpush2.msra.mxu1 %v373_v15  ;;  %v332_v52 = vld [vmem:[#allocation4 + $0x288] sm:$0xff]  ;;  %v334_v53 = vld [vmem:[#allocation4 + $0x298] sm:$0xff]  ;;  %v331_v54 = vld [vmem:[#allocation4 + $0x280] sm:$0xff] }
  0x63   : > { %426 = vmatprep.subr.mxu0 %v368_v16  ;;  %497 = vmatprep.subr.mxu1 %v370_v17  ;;  %v333_v55 = vld [vmem:[#allocation4 + $0x290] sm:$0xff]  ;;  %v328_v56 = vld [vmem:[#allocation4 + $0x268] sm:$0xff]  ;;  %v330_v57 = vld [vmem:[#allocation4 + $0x278] sm:$0xff] }
  0x64   : > { %427 = vmatpush2.msra.mxu0 %v367_v18  ;;  %498 = vmatpush2.msra.mxu1 %v369_v19  ;;  %v327_v58 = vld [vmem:[#allocation4 + $0x260] sm:$0xff]  ;;  %v329_v59 = vld [vmem:[#allocation4 + $0x270] sm:$0xff]  ;;  %v324_v60 = vld [vmem:[#allocation4 + $0x248] sm:$0xff] }
  0x65   : > { %428 = vmatprep.subr.mxu0 %v364_v20  ;;  %499 = vmatprep.subr.mxu1 %v366_v21  ;;  %v326_v61 = vld [vmem:[#allocation4 + $0x258] sm:$0xff]  ;;  %v323_v62 = vld [vmem:[#allocation4 + $0x240] sm:$0xff]  ;;  %v325_v63 = vld [vmem:[#allocation4 + $0x250] sm:$0xff] }
  0x66   : > { %429 = vmatpush2.msra.mxu0 %v363_v22  ;;  %500 = vmatpush2.msra.mxu1 %v365_v23  ;;  %v1966_v4 = vld.sshfl [vmem:[%s2363_s19 + $0x4] sm:$0x33 pattern:$0x76325410]  ;;  %v320_v5 = vld [vmem:[#allocation4 + $0x228] sm:$0xff]  ;;  %v322_v6 = vld [vmem:[#allocation4 + $0x238] sm:$0xff] }
  0x67   : > { %430 = vmatprep.subr.mxu0 %v360_v24  ;;  %501 = vmatprep.subr.mxu1 %v362_v25  ;;  %v319_v7 = vld [vmem:[#allocation4 + $0x220] sm:$0xff]  ;;  %v321_v8 = vld [vmem:[#allocation4 + $0x230] sm:$0xff]  ;;  %v316_v9 = vld [vmem:[#allocation4 + $0x208] sm:$0xff]  ;;  %v387_v11 = vcombine.high %v1966_v4, %v1966_v4 }
  0x68   : > { %431 = vmatpush2.msra.mxu0 %v359_v26  ;;  %502 = vmatpush2.msra.mxu1 %v361_v27  ;;  %v318_v10 = vld [vmem:[#allocation4 + $0x218] sm:$0xff]  ;;  %v315_v12 = vld [vmem:[#allocation4 + $0x200] sm:$0xff]  ;;  %v317_v13 = vld [vmem:[#allocation4 + $0x210] sm:$0xff] }
  0x69   : > { %432 = vmatprep.subr.mxu0 %v356_v28  ;;  %503 = vmatprep.subr.mxu1 %v358_v29  ;;  %v179_v14 = vld [vmem:[%s2850_s1 + $0x1e8] sm:$0xff]  ;;  %v181_v15 = vld [vmem:[%s2850_s1 + $0x1f8] sm:$0xff]  ;;  %v178_v16 = vld [vmem:[%s2850_s1 + $0x1e0] sm:$0xff] }
  0x6a   : > { %433 = vmatpush2.msra.mxu0 %v355_v30  ;;  %504 = vmatpush2.msra.mxu1 %v357_v31  ;;  %v180_v17 = vld [vmem:[%s2850_s1 + $0x1f0] sm:$0xff]  ;;  %v175_v18 = vld [vmem:[%s2850_s1 + $0x1c8] sm:$0xff]  ;;  %v177_v19 = vld [vmem:[%s2850_s1 + $0x1d8] sm:$0xff] }
  0x6b   : > { %434 = vmatprep.subr.mxu0 %v352_v32  ;;  %505 = vmatprep.subr.mxu1 %v354_v33  ;;  %v174_v20 = vld [vmem:[%s2850_s1 + $0x1c0] sm:$0xff]  ;;  %v176_v21 = vld [vmem:[%s2850_s1 + $0x1d0] sm:$0xff]  ;;  %v171_v22 = vld [vmem:[%s2850_s1 + $0x1a8] sm:$0xff] }
  0x6c   : > { %435 = vmatpush2.msra.mxu0 %v351_v34  ;;  %506 = vmatpush2.msra.mxu1 %v353_v35  ;;  %v173_v23 = vld [vmem:[%s2850_s1 + $0x1b8] sm:$0xff]  ;;  %v170_v24 = vld [vmem:[%s2850_s1 + $0x1a0] sm:$0xff]  ;;  %v172_v25 = vld [vmem:[%s2850_s1 + $0x1b0] sm:$0xff] }
  0x6d   : > { %436 = vmatprep.subr.mxu0 %v348_v36  ;;  %507 = vmatprep.subr.mxu1 %v350_v37  ;;  %v167_v26 = vld [vmem:[%s2850_s1 + $0x188] sm:$0xff]  ;;  %v169_v27 = vld [vmem:[%s2850_s1 + $0x198] sm:$0xff]  ;;  %v166_v28 = vld [vmem:[%s2850_s1 + $0x180] sm:$0xff] }
  0x6e   : > { %437 = vmatpush2.msra.mxu0 %v347_v38  ;;  %508 = vmatpush2.msra.mxu1 %v349_v39  ;;  %v168_v29 = vld [vmem:[%s2850_s1 + $0x190] sm:$0xff]  ;;  %v163_v30 = vld [vmem:[%s2850_s1 + $0x168] sm:$0xff]  ;;  %v165_v31 = vld [vmem:[%s2850_s1 + $0x178] sm:$0xff] }
  0x6f   : > { %438 = vmatprep.subr.mxu0 %v344_v40  ;;  %509 = vmatprep.subr.mxu1 %v346_v41  ;;  %v162_v32 = vld [vmem:[%s2850_s1 + $0x160] sm:$0xff]  ;;  %v164_v33 = vld [vmem:[%s2850_s1 + $0x170] sm:$0xff]  ;;  %v159_v34 = vld [vmem:[%s2850_s1 + $0x148] sm:$0xff] }
  0x70   : > { %439 = vmatpush2.msra.mxu0 %v343_v42  ;;  %510 = vmatpush2.msra.mxu1 %v345_v43  ;;  %v161_v35 = vld [vmem:[%s2850_s1 + $0x158] sm:$0xff]  ;;  %v158_v36 = vld [vmem:[%s2850_s1 + $0x140] sm:$0xff]  ;;  %v160_v37 = vld [vmem:[%s2850_s1 + $0x150] sm:$0xff] }
  0x71   : > { %440 = vmatprep.subr.mxu0 %v340_v44  ;;  %511 = vmatprep.subr.mxu1 %v342_v45  ;;  %v155_v38 = vld [vmem:[%s2850_s1 + $0x128] sm:$0xff]  ;;  %v157_v39 = vld [vmem:[%s2850_s1 + $0x138] sm:$0xff]  ;;  %v154_v40 = vld [vmem:[%s2850_s1 + $0x120] sm:$0xff] }
  0x72   : > { %441 = vmatpush2.msra.mxu0 %v339_v46  ;;  %512 = vmatpush2.msra.mxu1 %v341_v47  ;;  %v156_v41 = vld [vmem:[%s2850_s1 + $0x130] sm:$0xff]  ;;  %v151_v42 = vld [vmem:[%s2850_s1 + $0x108] sm:$0xff]  ;;  %v153_v43 = vld [vmem:[%s2850_s1 + $0x118] sm:$0xff] }
  0x73   : > { %442 = vmatprep.subr.mxu0 %v336_v48  ;;  %513 = vmatprep.subr.mxu1 %v338_v49  ;;  %v150_v44 = vld [vmem:[%s2850_s1 + $0x100] sm:$0xff]  ;;  %v152_v45 = vld [vmem:[%s2850_s1 + $0x110] sm:$0xff]  ;;  %v147_v46 = vld [vmem:[%s2850_s1 + $0xe8] sm:$0xff] }
  0x74   : > { %443 = vmatpush2.msra.mxu0 %v335_v50  ;;  %514 = vmatpush2.msra.mxu1 %v337_v51  ;;  %v149_v47 = vld [vmem:[%s2850_s1 + $0xf8] sm:$0xff]  ;;  %v146_v48 = vld [vmem:[%s2850_s1 + $0xe0] sm:$0xff]  ;;  %v148_v49 = vld [vmem:[%s2850_s1 + $0xf0] sm:$0xff] }
  0x75   : > { %444 = vmatprep.subr.mxu0 %v332_v52  ;;  %515 = vmatprep.subr.mxu1 %v334_v53  ;;  %v143_v50 = vld [vmem:[%s2850_s1 + $0xc8] sm:$0xff]  ;;  %v145_v51 = vld [vmem:[%s2850_s1 + $0xd8] sm:$0xff]  ;;  %v142_v52 = vld [vmem:[%s2850_s1 + $0xc0] sm:$0xff] }
  0x76   : > { %445 = vmatpush2.msra.mxu0 %v331_v54  ;;  %516 = vmatpush2.msra.mxu1 %v333_v55  ;;  %v144_v53 = vld [vmem:[%s2850_s1 + $0xd0] sm:$0xff]  ;;  %v139_v54 = vld [vmem:[%s2850_s1 + $0xa8] sm:$0xff]  ;;  %v141_v55 = vld [vmem:[%s2850_s1 + $0xb8] sm:$0xff] }
  0x77   : > { %446 = vmatprep.subr.mxu0 %v328_v56  ;;  %517 = vmatprep.subr.mxu1 %v330_v57  ;;  %v138_v56 = vld [vmem:[%s2850_s1 + $0xa0] sm:$0xff]  ;;  %v140_v57 = vld [vmem:[%s2850_s1 + $0xb0] sm:$0xff] }
  0x78   : > { %447 = vmatpush2.msra.mxu0 %v327_v58  ;;  %518 = vmatpush2.msra.mxu1 %v329_v59  ;;  %v135_v58 = vld [vmem:[%s2850_s1 + $0x88] sm:$0xff]  ;;  %v137_v59 = vld [vmem:[%s2850_s1 + $0x98] sm:$0xff] }
  0x79   : > { %448 = vmatprep.subr.mxu0 %v324_v60  ;;  %519 = vmatprep.subr.mxu1 %v326_v61  ;;  %v134_v60 = vld [vmem:[%s2850_s1 + $0x80] sm:$0xff]  ;;  %v136_v61 = vld [vmem:[%s2850_s1 + $0x90] sm:$0xff] }
  0x7a   : > { %449 = vmatpush2.msra.mxu0 %v323_v62  ;;  %520 = vmatpush2.msra.mxu1 %v325_v63  ;;  %v131_v62 = vld [vmem:[%s2850_s1 + $0x68] sm:$0xff]  ;;  %v133_v63 = vld [vmem:[%s2850_s1 + $0x78] sm:$0xff] }
  0x7b   : > { %450 = vmatprep.subr.mxu0 %v320_v5  ;;  %521 = vmatprep.subr.mxu1 %v322_v6  ;;  %v132_v5 = vld [vmem:[%s2850_s1 + $0x70] sm:$0xff]  ;;  %v127_v6 = vld [vmem:[%s2850_s1 + $0x48] sm:$0xff] }
  0x7c   : > { %451 = vmatpush2.msra.mxu0 %v319_v7  ;;  %522 = vmatpush2.msra.mxu1 %v321_v8  ;;  %v129_v7 = vld [vmem:[%s2850_s1 + $0x58] sm:$0xff]  ;;  %v126_v8 = vld [vmem:[%s2850_s1 + $0x40] sm:$0xff] }
  0x7d   : > { %452 = vmatprep.subr.mxu0 %v316_v9  ;;  %523 = vmatprep.subr.mxu1 %v318_v10  ;;  %v128_v9 = vld [vmem:[%s2850_s1 + $0x50] sm:$0xff]  ;;  %v123_v10 = vld [vmem:[%s2850_s1 + $0x28] sm:$0xff] }
  0x7e   : > { %453 = vmatpush2.msra.mxu0 %v315_v12  ;;  %454 = vmatprep.mubr.f32.mxu0 %v387_v11  ;;  %v122_v12 = vld [vmem:[%s2850_s1 + $0x20] sm:$0xff] }
  0x7f   : > { %524 = vmatpush2.msra.mxu1 %v317_v13  ;;  %455 = vmatmul.mubr.f32.vlgmr.msra.gmra.mxu0 %v1966_v4  ;;  %v124_v13 = vld [vmem:[%s2850_s1 + $0x30] sm:$0xff] }
  0x80   : > { %525 = vmatprep.mubr.f32.mxu1 %v387_v11  ;;  %543 = vmatprep.subr.mxu0 %v179_v14  ;;  %v125_v11 = vld [vmem:[%s2850_s1 + $0x38] sm:$0xff]  ;;  %v119_v14 = vld [vmem:[%s2850_s1 + $0x8] sm:$0xff] }
  0x81   : > { %614 = vmatprep.subr.mxu1 %v181_v15  ;;  %526 = vmatmul.mubr.f32.vlgmr.msra.gmra.mxu1 %v1966_v4  ;;  %v130_v4 = vld [vmem:[%s2850_s1 + $0x60] sm:$0xff]  ;;  %v121_v15 = vld [vmem:[%s2850_s1 + $0x18] sm:$0xff] }
  0x82   : > { %544 = vmatpush1.msra.mxu0 %v178_v16  ;;  %615 = vmatpush1.msra.mxu1 %v180_v17  ;;  %v118_v16 = vld [vmem:[%s2850_s1] sm:$0xff]  ;;  %v120_v17 = vld [vmem:[%s2850_s1 + $0x10] sm:$0xff] }
  0x83   : > { %545 = vmatprep.subr.mxu0 %v175_v18  ;;  %616 = vmatprep.subr.mxu1 %v177_v19  ;;  %v243_v18 = vld [vmem:[%s2850_s1 + $0x3e8] sm:$0xff]  ;;  %v245_v19 = vld [vmem:[%s2850_s1 + $0x3f8] sm:$0xff] }
  0x84   : > { %546 = vmatpush1.msra.mxu0 %v174_v20  ;;  %617 = vmatpush1.msra.mxu1 %v176_v21  ;;  %v242_v20 = vld [vmem:[%s2850_s1 + $0x3e0] sm:$0xff]  ;;  %v244_v21 = vld [vmem:[%s2850_s1 + $0x3f0] sm:$0xff] }
  0x85   : > { %547 = vmatprep.subr.mxu0 %v171_v22  ;;  %618 = vmatprep.subr.mxu1 %v173_v23  ;;  %v239_v22 = vld [vmem:[%s2850_s1 + $0x3c8] sm:$0xff]  ;;  %v241_v23 = vld [vmem:[%s2850_s1 + $0x3d8] sm:$0xff] }
  0x86   : > { %548 = vmatpush1.msra.mxu0 %v170_v24  ;;  %619 = vmatpush1.msra.mxu1 %v172_v25  ;;  %v238_v24 = vld [vmem:[%s2850_s1 + $0x3c0] sm:$0xff]  ;;  %v240_v25 = vld [vmem:[%s2850_s1 + $0x3d0] sm:$0xff] }
  0x87   : > { %549 = vmatprep.subr.mxu0 %v167_v26  ;;  %620 = vmatprep.subr.mxu1 %v169_v27  ;;  %v235_v26 = vld [vmem:[%s2850_s1 + $0x3a8] sm:$0xff]  ;;  %v237_v27 = vld [vmem:[%s2850_s1 + $0x3b8] sm:$0xff] }
  0x88   : > { %550 = vmatpush1.msra.mxu0 %v166_v28  ;;  %621 = vmatpush1.msra.mxu1 %v168_v29  ;;  %v234_v28 = vld [vmem:[%s2850_s1 + $0x3a0] sm:$0xff]  ;;  %v236_v29 = vld [vmem:[%s2850_s1 + $0x3b0] sm:$0xff] }
  0x89   : > { %551 = vmatprep.subr.mxu0 %v163_v30  ;;  %622 = vmatprep.subr.mxu1 %v165_v31  ;;  %v231_v30 = vld [vmem:[%s2850_s1 + $0x388] sm:$0xff]  ;;  %v233_v31 = vld [vmem:[%s2850_s1 + $0x398] sm:$0xff] }
  0x8a   : > { %552 = vmatpush1.msra.mxu0 %v162_v32  ;;  %623 = vmatpush1.msra.mxu1 %v164_v33  ;;  %v230_v32 = vld [vmem:[%s2850_s1 + $0x380] sm:$0xff]  ;;  %v232_v33 = vld [vmem:[%s2850_s1 + $0x390] sm:$0xff] }
  0x8b   : > { %553 = vmatprep.subr.mxu0 %v159_v34  ;;  %624 = vmatprep.subr.mxu1 %v161_v35  ;;  %v227_v34 = vld [vmem:[%s2850_s1 + $0x368] sm:$0xff]  ;;  %v229_v35 = vld [vmem:[%s2850_s1 + $0x378] sm:$0xff] }
  0x8c   : > { %554 = vmatpush1.msra.mxu0 %v158_v36  ;;  %625 = vmatpush1.msra.mxu1 %v160_v37  ;;  %v226_v36 = vld [vmem:[%s2850_s1 + $0x360] sm:$0xff]  ;;  %v228_v37 = vld [vmem:[%s2850_s1 + $0x370] sm:$0xff] }
  0x8d   : > { %555 = vmatprep.subr.mxu0 %v155_v38  ;;  %626 = vmatprep.subr.mxu1 %v157_v39  ;;  %v223_v38 = vld [vmem:[%s2850_s1 + $0x348] sm:$0xff]  ;;  %v225_v39 = vld [vmem:[%s2850_s1 + $0x358] sm:$0xff] }
  0x8e   : > { %556 = vmatpush1.msra.mxu0 %v154_v40  ;;  %627 = vmatpush1.msra.mxu1 %v156_v41  ;;  %v222_v40 = vld [vmem:[%s2850_s1 + $0x340] sm:$0xff]  ;;  %v224_v41 = vld [vmem:[%s2850_s1 + $0x350] sm:$0xff] }
  0x8f   : > { %557 = vmatprep.subr.mxu0 %v151_v42  ;;  %628 = vmatprep.subr.mxu1 %v153_v43  ;;  %v219_v42 = vld [vmem:[%s2850_s1 + $0x328] sm:$0xff]  ;;  %v221_v43 = vld [vmem:[%s2850_s1 + $0x338] sm:$0xff] }
  0x90   : > { %558 = vmatpush1.msra.mxu0 %v150_v44  ;;  %629 = vmatpush1.msra.mxu1 %v152_v45  ;;  %v218_v44 = vld [vmem:[%s2850_s1 + $0x320] sm:$0xff]  ;;  %v220_v45 = vld [vmem:[%s2850_s1 + $0x330] sm:$0xff] }
  0x91   : > { %559 = vmatprep.subr.mxu0 %v147_v46  ;;  %630 = vmatprep.subr.mxu1 %v149_v47  ;;  %v215_v46 = vld [vmem:[%s2850_s1 + $0x308] sm:$0xff]  ;;  %v217_v47 = vld [vmem:[%s2850_s1 + $0x318] sm:$0xff] }
  0x92   : > { %560 = vmatpush1.msra.mxu0 %v146_v48  ;;  %631 = vmatpush1.msra.mxu1 %v148_v49  ;;  %v214_v48 = vld [vmem:[%s2850_s1 + $0x300] sm:$0xff]  ;;  %v216_v49 = vld [vmem:[%s2850_s1 + $0x310] sm:$0xff] }
  0x93   : > { %561 = vmatprep.subr.mxu0 %v143_v50  ;;  %632 = vmatprep.subr.mxu1 %v145_v51  ;;  %v211_v50 = vld [vmem:[%s2850_s1 + $0x2e8] sm:$0xff]  ;;  %v213_v51 = vld [vmem:[%s2850_s1 + $0x2f8] sm:$0xff] }
  0x94   : > { %562 = vmatpush1.msra.mxu0 %v142_v52  ;;  %633 = vmatpush1.msra.mxu1 %v144_v53  ;;  %v210_v52 = vld [vmem:[%s2850_s1 + $0x2e0] sm:$0xff]  ;;  %v212_v53 = vld [vmem:[%s2850_s1 + $0x2f0] sm:$0xff] }
  0x95   : > { %563 = vmatprep.subr.mxu0 %v139_v54  ;;  %634 = vmatprep.subr.mxu1 %v141_v55  ;;  %v207_v54 = vld [vmem:[%s2850_s1 + $0x2c8] sm:$0xff]  ;;  %v209_v55 = vld [vmem:[%s2850_s1 + $0x2d8] sm:$0xff] }
  0x96   : > { %564 = vmatpush1.msra.mxu0 %v138_v56  ;;  %635 = vmatpush1.msra.mxu1 %v140_v57  ;;  %v206_v56 = vld [vmem:[%s2850_s1 + $0x2c0] sm:$0xff]  ;;  %v208_v57 = vld [vmem:[%s2850_s1 + $0x2d0] sm:$0xff] }
  0x97   : > { %565 = vmatprep.subr.mxu0 %v135_v58  ;;  %636 = vmatprep.subr.mxu1 %v137_v59  ;;  %v203_v58 = vld [vmem:[%s2850_s1 + $0x2a8] sm:$0xff]  ;;  %v205_v59 = vld [vmem:[%s2850_s1 + $0x2b8] sm:$0xff] }
  0x98   : > { %566 = vmatpush1.msra.mxu0 %v134_v60  ;;  %637 = vmatpush1.msra.mxu1 %v136_v61  ;;  %v202_v60 = vld [vmem:[%s2850_s1 + $0x2a0] sm:$0xff]  ;;  %v204_v61 = vld [vmem:[%s2850_s1 + $0x2b0] sm:$0xff] }
  0x99   : > { %567 = vmatprep.subr.mxu0 %v131_v62  ;;  %638 = vmatprep.subr.mxu1 %v133_v63  ;;  %v199_v62 = vld [vmem:[%s2850_s1 + $0x288] sm:$0xff]  ;;  %v201_v63 = vld [vmem:[%s2850_s1 + $0x298] sm:$0xff] }
  0x9a   : > { %568 = vmatpush1.msra.mxu0 %v130_v4  ;;  %639 = vmatpush1.msra.mxu1 %v132_v5  ;;  %v198_v4 = vld [vmem:[%s2850_s1 + $0x280] sm:$0xff]  ;;  %v200_v5 = vld [vmem:[%s2850_s1 + $0x290] sm:$0xff] }
  0x9b   : > { %569 = vmatprep.subr.mxu0 %v127_v6  ;;  %640 = vmatprep.subr.mxu1 %v129_v7  ;;  %v195_v6 = vld [vmem:[%s2850_s1 + $0x268] sm:$0xff]  ;;  %v197_v7 = vld [vmem:[%s2850_s1 + $0x278] sm:$0xff] }
  0x9c   : > { %570 = vmatpush1.msra.mxu0 %v126_v8  ;;  %641 = vmatpush1.msra.mxu1 %v128_v9  ;;  %v194_v8 = vld [vmem:[%s2850_s1 + $0x260] sm:$0xff]  ;;  %v196_v9 = vld [vmem:[%s2850_s1 + $0x270] sm:$0xff] }
  0x9d   : > { %571 = vmatprep.subr.mxu0 %v123_v10  ;;  %642 = vmatprep.subr.mxu1 %v125_v11  ;;  %v191_v10 = vld [vmem:[%s2850_s1 + $0x248] sm:$0xff]  ;;  %v193_v11 = vld [vmem:[%s2850_s1 + $0x258] sm:$0xff] }
  0x9e   : > { %572 = vmatpush1.msra.mxu0 %v122_v12  ;;  %643 = vmatpush1.msra.mxu1 %v124_v13  ;;  %v1967_v12 = vld.sshfl [vmem:[%s2363_s19] sm:$0x33 pattern:$0x76325410]  ;;  %s1780_s19 = scalar_lea.vmem [#allocation3], %s1968_s11 }
  0x9f   : > { %573 = vmatprep.subr.mxu0 %v119_v14  ;;  %644 = vmatprep.subr.mxu1 %v121_v15  ;;  %v190_v13 = vld [vmem:[%s2850_s1 + $0x240] sm:$0xff]  ;;  %v192_v14 = vld [vmem:[%s2850_s1 + $0x250] sm:$0xff]  ;;  %v187_v15 = vld [vmem:[%s2850_s1 + $0x228] sm:$0xff] }
  0xa0   : > { %574 = vmatpush1.msra.mxu0 %v118_v16  ;;  %645 = vmatpush1.msra.mxu1 %v120_v17  ;;  %v189_v16 = vld [vmem:[%s2850_s1 + $0x238] sm:$0xff]  ;;  %v186_v17 = vld [vmem:[%s2850_s1 + $0x220] sm:$0xff] }
  0xa1   : > { %575 = vmatprep.subr.mxu0 %v243_v18  ;;  %646 = vmatprep.subr.mxu1 %v245_v19  ;;  %v188_v18 = vld [vmem:[%s2850_s1 + $0x230] sm:$0xff]  ;;  %v183_v19 = vld [vmem:[%s2850_s1 + $0x208] sm:$0xff] }
  0xa2   : > { %576 = vmatpush2.msra.mxu0 %v242_v20  ;;  %647 = vmatpush2.msra.mxu1 %v244_v21  ;;  %v185_v20 = vld [vmem:[%s2850_s1 + $0x218] sm:$0xff]  ;;  %v540_v21 = vcombine.high %v1967_v12, %v1967_v12 }
  0xa3   : > { %577 = vmatprep.subr.mxu0 %v239_v22  ;;  %648 = vmatprep.subr.mxu1 %v241_v23  ;;  %v182_v22 = vld [vmem:[%s2850_s1 + $0x200] sm:$0xff]  ;;  %v184_v23 = vld [vmem:[%s2850_s1 + $0x210] sm:$0xff] }
  0xa4   : > { %578 = vmatpush2.msra.mxu0 %v238_v24  ;;  %649 = vmatpush2.msra.mxu1 %v240_v25  ;;  %v746_v24 = vld [vmem:[#allocation7 + $0x1e8] sm:$0xff]  ;;  %v748_v25 = vld [vmem:[#allocation7 + $0x1f8] sm:$0xff] }
  0xa5   : > { %579 = vmatprep.subr.mxu0 %v235_v26  ;;  %650 = vmatprep.subr.mxu1 %v237_v27  ;;  %v745_v26 = vld [vmem:[#allocation7 + $0x1e0] sm:$0xff]  ;;  %v747_v27 = vld [vmem:[#allocation7 + $0x1f0] sm:$0xff] }
  0xa6   : > { %580 = vmatpush2.msra.mxu0 %v234_v28  ;;  %651 = vmatpush2.msra.mxu1 %v236_v29  ;;  %v742_v28 = vld [vmem:[#allocation7 + $0x1c8] sm:$0xff]  ;;  %v744_v29 = vld [vmem:[#allocation7 + $0x1d8] sm:$0xff] }
  0xa7   : > { %581 = vmatprep.subr.mxu0 %v231_v30  ;;  %652 = vmatprep.subr.mxu1 %v233_v31  ;;  %v741_v30 = vld [vmem:[#allocation7 + $0x1c0] sm:$0xff]  ;;  %v743_v31 = vld [vmem:[#allocation7 + $0x1d0] sm:$0xff] }
  0xa8   : > { %582 = vmatpush2.msra.mxu0 %v230_v32  ;;  %653 = vmatpush2.msra.mxu1 %v232_v33  ;;  %v738_v32 = vld [vmem:[#allocation7 + $0x1a8] sm:$0xff]  ;;  %v740_v33 = vld [vmem:[#allocation7 + $0x1b8] sm:$0xff] }
  0xa9   : > { %583 = vmatprep.subr.mxu0 %v227_v34  ;;  %654 = vmatprep.subr.mxu1 %v229_v35  ;;  %v737_v34 = vld [vmem:[#allocation7 + $0x1a0] sm:$0xff]  ;;  %v739_v35 = vld [vmem:[#allocation7 + $0x1b0] sm:$0xff] }
  0xaa   : > { %584 = vmatpush2.msra.mxu0 %v226_v36  ;;  %655 = vmatpush2.msra.mxu1 %v228_v37  ;;  %v734_v36 = vld [vmem:[#allocation7 + $0x188] sm:$0xff]  ;;  %v736_v37 = vld [vmem:[#allocation7 + $0x198] sm:$0xff] }
  0xab   : > { %585 = vmatprep.subr.mxu0 %v223_v38  ;;  %656 = vmatprep.subr.mxu1 %v225_v39  ;;  %v733_v38 = vld [vmem:[#allocation7 + $0x180] sm:$0xff]  ;;  %v735_v39 = vld [vmem:[#allocation7 + $0x190] sm:$0xff] }
  0xac   : > { %586 = vmatpush2.msra.mxu0 %v222_v40  ;;  %657 = vmatpush2.msra.mxu1 %v224_v41  ;;  %v730_v40 = vld [vmem:[#allocation7 + $0x168] sm:$0xff]  ;;  %v732_v41 = vld [vmem:[#allocation7 + $0x178] sm:$0xff] }
  0xad   : > { %587 = vmatprep.subr.mxu0 %v219_v42  ;;  %658 = vmatprep.subr.mxu1 %v221_v43  ;;  %v729_v42 = vld [vmem:[#allocation7 + $0x160] sm:$0xff]  ;;  %v731_v43 = vld [vmem:[#allocation7 + $0x170] sm:$0xff] }
  0xae   : > { %588 = vmatpush2.msra.mxu0 %v218_v44  ;;  %659 = vmatpush2.msra.mxu1 %v220_v45  ;;  %v726_v44 = vld [vmem:[#allocation7 + $0x148] sm:$0xff]  ;;  %v728_v45 = vld [vmem:[#allocation7 + $0x158] sm:$0xff] }
  0xaf   : > { %589 = vmatprep.subr.mxu0 %v215_v46  ;;  %660 = vmatprep.subr.mxu1 %v217_v47  ;;  %v725_v46 = vld [vmem:[#allocation7 + $0x140] sm:$0xff]  ;;  %v727_v47 = vld [vmem:[#allocation7 + $0x150] sm:$0xff] }
  0xb0   : > { %590 = vmatpush2.msra.mxu0 %v214_v48  ;;  %661 = vmatpush2.msra.mxu1 %v216_v49  ;;  %v722_v48 = vld [vmem:[#allocation7 + $0x128] sm:$0xff]  ;;  %v724_v49 = vld [vmem:[#allocation7 + $0x138] sm:$0xff] }
  0xb1   : > { %591 = vmatprep.subr.mxu0 %v211_v50  ;;  %662 = vmatprep.subr.mxu1 %v213_v51  ;;  %v721_v50 = vld [vmem:[#allocation7 + $0x120] sm:$0xff]  ;;  %v723_v51 = vld [vmem:[#allocation7 + $0x130] sm:$0xff] }
  0xb2   : > { %592 = vmatpush2.msra.mxu0 %v210_v52  ;;  %663 = vmatpush2.msra.mxu1 %v212_v53  ;;  %v718_v52 = vld [vmem:[#allocation7 + $0x108] sm:$0xff]  ;;  %v720_v53 = vld [vmem:[#allocation7 + $0x118] sm:$0xff] }
  0xb3   : > { %593 = vmatprep.subr.mxu0 %v207_v54  ;;  %664 = vmatprep.subr.mxu1 %v209_v55  ;;  %v717_v54 = vld [vmem:[#allocation7 + $0x100] sm:$0xff]  ;;  %v719_v55 = vld [vmem:[#allocation7 + $0x110] sm:$0xff] }
  0xb4   : > { %594 = vmatpush2.msra.mxu0 %v206_v56  ;;  %665 = vmatpush2.msra.mxu1 %v208_v57  ;;  %v714_v56 = vld [vmem:[#allocation7 + $0xe8] sm:$0xff]  ;;  %v716_v57 = vld [vmem:[#allocation7 + $0xf8] sm:$0xff] }
  0xb5   : > { %595 = vmatprep.subr.mxu0 %v203_v58  ;;  %666 = vmatprep.subr.mxu1 %v205_v59  ;;  %v713_v58 = vld [vmem:[#allocation7 + $0xe0] sm:$0xff]  ;;  %v715_v59 = vld [vmem:[#allocation7 + $0xf0] sm:$0xff] }
  0xb6   : > { %596 = vmatpush2.msra.mxu0 %v202_v60  ;;  %667 = vmatpush2.msra.mxu1 %v204_v61  ;;  %v710_v60 = vld [vmem:[#allocation7 + $0xc8] sm:$0xff]  ;;  %v712_v61 = vld [vmem:[#allocation7 + $0xd8] sm:$0xff] }
  0xb7   : > { %597 = vmatprep.subr.mxu0 %v199_v62  ;;  %668 = vmatprep.subr.mxu1 %v201_v63  ;;  %v709_v62 = vld [vmem:[#allocation7 + $0xc0] sm:$0xff]  ;;  %v711_v63 = vld [vmem:[#allocation7 + $0xd0] sm:$0xff] }
  0xb8   : > { %598 = vmatpush2.msra.mxu0 %v198_v4  ;;  %669 = vmatpush2.msra.mxu1 %v200_v5  ;;  %v706_v4 = vld [vmem:[#allocation7 + $0xa8] sm:$0xff]  ;;  %v708_v5 = vld [vmem:[#allocation7 + $0xb8] sm:$0xff] }
  0xb9   : > { %599 = vmatprep.subr.mxu0 %v195_v6  ;;  %670 = vmatprep.subr.mxu1 %v197_v7  ;;  %v705_v6 = vld [vmem:[#allocation7 + $0xa0] sm:$0xff]  ;;  %v707_v7 = vld [vmem:[#allocation7 + $0xb0] sm:$0xff] }
  0xba   : > { %600 = vmatpush2.msra.mxu0 %v194_v8  ;;  %671 = vmatpush2.msra.mxu1 %v196_v9  ;;  %v702_v8 = vld [vmem:[#allocation7 + $0x88] sm:$0xff]  ;;  %v704_v9 = vld [vmem:[#allocation7 + $0x98] sm:$0xff] }
  0xbb   : > { %601 = vmatprep.subr.mxu0 %v191_v10  ;;  %672 = vmatprep.subr.mxu1 %v193_v11  ;;  %v701_v10 = vld [vmem:[#allocation7 + $0x80] sm:$0xff]  ;;  %v703_v11 = vld [vmem:[#allocation7 + $0x90] sm:$0xff] }
  0xbc   : > { %602 = vmatpush2.msra.mxu0 %v190_v13  ;;  %673 = vmatpush2.msra.mxu1 %v192_v14  ;;  %v700_v13 = vld [vmem:[#allocation7 + $0x78] sm:$0xff]  ;;  %v697_v14 = vld [vmem:[#allocation7 + $0x60] sm:$0xff] }
  0xbd   : > { %603 = vmatprep.subr.mxu0 %v187_v15  ;;  %674 = vmatprep.subr.mxu1 %v189_v16  ;;  %v699_v15 = vld [vmem:[#allocation7 + $0x70] sm:$0xff]  ;;  %v694_v16 = vld [vmem:[#allocation7 + $0x48] sm:$0xff] }
  0xbe   : > { %604 = vmatpush2.msra.mxu0 %v186_v17  ;;  %675 = vmatpush2.msra.mxu1 %v188_v18  ;;  %v696_v17 = vld [vmem:[#allocation7 + $0x58] sm:$0xff]  ;;  %v693_v18 = vld [vmem:[#allocation7 + $0x40] sm:$0xff] }
  0xbf   : > { %605 = vmatprep.subr.mxu0 %v183_v19  ;;  %676 = vmatprep.subr.mxu1 %v185_v20  ;;  %v695_v19 = vld [vmem:[#allocation7 + $0x50] sm:$0xff]  ;;  %v690_v20 = vld [vmem:[#allocation7 + $0x28] sm:$0xff] }
  0xc0   : > { %606 = vmatpush2.msra.mxu0 %v182_v22  ;;  %607 = vmatprep.mubr.f32.mxu0 %v540_v21  ;;  %v689_v22 = vld [vmem:[#allocation7 + $0x20] sm:$0xff] }
  0xc1   : > { %677 = vmatpush2.msra.mxu1 %v184_v23  ;;  %678 = vmatprep.mubr.f32.mxu1 %v540_v21  ;;  %v692_v21 = vld [vmem:[#allocation7 + $0x38] sm:$0xff]  ;;  %v691_v23 = vld [vmem:[#allocation7 + $0x30] sm:$0xff] }
  0xc2   : > { %608 = vmatmul.mubr.f32.vlgmr.msra.gmra.mxu0 %v1967_v12  ;;  %679 = vmatmul.mubr.f32.vlgmr.msra.gmra.mxu1 %v1967_v12  ;;  %v698_v12 = vld [vmem:[#allocation7 + $0x68] sm:$0xff] }
  0xc3   : > { %749 = vmatprep.subr.mxu0 %v746_v24  ;;  %820 = vmatprep.subr.mxu1 %v748_v25  ;;  %v686_v24 = vld [vmem:[#allocation7 + $0x8] sm:$0xff]  ;;  %v688_v25 = vld [vmem:[#allocation7 + $0x18] sm:$0xff] }
  0xc4   : > { %750 = vmatpush1.msra.mxu0 %v745_v26  ;;  %821 = vmatpush1.msra.mxu1 %v747_v27  ;;  %v685_v26 = vld [vmem:[#allocation7] sm:$0xff]  ;;  %v687_v27 = vld [vmem:[#allocation7 + $0x10] sm:$0xff] }
  0xc5   : > { %751 = vmatprep.subr.mxu0 %v742_v28  ;;  %822 = vmatprep.subr.mxu1 %v744_v29  ;;  %v2247_v28 = vmov 0.0   ;;  %v1147_v29 = vld [vmem:[#allocation10 + $0x1e8] sm:$0xff] }
  0xc6   : > { %752 = vmatpush1.msra.mxu0 %v741_v30  ;;  %823 = vmatpush1.msra.mxu1 %v743_v31  ;;  %v1149_v30 = vld [vmem:[#allocation10 + $0x1f8] sm:$0xff]  ;;  %v1146_v31 = vld [vmem:[#allocation10 + $0x1e0] sm:$0xff] }
  0xc7   : > { %753 = vmatprep.subr.mxu0 %v738_v32  ;;  %824 = vmatprep.subr.mxu1 %v740_v33  ;;  %v1148_v32 = vld [vmem:[#allocation10 + $0x1f0] sm:$0xff]  ;;  %v1143_v33 = vld [vmem:[#allocation10 + $0x1c8] sm:$0xff] }
  0xc8   : > { %754 = vmatpush1.msra.mxu0 %v737_v34  ;;  %825 = vmatpush1.msra.mxu1 %v739_v35  ;;  %v1145_v34 = vld [vmem:[#allocation10 + $0x1d8] sm:$0xff]  ;;  %v1142_v35 = vld [vmem:[#allocation10 + $0x1c0] sm:$0xff] }
  0xc9   : > { %755 = vmatprep.subr.mxu0 %v734_v36  ;;  %826 = vmatprep.subr.mxu1 %v736_v37  ;;  %v1144_v36 = vld [vmem:[#allocation10 + $0x1d0] sm:$0xff]  ;;  %v1139_v37 = vld [vmem:[#allocation10 + $0x1a8] sm:$0xff] }
  0xca   : > { %756 = vmatpush1.msra.mxu0 %v733_v38  ;;  %827 = vmatpush1.msra.mxu1 %v735_v39  ;;  %v1141_v38 = vld [vmem:[#allocation10 + $0x1b8] sm:$0xff]  ;;  %v1138_v39 = vld [vmem:[#allocation10 + $0x1a0] sm:$0xff] }
  0xcb   : > { %757 = vmatprep.subr.mxu0 %v730_v40  ;;  %828 = vmatprep.subr.mxu1 %v732_v41  ;;  %v1140_v40 = vld [vmem:[#allocation10 + $0x1b0] sm:$0xff]  ;;  %v1135_v41 = vld [vmem:[#allocation10 + $0x188] sm:$0xff] }
  0xcc   : > { %758 = vmatpush1.msra.mxu0 %v729_v42  ;;  %829 = vmatpush1.msra.mxu1 %v731_v43  ;;  %v1137_v42 = vld [vmem:[#allocation10 + $0x198] sm:$0xff]  ;;  %v1136_v43 = vld [vmem:[#allocation10 + $0x190] sm:$0xff] }
  0xcd   : > { %759 = vmatprep.subr.mxu0 %v726_v44  ;;  %830 = vmatprep.subr.mxu1 %v728_v45  ;;  %v1131_v44 = vld [vmem:[#allocation10 + $0x168] sm:$0xff]  ;;  %v1133_v45 = vld [vmem:[#allocation10 + $0x178] sm:$0xff] }
  0xce   : > { %760 = vmatpush1.msra.mxu0 %v725_v46  ;;  %831 = vmatpush1.msra.mxu1 %v727_v47  ;;  %v1130_v46 = vld [vmem:[#allocation10 + $0x160] sm:$0xff]  ;;  %v1132_v47 = vld [vmem:[#allocation10 + $0x170] sm:$0xff] }
  0xcf   : > { %761 = vmatprep.subr.mxu0 %v722_v48  ;;  %832 = vmatprep.subr.mxu1 %v724_v49  ;;  %v1127_v48 = vld [vmem:[#allocation10 + $0x148] sm:$0xff]  ;;  %v1129_v49 = vld [vmem:[#allocation10 + $0x158] sm:$0xff] }
  0xd0   : > { %762 = vmatpush1.msra.mxu0 %v721_v50  ;;  %833 = vmatpush1.msra.mxu1 %v723_v51  ;;  %v1126_v50 = vld [vmem:[#allocation10 + $0x140] sm:$0xff]  ;;  %v1128_v51 = vld [vmem:[#allocation10 + $0x150] sm:$0xff] }
  0xd1   : > { %763 = vmatprep.subr.mxu0 %v718_v52  ;;  %834 = vmatprep.subr.mxu1 %v720_v53  ;;  %v1123_v52 = vld [vmem:[#allocation10 + $0x128] sm:$0xff]  ;;  %v1125_v53 = vld [vmem:[#allocation10 + $0x138] sm:$0xff] }
  0xd2   : > { %764 = vmatpush1.msra.mxu0 %v717_v54  ;;  %835 = vmatpush1.msra.mxu1 %v719_v55  ;;  %v1122_v54 = vld [vmem:[#allocation10 + $0x120] sm:$0xff]  ;;  %v1124_v55 = vld [vmem:[#allocation10 + $0x130] sm:$0xff] }
  0xd3   : > { %765 = vmatprep.subr.mxu0 %v714_v56  ;;  %836 = vmatprep.subr.mxu1 %v716_v57  ;;  %v1119_v56 = vld [vmem:[#allocation10 + $0x108] sm:$0xff]  ;;  %v1121_v57 = vld [vmem:[#allocation10 + $0x118] sm:$0xff] }
  0xd4   : > { %766 = vmatpush1.msra.mxu0 %v713_v58  ;;  %837 = vmatpush1.msra.mxu1 %v715_v59  ;;  %v1118_v58 = vld [vmem:[#allocation10 + $0x100] sm:$0xff]  ;;  %v1120_v59 = vld [vmem:[#allocation10 + $0x110] sm:$0xff] }
  0xd5   : > { %767 = vmatprep.subr.mxu0 %v710_v60  ;;  %838 = vmatprep.subr.mxu1 %v712_v61  ;;  %v1115_v60 = vld [vmem:[#allocation10 + $0xe8] sm:$0xff]  ;;  %v1117_v61 = vld [vmem:[#allocation10 + $0xf8] sm:$0xff] }
  0xd6   : > { %768 = vmatpush1.msra.mxu0 %v709_v62  ;;  %839 = vmatpush1.msra.mxu1 %v711_v63  ;;  %v1114_v62 = vld [vmem:[#allocation10 + $0xe0] sm:$0xff]  ;;  %v1116_v63 = vld [vmem:[#allocation10 + $0xf0] sm:$0xff] }
  0xd7   : > { %769 = vmatprep.subr.mxu0 %v706_v4  ;;  %840 = vmatprep.subr.mxu1 %v708_v5  ;;  %v1111_v4 = vld [vmem:[#allocation10 + $0xc8] sm:$0xff]  ;;  %v1113_v5 = vld [vmem:[#allocation10 + $0xd8] sm:$0xff] }
  0xd8   : > { %770 = vmatpush1.msra.mxu0 %v705_v6  ;;  %841 = vmatpush1.msra.mxu1 %v707_v7  ;;  %v1110_v6 = vld [vmem:[#allocation10 + $0xc0] sm:$0xff]  ;;  %v1112_v7 = vld [vmem:[#allocation10 + $0xd0] sm:$0xff] }
  0xd9   : > { %771 = vmatprep.subr.mxu0 %v702_v8  ;;  %842 = vmatprep.subr.mxu1 %v704_v9  ;;  %v1107_v8 = vld [vmem:[#allocation10 + $0xa8] sm:$0xff]  ;;  %v1109_v9 = vld [vmem:[#allocation10 + $0xb8] sm:$0xff] }
  0xda   : > { %772 = vmatpush1.msra.mxu0 %v701_v10  ;;  %843 = vmatpush1.msra.mxu1 %v703_v11  ;;  %v1106_v10 = vld [vmem:[#allocation10 + $0xa0] sm:$0xff]  ;;  %v1108_v11 = vld [vmem:[#allocation10 + $0xb0] sm:$0xff] }
  0xdb   : > { %773 = vmatprep.subr.mxu0 %v698_v12  ;;  %844 = vmatprep.subr.mxu1 %v700_v13  ;;  %v1103_v12 = vld [vmem:[#allocation10 + $0x88] sm:$0xff]  ;;  %v1105_v13 = vld [vmem:[#allocation10 + $0x98] sm:$0xff] }
  0xdc   : > { %774 = vmatpush1.msra.mxu0 %v697_v14  ;;  %845 = vmatpush1.msra.mxu1 %v699_v15  ;;  %v1102_v14 = vld [vmem:[#allocation10 + $0x80] sm:$0xff]  ;;  %v1104_v15 = vld [vmem:[#allocation10 + $0x90] sm:$0xff] }
  0xdd   : > { %775 = vmatprep.subr.mxu0 %v694_v16  ;;  %846 = vmatprep.subr.mxu1 %v696_v17  ;;  %v1099_v16 = vld [vmem:[#allocation10 + $0x68] sm:$0xff]  ;;  %v1101_v17 = vld [vmem:[#allocation10 + $0x78] sm:$0xff] }
  0xde   : > { %776 = vmatpush1.msra.mxu0 %v693_v18  ;;  %847 = vmatpush1.msra.mxu1 %v695_v19  ;;  %v1098_v18 = vld [vmem:[#allocation10 + $0x60] sm:$0xff]  ;;  %v1100_v19 = vld [vmem:[#allocation10 + $0x70] sm:$0xff] }
  0xdf   : > { %777 = vmatprep.subr.mxu0 %v690_v20  ;;  %848 = vmatprep.subr.mxu1 %v692_v21  ;;  %v1095_v20 = vld [vmem:[#allocation10 + $0x48] sm:$0xff]  ;;  %v1097_v21 = vld [vmem:[#allocation10 + $0x58] sm:$0xff] }
  0xe0   : > { %778 = vmatpush1.msra.mxu0 %v689_v22  ;;  %849 = vmatpush1.msra.mxu1 %v691_v23  ;;  %v1094_v22 = vld [vmem:[#allocation10 + $0x40] sm:$0xff]  ;;  %v1096_v23 = vld [vmem:[#allocation10 + $0x50] sm:$0xff] }
  0xe1   : > { %779 = vmatprep.subr.mxu0 %v686_v24  ;;  %850 = vmatprep.subr.mxu1 %v688_v25  ;;  %v1091_v24 = vld [vmem:[#allocation10 + $0x28] sm:$0xff]  ;;  %v1093_v25 = vld [vmem:[#allocation10 + $0x38] sm:$0xff] }
  0xe2   : > { %780 = vmatpush1.msra.mxu0 %v685_v26  ;;  %813 = vmatprep.mubr.f32.mxu0 %v2247_v28  ;;  %v1090_v26 = vld [vmem:[#allocation10 + $0x20] sm:$0xff] }
  0xe3   : > { %851 = vmatpush1.msra.mxu1 %v687_v27  ;;  %884 = vmatprep.mubr.f32.mxu1 %v2247_v28  ;;  %v1092_v27 = vld [vmem:[#allocation10 + $0x30] sm:$0xff] }
  0xe4   : > { %814 = vmatmul.mubr.f32.vlgmr.msra.gmra.mxu0 %v2234_v3  ;;  %885 = vmatmul.mubr.f32.vlgmr.msra.gmra.mxu1 %v2234_v3  ;;  %v1134_v3 = vld [vmem:[#allocation10 + $0x180] sm:$0xff] }
  0xe5   : > { %1225 = vmatprep.subr.mxu0 %v1147_v29  ;;  %1296 = vmatprep.subr.mxu1 %v1149_v30  ;;  %v1087_v29 = vld [vmem:[#allocation10 + $0x8] sm:$0xff]  ;;  %v1089_v30 = vld [vmem:[#allocation10 + $0x18] sm:$0xff] }
  0xe6   : > { %1226 = vmatpush1.msra.mxu0 %v1146_v31  ;;  %1297 = vmatpush1.msra.mxu1 %v1148_v32  ;;  %v1086_v31 = vld [vmem:[#allocation10] sm:$0xff]  ;;  %v1088_v32 = vld [vmem:[#allocation10 + $0x10] sm:$0xff] }
  0xe7   : > { %1227 = vmatprep.subr.mxu0 %v1143_v33  ;;  %1298 = vmatprep.subr.mxu1 %v1145_v34  ;;  %v1211_v33 = vld [vmem:[#allocation10 + $0x3e8] sm:$0xff]  ;;  %v1213_v34 = vld [vmem:[#allocation10 + $0x3f8] sm:$0xff] }
  0xe8   : > { %1228 = vmatpush1.msra.mxu0 %v1142_v35  ;;  %1299 = vmatpush1.msra.mxu1 %v1144_v36  ;;  %v1210_v35 = vld [vmem:[#allocation10 + $0x3e0] sm:$0xff]  ;;  %v1212_v36 = vld [vmem:[#allocation10 + $0x3f0] sm:$0xff] }
  0xe9   : > { %1229 = vmatprep.subr.mxu0 %v1139_v37  ;;  %1300 = vmatprep.subr.mxu1 %v1141_v38  ;;  %v1207_v37 = vld [vmem:[#allocation10 + $0x3c8] sm:$0xff]  ;;  %v1209_v38 = vld [vmem:[#allocation10 + $0x3d8] sm:$0xff] }
  0xea   : > { %1230 = vmatpush1.msra.mxu0 %v1138_v39  ;;  %1301 = vmatpush1.msra.mxu1 %v1140_v40  ;;  %v1206_v39 = vld [vmem:[#allocation10 + $0x3c0] sm:$0xff]  ;;  %v1208_v40 = vld [vmem:[#allocation10 + $0x3d0] sm:$0xff] }
  0xeb   : > { %1231 = vmatprep.subr.mxu0 %v1135_v41  ;;  %1302 = vmatprep.subr.mxu1 %v1137_v42  ;;  %v1203_v41 = vld [vmem:[#allocation10 + $0x3a8] sm:$0xff]  ;;  %v1205_v42 = vld [vmem:[#allocation10 + $0x3b8] sm:$0xff] }
  0xec   : > { %1232 = vmatpush1.msra.mxu0 %v1134_v3  ;;  %1303 = vmatpush1.msra.mxu1 %v1136_v43  ;;  %v1202_v3 = vld [vmem:[#allocation10 + $0x3a0] sm:$0xff]  ;;  %v1204_v43 = vld [vmem:[#allocation10 + $0x3b0] sm:$0xff] }
  0xed   : > { %1233 = vmatprep.subr.mxu0 %v1131_v44  ;;  %1304 = vmatprep.subr.mxu1 %v1133_v45  ;;  %v1199_v44 = vld [vmem:[#allocation10 + $0x388] sm:$0xff]  ;;  %v1201_v45 = vld [vmem:[#allocation10 + $0x398] sm:$0xff] }
  0xee   : > { %1234 = vmatpush1.msra.mxu0 %v1130_v46  ;;  %1305 = vmatpush1.msra.mxu1 %v1132_v47  ;;  %v1198_v46 = vld [vmem:[#allocation10 + $0x380] sm:$0xff]  ;;  %v1200_v47 = vld [vmem:[#allocation10 + $0x390] sm:$0xff] }
  0xef   : > { %1235 = vmatprep.subr.mxu0 %v1127_v48  ;;  %1306 = vmatprep.subr.mxu1 %v1129_v49  ;;  %v1195_v48 = vld [vmem:[#allocation10 + $0x368] sm:$0xff]  ;;  %v1197_v49 = vld [vmem:[#allocation10 + $0x378] sm:$0xff] }
  0xf0   : > { %1236 = vmatpush1.msra.mxu0 %v1126_v50  ;;  %1307 = vmatpush1.msra.mxu1 %v1128_v51  ;;  %v1194_v50 = vld [vmem:[#allocation10 + $0x360] sm:$0xff]  ;;  %v1196_v51 = vld [vmem:[#allocation10 + $0x370] sm:$0xff] }
  0xf1   : > { %1237 = vmatprep.subr.mxu0 %v1123_v52  ;;  %1308 = vmatprep.subr.mxu1 %v1125_v53  ;;  %v1191_v52 = vld [vmem:[#allocation10 + $0x348] sm:$0xff]  ;;  %v1193_v53 = vld [vmem:[#allocation10 + $0x358] sm:$0xff] }
  0xf2   : > { %1238 = vmatpush1.msra.mxu0 %v1122_v54  ;;  %1309 = vmatpush1.msra.mxu1 %v1124_v55  ;;  %v1190_v54 = vld [vmem:[#allocation10 + $0x340] sm:$0xff]  ;;  %v1192_v55 = vld [vmem:[#allocation10 + $0x350] sm:$0xff] }
  0xf3   : > { %1239 = vmatprep.subr.mxu0 %v1119_v56  ;;  %1310 = vmatprep.subr.mxu1 %v1121_v57  ;;  %v1187_v56 = vld [vmem:[#allocation10 + $0x328] sm:$0xff]  ;;  %v1189_v57 = vld [vmem:[#allocation10 + $0x338] sm:$0xff] }
  0xf4   : > { %1240 = vmatpush1.msra.mxu0 %v1118_v58  ;;  %1311 = vmatpush1.msra.mxu1 %v1120_v59  ;;  %v1186_v58 = vld [vmem:[#allocation10 + $0x320] sm:$0xff]  ;;  %v1188_v59 = vld [vmem:[#allocation10 + $0x330] sm:$0xff] }
  0xf5   : > { %1241 = vmatprep.subr.mxu0 %v1115_v60  ;;  %1312 = vmatprep.subr.mxu1 %v1117_v61  ;;  %v1183_v60 = vld [vmem:[#allocation10 + $0x308] sm:$0xff]  ;;  %v1185_v61 = vld [vmem:[#allocation10 + $0x318] sm:$0xff] }
  0xf6   : > { %1242 = vmatpush1.msra.mxu0 %v1114_v62  ;;  %1313 = vmatpush1.msra.mxu1 %v1116_v63  ;;  %v1182_v62 = vld [vmem:[#allocation10 + $0x300] sm:$0xff]  ;;  %v1184_v63 = vld [vmem:[#allocation10 + $0x310] sm:$0xff] }
  0xf7   : > { %1243 = vmatprep.subr.mxu0 %v1111_v4  ;;  %1314 = vmatprep.subr.mxu1 %v1113_v5  ;;  %v1179_v4 = vld [vmem:[#allocation10 + $0x2e8] sm:$0xff]  ;;  %v1181_v5 = vld [vmem:[#allocation10 + $0x2f8] sm:$0xff] }
  0xf8   : > { %1244 = vmatpush1.msra.mxu0 %v1110_v6  ;;  %1315 = vmatpush1.msra.mxu1 %v1112_v7  ;;  %v1178_v6 = vld [vmem:[#allocation10 + $0x2e0] sm:$0xff]  ;;  %v1180_v7 = vld [vmem:[#allocation10 + $0x2f0] sm:$0xff] }
  0xf9   : > { %1245 = vmatprep.subr.mxu0 %v1107_v8  ;;  %1316 = vmatprep.subr.mxu1 %v1109_v9  ;;  %v1175_v8 = vld [vmem:[#allocation10 + $0x2c8] sm:$0xff]  ;;  %v1177_v9 = vld [vmem:[#allocation10 + $0x2d8] sm:$0xff] }
  0xfa   : > { %1246 = vmatpush1.msra.mxu0 %v1106_v10  ;;  %1317 = vmatpush1.msra.mxu1 %v1108_v11  ;;  %v1174_v10 = vld [vmem:[#allocation10 + $0x2c0] sm:$0xff]  ;;  %v1176_v11 = vld [vmem:[#allocation10 + $0x2d0] sm:$0xff] }
  0xfb   : > { %1247 = vmatprep.subr.mxu0 %v1103_v12  ;;  %1318 = vmatprep.subr.mxu1 %v1105_v13  ;;  %v1171_v12 = vld [vmem:[#allocation10 + $0x2a8] sm:$0xff]  ;;  %v1173_v13 = vld [vmem:[#allocation10 + $0x2b8] sm:$0xff] }
  0xfc   : > { %1248 = vmatpush1.msra.mxu0 %v1102_v14  ;;  %1319 = vmatpush1.msra.mxu1 %v1104_v15  ;;  %v1170_v14 = vld [vmem:[#allocation10 + $0x2a0] sm:$0xff]  ;;  %v1172_v15 = vld [vmem:[#allocation10 + $0x2b0] sm:$0xff] }
  0xfd   : > { %1249 = vmatprep.subr.mxu0 %v1099_v16  ;;  %1320 = vmatprep.subr.mxu1 %v1101_v17  ;;  %v1167_v16 = vld [vmem:[#allocation10 + $0x288] sm:$0xff]  ;;  %v1169_v17 = vld [vmem:[#allocation10 + $0x298] sm:$0xff] }
  0xfe   : > { %1250 = vmatpush1.msra.mxu0 %v1098_v18  ;;  %1321 = vmatpush1.msra.mxu1 %v1100_v19  ;;  %v1166_v18 = vld [vmem:[#allocation10 + $0x280] sm:$0xff]  ;;  %v1168_v19 = vld [vmem:[#allocation10 + $0x290] sm:$0xff] }
  0xff   : > { %1251 = vmatprep.subr.mxu0 %v1095_v20  ;;  %1322 = vmatprep.subr.mxu1 %v1097_v21  ;;  %v1163_v20 = vld [vmem:[#allocation10 + $0x268] sm:$0xff]  ;;  %v1165_v21 = vld [vmem:[#allocation10 + $0x278] sm:$0xff] }
 0x100   : > { %1252 = vmatpush1.msra.mxu0 %v1094_v22  ;;  %1323 = vmatpush1.msra.mxu1 %v1096_v23  ;;  %v1162_v22 = vld [vmem:[#allocation10 + $0x260] sm:$0xff]  ;;  %v1164_v23 = vld [vmem:[#allocation10 + $0x270] sm:$0xff] }
 0x101   : > { %1253 = vmatprep.subr.mxu0 %v1091_v24  ;;  %1324 = vmatprep.subr.mxu1 %v1093_v25  ;;  %v1159_v24 = vld [vmem:[#allocation10 + $0x248] sm:$0xff]  ;;  %v1161_v25 = vld [vmem:[#allocation10 + $0x258] sm:$0xff] }
 0x102   : > { %1254 = vmatpush1.msra.mxu0 %v1090_v26  ;;  %1325 = vmatpush1.msra.mxu1 %v1092_v27  ;;  %v1158_v26 = vld [vmem:[#allocation10 + $0x240] sm:$0xff]  ;;  %v1160_v27 = vld [vmem:[#allocation10 + $0x250] sm:$0xff] }
 0x103   : > { %1255 = vmatprep.subr.mxu0 %v1087_v29  ;;  %1326 = vmatprep.subr.mxu1 %v1089_v30  ;;  %v1974_v29 = vld.sshfl [vmem:[%s2761_s26 + $0x4] sm:$0x33 pattern:$0x76325410]  ;;  %v1155_v30 = vld [vmem:[#allocation10 + $0x228] sm:$0xff] }
 0x104   : > { %1256 = vmatpush1.msra.mxu0 %v1086_v31  ;;  %1327 = vmatpush1.msra.mxu1 %v1088_v32  ;;  %v1157_v31 = vld [vmem:[#allocation10 + $0x238] sm:$0xff]  ;;  %v1154_v32 = vld [vmem:[#allocation10 + $0x220] sm:$0xff] }
 0x105   : > { %1257 = vmatprep.subr.mxu0 %v1211_v33  ;;  %1328 = vmatprep.subr.mxu1 %v1213_v34  ;;  %v1156_v33 = vld [vmem:[#allocation10 + $0x230] sm:$0xff]  ;;  %v1151_v34 = vld [vmem:[#allocation10 + $0x208] sm:$0xff] }
 0x106   : > { %1258 = vmatpush2.msra.mxu0 %v1210_v35  ;;  %1329 = vmatpush2.msra.mxu1 %v1212_v36  ;;  %v1153_v35 = vld [vmem:[#allocation10 + $0x218] sm:$0xff]  ;;  %v1222_v36 = vcombine.high %v1974_v29, %v1974_v29 }
 0x107   : > { %1259 = vmatprep.subr.mxu0 %v1207_v37  ;;  %1330 = vmatprep.subr.mxu1 %v1209_v38  ;;  %v1150_v37 = vld [vmem:[#allocation10 + $0x200] sm:$0xff]  ;;  %v1152_v38 = vld [vmem:[#allocation10 + $0x210] sm:$0xff] }
 0x108   : > { %1260 = vmatpush2.msra.mxu0 %v1206_v39  ;;  %1331 = vmatpush2.msra.mxu1 %v1208_v40  ;;  %v1014_v39 = vld [vmem:[#allocation9 + $0x1e8] sm:$0xff]  ;;  %v1016_v40 = vld [vmem:[#allocation9 + $0x1f8] sm:$0xff] }
 0x109   : > { %1261 = vmatprep.subr.mxu0 %v1203_v41  ;;  %1332 = vmatprep.subr.mxu1 %v1205_v42  ;;  %v1013_v41 = vld [vmem:[#allocation9 + $0x1e0] sm:$0xff]  ;;  %v1015_v42 = vld [vmem:[#allocation9 + $0x1f0] sm:$0xff] }
 0x10a   : > { %1262 = vmatpush2.msra.mxu0 %v1202_v3  ;;  %1333 = vmatpush2.msra.mxu1 %v1204_v43  ;;  %v1010_v3 = vld [vmem:[#allocation9 + $0x1c8] sm:$0xff]  ;;  %v1012_v43 = vld [vmem:[#allocation9 + $0x1d8] sm:$0xff] }
 0x10b   : > { %1263 = vmatprep.subr.mxu0 %v1199_v44  ;;  %1334 = vmatprep.subr.mxu1 %v1201_v45  ;;  %v1009_v44 = vld [vmem:[#allocation9 + $0x1c0] sm:$0xff]  ;;  %v1011_v45 = vld [vmem:[#allocation9 + $0x1d0] sm:$0xff] }
 0x10c   : > { %1264 = vmatpush2.msra.mxu0 %v1198_v46  ;;  %1335 = vmatpush2.msra.mxu1 %v1200_v47  ;;  %v1006_v46 = vld [vmem:[#allocation9 + $0x1a8] sm:$0xff]  ;;  %v1008_v47 = vld [vmem:[#allocation9 + $0x1b8] sm:$0xff] }
 0x10d   : > { %1265 = vmatprep.subr.mxu0 %v1195_v48  ;;  %1336 = vmatprep.subr.mxu1 %v1197_v49  ;;  %v1005_v48 = vld [vmem:[#allocation9 + $0x1a0] sm:$0xff]  ;;  %v1007_v49 = vld [vmem:[#allocation9 + $0x1b0] sm:$0xff] }
 0x10e   : > { %1266 = vmatpush2.msra.mxu0 %v1194_v50  ;;  %1337 = vmatpush2.msra.mxu1 %v1196_v51  ;;  %v1002_v50 = vld [vmem:[#allocation9 + $0x188] sm:$0xff]  ;;  %v1004_v51 = vld [vmem:[#allocation9 + $0x198] sm:$0xff] }
 0x10f   : > { %1267 = vmatprep.subr.mxu0 %v1191_v52  ;;  %1338 = vmatprep.subr.mxu1 %v1193_v53  ;;  %v1001_v52 = vld [vmem:[#allocation9 + $0x180] sm:$0xff]  ;;  %v1003_v53 = vld [vmem:[#allocation9 + $0x190] sm:$0xff] }
 0x110   : > { %1268 = vmatpush2.msra.mxu0 %v1190_v54  ;;  %1339 = vmatpush2.msra.mxu1 %v1192_v55  ;;  %v998_v54 = vld [vmem:[#allocation9 + $0x168] sm:$0xff]  ;;  %v1000_v55 = vld [vmem:[#allocation9 + $0x178] sm:$0xff] }
 0x111   : > { %1269 = vmatprep.subr.mxu0 %v1187_v56  ;;  %1340 = vmatprep.subr.mxu1 %v1189_v57  ;;  %v997_v56 = vld [vmem:[#allocation9 + $0x160] sm:$0xff]  ;;  %v999_v57 = vld [vmem:[#allocation9 + $0x170] sm:$0xff] }
 0x112   : > { %1270 = vmatpush2.msra.mxu0 %v1186_v58  ;;  %1341 = vmatpush2.msra.mxu1 %v1188_v59  ;;  %v994_v58 = vld [vmem:[#allocation9 + $0x148] sm:$0xff]  ;;  %v996_v59 = vld [vmem:[#allocation9 + $0x158] sm:$0xff] }
 0x113   : > { %1271 = vmatprep.subr.mxu0 %v1183_v60  ;;  %1342 = vmatprep.subr.mxu1 %v1185_v61  ;;  %v993_v60 = vld [vmem:[#allocation9 + $0x140] sm:$0xff]  ;;  %v995_v61 = vld [vmem:[#allocation9 + $0x150] sm:$0xff] }
 0x114   : > { %1272 = vmatpush2.msra.mxu0 %v1182_v62  ;;  %1343 = vmatpush2.msra.mxu1 %v1184_v63  ;;  %v990_v62 = vld [vmem:[#allocation9 + $0x128] sm:$0xff]  ;;  %v992_v63 = vld [vmem:[#allocation9 + $0x138] sm:$0xff] }
 0x115   : > { %1273 = vmatprep.subr.mxu0 %v1179_v4  ;;  %1344 = vmatprep.subr.mxu1 %v1181_v5  ;;  %v989_v4 = vld [vmem:[#allocation9 + $0x120] sm:$0xff]  ;;  %v991_v5 = vld [vmem:[#allocation9 + $0x130] sm:$0xff] }
 0x116   : > { %1274 = vmatpush2.msra.mxu0 %v1178_v6  ;;  %1345 = vmatpush2.msra.mxu1 %v1180_v7  ;;  %v986_v6 = vld [vmem:[#allocation9 + $0x108] sm:$0xff]  ;;  %v988_v7 = vld [vmem:[#allocation9 + $0x118] sm:$0xff] }
 0x117   : > { %1275 = vmatprep.subr.mxu0 %v1175_v8  ;;  %1346 = vmatprep.subr.mxu1 %v1177_v9  ;;  %v985_v8 = vld [vmem:[#allocation9 + $0x100] sm:$0xff]  ;;  %v987_v9 = vld [vmem:[#allocation9 + $0x110] sm:$0xff] }
 0x118   : > { %1276 = vmatpush2.msra.mxu0 %v1174_v10  ;;  %1347 = vmatpush2.msra.mxu1 %v1176_v11  ;;  %v982_v10 = vld [vmem:[#allocation9 + $0xe8] sm:$0xff]  ;;  %v984_v11 = vld [vmem:[#allocation9 + $0xf8] sm:$0xff] }
 0x119   : > { %1277 = vmatprep.subr.mxu0 %v1171_v12  ;;  %1348 = vmatprep.subr.mxu1 %v1173_v13  ;;  %v981_v12 = vld [vmem:[#allocation9 + $0xe0] sm:$0xff]  ;;  %v983_v13 = vld [vmem:[#allocation9 + $0xf0] sm:$0xff] }
 0x11a   : > { %1278 = vmatpush2.msra.mxu0 %v1170_v14  ;;  %1349 = vmatpush2.msra.mxu1 %v1172_v15  ;;  %v978_v14 = vld [vmem:[#allocation9 + $0xc8] sm:$0xff]  ;;  %v980_v15 = vld [vmem:[#allocation9 + $0xd8] sm:$0xff] }
 0x11b   : > { %1279 = vmatprep.subr.mxu0 %v1167_v16  ;;  %1350 = vmatprep.subr.mxu1 %v1169_v17  ;;  %v977_v16 = vld [vmem:[#allocation9 + $0xc0] sm:$0xff]  ;;  %v979_v17 = vld [vmem:[#allocation9 + $0xd0] sm:$0xff] }
 0x11c   : > { %1280 = vmatpush2.msra.mxu0 %v1166_v18  ;;  %1351 = vmatpush2.msra.mxu1 %v1168_v19  ;;  %v974_v18 = vld [vmem:[#allocation9 + $0xa8] sm:$0xff]  ;;  %v976_v19 = vld [vmem:[#allocation9 + $0xb8] sm:$0xff] }
 0x11d   : > { %1281 = vmatprep.subr.mxu0 %v1163_v20  ;;  %1352 = vmatprep.subr.mxu1 %v1165_v21  ;;  %v973_v20 = vld [vmem:[#allocation9 + $0xa0] sm:$0xff]  ;;  %v975_v21 = vld [vmem:[#allocation9 + $0xb0] sm:$0xff] }
 0x11e   : > { %1282 = vmatpush2.msra.mxu0 %v1162_v22  ;;  %1353 = vmatpush2.msra.mxu1 %v1164_v23  ;;  %v970_v22 = vld [vmem:[#allocation9 + $0x88] sm:$0xff]  ;;  %v972_v23 = vld [vmem:[#allocation9 + $0x98] sm:$0xff] }
 0x11f   : > { %1283 = vmatprep.subr.mxu0 %v1159_v24  ;;  %1354 = vmatprep.subr.mxu1 %v1161_v25  ;;  %v969_v24 = vld [vmem:[#allocation9 + $0x80] sm:$0xff]  ;;  %v971_v25 = vld [vmem:[#allocation9 + $0x90] sm:$0xff] }
 0x120   : > { %1284 = vmatpush2.msra.mxu0 %v1158_v26  ;;  %1355 = vmatpush2.msra.mxu1 %v1160_v27  ;;  %v966_v26 = vld [vmem:[#allocation9 + $0x68] sm:$0xff]  ;;  %v968_v27 = vld [vmem:[#allocation9 + $0x78] sm:$0xff] }
 0x121   : > { %1285 = vmatprep.subr.mxu0 %v1155_v30  ;;  %1356 = vmatprep.subr.mxu1 %v1157_v31  ;;  %v967_v30 = vld [vmem:[#allocation9 + $0x70] sm:$0xff]  ;;  %v962_v31 = vld [vmem:[#allocation9 + $0x48] sm:$0xff] }
 0x122   : > { %1286 = vmatpush2.msra.mxu0 %v1154_v32  ;;  %1357 = vmatpush2.msra.mxu1 %v1156_v33  ;;  %v964_v32 = vld [vmem:[#allocation9 + $0x58] sm:$0xff]  ;;  %v961_v33 = vld [vmem:[#allocation9 + $0x40] sm:$0xff] }
 0x123   : > { %1287 = vmatprep.subr.mxu0 %v1151_v34  ;;  %1358 = vmatprep.subr.mxu1 %v1153_v35  ;;  %v963_v34 = vld [vmem:[#allocation9 + $0x50] sm:$0xff]  ;;  %v958_v35 = vld [vmem:[#allocation9 + $0x28] sm:$0xff] }
 0x124   : > { %1288 = vmatpush2.msra.mxu0 %v1150_v37  ;;  %1289 = vmatprep.mubr.f32.mxu0 %v1222_v36  ;;  %v957_v37 = vld [vmem:[#allocation9 + $0x20] sm:$0xff] }
 0x125   : > { %1359 = vmatpush2.msra.mxu1 %v1152_v38  ;;  %1290 = vmatmul.mubr.f32.vlgmr.msra.gmra.mxu0 %v1974_v29  ;;  %v959_v38 = vld [vmem:[#allocation9 + $0x30] sm:$0xff] }
 0x126   : > { %1360 = vmatprep.mubr.f32.mxu1 %v1222_v36  ;;  %1378 = vmatprep.subr.mxu0 %v1014_v39  ;;  %v960_v36 = vld [vmem:[#allocation9 + $0x38] sm:$0xff]  ;;  %v954_v39 = vld [vmem:[#allocation9 + $0x8] sm:$0xff] }
 0x127   : > { %1449 = vmatprep.subr.mxu1 %v1016_v40  ;;  %1361 = vmatmul.mubr.f32.vlgmr.msra.gmra.mxu1 %v1974_v29  ;;  %v965_v29 = vld [vmem:[#allocation9 + $0x60] sm:$0xff]  ;;  %v956_v40 = vld [vmem:[#allocation9 + $0x18] sm:$0xff] }
 0x128   : > { %1379 = vmatpush1.msra.mxu0 %v1013_v41  ;;  %1450 = vmatpush1.msra.mxu1 %v1015_v42  ;;  %v953_v41 = vld [vmem:[#allocation9] sm:$0xff]  ;;  %v955_v42 = vld [vmem:[#allocation9 + $0x10] sm:$0xff] }
 0x129   : > { %1380 = vmatprep.subr.mxu0 %v1010_v3  ;;  %1451 = vmatprep.subr.mxu1 %v1012_v43  ;;  %v1078_v3 = vld [vmem:[#allocation9 + $0x3e8] sm:$0xff]  ;;  %v1080_v43 = vld [vmem:[#allocation9 + $0x3f8] sm:$0xff] }
 0x12a   : > { %1381 = vmatpush1.msra.mxu0 %v1009_v44  ;;  %1452 = vmatpush1.msra.mxu1 %v1011_v45  ;;  %v1077_v44 = vld [vmem:[#allocation9 + $0x3e0] sm:$0xff]  ;;  %v1079_v45 = vld [vmem:[#allocation9 + $0x3f0] sm:$0xff] }
 0x12b   : > { %1382 = vmatprep.subr.mxu0 %v1006_v46  ;;  %1453 = vmatprep.subr.mxu1 %v1008_v47  ;;  %v1074_v46 = vld [vmem:[#allocation9 + $0x3c8] sm:$0xff]  ;;  %v1076_v47 = vld [vmem:[#allocation9 + $0x3d8] sm:$0xff] }
 0x12c   : > { %1383 = vmatpush1.msra.mxu0 %v1005_v48  ;;  %1454 = vmatpush1.msra.mxu1 %v1007_v49  ;;  %v1073_v48 = vld [vmem:[#allocation9 + $0x3c0] sm:$0xff]  ;;  %v1075_v49 = vld [vmem:[#allocation9 + $0x3d0] sm:$0xff] }
 0x12d   : > { %1384 = vmatprep.subr.mxu0 %v1002_v50  ;;  %1455 = vmatprep.subr.mxu1 %v1004_v51  ;;  %v1070_v50 = vld [vmem:[#allocation9 + $0x3a8] sm:$0xff]  ;;  %v1072_v51 = vld [vmem:[#allocation9 + $0x3b8] sm:$0xff] }
 0x12e   : > { %1385 = vmatpush1.msra.mxu0 %v1001_v52  ;;  %1456 = vmatpush1.msra.mxu1 %v1003_v53  ;;  %v1069_v52 = vld [vmem:[#allocation9 + $0x3a0] sm:$0xff]  ;;  %v1071_v53 = vld [vmem:[#allocation9 + $0x3b0] sm:$0xff] }
 0x12f   : > { %1386 = vmatprep.subr.mxu0 %v998_v54  ;;  %1457 = vmatprep.subr.mxu1 %v1000_v55  ;;  %v1066_v54 = vld [vmem:[#allocation9 + $0x388] sm:$0xff]  ;;  %v1068_v55 = vld [vmem:[#allocation9 + $0x398] sm:$0xff] }
 0x130   : > { %1387 = vmatpush1.msra.mxu0 %v997_v56  ;;  %1458 = vmatpush1.msra.mxu1 %v999_v57  ;;  %v1065_v56 = vld [vmem:[#allocation9 + $0x380] sm:$0xff]  ;;  %v1067_v57 = vld [vmem:[#allocation9 + $0x390] sm:$0xff] }
 0x131   : > { %1388 = vmatprep.subr.mxu0 %v994_v58  ;;  %1459 = vmatprep.subr.mxu1 %v996_v59  ;;  %v1062_v58 = vld [vmem:[#allocation9 + $0x368] sm:$0xff]  ;;  %v1064_v59 = vld [vmem:[#allocation9 + $0x378] sm:$0xff] }
 0x132   : > { %1389 = vmatpush1.msra.mxu0 %v993_v60  ;;  %1460 = vmatpush1.msra.mxu1 %v995_v61  ;;  %v1061_v60 = vld [vmem:[#allocation9 + $0x360] sm:$0xff]  ;;  %v1063_v61 = vld [vmem:[#allocation9 + $0x370] sm:$0xff] }
 0x133   : > { %1390 = vmatprep.subr.mxu0 %v990_v62  ;;  %1461 = vmatprep.subr.mxu1 %v992_v63  ;;  %v1058_v62 = vld [vmem:[#allocation9 + $0x348] sm:$0xff]  ;;  %v1060_v63 = vld [vmem:[#allocation9 + $0x358] sm:$0xff] }
 0x134   : > { %1391 = vmatpush1.msra.mxu0 %v989_v4  ;;  %1462 = vmatpush1.msra.mxu1 %v991_v5  ;;  %v1057_v4 = vld [vmem:[#allocation9 + $0x340] sm:$0xff]  ;;  %v1059_v5 = vld [vmem:[#allocation9 + $0x350] sm:$0xff] }
 0x135   : > { %1392 = vmatprep.subr.mxu0 %v986_v6  ;;  %1463 = vmatprep.subr.mxu1 %v988_v7  ;;  %v1054_v6 = vld [vmem:[#allocation9 + $0x328] sm:$0xff]  ;;  %v1056_v7 = vld [vmem:[#allocation9 + $0x338] sm:$0xff] }
 0x136   : > { %1393 = vmatpush1.msra.mxu0 %v985_v8  ;;  %1464 = vmatpush1.msra.mxu1 %v987_v9  ;;  %v1053_v8 = vld [vmem:[#allocation9 + $0x320] sm:$0xff]  ;;  %v1055_v9 = vld [vmem:[#allocation9 + $0x330] sm:$0xff] }
 0x137   : > { %1394 = vmatprep.subr.mxu0 %v982_v10  ;;  %1465 = vmatprep.subr.mxu1 %v984_v11  ;;  %v1050_v10 = vld [vmem:[#allocation9 + $0x308] sm:$0xff]  ;;  %v1052_v11 = vld [vmem:[#allocation9 + $0x318] sm:$0xff] }
 0x138   : > { %1395 = vmatpush1.msra.mxu0 %v981_v12  ;;  %1466 = vmatpush1.msra.mxu1 %v983_v13  ;;  %v1049_v12 = vld [vmem:[#allocation9 + $0x300] sm:$0xff]  ;;  %v1051_v13 = vld [vmem:[#allocation9 + $0x310] sm:$0xff] }
 0x139   : > { %1396 = vmatprep.subr.mxu0 %v978_v14  ;;  %1467 = vmatprep.subr.mxu1 %v980_v15  ;;  %v1046_v14 = vld [vmem:[#allocation9 + $0x2e8] sm:$0xff]  ;;  %v1048_v15 = vld [vmem:[#allocation9 + $0x2f8] sm:$0xff] }
 0x13a   : > { %1397 = vmatpush1.msra.mxu0 %v977_v16  ;;  %1468 = vmatpush1.msra.mxu1 %v979_v17  ;;  %v1045_v16 = vld [vmem:[#allocation9 + $0x2e0] sm:$0xff]  ;;  %v1047_v17 = vld [vmem:[#allocation9 + $0x2f0] sm:$0xff] }
 0x13b   : > { %1398 = vmatprep.subr.mxu0 %v974_v18  ;;  %1469 = vmatprep.subr.mxu1 %v976_v19  ;;  %v1042_v18 = vld [vmem:[#allocation9 + $0x2c8] sm:$0xff]  ;;  %v1044_v19 = vld [vmem:[#allocation9 + $0x2d8] sm:$0xff] }
 0x13c   : > { %1399 = vmatpush1.msra.mxu0 %v973_v20  ;;  %1470 = vmatpush1.msra.mxu1 %v975_v21  ;;  %v1041_v20 = vld [vmem:[#allocation9 + $0x2c0] sm:$0xff]  ;;  %v1043_v21 = vld [vmem:[#allocation9 + $0x2d0] sm:$0xff] }
 0x13d   : > { %1400 = vmatprep.subr.mxu0 %v970_v22  ;;  %1471 = vmatprep.subr.mxu1 %v972_v23  ;;  %v1038_v22 = vld [vmem:[#allocation9 + $0x2a8] sm:$0xff]  ;;  %v1040_v23 = vld [vmem:[#allocation9 + $0x2b8] sm:$0xff] }
 0x13e   : > { %1401 = vmatpush1.msra.mxu0 %v969_v24  ;;  %1472 = vmatpush1.msra.mxu1 %v971_v25  ;;  %v1037_v24 = vld [vmem:[#allocation9 + $0x2a0] sm:$0xff]  ;;  %v1039_v25 = vld [vmem:[#allocation9 + $0x2b0] sm:$0xff] }
 0x13f   : > { %1402 = vmatprep.subr.mxu0 %v966_v26  ;;  %1473 = vmatprep.subr.mxu1 %v968_v27  ;;  %v1034_v26 = vld [vmem:[#allocation9 + $0x288] sm:$0xff]  ;;  %v1036_v27 = vld [vmem:[#allocation9 + $0x298] sm:$0xff] }
 0x140   : > { %1403 = vmatpush1.msra.mxu0 %v965_v29  ;;  %1474 = vmatpush1.msra.mxu1 %v967_v30  ;;  %v1033_v29 = vld [vmem:[#allocation9 + $0x280] sm:$0xff]  ;;  %v1035_v30 = vld [vmem:[#allocation9 + $0x290] sm:$0xff] }
 0x141   : > { %1404 = vmatprep.subr.mxu0 %v962_v31  ;;  %1475 = vmatprep.subr.mxu1 %v964_v32  ;;  %v1030_v31 = vld [vmem:[#allocation9 + $0x268] sm:$0xff]  ;;  %v1032_v32 = vld [vmem:[#allocation9 + $0x278] sm:$0xff] }
 0x142   : > { %1405 = vmatpush1.msra.mxu0 %v961_v33  ;;  %1476 = vmatpush1.msra.mxu1 %v963_v34  ;;  %v1029_v33 = vld [vmem:[#allocation9 + $0x260] sm:$0xff]  ;;  %v1031_v34 = vld [vmem:[#allocation9 + $0x270] sm:$0xff] }
 0x143   : > { %1406 = vmatprep.subr.mxu0 %v958_v35  ;;  %1477 = vmatprep.subr.mxu1 %v960_v36  ;;  %v1026_v35 = vld [vmem:[#allocation9 + $0x248] sm:$0xff]  ;;  %v1028_v36 = vld [vmem:[#allocation9 + $0x258] sm:$0xff] }
 0x144   : > { %1407 = vmatpush1.msra.mxu0 %v957_v37  ;;  %1478 = vmatpush1.msra.mxu1 %v959_v38  ;;  %v1025_v37 = vld [vmem:[#allocation9 + $0x240] sm:$0xff]  ;;  %v1027_v38 = vld [vmem:[#allocation9 + $0x250] sm:$0xff] }
 0x145   : > { %1408 = vmatprep.subr.mxu0 %v954_v39  ;;  %1479 = vmatprep.subr.mxu1 %v956_v40  ;;  %v1975_v39 = vld.sshfl [vmem:[%s2761_s26] sm:$0x33 pattern:$0x76325410]  ;;  %v1022_v40 = vld [vmem:[#allocation9 + $0x228] sm:$0xff] }
 0x146   : > { %1409 = vmatpush1.msra.mxu0 %v953_v41  ;;  %1480 = vmatpush1.msra.mxu1 %v955_v42  ;;  %v1024_v41 = vld [vmem:[#allocation9 + $0x238] sm:$0xff]  ;;  %v1021_v42 = vld [vmem:[#allocation9 + $0x220] sm:$0xff] }
 0x147   : > { %1410 = vmatprep.subr.mxu0 %v1078_v3  ;;  %1481 = vmatprep.subr.mxu1 %v1080_v43  ;;  %v1023_v3 = vld [vmem:[#allocation9 + $0x230] sm:$0xff]  ;;  %v1018_v43 = vld [vmem:[#allocation9 + $0x208] sm:$0xff] }
 0x148   : > { %1411 = vmatpush2.msra.mxu0 %v1077_v44  ;;  %1482 = vmatpush2.msra.mxu1 %v1079_v45  ;;  %v1020_v44 = vld [vmem:[#allocation9 + $0x218] sm:$0xff]  ;;  %v1375_v45 = vcombine.high %v1975_v39, %v1975_v39 }
 0x149   : > { %1412 = vmatprep.subr.mxu0 %v1074_v46  ;;  %1483 = vmatprep.subr.mxu1 %v1076_v47  ;;  %v1017_v46 = vld [vmem:[#allocation9 + $0x200] sm:$0xff]  ;;  %v1019_v47 = vld [vmem:[#allocation9 + $0x210] sm:$0xff] }
 0x14a   : > { %1413 = vmatpush2.msra.mxu0 %v1073_v48  ;;  %1484 = vmatpush2.msra.mxu1 %v1075_v49  ;;  %v1581_v48 = vld [vmem:[#allocation12 + $0x1e8] sm:$0xff]  ;;  %v1583_v49 = vld [vmem:[#allocation12 + $0x1f8] sm:$0xff] }
 0x14b   : > { %1414 = vmatprep.subr.mxu0 %v1070_v50  ;;  %1485 = vmatprep.subr.mxu1 %v1072_v51  ;;  %v1580_v50 = vld [vmem:[#allocation12 + $0x1e0] sm:$0xff]  ;;  %v1582_v51 = vld [vmem:[#allocation12 + $0x1f0] sm:$0xff] }
 0x14c   : > { %1415 = vmatpush2.msra.mxu0 %v1069_v52  ;;  %1486 = vmatpush2.msra.mxu1 %v1071_v53  ;;  %v1577_v52 = vld [vmem:[#allocation12 + $0x1c8] sm:$0xff]  ;;  %v1579_v53 = vld [vmem:[#allocation12 + $0x1d8] sm:$0xff] }
 0x14d   : > { %1416 = vmatprep.subr.mxu0 %v1066_v54  ;;  %1487 = vmatprep.subr.mxu1 %v1068_v55  ;;  %v1576_v54 = vld [vmem:[#allocation12 + $0x1c0] sm:$0xff]  ;;  %v1578_v55 = vld [vmem:[#allocation12 + $0x1d0] sm:$0xff] }
 0x14e   : > { %1417 = vmatpush2.msra.mxu0 %v1065_v56  ;;  %1488 = vmatpush2.msra.mxu1 %v1067_v57  ;;  %v1573_v56 = vld [vmem:[#allocation12 + $0x1a8] sm:$0xff]  ;;  %v1575_v57 = vld [vmem:[#allocation12 + $0x1b8] sm:$0xff] }
 0x14f   : > { %1418 = vmatprep.subr.mxu0 %v1062_v58  ;;  %1489 = vmatprep.subr.mxu1 %v1064_v59  ;;  %v1572_v58 = vld [vmem:[#allocation12 + $0x1a0] sm:$0xff]  ;;  %v1574_v59 = vld [vmem:[#allocation12 + $0x1b0] sm:$0xff] }
 0x150   : > { %1419 = vmatpush2.msra.mxu0 %v1061_v60  ;;  %1490 = vmatpush2.msra.mxu1 %v1063_v61  ;;  %v1569_v60 = vld [vmem:[#allocation12 + $0x188] sm:$0xff]  ;;  %v1571_v61 = vld [vmem:[#allocation12 + $0x198] sm:$0xff] }
 0x151   : > { %1420 = vmatprep.subr.mxu0 %v1058_v62  ;;  %1491 = vmatprep.subr.mxu1 %v1060_v63  ;;  %v1568_v62 = vld [vmem:[#allocation12 + $0x180] sm:$0xff]  ;;  %v1570_v63 = vld [vmem:[#allocation12 + $0x190] sm:$0xff] }
 0x152   : > { %1421 = vmatpush2.msra.mxu0 %v1057_v4  ;;  %1492 = vmatpush2.msra.mxu1 %v1059_v5  ;;  %v1565_v4 = vld [vmem:[#allocation12 + $0x168] sm:$0xff]  ;;  %v1567_v5 = vld [vmem:[#allocation12 + $0x178] sm:$0xff] }
 0x153   : > { %1422 = vmatprep.subr.mxu0 %v1054_v6  ;;  %1493 = vmatprep.subr.mxu1 %v1056_v7  ;;  %v1564_v6 = vld [vmem:[#allocation12 + $0x160] sm:$0xff]  ;;  %v1566_v7 = vld [vmem:[#allocation12 + $0x170] sm:$0xff] }
 0x154   : > { %1423 = vmatpush2.msra.mxu0 %v1053_v8  ;;  %1494 = vmatpush2.msra.mxu1 %v1055_v9  ;;  %v1561_v8 = vld [vmem:[#allocation12 + $0x148] sm:$0xff]  ;;  %v1563_v9 = vld [vmem:[#allocation12 + $0x158] sm:$0xff] }
 0x155   : > { %1424 = vmatprep.subr.mxu0 %v1050_v10  ;;  %1495 = vmatprep.subr.mxu1 %v1052_v11  ;;  %v1560_v10 = vld [vmem:[#allocation12 + $0x140] sm:$0xff]  ;;  %v1562_v11 = vld [vmem:[#allocation12 + $0x150] sm:$0xff] }
 0x156   : > { %1425 = vmatpush2.msra.mxu0 %v1049_v12  ;;  %1496 = vmatpush2.msra.mxu1 %v1051_v13  ;;  %v1557_v12 = vld [vmem:[#allocation12 + $0x128] sm:$0xff]  ;;  %v1559_v13 = vld [vmem:[#allocation12 + $0x138] sm:$0xff] }
 0x157   : > { %1426 = vmatprep.subr.mxu0 %v1046_v14  ;;  %1497 = vmatprep.subr.mxu1 %v1048_v15  ;;  %v1556_v14 = vld [vmem:[#allocation12 + $0x120] sm:$0xff]  ;;  %v1558_v15 = vld [vmem:[#allocation12 + $0x130] sm:$0xff] }
 0x158   : > { %1427 = vmatpush2.msra.mxu0 %v1045_v16  ;;  %1498 = vmatpush2.msra.mxu1 %v1047_v17  ;;  %v1553_v16 = vld [vmem:[#allocation12 + $0x108] sm:$0xff]  ;;  %v1555_v17 = vld [vmem:[#allocation12 + $0x118] sm:$0xff] }
 0x159   : > { %1428 = vmatprep.subr.mxu0 %v1042_v18  ;;  %1499 = vmatprep.subr.mxu1 %v1044_v19  ;;  %v1552_v18 = vld [vmem:[#allocation12 + $0x100] sm:$0xff]  ;;  %v1554_v19 = vld [vmem:[#allocation12 + $0x110] sm:$0xff] }
 0x15a   : > { %1429 = vmatpush2.msra.mxu0 %v1041_v20  ;;  %1500 = vmatpush2.msra.mxu1 %v1043_v21  ;;  %v1549_v20 = vld [vmem:[#allocation12 + $0xe8] sm:$0xff]  ;;  %v1551_v21 = vld [vmem:[#allocation12 + $0xf8] sm:$0xff] }
 0x15b   : > { %1430 = vmatprep.subr.mxu0 %v1038_v22  ;;  %1501 = vmatprep.subr.mxu1 %v1040_v23  ;;  %v1548_v22 = vld [vmem:[#allocation12 + $0xe0] sm:$0xff]  ;;  %v1550_v23 = vld [vmem:[#allocation12 + $0xf0] sm:$0xff] }
 0x15c   : > { %1431 = vmatpush2.msra.mxu0 %v1037_v24  ;;  %1502 = vmatpush2.msra.mxu1 %v1039_v25  ;;  %v1545_v24 = vld [vmem:[#allocation12 + $0xc8] sm:$0xff]  ;;  %v1547_v25 = vld [vmem:[#allocation12 + $0xd8] sm:$0xff] }
 0x15d   : > { %1432 = vmatprep.subr.mxu0 %v1034_v26  ;;  %1503 = vmatprep.subr.mxu1 %v1036_v27  ;;  %v1544_v26 = vld [vmem:[#allocation12 + $0xc0] sm:$0xff]  ;;  %v1546_v27 = vld [vmem:[#allocation12 + $0xd0] sm:$0xff] }
 0x15e   : > { %1433 = vmatpush2.msra.mxu0 %v1033_v29  ;;  %1504 = vmatpush2.msra.mxu1 %v1035_v30  ;;  %v1541_v29 = vld [vmem:[#allocation12 + $0xa8] sm:$0xff]  ;;  %v1543_v30 = vld [vmem:[#allocation12 + $0xb8] sm:$0xff] }
 0x15f   : > { %1434 = vmatprep.subr.mxu0 %v1030_v31  ;;  %1505 = vmatprep.subr.mxu1 %v1032_v32  ;;  %v1540_v31 = vld [vmem:[#allocation12 + $0xa0] sm:$0xff]  ;;  %v1542_v32 = vld [vmem:[#allocation12 + $0xb0] sm:$0xff] }
 0x160   : > { %1435 = vmatpush2.msra.mxu0 %v1029_v33  ;;  %1506 = vmatpush2.msra.mxu1 %v1031_v34  ;;  %v1537_v33 = vld [vmem:[#allocation12 + $0x88] sm:$0xff]  ;;  %v1539_v34 = vld [vmem:[#allocation12 + $0x98] sm:$0xff] }
 0x161   : > { %1436 = vmatprep.subr.mxu0 %v1026_v35  ;;  %1507 = vmatprep.subr.mxu1 %v1028_v36  ;;  %v1536_v35 = vld [vmem:[#allocation12 + $0x80] sm:$0xff]  ;;  %v1538_v36 = vld [vmem:[#allocation12 + $0x90] sm:$0xff] }
 0x162   : > { %1437 = vmatpush2.msra.mxu0 %v1025_v37  ;;  %1508 = vmatpush2.msra.mxu1 %v1027_v38  ;;  %v1533_v37 = vld [vmem:[#allocation12 + $0x68] sm:$0xff]  ;;  %v1535_v38 = vld [vmem:[#allocation12 + $0x78] sm:$0xff] }
 0x163   : > { %1438 = vmatprep.subr.mxu0 %v1022_v40  ;;  %1509 = vmatprep.subr.mxu1 %v1024_v41  ;;  %v1534_v40 = vld [vmem:[#allocation12 + $0x70] sm:$0xff]  ;;  %v1529_v41 = vld [vmem:[#allocation12 + $0x48] sm:$0xff] }
 0x164   : > { %1439 = vmatpush2.msra.mxu0 %v1021_v42  ;;  %1510 = vmatpush2.msra.mxu1 %v1023_v3  ;;  %v1531_v42 = vld [vmem:[#allocation12 + $0x58] sm:$0xff]  ;;  %v1528_v3 = vld [vmem:[#allocation12 + $0x40] sm:$0xff] }
 0x165   : > { %1440 = vmatprep.subr.mxu0 %v1018_v43  ;;  %1511 = vmatprep.subr.mxu1 %v1020_v44  ;;  %v1530_v43 = vld [vmem:[#allocation12 + $0x50] sm:$0xff]  ;;  %v1525_v44 = vld [vmem:[#allocation12 + $0x28] sm:$0xff] }
 0x166   : > { %1441 = vmatpush2.msra.mxu0 %v1017_v46  ;;  %1442 = vmatprep.mubr.f32.mxu0 %v1375_v45  ;;  %v1524_v46 = vld [vmem:[#allocation12 + $0x20] sm:$0xff] }
 0x167   : > { %1512 = vmatpush2.msra.mxu1 %v1019_v47  ;;  %1513 = vmatprep.mubr.f32.mxu1 %v1375_v45  ;;  %v1527_v45 = vld [vmem:[#allocation12 + $0x38] sm:$0xff]  ;;  %v1526_v47 = vld [vmem:[#allocation12 + $0x30] sm:$0xff] }
 0x168   : > { %1443 = vmatmul.mubr.f32.vlgmr.msra.gmra.mxu0 %v1975_v39  ;;  %1514 = vmatmul.mubr.f32.vlgmr.msra.gmra.mxu1 %v1975_v39  ;;  %v1532_v39 = vld [vmem:[#allocation12 + $0x60] sm:$0xff] }
 0x169   : > { %1584 = vmatprep.subr.mxu0 %v1581_v48  ;;  %1655 = vmatprep.subr.mxu1 %v1583_v49  ;;  %v1521_v48 = vld [vmem:[#allocation12 + $0x8] sm:$0xff]  ;;  %v1523_v49 = vld [vmem:[#allocation12 + $0x18] sm:$0xff] }
 0x16a   : > { %1585 = vmatpush1.msra.mxu0 %v1580_v50  ;;  %1656 = vmatpush1.msra.mxu1 %v1582_v51  ;;  %v1520_v50 = vld [vmem:[#allocation12] sm:$0xff]  ;;  %v1522_v51 = vld [vmem:[#allocation12 + $0x10] sm:$0xff] }
 0x16b   : > { %1586 = vmatprep.subr.mxu0 %v1577_v52  ;;  %1657 = vmatprep.subr.mxu1 %v1579_v53  ;;  %v897_v52 = vlaneseq  ;;  %v456_v53 = vpop.f32.mrf.mxu0 }
 0x16c   : > { %1587 = vmatpush1.msra.mxu0 %v1576_v54  ;;  %1658 = vmatpush1.msra.mxu1 %v1578_v55  ;;  %v527_v54 = vpop.f32.mrf.mxu1 }
 0x16d   : > { %1588 = vmatprep.subr.mxu0 %v1573_v56  ;;  %1659 = vmatprep.subr.mxu1 %v1575_v57  ;;  %v2769_v55 = vshrl.u32 %v897_v52, 7  ;;  %v458_v56 = vpop.f32.mrf.mxu0 }
 0x16e   : > { %1589 = vmatpush1.msra.mxu0 %v1572_v58  ;;  %1660 = vmatpush1.msra.mxu1 %v1574_v59  ;;  %v529_v57 = vpop.f32.mrf.mxu1 }
 0x16f   : > { %1590 = vmatprep.subr.mxu0 %v1569_v60  ;;  %1661 = vmatprep.subr.mxu1 %v1571_v61  ;;  %v899_v60 = vsub.s32 0, %v2769_v55  ;;  %v895_v61 = vld [vmem:[%s2853_s4] sm:$0xf] }
 0x170   : > { %1591 = vmatpush1.msra.mxu0 %v1568_v62  ;;  %1662 = vmatpush1.msra.mxu1 %v1570_v63 }
 0x171   : > { %1592 = vmatprep.subr.mxu0 %v1565_v4  ;;  %1663 = vmatprep.subr.mxu1 %v1567_v5  ;;  %v900_v4 = vrot.slane %v895_v61, %v899_v60 }
 0x172   : > { %1593 = vmatpush1.msra.mxu0 %v1564_v6  ;;  %1664 = vmatpush1.msra.mxu1 %v1566_v7 }
 0x173   : > { %1594 = vmatprep.subr.mxu0 %v1561_v8  ;;  %1665 = vmatprep.subr.mxu1 %v1563_v9 }
 0x174   : > { %1595 = vmatpush1.msra.mxu0 %v1560_v10  ;;  %1666 = vmatpush1.msra.mxu1 %v1562_v11 }
 0x175   : > { %1596 = vmatprep.subr.mxu0 %v1557_v12  ;;  %1667 = vmatprep.subr.mxu1 %v1559_v13  ;;  %v911_v13 = vsub.s32 3, %v2769_v55 }
 0x176   : > { %1597 = vmatpush1.msra.mxu0 %v1556_v14  ;;  %1668 = vmatpush1.msra.mxu1 %v1558_v15 }
 0x177   : > { %1598 = vmatprep.subr.mxu0 %v1553_v16  ;;  %1669 = vmatprep.subr.mxu1 %v1555_v17 }
 0x178   : > { %1599 = vmatpush1.msra.mxu0 %v1552_v18  ;;  %1670 = vmatpush1.msra.mxu1 %v1554_v19 }
 0x179   : > { %1600 = vmatprep.subr.mxu0 %v1549_v20  ;;  %1671 = vmatprep.subr.mxu1 %v1551_v21  ;;  %v912_v21 = vrot.slane %v895_v61, %v911_v13 }
 0x17a   : > { %1601 = vmatpush1.msra.mxu0 %v1548_v22  ;;  %1672 = vmatpush1.msra.mxu1 %v1550_v23 }
 0x17b   : > { %1602 = vmatprep.subr.mxu0 %v1545_v24  ;;  %1673 = vmatprep.subr.mxu1 %v1547_v25  ;;  %v907_v24 = vsub.s32 2, %v2769_v55 }
 0x17c   : > { %1603 = vmatpush1.msra.mxu0 %v1544_v26  ;;  %1674 = vmatpush1.msra.mxu1 %v1546_v27 }
 0x17d   : > { %1604 = vmatprep.subr.mxu0 %v1541_v29  ;;  %1675 = vmatprep.subr.mxu1 %v1543_v30  ;;  %v908_v29 = vrot.slane %v895_v61, %v907_v24 }
 0x17e   : > { %1605 = vmatpush1.msra.mxu0 %v1540_v31  ;;  %1676 = vmatpush1.msra.mxu1 %v1542_v32 }
 0x17f   : > { %1606 = vmatprep.subr.mxu0 %v1537_v33  ;;  %1677 = vmatprep.subr.mxu1 %v1539_v34 }
 0x180   : > { %1607 = vmatpush1.msra.mxu0 %v1536_v35  ;;  %1678 = vmatpush1.msra.mxu1 %v1538_v36 }
 0x181   : > { %1608 = vmatprep.subr.mxu0 %v1533_v37  ;;  %1679 = vmatprep.subr.mxu1 %v1535_v38 }
 0x182   : > { %1609 = vmatpush1.msra.mxu0 %v1532_v39  ;;  %1680 = vmatpush1.msra.mxu1 %v1534_v40  ;;  %v609_v58 = vpop.f32.mrf.mxu0  ;;  %v680_v59 = vpop.f32.mrf.mxu1 }
 0x183   : > { %1610 = vmatprep.subr.mxu0 %v1529_v41  ;;  %1681 = vmatprep.subr.mxu1 %v1531_v42  ;;  %v610_v63 = vadd.f32 %v609_v58, %v456_v53  ;;  %v681_v25 = vadd.f32 %v680_v59, %v527_v54 }
 0x184   : > { %1611 = vmatpush1.msra.mxu0 %v1528_v3  ;;  %1682 = vmatpush1.msra.mxu1 %v1530_v43  ;;  %v611_v62 = vpop.f32.mrf.mxu0 }
 0x185   : > { %1612 = vmatprep.subr.mxu0 %v1525_v44  ;;  %1683 = vmatprep.subr.mxu1 %v1527_v45  ;;  %v612_v6 = vadd.f32 %v611_v62, %v458_v56 }
 0x186   : > { %1613 = vmatpush1.msra.mxu0 %v1524_v46  ;;  %1684 = vmatpush1.msra.mxu1 %v1526_v47 }
 0x187   : > { %1614 = vmatprep.subr.mxu0 %v1521_v48  ;;  %1685 = vmatprep.subr.mxu1 %v1523_v49 }
 0x188   : > { %1615 = vmatpush1.msra.mxu0 %v1520_v50  ;;  %1648 = vmatprep.mubr.f32.mxu0 %v2247_v28 }
 0x189   : > { %1686 = vmatpush1.msra.mxu1 %v1522_v51  ;;  %1719 = vmatprep.mubr.f32.mxu1 %v2247_v28  ;;  %v903_v28 = vsub.s32 1, %v2769_v55  ;;  %v1730_v51 = vld [vmem:[%s2857_s8] sm:$0xf] }
 0x18a   : > { %1649 = vmatmul.mubr.f32.vlgmr.msra.gmra.mxu0 %v2226_v1  ;;  %1720 = vmatmul.mubr.f32.vlgmr.msra.gmra.mxu1 %v2226_v1  ;;  %v682_v1 = vpop.f32.mrf.mxu1  ;;  %v1735_v56 = vrot.slane %v1730_v51, %v899_v60  ;;  %v1747_v60 = vrot.slane %v1730_v51, %v911_v13 }
 0x18b   : > { %v904_v9 = vrot.slane %v895_v61, %v903_v28  ;;  %v683_v17 = vadd.f32 %v682_v1, %v529_v57  ;;  %v1739_v62 = vrot.slane %v1730_v51, %v903_v28 }
 0x1a4   : > { %v815_v5 = vpop.f32.mrf.mxu0  ;;  %v886_v8 = vpop.f32.mrf.mxu1 }
 0x1a5   : > { %v891_v7 = vadd.f32 %v815_v5, %v610_v63  ;;  %v893_v27 = vadd.f32 %v886_v8, %v681_v25 }
 0x1a6   : > { %v817_v10 = vpop.f32.mrf.mxu0  ;;  %v888_v16 = vpop.f32.mrf.mxu1 }
 0x1a7   : > { %v917_v11 = vadd.f32 %v900_v4, %v891_v7  ;;  %v892_v12 = vadd.f32 %v817_v10, %v612_v6  ;;  %v894_v20 = vadd.f32 %v888_v16, %v683_v17  ;;  %v919_v32 = vadd.f32 %v908_v29, %v893_v27 }
 0x1a8   : > { %v1743_v17 = vrot.slane %v1730_v51, %v907_v24 }
 0x1a9   : > { %v921_v14 = vsub.f32 0.0, %v917_v11  ;;  %v918_v15 = vadd.f32 %v904_v9, %v892_v12  ;;  %v920_v23 = vadd.f32 %v912_v21, %v894_v20 }
 0x1ab   : > { %v922_v18 = vmul.f32 1.442695, %v921_v14  ;;  %v927_v19 = vsub.f32 0.0, %v918_v15  ;;  %v934_v26 = vsub.f32 0.0, %v920_v23 }
 0x1ad   : > { %2040 = vpow2.f32 %v922_v18  ;;  %v928_v22 = vmul.f32 1.442695, %v927_v19  ;;  %v935_v30 = vmul.f32 1.442695, %v934_v26 }
 0x1af   : > { %2042 = vpow2.f32 %v928_v22 }
 0x1b0   : > { %2044 = vpow2.f32 %v935_v30 }
 0x1ba   : > { %v2041_v31 = vpop.eup %2040 }
 0x1bb   : > { %v924_v33 = vadd.f32 1.0, %v2041_v31 }
 0x1bc   : > { %v2043_v34 = vpop.eup %2042 }
 0x1bd   : > { %2046 = vrcp.f32 %v924_v33  ;;  %v930_v35 = vadd.f32 1.0, %v2043_v34  ;;  %v2045_v36 = vpop.eup %2044 }
 0x1be   : > { %2048 = vtanh.f32 %v919_v32  ;;  %v937_v40 = vadd.f32 1.0, %v2045_v36 }
 0x1bf   : > { %2050 = vrcp.f32 %v930_v35 }
 0x1c0   : > { %2052 = vrcp.f32 %v937_v40 }
 0x1ca   : > { %v2047_v37 = vpop.eup %2046 }
 0x1cb   : > { %v2049_v38 = vpop.eup %2048 }
 0x1cc   : > { %v2051_v39 = vpop.eup %2050  ;;  %v941_v41 = vmul.f32 %v2049_v38, %v2047_v37 }
 0x1cd   : > { %v940_v42 = vmul.f32 %v2230_v2, %v2051_v39  ;;  %v2053_v3 = vpop.eup %2052 }
 0x1cf   : > { %v2787_v2 = vadd.f32 %v941_v41, %v940_v42  }
 0x1d1   : > { %2054 = vtanh.f32 %v2787_v2 }
 0x1de   : > { %v2055_v43 = vpop.eup %2054 }
 0x1df   : > { %v2791_v3 = vmul.f32 %v2055_v43, %v2053_v3  }
 0x1e1   : > { %v2860_v44 = vmov %v2791_v3 }
 0x1e2   : > { %946 = vst [vmem:[%s945_s29] sm:$0x3] %v2860_v44  ;;  %v2862_v3 = vmov %v2860_v44 }
 0x1e5   : > { %v1291_v45 = vpop.f32.mrf.mxu0 }
 0x1e7   : > { %v1362_v46 = vpop.f32.mrf.mxu1  ;;  %v1293_v47 = vpop.f32.mrf.mxu0 }
 0x1e9   : > { %v1364_v48 = vpop.f32.mrf.mxu1  ;;  %v1782_v34 = vld [vmem:[#allocation2] sm:$0x3] (%p105_p11)  ;;  %v1783_v36 = vld [vmem:[#allocation2 + $0x2] sm:$0x3] (%p105_p11)  ;;  %v1784_v39 = vld [vmem:[#allocation2 + $0x4] sm:$0x3] (%p105_p11) }
 0x1ea   :  { %v1785_v3 = vld [vmem:[#allocation2 + $0x6] sm:$0x3] (%p105_p11)  ;;  %v1787_v2 = vld [vmem:[#allocation2 + $0xa] sm:$0x3] (%p105_p11)  ;;  %v1789_v51 = vld [vmem:[#allocation2 + $0xe] sm:$0x3] (%p105_p11) }
 0x228   : > { %v1444_v49 = vpop.f32.mrf.mxu0  ;;  %v1515_v50 = vpop.f32.mrf.mxu1 }
 0x229   : > { %v1445_v53 = vadd.f32 %v1444_v49, %v1291_v45  ;;  %v1516_v15 = vadd.f32 %v1515_v50, %v1362_v46  ;;  %v1786_v45 = vld [vmem:[#allocation2 + $0x8] sm:$0x3] (%p105_p11)  ;;  %v1788_v49 = vld [vmem:[#allocation2 + $0xc] sm:$0x3] (%p105_p11) }
 0x22a   : > { %v1446_v52 = vpop.f32.mrf.mxu0  ;;  %v1517_v54 = vpop.f32.mrf.mxu1 }
 0x22b   : > { %v1447_v58 = vadd.f32 %v1446_v52, %v1293_v47  ;;  %v1518_v8 = vadd.f32 %v1517_v54, %v1364_v48 }
 0x24a   : > { %v1650_v57 = vpop.f32.mrf.mxu0  ;;  %v1721_v61 = vpop.f32.mrf.mxu1 }
 0x24b   : > { %v1726_v59 = vadd.f32 %v1650_v57, %v1445_v53  ;;  %v1728_v28 = vadd.f32 %v1721_v61, %v1516_v15 }
 0x24c   : > { %v1652_v63 = vpop.f32.mrf.mxu0  ;;  %v1723_v7 = vpop.f32.mrf.mxu1 }
 0x24d   : > { %v1752_v1 = vadd.f32 %v1735_v56, %v1726_v59  ;;  %v1727_v4 = vadd.f32 %v1652_v63, %v1447_v58  ;;  %v1729_v11 = vadd.f32 %v1723_v7, %v1518_v8  ;;  %v1754_v20 = vadd.f32 %v1743_v17, %v1728_v28 }
 0x24f   : > { %v1756_v5 = vsub.f32 0.0, %v1752_v1  ;;  %v1753_v6 = vadd.f32 %v1739_v62, %v1727_v4  ;;  %v1755_v14 = vadd.f32 %v1747_v60, %v1729_v11 }
 0x251   : > { %v1757_v9 = vmul.f32 1.442695, %v1756_v5  ;;  %v1762_v10 = vsub.f32 0.0, %v1753_v6  ;;  %v1769_v16 = vsub.f32 0.0, %v1755_v14 }
 0x253   : > { %2056 = vpow2.f32 %v1757_v9  ;;  %v1763_v12 = vmul.f32 1.442695, %v1762_v10  ;;  %v1770_v18 = vmul.f32 1.442695, %v1769_v16 }
 0x255   : > { %2058 = vpow2.f32 %v1763_v12 }
 0x256   : > { %2060 = vpow2.f32 %v1770_v18 }
 0x260   : > { %v2057_v19 = vpop.eup %2056 }
 0x261   : > { %v1759_v21 = vadd.f32 1.0, %v2057_v19 }
 0x262   : > { %v2059_v22 = vpop.eup %2058 }
 0x263   : > { %2062 = vrcp.f32 %v1759_v21  ;;  %v1765_v23 = vadd.f32 1.0, %v2059_v22  ;;  %v2061_v13 = vpop.eup %2060 }
 0x264   : > { %2064 = vtanh.f32 %v1754_v20  ;;  %v1772_v29 = vadd.f32 1.0, %v2061_v13 }
 0x265   : > { %2066 = vrcp.f32 %v1765_v23 }
 0x266   : > { %2068 = vrcp.f32 %v1772_v29 }
 0x270   : > { %v2063_v25 = vpop.eup %2062 }
 0x271   : > { %v2065_v26 = vpop.eup %2064 }
 0x272   : > { %v2067_v27 = vpop.eup %2066  ;;  %v1776_v30 = vmul.f32 %v2065_v26, %v2063_v25 }
 0x273   : > { %v1775_v55 = vmul.f32 %v2222_v0, %v2067_v27  ;;  %v2069_v24 = vpop.eup %2068 }
 0x275   : > { %v1777_v0 = vadd.f32 %v1776_v30, %v1775_v55  }
 0x277   : > { %2070 = vtanh.f32 %v1777_v0 }
 0x283   :  { %107 = sbr.rel (!%p105_p11) target bundleno = 62 (0x3e), region = 97 }
 0x284   : > { %v2071_v31 = vpop.eup %2070 }
 0x285   : > { %v1779_v32 = vmul.f32 %v2071_v31, %v2069_v24  }
 0x287   : > { %1781 = vst [vmem:[%s1780_s19] sm:$0x3] %v1779_v32  ;;  %v2861_v1 = vmov %v1779_v32  ;;  %v1896_v33 = vcombine.low (%p105_p11), %v2860_v44, %v1779_v32 }
 0x289   :  { %1984 = vst.sshfl [vmem:[#allocation13] sm:$0x33 pattern:$0x76325410] %v1896_v33 }
 0x28e   :  { %v1790_v35 = vld [vmem:[#allocation3] sm:$0x3]  ;;  %v1791_v38 = vld [vmem:[#allocation3 + $0x2] sm:$0x3]  ;;  %v1792_v40 = vld [vmem:[#allocation3 + $0x4] sm:$0x3] }
 0x28f   :  { %v1814_v37 = vcombine.low %v1782_v34, %v1790_v35  ;;  %v1822_v41 = vcombine.low %v1783_v36, %v1791_v38  ;;  %v1830_v42 = vcombine.low %v1784_v39, %v1792_v40  ;;  %v1793_v43 = vld [vmem:[#allocation3 + $0x6] sm:$0x3]  ;;  %v1794_v0 = vld [vmem:[#allocation3 + $0x8] sm:$0x3]  ;;  %v1795_v44 = vld [vmem:[#allocation3 + $0xa] sm:$0x3] }
 0x290   :  { %v1838_v46 = vcombine.low %v1785_v3, %v1793_v43  ;;  %v1846_v47 = vcombine.low %v1786_v45, %v1794_v0  ;;  %v1854_v48 = vcombine.low %v1787_v2, %v1795_v44  ;;  %v1796_v50 = vld [vmem:[#allocation3 + $0xc] sm:$0x3]  ;;  %v1797_v53 = vld [vmem:[#allocation3 + $0xe] sm:$0x3] }
 0x291   :  { %1976 = vst.sshfl [vmem:[%s2858_s9] sm:$0x33 pattern:$0x76325410] %v1814_v37  ;;  %v1862_v52 = vcombine.low %v1788_v49, %v1796_v50  ;;  %v1870_v54 = vcombine.low %v1789_v51, %v1797_v53 }
 0x292   :  { %1977 = vst.sshfl [vmem:[%s2858_s9 + $0x4] sm:$0x33 pattern:$0x76325410] %v1822_v41 }
 0x293   :  { %1978 = vst.sshfl [vmem:[%s2858_s9 + $0x8] sm:$0x33 pattern:$0x76325410] %v1830_v42 }
 0x294   :  { %1979 = vst.sshfl [vmem:[%s2858_s9 + $0xc] sm:$0x33 pattern:$0x76325410] %v1838_v46 }
 0x295   :  { %1980 = vst.sshfl [vmem:[%s2858_s9 + $0x10] sm:$0x33 pattern:$0x76325410] %v1846_v47 }
 0x296   :  { %1981 = vst.sshfl [vmem:[%s2858_s9 + $0x14] sm:$0x33 pattern:$0x76325410] %v1854_v48 }
 0x297   :  { %1982 = vst.sshfl [vmem:[%s2858_s9 + $0x18] sm:$0x33 pattern:$0x76325410] %v1862_v52 }
 0x298   :  { %1983 = vst.sshfl [vmem:[%s2858_s9 + $0x1c] sm:$0x33 pattern:$0x76325410] %v1870_v54 }
 0x299   :  { %2183 = shalt.err (!%p2180_p2)
}
 0x29a   :  { %1917 = dma.vmem_to_hbm [thread:$0]  %s1915_s18, 64, %s2859_s10, [#allocation6]  }
 0x29b   :  { %2218 = dma.done.wait [#allocation6], 64  }
 0x29c   :  { %2219 = vsyncadd [#allocation6], 4294967232 }
 0x29d   :  { %1923 = vsyncpa [#allocation5], 1 }
 0x29e   :  { %1924 = vsyncpa [#allocation8], 1 }
 0x29f   :  { %1925 = vsyncpa [#allocation11], 1 }
 0x2a0   :  { %1926 = vsyncpa [#allocation6], 1 }

// kernel: encoder_forward.9
= control target key start
LH: loop header
LB: loop body
LE: loop exit
PB: predicated region body
PF: predicated region fallthrough
CT: control target
= control target key end

     0   :  { %s813_s1 = inlined_call_operand.vmem [shape: f32[256,256], index: 1, kind: input, shape index: {}]   ;;  %s814_s3 = inlined_call_operand.vmem [shape: f32[256,256], index: 3, kind: input, shape index: {}]   ;;  %s815_s0 = inlined_call_operand.vmem [shape: f32[4,256], index: 0, kind: input, shape index: {}]   ;;  %s816_s2 = inlined_call_operand.vmem [shape: f32[1,256], index: 2, kind: input, shape index: {}]   ;;  %s817_s4 = inlined_call_operand.vmem [shape: f32[1,256], index: 4, kind: input, shape index: {}]   ;;  %s818_s5 = inlined_call_operand.vmem [shape: f32[4,256], index: 5, kind: output, shape index: {0}]   ;;  %s819_s6 = inlined_call_operand.vmem [shape: f32[4,256], index: 6, kind: output, shape index: {1}]  }
   0x1   :  { %v54_v0 = vld [vmem:[%s813_s1 + $0xf8] sm:$0xff]  ;;  %v53_v2 = vld [vmem:[%s813_s1 + $0xf0] sm:$0xff]  ;;  %v52_v4 = vld [vmem:[%s813_s1 + $0xe8] sm:$0xff] }
   0x2   :  { %v204_v1 = vld [vmem:[%s814_s3 + $0xf8] sm:$0xff]  ;;  %102 = vmatprep.subr.mxu0 %v54_v0  ;;  %v203_v3 = vld [vmem:[%s814_s3 + $0xf0] sm:$0xff]  ;;  %v202_v5 = vld [vmem:[%s814_s3 + $0xe8] sm:$0xff] }
   0x3   :  { %249 = vmatprep.subr.mxu1 %v204_v1  ;;  %103 = vmatpush1.msra.mxu0 %v53_v2  ;;  %v51_v6 = vld [vmem:[%s813_s1 + $0xe0] sm:$0xff]  ;;  %v50_v8 = vld [vmem:[%s813_s1 + $0xd8] sm:$0xff]  ;;  %v49_v10 = vld [vmem:[%s813_s1 + $0xd0] sm:$0xff] }
   0x4   :  { %250 = vmatpush1.msra.mxu1 %v203_v3  ;;  %v201_v7 = vld [vmem:[%s814_s3 + $0xe0] sm:$0xff]  ;;  %104 = vmatprep.subr.mxu0 %v52_v4  ;;  %v200_v9 = vld [vmem:[%s814_s3 + $0xd8] sm:$0xff]  ;;  %v199_v11 = vld [vmem:[%s814_s3 + $0xd0] sm:$0xff] }
   0x5   :  { %251 = vmatprep.subr.mxu1 %v202_v5  ;;  %105 = vmatpush1.msra.mxu0 %v51_v6  ;;  %v48_v12 = vld [vmem:[%s813_s1 + $0xc8] sm:$0xff]  ;;  %v47_v14 = vld [vmem:[%s813_s1 + $0xc0] sm:$0xff]  ;;  %v46_v16 = vld [vmem:[%s813_s1 + $0xb8] sm:$0xff] }
   0x6   :  { %252 = vmatpush1.msra.mxu1 %v201_v7  ;;  %v198_v13 = vld [vmem:[%s814_s3 + $0xc8] sm:$0xff]  ;;  %106 = vmatprep.subr.mxu0 %v50_v8  ;;  %v197_v15 = vld [vmem:[%s814_s3 + $0xc0] sm:$0xff]  ;;  %v196_v17 = vld [vmem:[%s814_s3 + $0xb8] sm:$0xff] }
   0x7   :  { %253 = vmatprep.subr.mxu1 %v200_v9  ;;  %107 = vmatpush1.msra.mxu0 %v49_v10  ;;  %v45_v18 = vld [vmem:[%s813_s1 + $0xb0] sm:$0xff]  ;;  %v44_v20 = vld [vmem:[%s813_s1 + $0xa8] sm:$0xff]  ;;  %v43_v22 = vld [vmem:[%s813_s1 + $0xa0] sm:$0xff] }
   0x8   :  { %254 = vmatpush1.msra.mxu1 %v199_v11  ;;  %108 = vmatprep.subr.mxu0 %v48_v12  ;;  %v195_v19 = vld [vmem:[%s814_s3 + $0xb0] sm:$0xff]  ;;  %v194_v21 = vld [vmem:[%s814_s3 + $0xa8] sm:$0xff]  ;;  %v193_v23 = vld [vmem:[%s814_s3 + $0xa0] sm:$0xff] }
   0x9   :  { %255 = vmatprep.subr.mxu1 %v198_v13  ;;  %109 = vmatpush1.msra.mxu0 %v47_v14  ;;  %v42_v24 = vld [vmem:[%s813_s1 + $0x98] sm:$0xff]  ;;  %v41_v26 = vld [vmem:[%s813_s1 + $0x90] sm:$0xff]  ;;  %v40_v28 = vld [vmem:[%s813_s1 + $0x88] sm:$0xff] }
   0xa   :  { %256 = vmatpush1.msra.mxu1 %v197_v15  ;;  %110 = vmatprep.subr.mxu0 %v46_v16  ;;  %v192_v25 = vld [vmem:[%s814_s3 + $0x98] sm:$0xff]  ;;  %v191_v27 = vld [vmem:[%s814_s3 + $0x90] sm:$0xff]  ;;  %v190_v29 = vld [vmem:[%s814_s3 + $0x88] sm:$0xff] }
   0xb   :  { %257 = vmatprep.subr.mxu1 %v196_v17  ;;  %111 = vmatpush1.msra.mxu0 %v45_v18  ;;  %v39_v30 = vld [vmem:[%s813_s1 + $0x80] sm:$0xff]  ;;  %v38_v32 = vld [vmem:[%s813_s1 + $0x78] sm:$0xff]  ;;  %v37_v34 = vld [vmem:[%s813_s1 + $0x70] sm:$0xff] }
   0xc   :  { %258 = vmatpush1.msra.mxu1 %v195_v19  ;;  %112 = vmatprep.subr.mxu0 %v44_v20  ;;  %v189_v31 = vld [vmem:[%s814_s3 + $0x80] sm:$0xff]  ;;  %v188_v33 = vld [vmem:[%s814_s3 + $0x78] sm:$0xff]  ;;  %v187_v35 = vld [vmem:[%s814_s3 + $0x70] sm:$0xff] }
   0xd   :  { %259 = vmatprep.subr.mxu1 %v194_v21  ;;  %113 = vmatpush1.msra.mxu0 %v43_v22  ;;  %v36_v36 = vld [vmem:[%s813_s1 + $0x68] sm:$0xff]  ;;  %v35_v38 = vld [vmem:[%s813_s1 + $0x60] sm:$0xff]  ;;  %v34_v40 = vld [vmem:[%s813_s1 + $0x58] sm:$0xff] }
   0xe   :  { %260 = vmatpush1.msra.mxu1 %v193_v23  ;;  %114 = vmatprep.subr.mxu0 %v42_v24  ;;  %v186_v37 = vld [vmem:[%s814_s3 + $0x68] sm:$0xff]  ;;  %v185_v39 = vld [vmem:[%s814_s3 + $0x60] sm:$0xff]  ;;  %v184_v41 = vld [vmem:[%s814_s3 + $0x58] sm:$0xff] }
   0xf   :  { %261 = vmatprep.subr.mxu1 %v192_v25  ;;  %115 = vmatpush1.msra.mxu0 %v41_v26  ;;  %v33_v42 = vld [vmem:[%s813_s1 + $0x50] sm:$0xff]  ;;  %v32_v44 = vld [vmem:[%s813_s1 + $0x48] sm:$0xff]  ;;  %v31_v46 = vld [vmem:[%s813_s1 + $0x40] sm:$0xff] }
  0x10   :  { %262 = vmatpush1.msra.mxu1 %v191_v27  ;;  %116 = vmatprep.subr.mxu0 %v40_v28  ;;  %v183_v43 = vld [vmem:[%s814_s3 + $0x50] sm:$0xff]  ;;  %v182_v45 = vld [vmem:[%s814_s3 + $0x48] sm:$0xff]  ;;  %v181_v47 = vld [vmem:[%s814_s3 + $0x40] sm:$0xff] }
  0x11   :  { %263 = vmatprep.subr.mxu1 %v190_v29  ;;  %117 = vmatpush1.msra.mxu0 %v39_v30  ;;  %v30_v48 = vld [vmem:[%s813_s1 + $0x38] sm:$0xff]  ;;  %v29_v50 = vld [vmem:[%s813_s1 + $0x30] sm:$0xff]  ;;  %v28_v52 = vld [vmem:[%s813_s1 + $0x28] sm:$0xff] }
  0x12   :  { %264 = vmatpush1.msra.mxu1 %v189_v31  ;;  %118 = vmatprep.subr.mxu0 %v38_v32  ;;  %v180_v49 = vld [vmem:[%s814_s3 + $0x38] sm:$0xff]  ;;  %v179_v51 = vld [vmem:[%s814_s3 + $0x30] sm:$0xff]  ;;  %v178_v53 = vld [vmem:[%s814_s3 + $0x28] sm:$0xff] }
  0x13   :  { %265 = vmatprep.subr.mxu1 %v188_v33  ;;  %119 = vmatpush1.msra.mxu0 %v37_v34  ;;  %v27_v54 = vld [vmem:[%s813_s1 + $0x20] sm:$0xff]  ;;  %v26_v56 = vld [vmem:[%s813_s1 + $0x18] sm:$0xff]  ;;  %v25_v58 = vld [vmem:[%s813_s1 + $0x10] sm:$0xff] }
  0x14   :  { %266 = vmatpush1.msra.mxu1 %v187_v35  ;;  %120 = vmatprep.subr.mxu0 %v36_v36  ;;  %v177_v55 = vld [vmem:[%s814_s3 + $0x20] sm:$0xff]  ;;  %v176_v57 = vld [vmem:[%s814_s3 + $0x18] sm:$0xff]  ;;  %v175_v59 = vld [vmem:[%s814_s3 + $0x10] sm:$0xff] }
  0x15   :  { %267 = vmatprep.subr.mxu1 %v186_v37  ;;  %121 = vmatpush1.msra.mxu0 %v35_v38  ;;  %v24_v60 = vld [vmem:[%s813_s1 + $0x8] sm:$0xff]  ;;  %v23_v62 = vld [vmem:[%s813_s1] sm:$0xff]  ;;  %v86_v0 = vld [vmem:[%s813_s1 + $0x1f8] sm:$0xff] }
  0x16   :  { %268 = vmatpush1.msra.mxu1 %v185_v39  ;;  %122 = vmatprep.subr.mxu0 %v34_v40  ;;  %v174_v61 = vld [vmem:[%s814_s3 + $0x8] sm:$0xff]  ;;  %v173_v63 = vld [vmem:[%s814_s3] sm:$0xff]  ;;  %v236_v1 = vld [vmem:[%s814_s3 + $0x1f8] sm:$0xff] }
  0x17   :  { %269 = vmatprep.subr.mxu1 %v184_v41  ;;  %123 = vmatpush1.msra.mxu0 %v33_v42  ;;  %v85_v2 = vld [vmem:[%s813_s1 + $0x1f0] sm:$0xff]  ;;  %v84_v4 = vld [vmem:[%s813_s1 + $0x1e8] sm:$0xff]  ;;  %v83_v6 = vld [vmem:[%s813_s1 + $0x1e0] sm:$0xff] }
  0x18   :  { %270 = vmatpush1.msra.mxu1 %v183_v43  ;;  %124 = vmatprep.subr.mxu0 %v32_v44  ;;  %v235_v3 = vld [vmem:[%s814_s3 + $0x1f0] sm:$0xff]  ;;  %v234_v5 = vld [vmem:[%s814_s3 + $0x1e8] sm:$0xff]  ;;  %v233_v7 = vld [vmem:[%s814_s3 + $0x1e0] sm:$0xff] }
  0x19   :  { %271 = vmatprep.subr.mxu1 %v182_v45  ;;  %125 = vmatpush1.msra.mxu0 %v31_v46  ;;  %v82_v8 = vld [vmem:[%s813_s1 + $0x1d8] sm:$0xff]  ;;  %v81_v10 = vld [vmem:[%s813_s1 + $0x1d0] sm:$0xff]  ;;  %v80_v12 = vld [vmem:[%s813_s1 + $0x1c8] sm:$0xff] }
  0x1a   :  { %272 = vmatpush1.msra.mxu1 %v181_v47  ;;  %126 = vmatprep.subr.mxu0 %v30_v48  ;;  %v232_v9 = vld [vmem:[%s814_s3 + $0x1d8] sm:$0xff]  ;;  %v231_v11 = vld [vmem:[%s814_s3 + $0x1d0] sm:$0xff]  ;;  %v230_v13 = vld [vmem:[%s814_s3 + $0x1c8] sm:$0xff] }
  0x1b   :  { %273 = vmatprep.subr.mxu1 %v180_v49  ;;  %127 = vmatpush1.msra.mxu0 %v29_v50  ;;  %v79_v14 = vld [vmem:[%s813_s1 + $0x1c0] sm:$0xff]  ;;  %v78_v16 = vld [vmem:[%s813_s1 + $0x1b8] sm:$0xff]  ;;  %v77_v18 = vld [vmem:[%s813_s1 + $0x1b0] sm:$0xff] }
  0x1c   :  { %274 = vmatpush1.msra.mxu1 %v179_v51  ;;  %128 = vmatprep.subr.mxu0 %v28_v52  ;;  %v229_v15 = vld [vmem:[%s814_s3 + $0x1c0] sm:$0xff]  ;;  %v228_v17 = vld [vmem:[%s814_s3 + $0x1b8] sm:$0xff]  ;;  %v227_v19 = vld [vmem:[%s814_s3 + $0x1b0] sm:$0xff] }
  0x1d   :  { %275 = vmatprep.subr.mxu1 %v178_v53  ;;  %129 = vmatpush1.msra.mxu0 %v27_v54  ;;  %v76_v20 = vld [vmem:[%s813_s1 + $0x1a8] sm:$0xff]  ;;  %v75_v22 = vld [vmem:[%s813_s1 + $0x1a0] sm:$0xff]  ;;  %v74_v24 = vld [vmem:[%s813_s1 + $0x198] sm:$0xff] }
  0x1e   :  { %276 = vmatpush1.msra.mxu1 %v177_v55  ;;  %130 = vmatprep.subr.mxu0 %v26_v56  ;;  %v226_v21 = vld [vmem:[%s814_s3 + $0x1a8] sm:$0xff]  ;;  %v225_v23 = vld [vmem:[%s814_s3 + $0x1a0] sm:$0xff]  ;;  %v224_v25 = vld [vmem:[%s814_s3 + $0x198] sm:$0xff] }
  0x1f   :  { %277 = vmatprep.subr.mxu1 %v176_v57  ;;  %131 = vmatpush1.msra.mxu0 %v25_v58  ;;  %v73_v26 = vld [vmem:[%s813_s1 + $0x190] sm:$0xff]  ;;  %v72_v28 = vld [vmem:[%s813_s1 + $0x188] sm:$0xff]  ;;  %v71_v30 = vld [vmem:[%s813_s1 + $0x180] sm:$0xff] }
  0x20   :  { %278 = vmatpush1.msra.mxu1 %v175_v59  ;;  %132 = vmatprep.subr.mxu0 %v24_v60  ;;  %v223_v27 = vld [vmem:[%s814_s3 + $0x190] sm:$0xff]  ;;  %v222_v29 = vld [vmem:[%s814_s3 + $0x188] sm:$0xff]  ;;  %v221_v31 = vld [vmem:[%s814_s3 + $0x180] sm:$0xff] }
  0x21   :  { %279 = vmatprep.subr.mxu1 %v174_v61  ;;  %133 = vmatpush1.msra.mxu0 %v23_v62  ;;  %v70_v32 = vld [vmem:[%s813_s1 + $0x178] sm:$0xff]  ;;  %v69_v34 = vld [vmem:[%s813_s1 + $0x170] sm:$0xff]  ;;  %v68_v36 = vld [vmem:[%s813_s1 + $0x168] sm:$0xff] }
  0x22   :  { %280 = vmatpush1.msra.mxu1 %v173_v63  ;;  %134 = vmatprep.subr.mxu0 %v86_v0  ;;  %v220_v33 = vld [vmem:[%s814_s3 + $0x178] sm:$0xff]  ;;  %v219_v35 = vld [vmem:[%s814_s3 + $0x170] sm:$0xff]  ;;  %v218_v37 = vld [vmem:[%s814_s3 + $0x168] sm:$0xff] }
  0x23   :  { %281 = vmatprep.subr.mxu1 %v236_v1  ;;  %135 = vmatpush2.msra.mxu0 %v85_v2  ;;  %v67_v38 = vld [vmem:[%s813_s1 + $0x160] sm:$0xff]  ;;  %v66_v40 = vld [vmem:[%s813_s1 + $0x158] sm:$0xff]  ;;  %v65_v42 = vld [vmem:[%s813_s1 + $0x150] sm:$0xff]  ;;  %v89_v2 = vlaneseq }
  0x24   :  { %282 = vmatpush2.msra.mxu1 %v235_v3  ;;  %136 = vmatprep.subr.mxu0 %v84_v4  ;;  %v217_v39 = vld [vmem:[%s814_s3 + $0x160] sm:$0xff]  ;;  %v216_v41 = vld [vmem:[%s814_s3 + $0x158] sm:$0xff]  ;;  %v215_v43 = vld [vmem:[%s814_s3 + $0x150] sm:$0xff] }
  0x25   :  { %283 = vmatprep.subr.mxu1 %v234_v5  ;;  %137 = vmatpush2.msra.mxu0 %v83_v6  ;;  %v64_v44 = vld [vmem:[%s813_s1 + $0x148] sm:$0xff]  ;;  %v63_v46 = vld [vmem:[%s813_s1 + $0x140] sm:$0xff]  ;;  %v62_v48 = vld [vmem:[%s813_s1 + $0x138] sm:$0xff]  ;;  %v90_v3 = vshrl.u32 %v89_v2, 7 }
  0x26   :  { %284 = vmatpush2.msra.mxu1 %v233_v7  ;;  %138 = vmatprep.subr.mxu0 %v82_v8  ;;  %v214_v45 = vld [vmem:[%s814_s3 + $0x148] sm:$0xff]  ;;  %v213_v47 = vld [vmem:[%s814_s3 + $0x140] sm:$0xff]  ;;  %v212_v49 = vld [vmem:[%s814_s3 + $0x138] sm:$0xff] }
  0x27   :  { %285 = vmatprep.subr.mxu1 %v232_v9  ;;  %139 = vmatpush2.msra.mxu0 %v81_v10  ;;  %v61_v50 = vld [vmem:[%s813_s1 + $0x130] sm:$0xff]  ;;  %v60_v52 = vld [vmem:[%s813_s1 + $0x128] sm:$0xff]  ;;  %v59_v54 = vld [vmem:[%s813_s1 + $0x120] sm:$0xff]  ;;  %v91_v4 = vsub.s32 0, %v90_v3  ;;  %v95_v7 = vsub.s32 1, %v90_v3 }
  0x28   :  { %286 = vmatpush2.msra.mxu1 %v231_v11  ;;  %140 = vmatprep.subr.mxu0 %v80_v12  ;;  %v211_v51 = vld [vmem:[%s814_s3 + $0x130] sm:$0xff]  ;;  %v210_v53 = vld [vmem:[%s814_s3 + $0x128] sm:$0xff]  ;;  %v209_v55 = vld [vmem:[%s814_s3 + $0x120] sm:$0xff] }
  0x29   :  { %287 = vmatprep.subr.mxu1 %v230_v13  ;;  %141 = vmatpush2.msra.mxu0 %v79_v14  ;;  %v22_v56 = vld [vmem:[%s815_s0] sm:$0xff]  ;;  %v58_v57 = vld [vmem:[%s813_s1 + $0x118] sm:$0xff]  ;;  %v57_v59 = vld [vmem:[%s813_s1 + $0x110] sm:$0xff] }
  0x2a   :  { %288 = vmatpush2.msra.mxu1 %v229_v15  ;;  %142 = vmatprep.subr.mxu0 %v78_v16  ;;  %v208_v58 = vld [vmem:[%s814_s3 + $0x118] sm:$0xff]  ;;  %v207_v60 = vld [vmem:[%s814_s3 + $0x110] sm:$0xff]  ;;  %v56_v61 = vld [vmem:[%s813_s1 + $0x108] sm:$0xff]  ;;  %v100_v63 = vcombine.high %v22_v56, %v22_v56 }
  0x2b   :  { %289 = vmatprep.subr.mxu1 %v228_v17  ;;  %143 = vmatpush2.msra.mxu0 %v77_v18  ;;  %v206_v62 = vld [vmem:[%s814_s3 + $0x108] sm:$0xff]  ;;  %v55_v0 = vld [vmem:[%s813_s1 + $0x100] sm:$0xff] }
  0x2c   :  { %290 = vmatpush2.msra.mxu1 %v227_v19  ;;  %144 = vmatprep.subr.mxu0 %v76_v20  ;;  %v205_v1 = vld [vmem:[%s814_s3 + $0x100] sm:$0xff] }
  0x2d   :  { %291 = vmatprep.subr.mxu1 %v226_v21  ;;  %145 = vmatpush2.msra.mxu0 %v75_v22  ;;  %v87_v5 = vld [vmem:[%s816_s2] sm:$0x3] }
  0x2e   :  { %292 = vmatpush2.msra.mxu1 %v225_v23  ;;  %146 = vmatprep.subr.mxu0 %v74_v24  ;;  %v237_v6 = vld [vmem:[%s817_s4] sm:$0x3]  ;;  %v92_v8 = vrot.slane %v87_v5, %v91_v4  ;;  %v96_v12 = vrot.slane %v87_v5, %v95_v7 }
  0x2f   :  { %293 = vmatprep.subr.mxu1 %v224_v25  ;;  %147 = vmatpush2.msra.mxu0 %v73_v26  ;;  %v242_v9 = vrot.slane %v237_v6, %v91_v4  ;;  %v246_v13 = vrot.slane %v237_v6, %v95_v7 }
  0x30   :  { %294 = vmatpush2.msra.mxu1 %v223_v27  ;;  %148 = vmatprep.subr.mxu0 %v72_v28 }
  0x31   :  { %295 = vmatprep.subr.mxu1 %v222_v29  ;;  %149 = vmatpush2.msra.mxu0 %v71_v30 }
  0x32   :  { %296 = vmatpush2.msra.mxu1 %v221_v31  ;;  %150 = vmatprep.subr.mxu0 %v70_v32 }
  0x33   :  { %297 = vmatprep.subr.mxu1 %v220_v33  ;;  %151 = vmatpush2.msra.mxu0 %v69_v34 }
  0x34   :  { %298 = vmatpush2.msra.mxu1 %v219_v35  ;;  %152 = vmatprep.subr.mxu0 %v68_v36 }
  0x35   :  { %299 = vmatprep.subr.mxu1 %v218_v37  ;;  %153 = vmatpush2.msra.mxu0 %v67_v38 }
  0x36   :  { %300 = vmatpush2.msra.mxu1 %v217_v39  ;;  %154 = vmatprep.subr.mxu0 %v66_v40 }
  0x37   :  { %301 = vmatprep.subr.mxu1 %v216_v41  ;;  %155 = vmatpush2.msra.mxu0 %v65_v42 }
  0x38   :  { %302 = vmatpush2.msra.mxu1 %v215_v43  ;;  %156 = vmatprep.subr.mxu0 %v64_v44 }
  0x39   :  { %303 = vmatprep.subr.mxu1 %v214_v45  ;;  %157 = vmatpush2.msra.mxu0 %v63_v46 }
  0x3a   :  { %304 = vmatpush2.msra.mxu1 %v213_v47  ;;  %158 = vmatprep.subr.mxu0 %v62_v48 }
  0x3b   :  { %305 = vmatprep.subr.mxu1 %v212_v49  ;;  %159 = vmatpush2.msra.mxu0 %v61_v50 }
  0x3c   :  { %306 = vmatpush2.msra.mxu1 %v211_v51  ;;  %160 = vmatprep.subr.mxu0 %v60_v52 }
  0x3d   :  { %307 = vmatprep.subr.mxu1 %v210_v53  ;;  %161 = vmatpush2.msra.mxu0 %v59_v54 }
  0x3e   :  { %308 = vmatpush2.msra.mxu1 %v209_v55  ;;  %162 = vmatprep.subr.mxu0 %v58_v57 }
  0x3f   :  { %309 = vmatprep.subr.mxu1 %v208_v58  ;;  %163 = vmatpush2.msra.mxu0 %v57_v59 }
  0x40   :  { %310 = vmatpush2.msra.mxu1 %v207_v60  ;;  %164 = vmatprep.subr.mxu0 %v56_v61 }
  0x41   :  { %311 = vmatprep.subr.mxu1 %v206_v62  ;;  %165 = vmatpush2.msra.mxu0 %v55_v0 }
  0x42   :  { %166 = vmatprep.mubr.f32.mxu0 %v100_v63  ;;  %312 = vmatpush2.msra.mxu1 %v205_v1 }
  0x43   :  { %313 = vmatprep.mubr.f32.mxu1 %v100_v63  ;;  %167 = vmatmul.mubr.f32.vlgmr.msra.gmra.mxu0 %v22_v56 }
  0x44   :  { %314 = vmatmul.mubr.f32.vlgmr.msra.gmra.mxu1 %v22_v56 }
 0x103   :  { %v168_v10 = vpop.f32.mrf.mxu0 }
 0x104   :  { %v315_v11 = vpop.f32.mrf.mxu1  ;;  %v169_v14 = vadd.f32 %v168_v10, %v92_v8 }
 0x105   :  { %v316_v15 = vadd.f32 %v315_v11, %v242_v9  ;;  %v170_v16 = vpop.f32.mrf.mxu0 }
 0x106   :  { %v317_v17 = vpop.f32.mrf.mxu1  ;;  %v322_v18 = vmul.f32 1.442695, %v169_v14  ;;  %v171_v20 = vadd.f32 %v170_v16, %v96_v12  ;;  %vm320_vm0 = vcmp.gt.f32.partialorder %v169_v14, 0.0 }
 0x107   :  { %v341_v19 = vmul.f32 1.442695, %v316_v15  ;;  %v318_v21 = vadd.f32 %v317_v17, %v246_v13  ;;  %vm339_vm1 = vcmp.gt.f32.partialorder %v316_v15, 0.0 }
 0x108   :  { %371 = vpow2.f32 %v322_v18  ;;  %v324_v22 = vmul.f32 1.442695, %v171_v20  ;;  %vm321_vm2 = vcmp.gt.f32.partialorder %v171_v20, 0.0 }
 0x109   :  { %373 = vpow2.f32 %v341_v19  ;;  %v343_v23 = vmul.f32 1.442695, %v318_v21  ;;  %vm340_vm3 = vcmp.gt.f32.partialorder %v318_v21, 0.0 }
 0x10a   :  { %375 = vpow2.f32 %v324_v22 }
 0x10b   :  { %377 = vpow2.f32 %v343_v23 }
 0x115   :  { %v372_v24 = vpop.eup %371 }
 0x116   :  { %v374_v25 = vpop.eup %373  ;;  %v366_v26 = vadd.f32 -1.0, %v372_v24 }
 0x117   :  { %v368_v27 = vadd.f32 -1.0, %v374_v25  ;;  %v376_v28 = vpop.eup %375 }
 0x118   :  { %v328_v29 = vmul.f32 1.6732632, %v366_v26  ;;  %v378_v30 = vpop.eup %377  ;;  %v367_v32 = vadd.f32 -1.0, %v376_v28 }
 0x119   :  { %v347_v31 = vmul.f32 1.6732632, %v368_v27  ;;  %v369_v33 = vadd.f32 -1.0, %v378_v30 }
 0x11a   :  { %v330_v34 = vsel %vm320_vm0, %v169_v14, %v328_v29  ;;  %v329_v35 = vmul.f32 1.6732632, %v367_v32 }
 0x11b   :  { %v349_v36 = vsel %vm339_vm1, %v316_v15, %v347_v31  ;;  %v348_v37 = vmul.f32 1.6732632, %v369_v33  ;;  %v332_v39 = vmul.f32 1.050701, %v330_v34 }
 0x11c   :  { %v331_v38 = vsel %vm321_vm2, %v171_v20, %v329_v35  ;;  %v351_v42 = vmul.f32 1.050701, %v349_v36 }
 0x11d   :  { %v333_v40 = vmul.f32 1.050701, %v331_v38  ;;  %v350_v41 = vsel %vm340_vm3, %v318_v21, %v348_v37 }
 0x11e   :  { %v352_v43 = vmul.f32 1.050701, %v350_v41 }
 0x11f   :  { %v336_v44 = vcombine.low %v332_v39, %v333_v40 }
 0x120   :  { %v355_v45 = vcombine.low %v351_v42, %v352_v43 }
 0x121   :  { %338 = vst [vmem:[%s818_s5] sm:$0xff] %v336_v44 }
 0x122   :  { %357 = vst [vmem:[%s819_s6] sm:$0xff] %v355_v45 }

</bundles_post_ra>
